<compile_context>
chip_gen: v5e
topology: v5e:2x2
jax: 0.10.0
libtpu: 0.0.40
codegen_flags: <defaults>
</compile_context>

<pallas_src>
import jax
import jax.numpy as jnp
from jax import lax
from jax.experimental import pallas as pl
from jax.experimental.pallas import tpu as pltpu


# ----------------------------------------------------------------------------
# Static shape constants implied by the module.
# ----------------------------------------------------------------------------
H_IN = 112                      # input spatial size (pinned by Linear(17*17*16, .))
C1_K, C1_OUT = 5, 8             # conv1: 5x5, 1 -> 8
P1_K = 3                        # pool1: 3x3 / stride 3
C2_K, C2_IN, C2_OUT = 3, 8, 16  # conv2: 3x3, 8 -> 16
P2_K = 2                        # pool2: 2x2 / stride 2

H1 = H_IN - C1_K + 1            # 108  (conv1 output)
H1P = H1 // P1_K                # 36   (pool1 output)
H2 = H1P - C2_K + 1             # 34   (conv2 output)
H2P = H2 // P2_K                # 17   (pool2 output)
FLAT = C2_OUT * H2P * H2P       # 4624


# ----------------------------------------------------------------------------
# Fused feature extractor kernel: one grid step == one image.
# ----------------------------------------------------------------------------
def _feature_kernel(w1_ref, b1_ref, w2_ref, b2_ref,              # SMEM (flat f32)
                    x_ref, pl1_ref, pr1_ref, pl2_ref, pr2_ref,   # VMEM
                    out_ref, p1_scr):
    pool_l1 = pl1_ref[...]          # (36, 108) row-selector of ones
    pool_r1 = pr1_ref[...]          # (108, 36)
    pool_l2 = pl2_ref[...]          # (17, 34)
    pool_r2 = pr2_ref[...]          # (34, 17)

    # conv1 (1->8, 5x5, valid) fused with the 3x3/3 average pool.
    @pl.loop(0, C1_OUT)
    def _(c):
        acc = jnp.zeros((H1, H1), jnp.float32)
        for dy in range(C1_K):
            for dx in range(C1_K):
                w = w1_ref[c * (C1_K * C1_K) + dy * C1_K + dx]
                acc = acc + w * x_ref[0, dy:dy + H1, dx:dx + H1]
        pooled = jnp.dot(pool_l1,
                         jnp.dot(acc, pool_r1, preferred_element_type=jnp.float32),
                         preferred_element_type=jnp.float32)         # (36, 36)
        p1_scr[c] = pooled * (1.0 / (P1_K * P1_K)) + b1_ref[c]

    # conv2 (8->16, 3x3, valid) fused with the 2x2/2 average pool.
    @pl.loop(0, C2_OUT)
    def _(co):
        acc = jnp.zeros((H2, H2), jnp.float32)
        for ci in range(C2_IN):
            for dy in range(C2_K):
                for dx in range(C2_K):
                    w = w2_ref[((co * C2_IN + ci) * C2_K + dy) * C2_K + dx]
                    acc = acc + w * p1_scr[ci, dy:dy + H2, dx:dx + H2]
        pooled = jnp.dot(pool_l2,
                         jnp.dot(acc, pool_r2, preferred_element_type=jnp.float32),
                         preferred_element_type=jnp.float32)         # (17, 17)
        out_ref[0, co] = pooled * (1.0 / (P2_K * P2_K)) + b2_ref[co]


def pallas_features(x, w1_flat, b1, w2_flat, b2,
                    pool_l1, pool_r1, pool_l2, pool_r2):
    """x: (N, 112, 112) f32 -> (N, 16, 17, 17) f32 (channels-first, flatten-ready)."""
    n = x.shape[0]
    smem = pl.BlockSpec(memory_space=pltpu.MemorySpace.SMEM)
    return pl.pallas_call(
        _feature_kernel,
        out_shape=jax.ShapeDtypeStruct((n, C2_OUT, H2P, H2P), jnp.float32),
        grid_spec=pltpu.PrefetchScalarGridSpec(
            num_scalar_prefetch=0,
            grid=(n,),
            in_specs=[
                smem, smem, smem, smem,                               # conv w/b (flat)
                pl.BlockSpec((1, H_IN, H_IN), lambda i: (i, 0, 0)),   # one image / step
                pl.BlockSpec((H1P, H1), lambda i: (0, 0)),
                pl.BlockSpec((H1, H1P), lambda i: (0, 0)),
                pl.BlockSpec((H2P, H2), lambda i: (0, 0)),
                pl.BlockSpec((H2, H2P), lambda i: (0, 0)),
            ],
            out_specs=pl.BlockSpec((1, C2_OUT, H2P, H2P), lambda i: (i, 0, 0, 0)),
            scratch_shapes=[pltpu.VMEM((C2_IN, H1P, H1P), jnp.float32)],  # pool1 out
        ),
        compiler_params=pltpu.CompilerParams(dimension_semantics=("parallel",)),
    )(w1_flat, b1, w2_flat, b2, x, pool_l1, pool_r1, pool_l2, pool_r2)


# ----------------------------------------------------------------------------
# Fused classifier kernel: ReLU -> fc1 -> fc2 -> fc3 in one launch.
# ----------------------------------------------------------------------------
def _classifier_kernel(x_ref, w1_ref, b1_ref, w2_ref, b2_ref, w3_ref, b3_ref, o_ref):
    a = jnp.maximum(x_ref[...], 0.0)                                  # F.relu, in f32
    h = jnp.dot(a.astype(jnp.bfloat16), w1_ref[...],
                preferred_element_type=jnp.float32) + b1_ref[...]
    h = jnp.dot(h.astype(jnp.bfloat16), w2_ref[...],
                preferred_element_type=jnp.float32) + b2_ref[...]
    h = jnp.dot(h.astype(jnp.bfloat16), w3_ref[...],
                preferred_element_type=jnp.float32) + b3_ref[...]
    o_ref[...] = h


def pallas_classifier(acts, w1, b1, w2, b2, w3, b3):
    """acts: (N, 4624) f32; weights bf16, biases (1, n) f32 -> (N, out) f32."""
    n = acts.shape[0]
    out_dim = w3.shape[1]
    vmem = pl.BlockSpec(memory_space=pltpu.MemorySpace.VMEM)
    return pl.pallas_call(
        _classifier_kernel,
        out_shape=jax.ShapeDtypeStruct((n, out_dim), jnp.float32),
        in_specs=[vmem] * 7,
        out_specs=vmem,
    )(acts, w1, b1, w2, b2, w3, b3)


# ----------------------------------------------------------------------------
# Parameter preparation (one-time, outside jit) and full forward pass.
# ----------------------------------------------------------------------------
def prepare_params(p):
    f32 = jnp.float32

    def pool_mats(h_in, k):
        left = (jnp.arange(h_in)[None, :] // k == jnp.arange(h_in // k)[:, None])
        left = left.astype(f32)
        return left, left.T

    pool_l1, pool_r1 = pool_mats(H1, P1_K)
    pool_l2, pool_r2 = pool_mats(H2, P2_K)
    return dict(
        # conv weights flattened in OIHW order for SMEM scalar indexing
        w1=jnp.transpose(p["w1"], (3, 2, 0, 1)).reshape(-1).astype(f32),
        b1=p["b1"].astype(f32),
        w2=jnp.transpose(p["w2"], (3, 2, 0, 1)).reshape(-1).astype(f32),
        b2=p["b2"].astype(f32),
        pool_l1=pool_l1, pool_r1=pool_r1, pool_l2=pool_l2, pool_r2=pool_r2,
        # FC weights go to the MXU as bf16 (f32 accumulation); biases stay f32
        fc1_w=p["fc1_w"].astype(jnp.bfloat16),
        fc1_b=p["fc1_b"].reshape(1, -1).astype(f32),
        fc2_w=p["fc2_w"].astype(jnp.bfloat16),
        fc2_b=p["fc2_b"].reshape(1, -1).astype(f32),
        fc3_w=p["fc3_w"].astype(jnp.bfloat16),
        fc3_b=p["fc3_b"].reshape(1, -1).astype(f32),
    )


def simple_cnn_forward(x_nchw, pp):
    n = x_nchw.shape[0]
    x = x_nchw.reshape(n, H_IN, H_IN).astype(jnp.float32)        # Cin == 1
    feats = pallas_features(x, pp["w1"], pp["b1"], pp["w2"], pp["b2"],
                            pp["pool_l1"], pp["pool_r1"], pp["pool_l2"], pp["pool_r2"])
    # channels-first layout => this reshape IS torch.nn.Flatten's (C,H,W) order.
    acts = feats.reshape(n, FLAT)
    return pallas_classifier(acts, pp["fc1_w"], pp["fc1_b"], pp["fc2_w"], pp["fc2_b"],
                             pp["fc3_w"], pp["fc3_b"])


# ----------------------------------------------------------------------------
# Pure-JAX reference (NCHW, f32 HIGHEST precision) -- correctness check only.
# ----------------------------------------------------------------------------
def _ref_avgpool_nchw(x, k):
    n, c, h, w = x.shape
    return x.reshape(n, c, h // k, k, w // k, k).mean(axis=(3, 5))


def reference_forward(x_nchw, p):
    hi = lax.Precision.HIGHEST
    w1 = jnp.transpose(p["w1"], (3, 2, 0, 1))                    # HWIO -> OIHW
    w2 = jnp.transpose(p["w2"], (3, 2, 0, 1))
    y = lax.conv_general_dilated(x_nchw, w1, (1, 1), "VALID",
                                 dimension_numbers=("NCHW", "OIHW", "NCHW"),
                                 precision=hi)
    y = y + p["b1"][None, :, None, None]
    y = _ref_avgpool_nchw(y, 3)
    y = lax.conv_general_dilated(y, w2, (1, 1), "VALID",
                                 dimension_numbers=("NCHW", "OIHW", "NCHW"),
                                 precision=hi)
    y = y + p["b2"][None, :, None, None]
    y = _ref_avgpool_nchw(y, 2)
    y = y.reshape(y.shape[0], -1)
    y = jnp.maximum(y, 0.0)
    y = jnp.dot(y, p["fc1_w"], precision=hi) + p["fc1_b"]
    y = jnp.dot(y, p["fc2_w"], precision=hi) + p["fc2_b"]
    y = jnp.dot(y, p["fc3_w"], precision=hi) + p["fc3_b"]
    return y


if __name__ == "__main__":
    output_dim = 10
    keys = jax.random.split(jax.random.PRNGKey(0), 11)

    params = {
        "w1": jax.random.normal(keys[0], (5, 5, 1, 8), jnp.float32) * (1.0 / 5.0),
        "b1": jax.random.normal(keys[1], (8,), jnp.float32) * 0.1,
        "w2": jax.random.normal(keys[2], (3, 3, 8, 16), jnp.float32) * (72.0 ** -0.5),
        "b2": jax.random.normal(keys[3], (16,), jnp.float32) * 0.1,
        "fc1_w": jax.random.normal(keys[4], (FLAT, 128), jnp.float32) * (FLAT ** -0.5),
        "fc1_b": jax.random.normal(keys[5], (128,), jnp.float32) * 0.1,
        "fc2_w": jax.random.normal(keys[6], (128, 64), jnp.float32) * (128.0 ** -0.5),
        "fc2_b": jax.random.normal(keys[7], (64,), jnp.float32) * 0.1,
        "fc3_w": jax.random.normal(keys[8], (64, output_dim), jnp.float32) * (64.0 ** -0.5),
        "fc3_b": jax.random.normal(keys[9], (output_dim,), jnp.float32) * 0.1,
    }

    # Input size is fixed by Linear(17*17*16, ...): 112x112 single-channel images.
    x = jax.random.normal(keys[10], (2, 1, 112, 112), jnp.float32)

    pp = prepare_params(params)                       # one-time, outside jit
    fwd = jax.jit(lambda xx: simple_cnn_forward(xx, pp))
    y = jax.block_until_ready(fwd(x))
    assert y.shape == (2, output_dim)

    y_ref = reference_forward(x, params)
    max_err = float(jnp.max(jnp.abs(y - y_ref)))
    # FC weights/activations go through the MXU in bf16 (f32 accumulation),
    # so allow ~1e-2-level absolute deviation from the all-f32 reference.
    assert max_err < 3e-2, f"mismatch vs reference: {max_err}"

    print("KERNEL_OK")
</pallas_src>

<mosaic_0001>
module attributes {stable_mosaic.version = 11 : i64} {
  func.func @_classifier_kernel(%arg0: memref<2x4624xf32, #tpu.memory_space<vmem>>, %arg1: memref<4624x128xbf16, #tpu.memory_space<vmem>>, %arg2: memref<1x128xf32, #tpu.memory_space<vmem>>, %arg3: memref<128x64xbf16, #tpu.memory_space<vmem>>, %arg4: memref<1x64xf32, #tpu.memory_space<vmem>>, %arg5: memref<64x10xbf16, #tpu.memory_space<vmem>>, %arg6: memref<1x10xf32, #tpu.memory_space<vmem>>, %arg7: memref<2x10xf32, #tpu.memory_space<vmem>>) attributes {dimension_semantics = [], scalar_prefetch = 0 : i64, scratch_operands = 0 : i64, tpu.core_type = #tpu.core_type<tc>} {
    %c0 = arith.constant 0 : index
    %c0_0 = arith.constant 0 : index
    %0 = vector.load %arg0[%c0, %c0_0] : memref<2x4624xf32, #tpu.memory_space<vmem>>, vector<2x4624xf32>
    %cst = arith.constant 0.000000e+00 : f32
    %1 = vector.broadcast %cst : f32 to vector<2x4624xf32>
    %2 = arith.maximumf %0, %1 : vector<2x4624xf32>
    %3 = arith.truncf %2 : vector<2x4624xf32> to vector<2x4624xbf16>
    %c0_1 = arith.constant 0 : index
    %c0_2 = arith.constant 0 : index
    %4 = vector.load %arg1[%c0_1, %c0_2] : memref<4624x128xbf16, #tpu.memory_space<vmem>>, vector<4624x128xbf16>
    %cst_3 = arith.constant dense<0.000000e+00> : vector<2x128xf32>
    %5 = tpu.matmul %3, %4, %cst_3 {dimension_numbers = #tpu.dot_dimension_numbers<[1], [0], [0], [1], [0, 0, 1, 1], [], []>} : vector<2x4624xbf16>, vector<4624x128xbf16>, vector<2x128xf32> -> vector<2x128xf32>
    %c0_4 = arith.constant 0 : index
    %c0_5 = arith.constant 0 : index
    %6 = vector.load %arg2[%c0_4, %c0_5] : memref<1x128xf32, #tpu.memory_space<vmem>>, vector<1x128xf32>
    %7 = vector.broadcast %6 : vector<1x128xf32> to vector<2x128xf32>
    %8 = arith.addf %5, %7 : vector<2x128xf32>
    %9 = arith.truncf %8 : vector<2x128xf32> to vector<2x128xbf16>
    %c0_6 = arith.constant 0 : index
    %c0_7 = arith.constant 0 : index
    %10 = vector.load %arg3[%c0_6, %c0_7] : memref<128x64xbf16, #tpu.memory_space<vmem>>, vector<128x64xbf16>
    %cst_8 = arith.constant dense<0.000000e+00> : vector<2x64xf32>
    %11 = tpu.matmul %9, %10, %cst_8 {dimension_numbers = #tpu.dot_dimension_numbers<[1], [0], [0], [1], [0, 0, 1, 1], [], []>} : vector<2x128xbf16>, vector<128x64xbf16>, vector<2x64xf32> -> vector<2x64xf32>
    %c0_9 = arith.constant 0 : index
    %c0_10 = arith.constant 0 : index
    %12 = vector.load %arg4[%c0_9, %c0_10] : memref<1x64xf32, #tpu.memory_space<vmem>>, vector<1x64xf32>
    %13 = vector.broadcast %12 : vector<1x64xf32> to vector<2x64xf32>
    %14 = arith.addf %11, %13 : vector<2x64xf32>
    %15 = arith.truncf %14 : vector<2x64xf32> to vector<2x64xbf16>
    %c0_11 = arith.constant 0 : index
    %c0_12 = arith.constant 0 : index
    %16 = vector.load %arg5[%c0_11, %c0_12] : memref<64x10xbf16, #tpu.memory_space<vmem>>, vector<64x10xbf16>
    %cst_13 = arith.constant dense<0.000000e+00> : vector<2x10xf32>
    %17 = tpu.matmul %15, %16, %cst_13 {dimension_numbers = #tpu.dot_dimension_numbers<[1], [0], [0], [1], [0, 0, 1, 1], [], []>} : vector<2x64xbf16>, vector<64x10xbf16>, vector<2x10xf32> -> vector<2x10xf32>
    %c0_14 = arith.constant 0 : index
    %c0_15 = arith.constant 0 : index
    %18 = vector.load %arg6[%c0_14, %c0_15] : memref<1x10xf32, #tpu.memory_space<vmem>>, vector<1x10xf32>
    %19 = vector.broadcast %18 : vector<1x10xf32> to vector<2x10xf32>
    %20 = arith.addf %17, %19 : vector<2x10xf32>
    %c0_16 = arith.constant 0 : index
    %c0_17 = arith.constant 0 : index
    %21 = vector.load %arg7[%c0_16, %c0_17] : memref<2x10xf32, #tpu.memory_space<vmem>>, vector<2x10xf32>
    tpu.vector_store %arg7[%c0_16, %c0_17], %20 {strides = array<i32>} : memref<2x10xf32, #tpu.memory_space<vmem>>, vector<2x10xf32>,
    return
  }
}

module attributes {stable_mosaic.version = 11 : i64} {
  func.func @_feature_kernel(%arg0: i32, %arg1: memref<200xf32, #tpu.memory_space<smem>>, %arg2: memref<8xf32, #tpu.memory_space<smem>>, %arg3: memref<1152xf32, #tpu.memory_space<smem>>, %arg4: memref<16xf32, #tpu.memory_space<smem>>, %arg5: memref<1x112x112xf32, #tpu.memory_space<vmem>>, %arg6: memref<36x108xf32, #tpu.memory_space<vmem>>, %arg7: memref<108x36xf32, #tpu.memory_space<vmem>>, %arg8: memref<17x34xf32, #tpu.memory_space<vmem>>, %arg9: memref<34x17xf32, #tpu.memory_space<vmem>>, %arg10: memref<1x16x17x17xf32, #tpu.memory_space<vmem>>, %arg11: memref<8x36x36xf32, #tpu.memory_space<vmem>>) attributes {dimension_semantics = [#tpu.dimension_semantics<parallel>], iteration_bounds = array<i64: 2>, scalar_prefetch = 0 : i64, scratch_operands = 1 : i64, tpu.core_type = #tpu.core_type<tc>, window_params = [{transform_indices = @transform_0, window_bounds = array<i64: 200>}, {transform_indices = @transform_1, window_bounds = array<i64: 8>}, {transform_indices = @transform_2, window_bounds = array<i64: 1152>}, {transform_indices = @transform_3, window_bounds = array<i64: 16>}, {transform_indices = @transform_4, window_bounds = array<i64: 1, 112, 112>}, {pipeline_mode = #tpu.pipeline_mode<synchronous>, transform_indices = @transform_5, window_bounds = array<i64: 36, 108>}, {pipeline_mode = #tpu.pipeline_mode<synchronous>, transform_indices = @transform_6, window_bounds = array<i64: 108, 36>}, {pipeline_mode = #tpu.pipeline_mode<synchronous>, transform_indices = @transform_7, window_bounds = array<i64: 17, 34>}, {pipeline_mode = #tpu.pipeline_mode<synchronous>, transform_indices = @transform_8, window_bounds = array<i64: 34, 17>}, {transform_indices = @transform_9, window_bounds = array<i64: 1, 16, 17, 17>}]} {
    %c0 = arith.constant 0 : index
    %c0_0 = arith.constant 0 : index
    %0 = vector.load %arg6[%c0, %c0_0] : memref<36x108xf32, #tpu.memory_space<vmem>>, vector<36x108xf32>
    %c0_1 = arith.constant 0 : index
    %c0_2 = arith.constant 0 : index
    %1 = vector.load %arg7[%c0_1, %c0_2] : memref<108x36xf32, #tpu.memory_space<vmem>>, vector<108x36xf32>
    %c0_3 = arith.constant 0 : index
    %c0_4 = arith.constant 0 : index
    %2 = vector.load %arg8[%c0_3, %c0_4] : memref<17x34xf32, #tpu.memory_space<vmem>>, vector<17x34xf32>
    %c0_5 = arith.constant 0 : index
    %c0_6 = arith.constant 0 : index
    %3 = vector.load %arg9[%c0_5, %c0_6] : memref<34x17xf32, #tpu.memory_space<vmem>>, vector<34x17xf32>
    %c0_i32 = arith.constant 0 : i32
    %c8_i32 = arith.constant 8 : i32
    %4 = arith.addi %c0_i32, %c8_i32 : i32
    %c1_i32 = arith.constant 1 : i32
    scf.for %arg12 = %c0_i32 to %4 step %c1_i32  : i32 {
      %c1_i32_11 = arith.constant 1 : i32
      %6 = arith.muli %arg12, %c1_i32_11 : i32
      %c0_i32_12 = arith.constant 0 : i32
      %7 = arith.addi %c0_i32_12, %6 : i32
      %cst = arith.constant 0.000000e+00 : f32
      %8 = vector.broadcast %cst : f32 to vector<108x108xf32>
      %c25_i32 = arith.constant 25 : i32
      %9 = arith.muli %7, %c25_i32 : i32
      %c0_i32_13 = arith.constant 0 : i32
      %10 = arith.addi %9, %c0_i32_13 : i32
      %c0_i32_14 = arith.constant 0 : i32
      %11 = arith.addi %10, %c0_i32_14 : i32
      %12 = arith.index_cast %11 : i32 to index
      %13 = memref.load %arg1[%12] : memref<200xf32, #tpu.memory_space<smem>>
      %c0_15 = arith.constant 0 : index
      %c0_16 = arith.constant 0 : index
      %c0_17 = arith.constant 0 : index
      %14 = vector.load %arg5[%c0_15, %c0_16, %c0_17] : memref<1x112x112xf32, #tpu.memory_space<vmem>>, vector<1x108x108xf32>
      %15 = vector.shape_cast %14 : vector<1x108x108xf32> to vector<108x108xf32>
      %16 = vector.broadcast %13 : f32 to vector<108x108xf32>
      %17 = arith.mulf %16, %15 : vector<108x108xf32>
      %18 = arith.addf %8, %17 : vector<108x108xf32>
      %c25_i32_18 = arith.constant 25 : i32
      %19 = arith.muli %7, %c25_i32_18 : i32
      %c0_i32_19 = arith.constant 0 : i32
      %20 = arith.addi %19, %c0_i32_19 : i32
      %c1_i32_20 = arith.constant 1 : i32
      %21 = arith.addi %20, %c1_i32_20 : i32
      %22 = arith.index_cast %21 : i32 to index
      %23 = memref.load %arg1[%22] : memref<200xf32, #tpu.memory_space<smem>>
      %c0_21 = arith.constant 0 : index
      %c0_22 = arith.constant 0 : index
      %c1 = arith.constant 1 : index
      %24 = vector.load %arg5[%c0_21, %c0_22, %c1] : memref<1x112x112xf32, #tpu.memory_space<vmem>>, vector<1x108x108xf32>
      %25 = vector.shape_cast %24 : vector<1x108x108xf32> to vector<108x108xf32>
      %26 = vector.broadcast %23 : f32 to vector<108x108xf32>
      %27 = arith.mulf %26, %25 : vector<108x108xf32>
      %28 = arith.addf %18, %27 : vector<108x108xf32>
      %c25_i32_23 = arith.constant 25 : i32
      %29 = arith.muli %7, %c25_i32_23 : i32
      %c0_i32_24 = arith.constant 0 : i32
      %30 = arith.addi %29, %c0_i32_24 : i32
      %c2_i32 = arith.constant 2 : i32
      %31 = arith.addi %30, %c2_i32 : i32
      %32 = arith.index_cast %31 : i32 to index
      %33 = memref.load %arg1[%32] : memref<200xf32, #tpu.memory_space<smem>>
      %c0_25 = arith.constant 0 : index
      %c0_26 = arith.constant 0 : index
      %c2 = arith.constant 2 : index
      %34 = vector.load %arg5[%c0_25, %c0_26, %c2] : memref<1x112x112xf32, #tpu.memory_space<vmem>>, vector<1x108x108xf32>
      %35 = vector.shape_cast %34 : vector<1x108x108xf32> to vector<108x108xf32>
      %36 = vector.broadcast %33 : f32 to vector<108x108xf32>
      %37 = arith.mulf %36, %35 : vector<108x108xf32>
      %38 = arith.addf %28, %37 : vector<108x108xf32>
      %c25_i32_27 = arith.constant 25 : i32
      %39 = arith.muli %7, %c25_i32_27 : i32
      %c0_i32_28 = arith.constant 0 : i32
      %40 = arith.addi %39, %c0_i32_28 : i32
      %c3_i32 = arith.constant 3 : i32
      %41 = arith.addi %40, %c3_i32 : i32
      %42 = arith.index_cast %41 : i32 to index
      %43 = memref.load %arg1[%42] : memref<200xf32, #tpu.memory_space<smem>>
      %c0_29 = arith.constant 0 : index
      %c0_30 = arith.constant 0 : index
      %c3 = arith.constant 3 : index
      %44 = vector.load %arg5[%c0_29, %c0_30, %c3] : memref<1x112x112xf32, #tpu.memory_space<vmem>>, vector<1x108x108xf32>
      %45 = vector.shape_cast %44 : vector<1x108x108xf32> to vector<108x108xf32>
      %46 = vector.broadcast %43 : f32 to vector<108x108xf32>
      %47 = arith.mulf %46, %45 : vector<108x108xf32>
      %48 = arith.addf %38, %47 : vector<108x108xf32>
      %c25_i32_31 = arith.constant 25 : i32
      %49 = arith.muli %7, %c25_i32_31 : i32
      %c0_i32_32 = arith.constant 0 : i32
      %50 = arith.addi %49, %c0_i32_32 : i32
      %c4_i32 = arith.constant 4 : i32
      %51 = arith.addi %50, %c4_i32 : i32
      %52 = arith.index_cast %51 : i32 to index
      %53 = memref.load %arg1[%52] : memref<200xf32, #tpu.memory_space<smem>>
      %c0_33 = arith.constant 0 : index
      %c0_34 = arith.constant 0 : index
      %c4 = arith.constant 4 : index
      %54 = vector.load %arg5[%c0_33, %c0_34, %c4] : memref<1x112x112xf32, #tpu.memory_space<vmem>>, vector<1x108x108xf32>
      %55 = vector.shape_cast %54 : vector<1x108x108xf32> to vector<108x108xf32>
      %56 = vector.broadcast %53 : f32 to vector<108x108xf32>
      %57 = arith.mulf %56, %55 : vector<108x108xf32>
      %58 = arith.addf %48, %57 : vector<108x108xf32>
      %c25_i32_35 = arith.constant 25 : i32
      %59 = arith.muli %7, %c25_i32_35 : i32
      %c5_i32 = arith.constant 5 : i32
      %60 = arith.addi %59, %c5_i32 : i32
      %c0_i32_36 = arith.constant 0 : i32
      %61 = arith.addi %60, %c0_i32_36 : i32
      %62 = arith.index_cast %61 : i32 to index
      %63 = memref.load %arg1[%62] : memref<200xf32, #tpu.memory_space<smem>>
      %c0_37 = arith.constant 0 : index
      %c1_38 = arith.constant 1 : index
      %c0_39 = arith.constant 0 : index
      %64 = vector.load %arg5[%c0_37, %c1_38, %c0_39] : memref<1x112x112xf32, #tpu.memory_space<vmem>>, vector<1x108x108xf32>
      %65 = vector.shape_cast %64 : vector<1x108x108xf32> to vector<108x108xf32>
      %66 = vector.broadcast %63 : f32 to vector<108x108xf32>
      %67 = arith.mulf %66, %65 : vector<108x108xf32>
      %68 = arith.addf %58, %67 : vector<108x108xf32>
      %c25_i32_40 = arith.constant 25 : i32
      %69 = arith.muli %7, %c25_i32_40 : i32
      %c5_i32_41 = arith.constant 5 : i32
      %70 = arith.addi %69, %c5_i32_41 : i32
      %c1_i32_42 = arith.constant 1 : i32
      %71 = arith.addi %70, %c1_i32_42 : i32
      %72 = arith.index_cast %71 : i32 to index
      %73 = memref.load %arg1[%72] : memref<200xf32, #tpu.memory_space<smem>>
      %c0_43 = arith.constant 0 : index
      %c1_44 = arith.constant 1 : index
      %c1_45 = arith.constant 1 : index
      %74 = vector.load %arg5[%c0_43, %c1_44, %c1_45] : memref<1x112x112xf32, #tpu.memory_space<vmem>>, vector<1x108x108xf32>
      %75 = vector.shape_cast %74 : vector<1x108x108xf32> to vector<108x108xf32>
      %76 = vector.broadcast %73 : f32 to vector<108x108xf32>
      %77 = arith.mulf %76, %75 : vector<108x108xf32>
      %78 = arith.addf %68, %77 : vector<108x108xf32>
      %c25_i32_46 = arith.constant 25 : i32
      %79 = arith.muli %7, %c25_i32_46 : i32
      %c5_i32_47 = arith.constant 5 : i32
      %80 = arith.addi %79, %c5_i32_47 : i32
      %c2_i32_48 = arith.constant 2 : i32
      %81 = arith.addi %80, %c2_i32_48 : i32
      %82 = arith.index_cast %81 : i32 to index
      %83 = memref.load %arg1[%82] : memref<200xf32, #tpu.memory_space<smem>>
      %c0_49 = arith.constant 0 : index
      %c1_50 = arith.constant 1 : index
      %c2_51 = arith.constant 2 : index
      %84 = vector.load %arg5[%c0_49, %c1_50, %c2_51] : memref<1x112x112xf32, #tpu.memory_space<vmem>>, vector<1x108x108xf32>
      %85 = vector.shape_cast %84 : vector<1x108x108xf32> to vector<108x108xf32>
      %86 = vector.broadcast %83 : f32 to vector<108x108xf32>
      %87 = arith.mulf %86, %85 : vector<108x108xf32>
      %88 = arith.addf %78, %87 : vector<108x108xf32>
      %c25_i32_52 = arith.constant 25 : i32
      %89 = arith.muli %7, %c25_i32_52 : i32
      %c5_i32_53 = arith.constant 5 : i32
      %90 = arith.addi %89, %c5_i32_53 : i32
      %c3_i32_54 = arith.constant 3 : i32
      %91 = arith.addi %90, %c3_i32_54 : i32
      %92 = arith.index_cast %91 : i32 to index
      %93 = memref.load %arg1[%92] : memref<200xf32, #tpu.memory_space<smem>>
      %c0_55 = arith.constant 0 : index
      %c1_56 = arith.constant 1 : index
      %c3_57 = arith.constant 3 : index
      %94 = vector.load %arg5[%c0_55, %c1_56, %c3_57] : memref<1x112x112xf32, #tpu.memory_space<vmem>>, vector<1x108x108xf32>
      %95 = vector.shape_cast %94 : vector<1x108x108xf32> to vector<108x108xf32>
      %96 = vector.broadcast %93 : f32 to vector<108x108xf32>
      %97 = arith.mulf %96, %95 : vector<108x108xf32>
      %98 = arith.addf %88, %97 : vector<108x108xf32>
      %c25_i32_58 = arith.constant 25 : i32
      %99 = arith.muli %7, %c25_i32_58 : i32
      %c5_i32_59 = arith.constant 5 : i32
      %100 = arith.addi %99, %c5_i32_59 : i32
      %c4_i32_60 = arith.constant 4 : i32
      %101 = arith.addi %100, %c4_i32_60 : i32
      %102 = arith.index_cast %101 : i32 to index
      %103 = memref.load %arg1[%102] : memref<200xf32, #tpu.memory_space<smem>>
      %c0_61 = arith.constant 0 : index
      %c1_62 = arith.constant 1 : index
      %c4_63 = arith.constant 4 : index
      %104 = vector.load %arg5[%c0_61, %c1_62, %c4_63] : memref<1x112x112xf32, #tpu.memory_space<vmem>>, vector<1x108x108xf32>
      %105 = vector.shape_cast %104 : vector<1x108x108xf32> to vector<108x108xf32>
      %106 = vector.broadcast %103 : f32 to vector<108x108xf32>
      %107 = arith.mulf %106, %105 : vector<108x108xf32>
      %108 = arith.addf %98, %107 : vector<108x108xf32>
      %c25_i32_64 = arith.constant 25 : i32
      %109 = arith.muli %7, %c25_i32_64 : i32
      %c10_i32 = arith.constant 10 : i32
      %110 = arith.addi %109, %c10_i32 : i32
      %c0_i32_65 = arith.constant 0 : i32
      %111 = arith.addi %110, %c0_i32_65 : i32
      %112 = arith.index_cast %111 : i32 to index
      %113 = memref.load %arg1[%112] : memref<200xf32, #tpu.memory_space<smem>>
      %c0_66 = arith.constant 0 : index
      %c2_67 = arith.constant 2 : index
      %c0_68 = arith.constant 0 : index
      %114 = vector.load %arg5[%c0_66, %c2_67, %c0_68] : memref<1x112x112xf32, #tpu.memory_space<vmem>>, vector<1x108x108xf32>
      %115 = vector.shape_cast %114 : vector<1x108x108xf32> to vector<108x108xf32>
      %116 = vector.broadcast %113 : f32 to vector<108x108xf32>
      %117 = arith.mulf %116, %115 : vector<108x108xf32>
      %118 = arith.addf %108, %117 : vector<108x108xf32>
      %c25_i32_69 = arith.constant 25 : i32
      %119 = arith.muli %7, %c25_i32_69 : i32
      %c10_i32_70 = arith.constant 10 : i32
      %120 = arith.addi %119, %c10_i32_70 : i32
      %c1_i32_71 = arith.constant 1 : i32
      %121 = arith.addi %120, %c1_i32_71 : i32
      %122 = arith.index_cast %121 : i32 to index
      %123 = memref.load %arg1[%122] : memref<200xf32, #tpu.memory_space<smem>>
      %c0_72 = arith.constant 0 : index
      %c2_73 = arith.constant 2 : index
      %c1_74 = arith.constant 1 : index
      %124 = vector.load %arg5[%c0_72, %c2_73, %c1_74] : memref<1x112x112xf32, #tpu.memory_space<vmem>>, vector<1x108x108xf32>
      %125 = vector.shape_cast %124 : vector<1x108x108xf32> to vector<108x108xf32>
      %126 = vector.broadcast %123 : f32 to vector<108x108xf32>
      %127 = arith.mulf %126, %125 : vector<108x108xf32>
      %128 = arith.addf %118, %127 : vector<108x108xf32>
      %c25_i32_75 = arith.constant 25 : i32
      %129 = arith.muli %7, %c25_i32_75 : i32
      %c10_i32_76 = arith.constant 10 : i32
      %130 = arith.addi %129, %c10_i32_76 : i32
      %c2_i32_77 = arith.constant 2 : i32
      %131 = arith.addi %130, %c2_i32_77 : i32
      %132 = arith.index_cast %131 : i32 to index
      %133 = memref.load %arg1[%132] : memref<200xf32, #tpu.memory_space<smem>>
      %c0_78 = arith.constant 0 : index
      %c2_79 = arith.constant 2 : index
      %c2_80 = arith.constant 2 : index
      %134 = vector.load %arg5[%c0_78, %c2_79, %c2_80] : memref<1x112x112xf32, #tpu.memory_space<vmem>>, vector<1x108x108xf32>
      %135 = vector.shape_cast %134 : vector<1x108x108xf32> to vector<108x108xf32>
      %136 = vector.broadcast %133 : f32 to vector<108x108xf32>
      %137 = arith.mulf %136, %135 : vector<108x108xf32>
      %138 = arith.addf %128, %137 : vector<108x108xf32>
      %c25_i32_81 = arith.constant 25 : i32
      %139 = arith.muli %7, %c25_i32_81 : i32
      %c10_i32_82 = arith.constant 10 : i32
      %140 = arith.addi %139, %c10_i32_82 : i32
      %c3_i32_83 = arith.constant 3 : i32
      %141 = arith.addi %140, %c3_i32_83 : i32
      %142 = arith.index_cast %141 : i32 to index
      %143 = memref.load %arg1[%142] : memref<200xf32, #tpu.memory_space<smem>>
      %c0_84 = arith.constant 0 : index
      %c2_85 = arith.constant 2 : index
      %c3_86 = arith.constant 3 : index
      %144 = vector.load %arg5[%c0_84, %c2_85, %c3_86] : memref<1x112x112xf32, #tpu.memory_space<vmem>>, vector<1x108x108xf32>
      %145 = vector.shape_cast %144 : vector<1x108x108xf32> to vector<108x108xf32>
      %146 = vector.broadcast %143 : f32 to vector<108x108xf32>
      %147 = arith.mulf %146, %145 : vector<108x108xf32>
      %148 = arith.addf %138, %147 : vector<108x108xf32>
      %c25_i32_87 = arith.constant 25 : i32
      %149 = arith.muli %7, %c25_i32_87 : i32
      %c10_i32_88 = arith.constant 10 : i32
      %150 = arith.addi %149, %c10_i32_88 : i32
      %c4_i32_89 = arith.constant 4 : i32
      %151 = arith.addi %150, %c4_i32_89 : i32
      %152 = arith.index_cast %151 : i32 to index
      %153 = memref.load %arg1[%152] : memref<200xf32, #tpu.memory_space<smem>>
      %c0_90 = arith.constant 0 : index
      %c2_91 = arith.constant 2 : index
      %c4_92 = arith.constant 4 : index
      %154 = vector.load %arg5[%c0_90, %c2_91, %c4_92] : memref<1x112x112xf32, #tpu.memory_space<vmem>>, vector<1x108x108xf32>
      %155 = vector.shape_cast %154 : vector<1x108x108xf32> to vector<108x108xf32>
      %156 = vector.broadcast %153 : f32 to vector<108x108xf32>
      %157 = arith.mulf %156, %155 : vector<108x108xf32>
      %158 = arith.addf %148, %157 : vector<108x108xf32>
      %c25_i32_93 = arith.constant 25 : i32
      %159 = arith.muli %7, %c25_i32_93 : i32
      %c15_i32 = arith.constant 15 : i32
      %160 = arith.addi %159, %c15_i32 : i32
      %c0_i32_94 = arith.constant 0 : i32
      %161 = arith.addi %160, %c0_i32_94 : i32
      %162 = arith.index_cast %161 : i32 to index
      %163 = memref.load %arg1[%162] : memref<200xf32, #tpu.memory_space<smem>>
      %c0_95 = arith.constant 0 : index
      %c3_96 = arith.constant 3 : index
      %c0_97 = arith.constant 0 : index
      %164 = vector.load %arg5[%c0_95, %c3_96, %c0_97] : memref<1x112x112xf32, #tpu.memory_space<vmem>>, vector<1x108x108xf32>
      %165 = vector.shape_cast %164 : vector<1x108x108xf32> to vector<108x108xf32>
      %166 = vector.broadcast %163 : f32 to vector<108x108xf32>
      %167 = arith.mulf %166, %165 : vector<108x108xf32>
      %168 = arith.addf %158, %167 : vector<108x108xf32>
      %c25_i32_98 = arith.constant 25 : i32
      %169 = arith.muli %7, %c25_i32_98 : i32
      %c15_i32_99 = arith.constant 15 : i32
      %170 = arith.addi %169, %c15_i32_99 : i32
      %c1_i32_100 = arith.constant 1 : i32
      %171 = arith.addi %170, %c1_i32_100 : i32
      %172 = arith.index_cast %171 : i32 to index
      %173 = memref.load %arg1[%172] : memref<200xf32, #tpu.memory_space<smem>>
      %c0_101 = arith.constant 0 : index
      %c3_102 = arith.constant 3 : index
      %c1_103 = arith.constant 1 : index
      %174 = vector.load %arg5[%c0_101, %c3_102, %c1_103] : memref<1x112x112xf32, #tpu.memory_space<vmem>>, vector<1x108x108xf32>
      %175 = vector.shape_cast %174 : vector<1x108x108xf32> to vector<108x108xf32>
      %176 = vector.broadcast %173 : f32 to vector<108x108xf32>
      %177 = arith.mulf %176, %175 : vector<108x108xf32>
      %178 = arith.addf %168, %177 : vector<108x108xf32>
      %c25_i32_104 = arith.constant 25 : i32
      %179 = arith.muli %7, %c25_i32_104 : i32
      %c15_i32_105 = arith.constant 15 : i32
      %180 = arith.addi %179, %c15_i32_105 : i32
      %c2_i32_106 = arith.constant 2 : i32
      %181 = arith.addi %180, %c2_i32_106 : i32
      %182 = arith.index_cast %181 : i32 to index
      %183 = memref.load %arg1[%182] : memref<200xf32, #tpu.memory_space<smem>>
      %c0_107 = arith.constant 0 : index
      %c3_108 = arith.constant 3 : index
      %c2_109 = arith.constant 2 : index
      %184 = vector.load %arg5[%c0_107, %c3_108, %c2_109] : memref<1x112x112xf32, #tpu.memory_space<vmem>>, vector<1x108x108xf32>
      %185 = vector.shape_cast %184 : vector<1x108x108xf32> to vector<108x108xf32>
      %186 = vector.broadcast %183 : f32 to vector<108x108xf32>
      %187 = arith.mulf %186, %185 : vector<108x108xf32>
      %188 = arith.addf %178, %187 : vector<108x108xf32>
      %c25_i32_110 = arith.constant 25 : i32
      %189 = arith.muli %7, %c25_i32_110 : i32
      %c15_i32_111 = arith.constant 15 : i32
      %190 = arith.addi %189, %c15_i32_111 : i32
      %c3_i32_112 = arith.constant 3 : i32
      %191 = arith.addi %190, %c3_i32_112 : i32
      %192 = arith.index_cast %191 : i32 to index
      %193 = memref.load %arg1[%192] : memref<200xf32, #tpu.memory_space<smem>>
      %c0_113 = arith.constant 0 : index
      %c3_114 = arith.constant 3 : index
      %c3_115 = arith.constant 3 : index
      %194 = vector.load %arg5[%c0_113, %c3_114, %c3_115] : memref<1x112x112xf32, #tpu.memory_space<vmem>>, vector<1x108x108xf32>
      %195 = vector.shape_cast %194 : vector<1x108x108xf32> to vector<108x108xf32>
      %196 = vector.broadcast %193 : f32 to vector<108x108xf32>
      %197 = arith.mulf %196, %195 : vector<108x108xf32>
      %198 = arith.addf %188, %197 : vector<108x108xf32>
      %c25_i32_116 = arith.constant 25 : i32
      %199 = arith.muli %7, %c25_i32_116 : i32
      %c15_i32_117 = arith.constant 15 : i32
      %200 = arith.addi %199, %c15_i32_117 : i32
      %c4_i32_118 = arith.constant 4 : i32
      %201 = arith.addi %200, %c4_i32_118 : i32
      %202 = arith.index_cast %201 : i32 to index
      %203 = memref.load %arg1[%202] : memref<200xf32, #tpu.memory_space<smem>>
      %c0_119 = arith.constant 0 : index
      %c3_120 = arith.constant 3 : index
      %c4_121 = arith.constant 4 : index
      %204 = vector.load %arg5[%c0_119, %c3_120, %c4_121] : memref<1x112x112xf32, #tpu.memory_space<vmem>>, vector<1x108x108xf32>
      %205 = vector.shape_cast %204 : vector<1x108x108xf32> to vector<108x108xf32>
      %206 = vector.broadcast %203 : f32 to vector<108x108xf32>
      %207 = arith.mulf %206, %205 : vector<108x108xf32>
      %208 = arith.addf %198, %207 : vector<108x108xf32>
      %c25_i32_122 = arith.constant 25 : i32
      %209 = arith.muli %7, %c25_i32_122 : i32
      %c20_i32 = arith.constant 20 : i32
      %210 = arith.addi %209, %c20_i32 : i32
      %c0_i32_123 = arith.constant 0 : i32
      %211 = arith.addi %210, %c0_i32_123 : i32
      %212 = arith.index_cast %211 : i32 to index
      %213 = memref.load %arg1[%212] : memref<200xf32, #tpu.memory_space<smem>>
      %c0_124 = arith.constant 0 : index
      %c4_125 = arith.constant 4 : index
      %c0_126 = arith.constant 0 : index
      %214 = vector.load %arg5[%c0_124, %c4_125, %c0_126] : memref<1x112x112xf32, #tpu.memory_space<vmem>>, vector<1x108x108xf32>
      %215 = vector.shape_cast %214 : vector<1x108x108xf32> to vector<108x108xf32>
      %216 = vector.broadcast %213 : f32 to vector<108x108xf32>
      %217 = arith.mulf %216, %215 : vector<108x108xf32>
      %218 = arith.addf %208, %217 : vector<108x108xf32>
      %c25_i32_127 = arith.constant 25 : i32
      %219 = arith.muli %7, %c25_i32_127 : i32
      %c20_i32_128 = arith.constant 20 : i32
      %220 = arith.addi %219, %c20_i32_128 : i32
      %c1_i32_129 = arith.constant 1 : i32
      %221 = arith.addi %220, %c1_i32_129 : i32
      %222 = arith.index_cast %221 : i32 to index
      %223 = memref.load %arg1[%222] : memref<200xf32, #tpu.memory_space<smem>>
      %c0_130 = arith.constant 0 : index
      %c4_131 = arith.constant 4 : index
      %c1_132 = arith.constant 1 : index
      %224 = vector.load %arg5[%c0_130, %c4_131, %c1_132] : memref<1x112x112xf32, #tpu.memory_space<vmem>>, vector<1x108x108xf32>
      %225 = vector.shape_cast %224 : vector<1x108x108xf32> to vector<108x108xf32>
      %226 = vector.broadcast %223 : f32 to vector<108x108xf32>
      %227 = arith.mulf %226, %225 : vector<108x108xf32>
      %228 = arith.addf %218, %227 : vector<108x108xf32>
      %c25_i32_133 = arith.constant 25 : i32
      %229 = arith.muli %7, %c25_i32_133 : i32
      %c20_i32_134 = arith.constant 20 : i32
      %230 = arith.addi %229, %c20_i32_134 : i32
      %c2_i32_135 = arith.constant 2 : i32
      %231 = arith.addi %230, %c2_i32_135 : i32
      %232 = arith.index_cast %231 : i32 to index
      %233 = memref.load %arg1[%232] : memref<200xf32, #tpu.memory_space<smem>>
      %c0_136 = arith.constant 0 : index
      %c4_137 = arith.constant 4 : index
      %c2_138 = arith.constant 2 : index
      %234 = vector.load %arg5[%c0_136, %c4_137, %c2_138] : memref<1x112x112xf32, #tpu.memory_space<vmem>>, vector<1x108x108xf32>
      %235 = vector.shape_cast %234 : vector<1x108x108xf32> to vector<108x108xf32>
      %236 = vector.broadcast %233 : f32 to vector<108x108xf32>
      %237 = arith.mulf %236, %235 : vector<108x108xf32>
      %238 = arith.addf %228, %237 : vector<108x108xf32>
      %c25_i32_139 = arith.constant 25 : i32
      %239 = arith.muli %7, %c25_i32_139 : i32
      %c20_i32_140 = arith.constant 20 : i32
      %240 = arith.addi %239, %c20_i32_140 : i32
      %c3_i32_141 = arith.constant 3 : i32
      %241 = arith.addi %240, %c3_i32_141 : i32
      %242 = arith.index_cast %241 : i32 to index
      %243 = memref.load %arg1[%242] : memref<200xf32, #tpu.memory_space<smem>>
      %c0_142 = arith.constant 0 : index
      %c4_143 = arith.constant 4 : index
      %c3_144 = arith.constant 3 : index
      %244 = vector.load %arg5[%c0_142, %c4_143, %c3_144] : memref<1x112x112xf32, #tpu.memory_space<vmem>>, vector<1x108x108xf32>
      %245 = vector.shape_cast %244 : vector<1x108x108xf32> to vector<108x108xf32>
      %246 = vector.broadcast %243 : f32 to vector<108x108xf32>
      %247 = arith.mulf %246, %245 : vector<108x108xf32>
      %248 = arith.addf %238, %247 : vector<108x108xf32>
      %c25_i32_145 = arith.constant 25 : i32
      %249 = arith.muli %7, %c25_i32_145 : i32
      %c20_i32_146 = arith.constant 20 : i32
      %250 = arith.addi %249, %c20_i32_146 : i32
      %c4_i32_147 = arith.constant 4 : i32
      %251 = arith.addi %250, %c4_i32_147 : i32
      %252 = arith.index_cast %251 : i32 to index
      %253 = memref.load %arg1[%252] : memref<200xf32, #tpu.memory_space<smem>>
      %c0_148 = arith.constant 0 : index
      %c4_149 = arith.constant 4 : index
      %c4_150 = arith.constant 4 : index
      %254 = vector.load %arg5[%c0_148, %c4_149, %c4_150] : memref<1x112x112xf32, #tpu.memory_space<vmem>>, vector<1x108x108xf32>
      %255 = vector.shape_cast %254 : vector<1x108x108xf32> to vector<108x108xf32>
      %256 = vector.broadcast %253 : f32 to vector<108x108xf32>
      %257 = arith.mulf %256, %255 : vector<108x108xf32>
      %258 = arith.addf %248, %257 : vector<108x108xf32>
      %cst_151 = arith.constant dense<0.000000e+00> : vector<108x36xf32>
      %259 = tpu.matmul %258, %1, %cst_151 {dimension_numbers = #tpu.dot_dimension_numbers<[1], [0], [0], [1], [0, 0, 1, 1], [], []>} : vector<108x108xf32>, vector<108x36xf32>, vector<108x36xf32> -> vector<108x36xf32>
      %cst_152 = arith.constant dense<0.000000e+00> : vector<36x36xf32>
      %260 = tpu.matmul %0, %259, %cst_152 {dimension_numbers = #tpu.dot_dimension_numbers<[1], [0], [0], [1], [0, 0, 1, 1], [], []>} : vector<36x108xf32>, vector<108x36xf32>, vector<36x36xf32> -> vector<36x36xf32>
      %cst_153 = arith.constant 0.111111112 : f32
      %261 = vector.broadcast %cst_153 : f32 to vector<36x36xf32>
      %262 = arith.mulf %260, %261 : vector<36x36xf32>
      %263 = arith.index_cast %7 : i32 to index
      %264 = memref.load %arg2[%263] : memref<8xf32, #tpu.memory_space<smem>>
      %265 = vector.broadcast %264 : f32 to vector<36x36xf32>
      %266 = arith.addf %262, %265 : vector<36x36xf32>
      %267 = arith.index_cast %7 : i32 to index
      %c0_154 = arith.constant 0 : index
      %c0_155 = arith.constant 0 : index
      %268 = vector.load %arg11[%267, %c0_154, %c0_155] : memref<8x36x36xf32, #tpu.memory_space<vmem>>, vector<1x36x36xf32>
      %269 = vector.shape_cast %268 : vector<1x36x36xf32> to vector<36x36xf32>
      %270 = vector.shape_cast %266 : vector<36x36xf32> to vector<1x36x36xf32>
      tpu.vector_store %arg11[%267, %c0_154, %c0_155], %270 {strides = array<i32>} : memref<8x36x36xf32, #tpu.memory_space<vmem>>, vector<1x36x36xf32>,
    }
    %c8_i32_7 = arith.constant 8 : i32
    %c0_i32_8 = arith.constant 0 : i32
    %c16_i32 = arith.constant 16 : i32
    %5 = arith.addi %c0_i32_8, %c16_i32 : i32
    %c1_i32_9 = arith.constant 1 : i32
    scf.for %arg12 = %c0_i32_8 to %5 step %c1_i32_9  : i32 {
      %c1_i32_11 = arith.constant 1 : i32
      %6 = arith.muli %arg12, %c1_i32_11 : i32
      %c0_i32_12 = arith.constant 0 : i32
      %7 = arith.addi %c0_i32_12, %6 : i32
      %cst = arith.constant 0.000000e+00 : f32
      %8 = vector.broadcast %cst : f32 to vector<34x34xf32>
      %c8_i32_13 = arith.constant 8 : i32
      %9 = arith.muli %7, %c8_i32_13 : i32
      %c0_i32_14 = arith.constant 0 : i32
      %10 = arith.addi %9, %c0_i32_14 : i32
      %c3_i32 = arith.constant 3 : i32
      %11 = arith.muli %10, %c3_i32 : i32
      %c0_i32_15 = arith.constant 0 : i32
      %12 = arith.addi %11, %c0_i32_15 : i32
      %c3_i32_16 = arith.constant 3 : i32
      %13 = arith.muli %12, %c3_i32_16 : i32
      %c0_i32_17 = arith.constant 0 : i32
      %14 = arith.addi %13, %c0_i32_17 : i32
      %15 = arith.index_cast %14 : i32 to index
      %16 = memref.load %arg3[%15] : memref<1152xf32, #tpu.memory_space<smem>>
      %c0_18 = arith.constant 0 : index
      %c0_19 = arith.constant 0 : index
      %c0_20 = arith.constant 0 : index
      %17 = vector.load %arg11[%c0_18, %c0_19, %c0_20] : memref<8x36x36xf32, #tpu.memory_space<vmem>>, vector<1x34x34xf32>
      %18 = vector.shape_cast %17 : vector<1x34x34xf32> to vector<34x34xf32>
      %19 = vector.broadcast %16 : f32 to vector<34x34xf32>
      %20 = arith.mulf %19, %18 : vector<34x34xf32>
      %21 = arith.addf %8, %20 : vector<34x34xf32>
      %c8_i32_21 = arith.constant 8 : i32
      %22 = arith.muli %7, %c8_i32_21 : i32
      %c0_i32_22 = arith.constant 0 : i32
      %23 = arith.addi %22, %c0_i32_22 : i32
      %c3_i32_23 = arith.constant 3 : i32
      %24 = arith.muli %23, %c3_i32_23 : i32
      %c0_i32_24 = arith.constant 0 : i32
      %25 = arith.addi %24, %c0_i32_24 : i32
      %c3_i32_25 = arith.constant 3 : i32
      %26 = arith.muli %25, %c3_i32_25 : i32
      %c1_i32_26 = arith.constant 1 : i32
      %27 = arith.addi %26, %c1_i32_26 : i32
      %28 = arith.index_cast %27 : i32 to index
      %29 = memref.load %arg3[%28] : memref<1152xf32, #tpu.memory_space<smem>>
      %c0_27 = arith.constant 0 : index
      %c0_28 = arith.constant 0 : index
      %c1 = arith.constant 1 : index
      %30 = vector.load %arg11[%c0_27, %c0_28, %c1] : memref<8x36x36xf32, #tpu.memory_space<vmem>>, vector<1x34x34xf32>
      %31 = vector.shape_cast %30 : vector<1x34x34xf32> to vector<34x34xf32>
      %32 = vector.broadcast %29 : f32 to vector<34x34xf32>
      %33 = arith.mulf %32, %31 : vector<34x34xf32>
      %34 = arith.addf %21, %33 : vector<34x34xf32>
      %c8_i32_29 = arith.constant 8 : i32
      %35 = arith.muli %7, %c8_i32_29 : i32
      %c0_i32_30 = arith.constant 0 : i32
      %36 = arith.addi %35, %c0_i32_30 : i32
      %c3_i32_31 = arith.constant 3 : i32
      %37 = arith.muli %36, %c3_i32_31 : i32
      %c0_i32_32 = arith.constant 0 : i32
      %38 = arith.addi %37, %c0_i32_32 : i32
      %c3_i32_33 = arith.constant 3 : i32
      %39 = arith.muli %38, %c3_i32_33 : i32
      %c2_i32 = arith.constant 2 : i32
      %40 = arith.addi %39, %c2_i32 : i32
      %41 = arith.index_cast %40 : i32 to index
      %42 = memref.load %arg3[%41] : memref<1152xf32, #tpu.memory_space<smem>>
      %c0_34 = arith.constant 0 : index
      %c0_35 = arith.constant 0 : index
      %c2 = arith.constant 2 : index
      %43 = vector.load %arg11[%c0_34, %c0_35, %c2] : memref<8x36x36xf32, #tpu.memory_space<vmem>>, vector<1x34x34xf32>
      %44 = vector.shape_cast %43 : vector<1x34x34xf32> to vector<34x34xf32>
      %45 = vector.broadcast %42 : f32 to vector<34x34xf32>
      %46 = arith.mulf %45, %44 : vector<34x34xf32>
      %47 = arith.addf %34, %46 : vector<34x34xf32>
      %c8_i32_36 = arith.constant 8 : i32
      %48 = arith.muli %7, %c8_i32_36 : i32
      %c0_i32_37 = arith.constant 0 : i32
      %49 = arith.addi %48, %c0_i32_37 : i32
      %c3_i32_38 = arith.constant 3 : i32
      %50 = arith.muli %49, %c3_i32_38 : i32
      %c1_i32_39 = arith.constant 1 : i32
      %51 = arith.addi %50, %c1_i32_39 : i32
      %c3_i32_40 = arith.constant 3 : i32
      %52 = arith.muli %51, %c3_i32_40 : i32
      %c0_i32_41 = arith.constant 0 : i32
      %53 = arith.addi %52, %c0_i32_41 : i32
      %54 = arith.index_cast %53 : i32 to index
      %55 = memref.load %arg3[%54] : memref<1152xf32, #tpu.memory_space<smem>>
      %c0_42 = arith.constant 0 : index
      %c1_43 = arith.constant 1 : index
      %c0_44 = arith.constant 0 : index
      %56 = vector.load %arg11[%c0_42, %c1_43, %c0_44] : memref<8x36x36xf32, #tpu.memory_space<vmem>>, vector<1x34x34xf32>
      %57 = vector.shape_cast %56 : vector<1x34x34xf32> to vector<34x34xf32>
      %58 = vector.broadcast %55 : f32 to vector<34x34xf32>
      %59 = arith.mulf %58, %57 : vector<34x34xf32>
      %60 = arith.addf %47, %59 : vector<34x34xf32>
      %c8_i32_45 = arith.constant 8 : i32
      %61 = arith.muli %7, %c8_i32_45 : i32
      %c0_i32_46 = arith.constant 0 : i32
      %62 = arith.addi %61, %c0_i32_46 : i32
      %c3_i32_47 = arith.constant 3 : i32
      %63 = arith.muli %62, %c3_i32_47 : i32
      %c1_i32_48 = arith.constant 1 : i32
      %64 = arith.addi %63, %c1_i32_48 : i32
      %c3_i32_49 = arith.constant 3 : i32
      %65 = arith.muli %64, %c3_i32_49 : i32
      %c1_i32_50 = arith.constant 1 : i32
      %66 = arith.addi %65, %c1_i32_50 : i32
      %67 = arith.index_cast %66 : i32 to index
      %68 = memref.load %arg3[%67] : memref<1152xf32, #tpu.memory_space<smem>>
      %c0_51 = arith.constant 0 : index
      %c1_52 = arith.constant 1 : index
      %c1_53 = arith.constant 1 : index
      %69 = vector.load %arg11[%c0_51, %c1_52, %c1_53] : memref<8x36x36xf32, #tpu.memory_space<vmem>>, vector<1x34x34xf32>
      %70 = vector.shape_cast %69 : vector<1x34x34xf32> to vector<34x34xf32>
      %71 = vector.broadcast %68 : f32 to vector<34x34xf32>
      %72 = arith.mulf %71, %70 : vector<34x34xf32>
      %73 = arith.addf %60, %72 : vector<34x34xf32>
      %c8_i32_54 = arith.constant 8 : i32
      %74 = arith.muli %7, %c8_i32_54 : i32
      %c0_i32_55 = arith.constant 0 : i32
      %75 = arith.addi %74, %c0_i32_55 : i32
      %c3_i32_56 = arith.constant 3 : i32
      %76 = arith.muli %75, %c3_i32_56 : i32
      %c1_i32_57 = arith.constant 1 : i32
      %77 = arith.addi %76, %c1_i32_57 : i32
      %c3_i32_58 = arith.constant 3 : i32
      %78 = arith.muli %77, %c3_i32_58 : i32
      %c2_i32_59 = arith.constant 2 : i32
      %79 = arith.addi %78, %c2_i32_59 : i32
      %80 = arith.index_cast %79 : i32 to index
      %81 = memref.load %arg3[%80] : memref<1152xf32, #tpu.memory_space<smem>>
      %c0_60 = arith.constant 0 : index
      %c1_61 = arith.constant 1 : index
      %c2_62 = arith.constant 2 : index
      %82 = vector.load %arg11[%c0_60, %c1_61, %c2_62] : memref<8x36x36xf32, #tpu.memory_space<vmem>>, vector<1x34x34xf32>
      %83 = vector.shape_cast %82 : vector<1x34x34xf32> to vector<34x34xf32>
      %84 = vector.broadcast %81 : f32 to vector<34x34xf32>
      %85 = arith.mulf %84, %83 : vector<34x34xf32>
      %86 = arith.addf %73, %85 : vector<34x34xf32>
      %c8_i32_63 = arith.constant 8 : i32
      %87 = arith.muli %7, %c8_i32_63 : i32
      %c0_i32_64 = arith.constant 0 : i32
      %88 = arith.addi %87, %c0_i32_64 : i32
      %c3_i32_65 = arith.constant 3 : i32
      %89 = arith.muli %88, %c3_i32_65 : i32
      %c2_i32_66 = arith.constant 2 : i32
      %90 = arith.addi %89, %c2_i32_66 : i32
      %c3_i32_67 = arith.constant 3 : i32
      %91 = arith.muli %90, %c3_i32_67 : i32
      %c0_i32_68 = arith.constant 0 : i32
      %92 = arith.addi %91, %c0_i32_68 : i32
      %93 = arith.index_cast %92 : i32 to index
      %94 = memref.load %arg3[%93] : memref<1152xf32, #tpu.memory_space<smem>>
      %c0_69 = arith.constant 0 : index
      %c2_70 = arith.constant 2 : index
      %c0_71 = arith.constant 0 : index
      %95 = vector.load %arg11[%c0_69, %c2_70, %c0_71] : memref<8x36x36xf32, #tpu.memory_space<vmem>>, vector<1x34x34xf32>
      %96 = vector.shape_cast %95 : vector<1x34x34xf32> to vector<34x34xf32>
      %97 = vector.broadcast %94 : f32 to vector<34x34xf32>
      %98 = arith.mulf %97, %96 : vector<34x34xf32>
      %99 = arith.addf %86, %98 : vector<34x34xf32>
      %c8_i32_72 = arith.constant 8 : i32
      %100 = arith.muli %7, %c8_i32_72 : i32
      %c0_i32_73 = arith.constant 0 : i32
      %101 = arith.addi %100, %c0_i32_73 : i32
      %c3_i32_74 = arith.constant 3 : i32
      %102 = arith.muli %101, %c3_i32_74 : i32
      %c2_i32_75 = arith.constant 2 : i32
      %103 = arith.addi %102, %c2_i32_75 : i32
      %c3_i32_76 = arith.constant 3 : i32
      %104 = arith.muli %103, %c3_i32_76 : i32
      %c1_i32_77 = arith.constant 1 : i32
      %105 = arith.addi %104, %c1_i32_77 : i32
      %106 = arith.index_cast %105 : i32 to index
      %107 = memref.load %arg3[%106] : memref<1152xf32, #tpu.memory_space<smem>>
      %c0_78 = arith.constant 0 : index
      %c2_79 = arith.constant 2 : index
      %c1_80 = arith.constant 1 : index
      %108 = vector.load %arg11[%c0_78, %c2_79, %c1_80] : memref<8x36x36xf32, #tpu.memory_space<vmem>>, vector<1x34x34xf32>
      %109 = vector.shape_cast %108 : vector<1x34x34xf32> to vector<34x34xf32>
      %110 = vector.broadcast %107 : f32 to vector<34x34xf32>
      %111 = arith.mulf %110, %109 : vector<34x34xf32>
      %112 = arith.addf %99, %111 : vector<34x34xf32>
      %c8_i32_81 = arith.constant 8 : i32
      %113 = arith.muli %7, %c8_i32_81 : i32
      %c0_i32_82 = arith.constant 0 : i32
      %114 = arith.addi %113, %c0_i32_82 : i32
      %c3_i32_83 = arith.constant 3 : i32
      %115 = arith.muli %114, %c3_i32_83 : i32
      %c2_i32_84 = arith.constant 2 : i32
      %116 = arith.addi %115, %c2_i32_84 : i32
      %c3_i32_85 = arith.constant 3 : i32
      %117 = arith.muli %116, %c3_i32_85 : i32
      %c2_i32_86 = arith.constant 2 : i32
      %118 = arith.addi %117, %c2_i32_86 : i32
      %119 = arith.index_cast %118 : i32 to index
      %120 = memref.load %arg3[%119] : memref<1152xf32, #tpu.memory_space<smem>>
      %c0_87 = arith.constant 0 : index
      %c2_88 = arith.constant 2 : index
      %c2_89 = arith.constant 2 : index
      %121 = vector.load %arg11[%c0_87, %c2_88, %c2_89] : memref<8x36x36xf32, #tpu.memory_space<vmem>>, vector<1x34x34xf32>
      %122 = vector.shape_cast %121 : vector<1x34x34xf32> to vector<34x34xf32>
      %123 = vector.broadcast %120 : f32 to vector<34x34xf32>
      %124 = arith.mulf %123, %122 : vector<34x34xf32>
      %125 = arith.addf %112, %124 : vector<34x34xf32>
      %c8_i32_90 = arith.constant 8 : i32
      %126 = arith.muli %7, %c8_i32_90 : i32
      %c1_i32_91 = arith.constant 1 : i32
      %127 = arith.addi %126, %c1_i32_91 : i32
      %c3_i32_92 = arith.constant 3 : i32
      %128 = arith.muli %127, %c3_i32_92 : i32
      %c0_i32_93 = arith.constant 0 : i32
      %129 = arith.addi %128, %c0_i32_93 : i32
      %c3_i32_94 = arith.constant 3 : i32
      %130 = arith.muli %129, %c3_i32_94 : i32
      %c0_i32_95 = arith.constant 0 : i32
      %131 = arith.addi %130, %c0_i32_95 : i32
      %132 = arith.index_cast %131 : i32 to index
      %133 = memref.load %arg3[%132] : memref<1152xf32, #tpu.memory_space<smem>>
      %c1_96 = arith.constant 1 : index
      %c0_97 = arith.constant 0 : index
      %c0_98 = arith.constant 0 : index
      %134 = vector.load %arg11[%c1_96, %c0_97, %c0_98] : memref<8x36x36xf32, #tpu.memory_space<vmem>>, vector<1x34x34xf32>
      %135 = vector.shape_cast %134 : vector<1x34x34xf32> to vector<34x34xf32>
      %136 = vector.broadcast %133 : f32 to vector<34x34xf32>
      %137 = arith.mulf %136, %135 : vector<34x34xf32>
      %138 = arith.addf %125, %137 : vector<34x34xf32>
      %c8_i32_99 = arith.constant 8 : i32
      %139 = arith.muli %7, %c8_i32_99 : i32
      %c1_i32_100 = arith.constant 1 : i32
      %140 = arith.addi %139, %c1_i32_100 : i32
      %c3_i32_101 = arith.constant 3 : i32
      %141 = arith.muli %140, %c3_i32_101 : i32
      %c0_i32_102 = arith.constant 0 : i32
      %142 = arith.addi %141, %c0_i32_102 : i32
      %c3_i32_103 = arith.constant 3 : i32
      %143 = arith.muli %142, %c3_i32_103 : i32
      %c1_i32_104 = arith.constant 1 : i32
      %144 = arith.addi %143, %c1_i32_104 : i32
      %145 = arith.index_cast %144 : i32 to index
      %146 = memref.load %arg3[%145] : memref<1152xf32, #tpu.memory_space<smem>>
      %c1_105 = arith.constant 1 : index
      %c0_106 = arith.constant 0 : index
      %c1_107 = arith.constant 1 : index
      %147 = vector.load %arg11[%c1_105, %c0_106, %c1_107] : memref<8x36x36xf32, #tpu.memory_space<vmem>>, vector<1x34x34xf32>
      %148 = vector.shape_cast %147 : vector<1x34x34xf32> to vector<34x34xf32>
      %149 = vector.broadcast %146 : f32 to vector<34x34xf32>
      %150 = arith.mulf %149, %148 : vector<34x34xf32>
      %151 = arith.addf %138, %150 : vector<34x34xf32>
      %c8_i32_108 = arith.constant 8 : i32
      %152 = arith.muli %7, %c8_i32_108 : i32
      %c1_i32_109 = arith.constant 1 : i32
      %153 = arith.addi %152, %c1_i32_109 : i32
      %c3_i32_110 = arith.constant 3 : i32
      %154 = arith.muli %153, %c3_i32_110 : i32
      %c0_i32_111 = arith.constant 0 : i32
      %155 = arith.addi %154, %c0_i32_111 : i32
      %c3_i32_112 = arith.constant 3 : i32
      %156 = arith.muli %155, %c3_i32_112 : i32
      %c2_i32_113 = arith.constant 2 : i32
      %157 = arith.addi %156, %c2_i32_113 : i32
      %158 = arith.index_cast %157 : i32 to index
      %159 = memref.load %arg3[%158] : memref<1152xf32, #tpu.memory_space<smem>>
      %c1_114 = arith.constant 1 : index
      %c0_115 = arith.constant 0 : index
      %c2_116 = arith.constant 2 : index
      %160 = vector.load %arg11[%c1_114, %c0_115, %c2_116] : memref<8x36x36xf32, #tpu.memory_space<vmem>>, vector<1x34x34xf32>
      %161 = vector.shape_cast %160 : vector<1x34x34xf32> to vector<34x34xf32>
      %162 = vector.broadcast %159 : f32 to vector<34x34xf32>
      %163 = arith.mulf %162, %161 : vector<34x34xf32>
      %164 = arith.addf %151, %163 : vector<34x34xf32>
      %c8_i32_117 = arith.constant 8 : i32
      %165 = arith.muli %7, %c8_i32_117 : i32
      %c1_i32_118 = arith.constant 1 : i32
      %166 = arith.addi %165, %c1_i32_118 : i32
      %c3_i32_119 = arith.constant 3 : i32
      %167 = arith.muli %166, %c3_i32_119 : i32
      %c1_i32_120 = arith.constant 1 : i32
      %168 = arith.addi %167, %c1_i32_120 : i32
      %c3_i32_121 = arith.constant 3 : i32
      %169 = arith.muli %168, %c3_i32_121 : i32
      %c0_i32_122 = arith.constant 0 : i32
      %170 = arith.addi %169, %c0_i32_122 : i32
      %171 = arith.index_cast %170 : i32 to index
      %172 = memref.load %arg3[%171] : memref<1152xf32, #tpu.memory_space<smem>>
      %c1_123 = arith.constant 1 : index
      %c1_124 = arith.constant 1 : index
      %c0_125 = arith.constant 0 : index
      %173 = vector.load %arg11[%c1_123, %c1_124, %c0_125] : memref<8x36x36xf32, #tpu.memory_space<vmem>>, vector<1x34x34xf32>
      %174 = vector.shape_cast %173 : vector<1x34x34xf32> to vector<34x34xf32>
      %175 = vector.broadcast %172 : f32 to vector<34x34xf32>
      %176 = arith.mulf %175, %174 : vector<34x34xf32>
      %177 = arith.addf %164, %176 : vector<34x34xf32>
      %c8_i32_126 = arith.constant 8 : i32
      %178 = arith.muli %7, %c8_i32_126 : i32
      %c1_i32_127 = arith.constant 1 : i32
      %179 = arith.addi %178, %c1_i32_127 : i32
      %c3_i32_128 = arith.constant 3 : i32
      %180 = arith.muli %179, %c3_i32_128 : i32
      %c1_i32_129 = arith.constant 1 : i32
      %181 = arith.addi %180, %c1_i32_129 : i32
      %c3_i32_130 = arith.constant 3 : i32
      %182 = arith.muli %181, %c3_i32_130 : i32
      %c1_i32_131 = arith.constant 1 : i32
      %183 = arith.addi %182, %c1_i32_131 : i32
      %184 = arith.index_cast %183 : i32 to index
      %185 = memref.load %arg3[%184] : memref<1152xf32, #tpu.memory_space<smem>>
      %c1_132 = arith.constant 1 : index
      %c1_133 = arith.constant 1 : index
      %c1_134 = arith.constant 1 : index
      %186 = vector.load %arg11[%c1_132, %c1_133, %c1_134] : memref<8x36x36xf32, #tpu.memory_space<vmem>>, vector<1x34x34xf32>
      %187 = vector.shape_cast %186 : vector<1x34x34xf32> to vector<34x34xf32>
      %188 = vector.broadcast %185 : f32 to vector<34x34xf32>
      %189 = arith.mulf %188, %187 : vector<34x34xf32>
      %190 = arith.addf %177, %189 : vector<34x34xf32>
      %c8_i32_135 = arith.constant 8 : i32
      %191 = arith.muli %7, %c8_i32_135 : i32
      %c1_i32_136 = arith.constant 1 : i32
      %192 = arith.addi %191, %c1_i32_136 : i32
      %c3_i32_137 = arith.constant 3 : i32
      %193 = arith.muli %192, %c3_i32_137 : i32
      %c1_i32_138 = arith.constant 1 : i32
      %194 = arith.addi %193, %c1_i32_138 : i32
      %c3_i32_139 = arith.constant 3 : i32
      %195 = arith.muli %194, %c3_i32_139 : i32
      %c2_i32_140 = arith.constant 2 : i32
      %196 = arith.addi %195, %c2_i32_140 : i32
      %197 = arith.index_cast %196 : i32 to index
      %198 = memref.load %arg3[%197] : memref<1152xf32, #tpu.memory_space<smem>>
      %c1_141 = arith.constant 1 : index
      %c1_142 = arith.constant 1 : index
      %c2_143 = arith.constant 2 : index
      %199 = vector.load %arg11[%c1_141, %c1_142, %c2_143] : memref<8x36x36xf32, #tpu.memory_space<vmem>>, vector<1x34x34xf32>
      %200 = vector.shape_cast %199 : vector<1x34x34xf32> to vector<34x34xf32>
      %201 = vector.broadcast %198 : f32 to vector<34x34xf32>
      %202 = arith.mulf %201, %200 : vector<34x34xf32>
      %203 = arith.addf %190, %202 : vector<34x34xf32>
      %c8_i32_144 = arith.constant 8 : i32
      %204 = arith.muli %7, %c8_i32_144 : i32
      %c1_i32_145 = arith.constant 1 : i32
      %205 = arith.addi %204, %c1_i32_145 : i32
      %c3_i32_146 = arith.constant 3 : i32
      %206 = arith.muli %205, %c3_i32_146 : i32
      %c2_i32_147 = arith.constant 2 : i32
      %207 = arith.addi %206, %c2_i32_147 : i32
      %c3_i32_148 = arith.constant 3 : i32
      %208 = arith.muli %207, %c3_i32_148 : i32
      %c0_i32_149 = arith.constant 0 : i32
      %209 = arith.addi %208, %c0_i32_149 : i32
      %210 = arith.index_cast %209 : i32 to index
      %211 = memref.load %arg3[%210] : memref<1152xf32, #tpu.memory_space<smem>>
      %c1_150 = arith.constant 1 : index
      %c2_151 = arith.constant 2 : index
      %c0_152 = arith.constant 0 : index
      %212 = vector.load %arg11[%c1_150, %c2_151, %c0_152] : memref<8x36x36xf32, #tpu.memory_space<vmem>>, vector<1x34x34xf32>
      %213 = vector.shape_cast %212 : vector<1x34x34xf32> to vector<34x34xf32>
      %214 = vector.broadcast %211 : f32 to vector<34x34xf32>
      %215 = arith.mulf %214, %213 : vector<34x34xf32>
      %216 = arith.addf %203, %215 : vector<34x34xf32>
      %c8_i32_153 = arith.constant 8 : i32
      %217 = arith.muli %7, %c8_i32_153 : i32
      %c1_i32_154 = arith.constant 1 : i32
      %218 = arith.addi %217, %c1_i32_154 : i32
      %c3_i32_155 = arith.constant 3 : i32
      %219 = arith.muli %218, %c3_i32_155 : i32
      %c2_i32_156 = arith.constant 2 : i32
      %220 = arith.addi %219, %c2_i32_156 : i32
      %c3_i32_157 = arith.constant 3 : i32
      %221 = arith.muli %220, %c3_i32_157 : i32
      %c1_i32_158 = arith.constant 1 : i32
      %222 = arith.addi %221, %c1_i32_158 : i32
      %223 = arith.index_cast %222 : i32 to index
      %224 = memref.load %arg3[%223] : memref<1152xf32, #tpu.memory_space<smem>>
      %c1_159 = arith.constant 1 : index
      %c2_160 = arith.constant 2 : index
      %c1_161 = arith.constant 1 : index
      %225 = vector.load %arg11[%c1_159, %c2_160, %c1_161] : memref<8x36x36xf32, #tpu.memory_space<vmem>>, vector<1x34x34xf32>
      %226 = vector.shape_cast %225 : vector<1x34x34xf32> to vector<34x34xf32>
      %227 = vector.broadcast %224 : f32 to vector<34x34xf32>
      %228 = arith.mulf %227, %226 : vector<34x34xf32>
      %229 = arith.addf %216, %228 : vector<34x34xf32>
      %c8_i32_162 = arith.constant 8 : i32
      %230 = arith.muli %7, %c8_i32_162 : i32
      %c1_i32_163 = arith.constant 1 : i32
      %231 = arith.addi %230, %c1_i32_163 : i32
      %c3_i32_164 = arith.constant 3 : i32
      %232 = arith.muli %231, %c3_i32_164 : i32
      %c2_i32_165 = arith.constant 2 : i32
      %233 = arith.addi %232, %c2_i32_165 : i32
      %c3_i32_166 = arith.constant 3 : i32
      %234 = arith.muli %233, %c3_i32_166 : i32
      %c2_i32_167 = arith.constant 2 : i32
      %235 = arith.addi %234, %c2_i32_167 : i32
      %236 = arith.index_cast %235 : i32 to index
      %237 = memref.load %arg3[%236] : memref<1152xf32, #tpu.memory_space<smem>>
      %c1_168 = arith.constant 1 : index
      %c2_169 = arith.constant 2 : index
      %c2_170 = arith.constant 2 : index
      %238 = vector.load %arg11[%c1_168, %c2_169, %c2_170] : memref<8x36x36xf32, #tpu.memory_space<vmem>>, vector<1x34x34xf32>
      %239 = vector.shape_cast %238 : vector<1x34x34xf32> to vector<34x34xf32>
      %240 = vector.broadcast %237 : f32 to vector<34x34xf32>
      %241 = arith.mulf %240, %239 : vector<34x34xf32>
      %242 = arith.addf %229, %241 : vector<34x34xf32>
      %c8_i32_171 = arith.constant 8 : i32
      %243 = arith.muli %7, %c8_i32_171 : i32
      %c2_i32_172 = arith.constant 2 : i32
      %244 = arith.addi %243, %c2_i32_172 : i32
      %c3_i32_173 = arith.constant 3 : i32
      %245 = arith.muli %244, %c3_i32_173 : i32
      %c0_i32_174 = arith.constant 0 : i32
      %246 = arith.addi %245, %c0_i32_174 : i32
      %c3_i32_175 = arith.constant 3 : i32
      %247 = arith.muli %246, %c3_i32_175 : i32
      %c0_i32_176 = arith.constant 0 : i32
      %248 = arith.addi %247, %c0_i32_176 : i32
      %249 = arith.index_cast %248 : i32 to index
      %250 = memref.load %arg3[%249] : memref<1152xf32, #tpu.memory_space<smem>>
      %c2_177 = arith.constant 2 : index
      %c0_178 = arith.constant 0 : index
      %c0_179 = arith.constant 0 : index
      %251 = vector.load %arg11[%c2_177, %c0_178, %c0_179] : memref<8x36x36xf32, #tpu.memory_space<vmem>>, vector<1x34x34xf32>
      %252 = vector.shape_cast %251 : vector<1x34x34xf32> to vector<34x34xf32>
      %253 = vector.broadcast %250 : f32 to vector<34x34xf32>
      %254 = arith.mulf %253, %252 : vector<34x34xf32>
      %255 = arith.addf %242, %254 : vector<34x34xf32>
      %c8_i32_180 = arith.constant 8 : i32
      %256 = arith.muli %7, %c8_i32_180 : i32
      %c2_i32_181 = arith.constant 2 : i32
      %257 = arith.addi %256, %c2_i32_181 : i32
      %c3_i32_182 = arith.constant 3 : i32
      %258 = arith.muli %257, %c3_i32_182 : i32
      %c0_i32_183 = arith.constant 0 : i32
      %259 = arith.addi %258, %c0_i32_183 : i32
      %c3_i32_184 = arith.constant 3 : i32
      %260 = arith.muli %259, %c3_i32_184 : i32
      %c1_i32_185 = arith.constant 1 : i32
      %261 = arith.addi %260, %c1_i32_185 : i32
      %262 = arith.index_cast %261 : i32 to index
      %263 = memref.load %arg3[%262] : memref<1152xf32, #tpu.memory_space<smem>>
      %c2_186 = arith.constant 2 : index
      %c0_187 = arith.constant 0 : index
      %c1_188 = arith.constant 1 : index
      %264 = vector.load %arg11[%c2_186, %c0_187, %c1_188] : memref<8x36x36xf32, #tpu.memory_space<vmem>>, vector<1x34x34xf32>
      %265 = vector.shape_cast %264 : vector<1x34x34xf32> to vector<34x34xf32>
      %266 = vector.broadcast %263 : f32 to vector<34x34xf32>
      %267 = arith.mulf %266, %265 : vector<34x34xf32>
      %268 = arith.addf %255, %267 : vector<34x34xf32>
      %c8_i32_189 = arith.constant 8 : i32
      %269 = arith.muli %7, %c8_i32_189 : i32
      %c2_i32_190 = arith.constant 2 : i32
      %270 = arith.addi %269, %c2_i32_190 : i32
      %c3_i32_191 = arith.constant 3 : i32
      %271 = arith.muli %270, %c3_i32_191 : i32
      %c0_i32_192 = arith.constant 0 : i32
      %272 = arith.addi %271, %c0_i32_192 : i32
      %c3_i32_193 = arith.constant 3 : i32
      %273 = arith.muli %272, %c3_i32_193 : i32
      %c2_i32_194 = arith.constant 2 : i32
      %274 = arith.addi %273, %c2_i32_194 : i32
      %275 = arith.index_cast %274 : i32 to index
      %276 = memref.load %arg3[%275] : memref<1152xf32, #tpu.memory_space<smem>>
      %c2_195 = arith.constant 2 : index
      %c0_196 = arith.constant 0 : index
      %c2_197 = arith.constant 2 : index
      %277 = vector.load %arg11[%c2_195, %c0_196, %c2_197] : memref<8x36x36xf32, #tpu.memory_space<vmem>>, vector<1x34x34xf32>
      %278 = vector.shape_cast %277 : vector<1x34x34xf32> to vector<34x34xf32>
      %279 = vector.broadcast %276 : f32 to vector<34x34xf32>
      %280 = arith.mulf %279, %278 : vector<34x34xf32>
      %281 = arith.addf %268, %280 : vector<34x34xf32>
      %c8_i32_198 = arith.constant 8 : i32
      %282 = arith.muli %7, %c8_i32_198 : i32
      %c2_i32_199 = arith.constant 2 : i32
      %283 = arith.addi %282, %c2_i32_199 : i32
      %c3_i32_200 = arith.constant 3 : i32
      %284 = arith.muli %283, %c3_i32_200 : i32
      %c1_i32_201 = arith.constant 1 : i32
      %285 = arith.addi %284, %c1_i32_201 : i32
      %c3_i32_202 = arith.constant 3 : i32
      %286 = arith.muli %285, %c3_i32_202 : i32
      %c0_i32_203 = arith.constant 0 : i32
      %287 = arith.addi %286, %c0_i32_203 : i32
      %288 = arith.index_cast %287 : i32 to index
      %289 = memref.load %arg3[%288] : memref<1152xf32, #tpu.memory_space<smem>>
      %c2_204 = arith.constant 2 : index
      %c1_205 = arith.constant 1 : index
      %c0_206 = arith.constant 0 : index
      %290 = vector.load %arg11[%c2_204, %c1_205, %c0_206] : memref<8x36x36xf32, #tpu.memory_space<vmem>>, vector<1x34x34xf32>
      %291 = vector.shape_cast %290 : vector<1x34x34xf32> to vector<34x34xf32>
      %292 = vector.broadcast %289 : f32 to vector<34x34xf32>
      %293 = arith.mulf %292, %291 : vector<34x34xf32>
      %294 = arith.addf %281, %293 : vector<34x34xf32>
      %c8_i32_207 = arith.constant 8 : i32
      %295 = arith.muli %7, %c8_i32_207 : i32
      %c2_i32_208 = arith.constant 2 : i32
      %296 = arith.addi %295, %c2_i32_208 : i32
      %c3_i32_209 = arith.constant 3 : i32
      %297 = arith.muli %296, %c3_i32_209 : i32
      %c1_i32_210 = arith.constant 1 : i32
      %298 = arith.addi %297, %c1_i32_210 : i32
      %c3_i32_211 = arith.constant 3 : i32
      %299 = arith.muli %298, %c3_i32_211 : i32
      %c1_i32_212 = arith.constant 1 : i32
      %300 = arith.addi %299, %c1_i32_212 : i32
      %301 = arith.index_cast %300 : i32 to index
      %302 = memref.load %arg3[%301] : memref<1152xf32, #tpu.memory_space<smem>>
      %c2_213 = arith.constant 2 : index
      %c1_214 = arith.constant 1 : index
      %c1_215 = arith.constant 1 : index
      %303 = vector.load %arg11[%c2_213, %c1_214, %c1_215] : memref<8x36x36xf32, #tpu.memory_space<vmem>>, vector<1x34x34xf32>
      %304 = vector.shape_cast %303 : vector<1x34x34xf32> to vector<34x34xf32>
      %305 = vector.broadcast %302 : f32 to vector<34x34xf32>
      %306 = arith.mulf %305, %304 : vector<34x34xf32>
      %307 = arith.addf %294, %306 : vector<34x34xf32>
      %c8_i32_216 = arith.constant 8 : i32
      %308 = arith.muli %7, %c8_i32_216 : i32
      %c2_i32_217 = arith.constant 2 : i32
      %309 = arith.addi %308, %c2_i32_217 : i32
      %c3_i32_218 = arith.constant 3 : i32
      %310 = arith.muli %309, %c3_i32_218 : i32
      %c1_i32_219 = arith.constant 1 : i32
      %311 = arith.addi %310, %c1_i32_219 : i32
      %c3_i32_220 = arith.constant 3 : i32
      %312 = arith.muli %311, %c3_i32_220 : i32
      %c2_i32_221 = arith.constant 2 : i32
      %313 = arith.addi %312, %c2_i32_221 : i32
      %314 = arith.index_cast %313 : i32 to index
      %315 = memref.load %arg3[%314] : memref<1152xf32, #tpu.memory_space<smem>>
      %c2_222 = arith.constant 2 : index
      %c1_223 = arith.constant 1 : index
      %c2_224 = arith.constant 2 : index
      %316 = vector.load %arg11[%c2_222, %c1_223, %c2_224] : memref<8x36x36xf32, #tpu.memory_space<vmem>>, vector<1x34x34xf32>
      %317 = vector.shape_cast %316 : vector<1x34x34xf32> to vector<34x34xf32>
      %318 = vector.broadcast %315 : f32 to vector<34x34xf32>
      %319 = arith.mulf %318, %317 : vector<34x34xf32>
      %320 = arith.addf %307, %319 : vector<34x34xf32>
      %c8_i32_225 = arith.constant 8 : i32
      %321 = arith.muli %7, %c8_i32_225 : i32
      %c2_i32_226 = arith.constant 2 : i32
      %322 = arith.addi %321, %c2_i32_226 : i32
      %c3_i32_227 = arith.constant 3 : i32
      %323 = arith.muli %322, %c3_i32_227 : i32
      %c2_i32_228 = arith.constant 2 : i32
      %324 = arith.addi %323, %c2_i32_228 : i32
      %c3_i32_229 = arith.constant 3 : i32
      %325 = arith.muli %324, %c3_i32_229 : i32
      %c0_i32_230 = arith.constant 0 : i32
      %326 = arith.addi %325, %c0_i32_230 : i32
      %327 = arith.index_cast %326 : i32 to index
      %328 = memref.load %arg3[%327] : memref<1152xf32, #tpu.memory_space<smem>>
      %c2_231 = arith.constant 2 : index
      %c2_232 = arith.constant 2 : index
      %c0_233 = arith.constant 0 : index
      %329 = vector.load %arg11[%c2_231, %c2_232, %c0_233] : memref<8x36x36xf32, #tpu.memory_space<vmem>>, vector<1x34x34xf32>
      %330 = vector.shape_cast %329 : vector<1x34x34xf32> to vector<34x34xf32>
      %331 = vector.broadcast %328 : f32 to vector<34x34xf32>
      %332 = arith.mulf %331, %330 : vector<34x34xf32>
      %333 = arith.addf %320, %332 : vector<34x34xf32>
      %c8_i32_234 = arith.constant 8 : i32
      %334 = arith.muli %7, %c8_i32_234 : i32
      %c2_i32_235 = arith.constant 2 : i32
      %335 = arith.addi %334, %c2_i32_235 : i32
      %c3_i32_236 = arith.constant 3 : i32
      %336 = arith.muli %335, %c3_i32_236 : i32
      %c2_i32_237 = arith.constant 2 : i32
      %337 = arith.addi %336, %c2_i32_237 : i32
      %c3_i32_238 = arith.constant 3 : i32
      %338 = arith.muli %337, %c3_i32_238 : i32
      %c1_i32_239 = arith.constant 1 : i32
      %339 = arith.addi %338, %c1_i32_239 : i32
      %340 = arith.index_cast %339 : i32 to index
      %341 = memref.load %arg3[%340] : memref<1152xf32, #tpu.memory_space<smem>>
      %c2_240 = arith.constant 2 : index
      %c2_241 = arith.constant 2 : index
      %c1_242 = arith.constant 1 : index
      %342 = vector.load %arg11[%c2_240, %c2_241, %c1_242] : memref<8x36x36xf32, #tpu.memory_space<vmem>>, vector<1x34x34xf32>
      %343 = vector.shape_cast %342 : vector<1x34x34xf32> to vector<34x34xf32>
      %344 = vector.broadcast %341 : f32 to vector<34x34xf32>
      %345 = arith.mulf %344, %343 : vector<34x34xf32>
      %346 = arith.addf %333, %345 : vector<34x34xf32>
      %c8_i32_243 = arith.constant 8 : i32
      %347 = arith.muli %7, %c8_i32_243 : i32
      %c2_i32_244 = arith.constant 2 : i32
      %348 = arith.addi %347, %c2_i32_244 : i32
      %c3_i32_245 = arith.constant 3 : i32
      %349 = arith.muli %348, %c3_i32_245 : i32
      %c2_i32_246 = arith.constant 2 : i32
      %350 = arith.addi %349, %c2_i32_246 : i32
      %c3_i32_247 = arith.constant 3 : i32
      %351 = arith.muli %350, %c3_i32_247 : i32
      %c2_i32_248 = arith.constant 2 : i32
      %352 = arith.addi %351, %c2_i32_248 : i32
      %353 = arith.index_cast %352 : i32 to index
      %354 = memref.load %arg3[%353] : memref<1152xf32, #tpu.memory_space<smem>>
      %c2_249 = arith.constant 2 : index
      %c2_250 = arith.constant 2 : index
      %c2_251 = arith.constant 2 : index
      %355 = vector.load %arg11[%c2_249, %c2_250, %c2_251] : memref<8x36x36xf32, #tpu.memory_space<vmem>>, vector<1x34x34xf32>
      %356 = vector.shape_cast %355 : vector<1x34x34xf32> to vector<34x34xf32>
      %357 = vector.broadcast %354 : f32 to vector<34x34xf32>
      %358 = arith.mulf %357, %356 : vector<34x34xf32>
      %359 = arith.addf %346, %358 : vector<34x34xf32>
      %c8_i32_252 = arith.constant 8 : i32
      %360 = arith.muli %7, %c8_i32_252 : i32
      %c3_i32_253 = arith.constant 3 : i32
      %361 = arith.addi %360, %c3_i32_253 : i32
      %c3_i32_254 = arith.constant 3 : i32
      %362 = arith.muli %361, %c3_i32_254 : i32
      %c0_i32_255 = arith.constant 0 : i32
      %363 = arith.addi %362, %c0_i32_255 : i32
      %c3_i32_256 = arith.constant 3 : i32
      %364 = arith.muli %363, %c3_i32_256 : i32
      %c0_i32_257 = arith.constant 0 : i32
      %365 = arith.addi %364, %c0_i32_257 : i32
      %366 = arith.index_cast %365 : i32 to index
      %367 = memref.load %arg3[%366] : memref<1152xf32, #tpu.memory_space<smem>>
      %c3 = arith.constant 3 : index
      %c0_258 = arith.constant 0 : index
      %c0_259 = arith.constant 0 : index
      %368 = vector.load %arg11[%c3, %c0_258, %c0_259] : memref<8x36x36xf32, #tpu.memory_space<vmem>>, vector<1x34x34xf32>
      %369 = vector.shape_cast %368 : vector<1x34x34xf32> to vector<34x34xf32>
      %370 = vector.broadcast %367 : f32 to vector<34x34xf32>
      %371 = arith.mulf %370, %369 : vector<34x34xf32>
      %372 = arith.addf %359, %371 : vector<34x34xf32>
      %c8_i32_260 = arith.constant 8 : i32
      %373 = arith.muli %7, %c8_i32_260 : i32
      %c3_i32_261 = arith.constant 3 : i32
      %374 = arith.addi %373, %c3_i32_261 : i32
      %c3_i32_262 = arith.constant 3 : i32
      %375 = arith.muli %374, %c3_i32_262 : i32
      %c0_i32_263 = arith.constant 0 : i32
      %376 = arith.addi %375, %c0_i32_263 : i32
      %c3_i32_264 = arith.constant 3 : i32
      %377 = arith.muli %376, %c3_i32_264 : i32
      %c1_i32_265 = arith.constant 1 : i32
      %378 = arith.addi %377, %c1_i32_265 : i32
      %379 = arith.index_cast %378 : i32 to index
      %380 = memref.load %arg3[%379] : memref<1152xf32, #tpu.memory_space<smem>>
      %c3_266 = arith.constant 3 : index
      %c0_267 = arith.constant 0 : index
      %c1_268 = arith.constant 1 : index
      %381 = vector.load %arg11[%c3_266, %c0_267, %c1_268] : memref<8x36x36xf32, #tpu.memory_space<vmem>>, vector<1x34x34xf32>
      %382 = vector.shape_cast %381 : vector<1x34x34xf32> to vector<34x34xf32>
      %383 = vector.broadcast %380 : f32 to vector<34x34xf32>
      %384 = arith.mulf %383, %382 : vector<34x34xf32>
      %385 = arith.addf %372, %384 : vector<34x34xf32>
      %c8_i32_269 = arith.constant 8 : i32
      %386 = arith.muli %7, %c8_i32_269 : i32
      %c3_i32_270 = arith.constant 3 : i32
      %387 = arith.addi %386, %c3_i32_270 : i32
      %c3_i32_271 = arith.constant 3 : i32
      %388 = arith.muli %387, %c3_i32_271 : i32
      %c0_i32_272 = arith.constant 0 : i32
      %389 = arith.addi %388, %c0_i32_272 : i32
      %c3_i32_273 = arith.constant 3 : i32
      %390 = arith.muli %389, %c3_i32_273 : i32
      %c2_i32_274 = arith.constant 2 : i32
      %391 = arith.addi %390, %c2_i32_274 : i32
      %392 = arith.index_cast %391 : i32 to index
      %393 = memref.load %arg3[%392] : memref<1152xf32, #tpu.memory_space<smem>>
      %c3_275 = arith.constant 3 : index
      %c0_276 = arith.constant 0 : index
      %c2_277 = arith.constant 2 : index
      %394 = vector.load %arg11[%c3_275, %c0_276, %c2_277] : memref<8x36x36xf32, #tpu.memory_space<vmem>>, vector<1x34x34xf32>
      %395 = vector.shape_cast %394 : vector<1x34x34xf32> to vector<34x34xf32>
      %396 = vector.broadcast %393 : f32 to vector<34x34xf32>
      %397 = arith.mulf %396, %395 : vector<34x34xf32>
      %398 = arith.addf %385, %397 : vector<34x34xf32>
      %c8_i32_278 = arith.constant 8 : i32
      %399 = arith.muli %7, %c8_i32_278 : i32
      %c3_i32_279 = arith.constant 3 : i32
      %400 = arith.addi %399, %c3_i32_279 : i32
      %c3_i32_280 = arith.constant 3 : i32
      %401 = arith.muli %400, %c3_i32_280 : i32
      %c1_i32_281 = arith.constant 1 : i32
      %402 = arith.addi %401, %c1_i32_281 : i32
      %c3_i32_282 = arith.constant 3 : i32
      %403 = arith.muli %402, %c3_i32_282 : i32
      %c0_i32_283 = arith.constant 0 : i32
      %404 = arith.addi %403, %c0_i32_283 : i32
      %405 = arith.index_cast %404 : i32 to index
      %406 = memref.load %arg3[%405] : memref<1152xf32, #tpu.memory_space<smem>>
      %c3_284 = arith.constant 3 : index
      %c1_285 = arith.constant 1 : index
      %c0_286 = arith.constant 0 : index
      %407 = vector.load %arg11[%c3_284, %c1_285, %c0_286] : memref<8x36x36xf32, #tpu.memory_space<vmem>>, vector<1x34x34xf32>
      %408 = vector.shape_cast %407 : vector<1x34x34xf32> to vector<34x34xf32>
      %409 = vector.broadcast %406 : f32 to vector<34x34xf32>
      %410 = arith.mulf %409, %408 : vector<34x34xf32>
      %411 = arith.addf %398, %410 : vector<34x34xf32>
      %c8_i32_287 = arith.constant 8 : i32
      %412 = arith.muli %7, %c8_i32_287 : i32
      %c3_i32_288 = arith.constant 3 : i32
      %413 = arith.addi %412, %c3_i32_288 : i32
      %c3_i32_289 = arith.constant 3 : i32
      %414 = arith.muli %413, %c3_i32_289 : i32
      %c1_i32_290 = arith.constant 1 : i32
      %415 = arith.addi %414, %c1_i32_290 : i32
      %c3_i32_291 = arith.constant 3 : i32
      %416 = arith.muli %415, %c3_i32_291 : i32
      %c1_i32_292 = arith.constant 1 : i32
      %417 = arith.addi %416, %c1_i32_292 : i32
      %418 = arith.index_cast %417 : i32 to index
      %419 = memref.load %arg3[%418] : memref<1152xf32, #tpu.memory_space<smem>>
      %c3_293 = arith.constant 3 : index
      %c1_294 = arith.constant 1 : index
      %c1_295 = arith.constant 1 : index
      %420 = vector.load %arg11[%c3_293, %c1_294, %c1_295] : memref<8x36x36xf32, #tpu.memory_space<vmem>>, vector<1x34x34xf32>
      %421 = vector.shape_cast %420 : vector<1x34x34xf32> to vector<34x34xf32>
      %422 = vector.broadcast %419 : f32 to vector<34x34xf32>
      %423 = arith.mulf %422, %421 : vector<34x34xf32>
      %424 = arith.addf %411, %423 : vector<34x34xf32>
      %c8_i32_296 = arith.constant 8 : i32
      %425 = arith.muli %7, %c8_i32_296 : i32
      %c3_i32_297 = arith.constant 3 : i32
      %426 = arith.addi %425, %c3_i32_297 : i32
      %c3_i32_298 = arith.constant 3 : i32
      %427 = arith.muli %426, %c3_i32_298 : i32
      %c1_i32_299 = arith.constant 1 : i32
      %428 = arith.addi %427, %c1_i32_299 : i32
      %c3_i32_300 = arith.constant 3 : i32
      %429 = arith.muli %428, %c3_i32_300 : i32
      %c2_i32_301 = arith.constant 2 : i32
      %430 = arith.addi %429, %c2_i32_301 : i32
      %431 = arith.index_cast %430 : i32 to index
      %432 = memref.load %arg3[%431] : memref<1152xf32, #tpu.memory_space<smem>>
      %c3_302 = arith.constant 3 : index
      %c1_303 = arith.constant 1 : index
      %c2_304 = arith.constant 2 : index
      %433 = vector.load %arg11[%c3_302, %c1_303, %c2_304] : memref<8x36x36xf32, #tpu.memory_space<vmem>>, vector<1x34x34xf32>
      %434 = vector.shape_cast %433 : vector<1x34x34xf32> to vector<34x34xf32>
      %435 = vector.broadcast %432 : f32 to vector<34x34xf32>
      %436 = arith.mulf %435, %434 : vector<34x34xf32>
      %437 = arith.addf %424, %436 : vector<34x34xf32>
      %c8_i32_305 = arith.constant 8 : i32
      %438 = arith.muli %7, %c8_i32_305 : i32
      %c3_i32_306 = arith.constant 3 : i32
      %439 = arith.addi %438, %c3_i32_306 : i32
      %c3_i32_307 = arith.constant 3 : i32
      %440 = arith.muli %439, %c3_i32_307 : i32
      %c2_i32_308 = arith.constant 2 : i32
      %441 = arith.addi %440, %c2_i32_308 : i32
      %c3_i32_309 = arith.constant 3 : i32
      %442 = arith.muli %441, %c3_i32_309 : i32
      %c0_i32_310 = arith.constant 0 : i32
      %443 = arith.addi %442, %c0_i32_310 : i32
      %444 = arith.index_cast %443 : i32 to index
      %445 = memref.load %arg3[%444] : memref<1152xf32, #tpu.memory_space<smem>>
      %c3_311 = arith.constant 3 : index
      %c2_312 = arith.constant 2 : index
      %c0_313 = arith.constant 0 : index
      %446 = vector.load %arg11[%c3_311, %c2_312, %c0_313] : memref<8x36x36xf32, #tpu.memory_space<vmem>>, vector<1x34x34xf32>
      %447 = vector.shape_cast %446 : vector<1x34x34xf32> to vector<34x34xf32>
      %448 = vector.broadcast %445 : f32 to vector<34x34xf32>
      %449 = arith.mulf %448, %447 : vector<34x34xf32>
      %450 = arith.addf %437, %449 : vector<34x34xf32>
      %c8_i32_314 = arith.constant 8 : i32
      %451 = arith.muli %7, %c8_i32_314 : i32
      %c3_i32_315 = arith.constant 3 : i32
      %452 = arith.addi %451, %c3_i32_315 : i32
      %c3_i32_316 = arith.constant 3 : i32
      %453 = arith.muli %452, %c3_i32_316 : i32
      %c2_i32_317 = arith.constant 2 : i32
      %454 = arith.addi %453, %c2_i32_317 : i32
      %c3_i32_318 = arith.constant 3 : i32
      %455 = arith.muli %454, %c3_i32_318 : i32
      %c1_i32_319 = arith.constant 1 : i32
      %456 = arith.addi %455, %c1_i32_319 : i32
      %457 = arith.index_cast %456 : i32 to index
      %458 = memref.load %arg3[%457] : memref<1152xf32, #tpu.memory_space<smem>>
      %c3_320 = arith.constant 3 : index
      %c2_321 = arith.constant 2 : index
      %c1_322 = arith.constant 1 : index
      %459 = vector.load %arg11[%c3_320, %c2_321, %c1_322] : memref<8x36x36xf32, #tpu.memory_space<vmem>>, vector<1x34x34xf32>
      %460 = vector.shape_cast %459 : vector<1x34x34xf32> to vector<34x34xf32>
      %461 = vector.broadcast %458 : f32 to vector<34x34xf32>
      %462 = arith.mulf %461, %460 : vector<34x34xf32>
      %463 = arith.addf %450, %462 : vector<34x34xf32>
      %c8_i32_323 = arith.constant 8 : i32
      %464 = arith.muli %7, %c8_i32_323 : i32
      %c3_i32_324 = arith.constant 3 : i32
      %465 = arith.addi %464, %c3_i32_324 : i32
      %c3_i32_325 = arith.constant 3 : i32
      %466 = arith.muli %465, %c3_i32_325 : i32
      %c2_i32_326 = arith.constant 2 : i32
      %467 = arith.addi %466, %c2_i32_326 : i32
      %c3_i32_327 = arith.constant 3 : i32
      %468 = arith.muli %467, %c3_i32_327 : i32
      %c2_i32_328 = arith.constant 2 : i32
      %469 = arith.addi %468, %c2_i32_328 : i32
      %470 = arith.index_cast %469 : i32 to index
      %471 = memref.load %arg3[%470] : memref<1152xf32, #tpu.memory_space<smem>>
      %c3_329 = arith.constant 3 : index
      %c2_330 = arith.constant 2 : index
      %c2_331 = arith.constant 2 : index
      %472 = vector.load %arg11[%c3_329, %c2_330, %c2_331] : memref<8x36x36xf32, #tpu.memory_space<vmem>>, vector<1x34x34xf32>
      %473 = vector.shape_cast %472 : vector<1x34x34xf32> to vector<34x34xf32>
      %474 = vector.broadcast %471 : f32 to vector<34x34xf32>
      %475 = arith.mulf %474, %473 : vector<34x34xf32>
      %476 = arith.addf %463, %475 : vector<34x34xf32>
      %c8_i32_332 = arith.constant 8 : i32
      %477 = arith.muli %7, %c8_i32_332 : i32
      %c4_i32 = arith.constant 4 : i32
      %478 = arith.addi %477, %c4_i32 : i32
      %c3_i32_333 = arith.constant 3 : i32
      %479 = arith.muli %478, %c3_i32_333 : i32
      %c0_i32_334 = arith.constant 0 : i32
      %480 = arith.addi %479, %c0_i32_334 : i32
      %c3_i32_335 = arith.constant 3 : i32
      %481 = arith.muli %480, %c3_i32_335 : i32
      %c0_i32_336 = arith.constant 0 : i32
      %482 = arith.addi %481, %c0_i32_336 : i32
      %483 = arith.index_cast %482 : i32 to index
      %484 = memref.load %arg3[%483] : memref<1152xf32, #tpu.memory_space<smem>>
      %c4 = arith.constant 4 : index
      %c0_337 = arith.constant 0 : index
      %c0_338 = arith.constant 0 : index
      %485 = vector.load %arg11[%c4, %c0_337, %c0_338] : memref<8x36x36xf32, #tpu.memory_space<vmem>>, vector<1x34x34xf32>
      %486 = vector.shape_cast %485 : vector<1x34x34xf32> to vector<34x34xf32>
      %487 = vector.broadcast %484 : f32 to vector<34x34xf32>
      %488 = arith.mulf %487, %486 : vector<34x34xf32>
      %489 = arith.addf %476, %488 : vector<34x34xf32>
      %c8_i32_339 = arith.constant 8 : i32
      %490 = arith.muli %7, %c8_i32_339 : i32
      %c4_i32_340 = arith.constant 4 : i32
      %491 = arith.addi %490, %c4_i32_340 : i32
      %c3_i32_341 = arith.constant 3 : i32
      %492 = arith.muli %491, %c3_i32_341 : i32
      %c0_i32_342 = arith.constant 0 : i32
      %493 = arith.addi %492, %c0_i32_342 : i32
      %c3_i32_343 = arith.constant 3 : i32
      %494 = arith.muli %493, %c3_i32_343 : i32
      %c1_i32_344 = arith.constant 1 : i32
      %495 = arith.addi %494, %c1_i32_344 : i32
      %496 = arith.index_cast %495 : i32 to index
      %497 = memref.load %arg3[%496] : memref<1152xf32, #tpu.memory_space<smem>>
      %c4_345 = arith.constant 4 : index
      %c0_346 = arith.constant 0 : index
      %c1_347 = arith.constant 1 : index
      %498 = vector.load %arg11[%c4_345, %c0_346, %c1_347] : memref<8x36x36xf32, #tpu.memory_space<vmem>>, vector<1x34x34xf32>
      %499 = vector.shape_cast %498 : vector<1x34x34xf32> to vector<34x34xf32>
      %500 = vector.broadcast %497 : f32 to vector<34x34xf32>
      %501 = arith.mulf %500, %499 : vector<34x34xf32>
      %502 = arith.addf %489, %501 : vector<34x34xf32>
      %c8_i32_348 = arith.constant 8 : i32
      %503 = arith.muli %7, %c8_i32_348 : i32
      %c4_i32_349 = arith.constant 4 : i32
      %504 = arith.addi %503, %c4_i32_349 : i32
      %c3_i32_350 = arith.constant 3 : i32
      %505 = arith.muli %504, %c3_i32_350 : i32
      %c0_i32_351 = arith.constant 0 : i32
      %506 = arith.addi %505, %c0_i32_351 : i32
      %c3_i32_352 = arith.constant 3 : i32
      %507 = arith.muli %506, %c3_i32_352 : i32
      %c2_i32_353 = arith.constant 2 : i32
      %508 = arith.addi %507, %c2_i32_353 : i32
      %509 = arith.index_cast %508 : i32 to index
      %510 = memref.load %arg3[%509] : memref<1152xf32, #tpu.memory_space<smem>>
      %c4_354 = arith.constant 4 : index
      %c0_355 = arith.constant 0 : index
      %c2_356 = arith.constant 2 : index
      %511 = vector.load %arg11[%c4_354, %c0_355, %c2_356] : memref<8x36x36xf32, #tpu.memory_space<vmem>>, vector<1x34x34xf32>
      %512 = vector.shape_cast %511 : vector<1x34x34xf32> to vector<34x34xf32>
      %513 = vector.broadcast %510 : f32 to vector<34x34xf32>
      %514 = arith.mulf %513, %512 : vector<34x34xf32>
      %515 = arith.addf %502, %514 : vector<34x34xf32>
      %c8_i32_357 = arith.constant 8 : i32
      %516 = arith.muli %7, %c8_i32_357 : i32
      %c4_i32_358 = arith.constant 4 : i32
      %517 = arith.addi %516, %c4_i32_358 : i32
      %c3_i32_359 = arith.constant 3 : i32
      %518 = arith.muli %517, %c3_i32_359 : i32
      %c1_i32_360 = arith.constant 1 : i32
      %519 = arith.addi %518, %c1_i32_360 : i32
      %c3_i32_361 = arith.constant 3 : i32
      %520 = arith.muli %519, %c3_i32_361 : i32
      %c0_i32_362 = arith.constant 0 : i32
      %521 = arith.addi %520, %c0_i32_362 : i32
      %522 = arith.index_cast %521 : i32 to index
      %523 = memref.load %arg3[%522] : memref<1152xf32, #tpu.memory_space<smem>>
      %c4_363 = arith.constant 4 : index
      %c1_364 = arith.constant 1 : index
      %c0_365 = arith.constant 0 : index
      %524 = vector.load %arg11[%c4_363, %c1_364, %c0_365] : memref<8x36x36xf32, #tpu.memory_space<vmem>>, vector<1x34x34xf32>
      %525 = vector.shape_cast %524 : vector<1x34x34xf32> to vector<34x34xf32>
      %526 = vector.broadcast %523 : f32 to vector<34x34xf32>
      %527 = arith.mulf %526, %525 : vector<34x34xf32>
      %528 = arith.addf %515, %527 : vector<34x34xf32>
      %c8_i32_366 = arith.constant 8 : i32
      %529 = arith.muli %7, %c8_i32_366 : i32
      %c4_i32_367 = arith.constant 4 : i32
      %530 = arith.addi %529, %c4_i32_367 : i32
      %c3_i32_368 = arith.constant 3 : i32
      %531 = arith.muli %530, %c3_i32_368 : i32
      %c1_i32_369 = arith.constant 1 : i32
      %532 = arith.addi %531, %c1_i32_369 : i32
      %c3_i32_370 = arith.constant 3 : i32
      %533 = arith.muli %532, %c3_i32_370 : i32
      %c1_i32_371 = arith.constant 1 : i32
      %534 = arith.addi %533, %c1_i32_371 : i32
      %535 = arith.index_cast %534 : i32 to index
      %536 = memref.load %arg3[%535] : memref<1152xf32, #tpu.memory_space<smem>>
      %c4_372 = arith.constant 4 : index
      %c1_373 = arith.constant 1 : index
      %c1_374 = arith.constant 1 : index
      %537 = vector.load %arg11[%c4_372, %c1_373, %c1_374] : memref<8x36x36xf32, #tpu.memory_space<vmem>>, vector<1x34x34xf32>
      %538 = vector.shape_cast %537 : vector<1x34x34xf32> to vector<34x34xf32>
      %539 = vector.broadcast %536 : f32 to vector<34x34xf32>
      %540 = arith.mulf %539, %538 : vector<34x34xf32>
      %541 = arith.addf %528, %540 : vector<34x34xf32>
      %c8_i32_375 = arith.constant 8 : i32
      %542 = arith.muli %7, %c8_i32_375 : i32
      %c4_i32_376 = arith.constant 4 : i32
      %543 = arith.addi %542, %c4_i32_376 : i32
      %c3_i32_377 = arith.constant 3 : i32
      %544 = arith.muli %543, %c3_i32_377 : i32
      %c1_i32_378 = arith.constant 1 : i32
      %545 = arith.addi %544, %c1_i32_378 : i32
      %c3_i32_379 = arith.constant 3 : i32
      %546 = arith.muli %545, %c3_i32_379 : i32
      %c2_i32_380 = arith.constant 2 : i32
      %547 = arith.addi %546, %c2_i32_380 : i32
      %548 = arith.index_cast %547 : i32 to index
      %549 = memref.load %arg3[%548] : memref<1152xf32, #tpu.memory_space<smem>>
      %c4_381 = arith.constant 4 : index
      %c1_382 = arith.constant 1 : index
      %c2_383 = arith.constant 2 : index
      %550 = vector.load %arg11[%c4_381, %c1_382, %c2_383] : memref<8x36x36xf32, #tpu.memory_space<vmem>>, vector<1x34x34xf32>
      %551 = vector.shape_cast %550 : vector<1x34x34xf32> to vector<34x34xf32>
      %552 = vector.broadcast %549 : f32 to vector<34x34xf32>
      %553 = arith.mulf %552, %551 : vector<34x34xf32>
      %554 = arith.addf %541, %553 : vector<34x34xf32>
      %c8_i32_384 = arith.constant 8 : i32
      %555 = arith.muli %7, %c8_i32_384 : i32
      %c4_i32_385 = arith.constant 4 : i32
      %556 = arith.addi %555, %c4_i32_385 : i32
      %c3_i32_386 = arith.constant 3 : i32
      %557 = arith.muli %556, %c3_i32_386 : i32
      %c2_i32_387 = arith.constant 2 : i32
      %558 = arith.addi %557, %c2_i32_387 : i32
      %c3_i32_388 = arith.constant 3 : i32
      %559 = arith.muli %558, %c3_i32_388 : i32
      %c0_i32_389 = arith.constant 0 : i32
      %560 = arith.addi %559, %c0_i32_389 : i32
      %561 = arith.index_cast %560 : i32 to index
      %562 = memref.load %arg3[%561] : memref<1152xf32, #tpu.memory_space<smem>>
      %c4_390 = arith.constant 4 : index
      %c2_391 = arith.constant 2 : index
      %c0_392 = arith.constant 0 : index
      %563 = vector.load %arg11[%c4_390, %c2_391, %c0_392] : memref<8x36x36xf32, #tpu.memory_space<vmem>>, vector<1x34x34xf32>
      %564 = vector.shape_cast %563 : vector<1x34x34xf32> to vector<34x34xf32>
      %565 = vector.broadcast %562 : f32 to vector<34x34xf32>
      %566 = arith.mulf %565, %564 : vector<34x34xf32>
      %567 = arith.addf %554, %566 : vector<34x34xf32>
      %c8_i32_393 = arith.constant 8 : i32
      %568 = arith.muli %7, %c8_i32_393 : i32
      %c4_i32_394 = arith.constant 4 : i32
      %569 = arith.addi %568, %c4_i32_394 : i32
      %c3_i32_395 = arith.constant 3 : i32
      %570 = arith.muli %569, %c3_i32_395 : i32
      %c2_i32_396 = arith.constant 2 : i32
      %571 = arith.addi %570, %c2_i32_396 : i32
      %c3_i32_397 = arith.constant 3 : i32
      %572 = arith.muli %571, %c3_i32_397 : i32
      %c1_i32_398 = arith.constant 1 : i32
      %573 = arith.addi %572, %c1_i32_398 : i32
      %574 = arith.index_cast %573 : i32 to index
      %575 = memref.load %arg3[%574] : memref<1152xf32, #tpu.memory_space<smem>>
      %c4_399 = arith.constant 4 : index
      %c2_400 = arith.constant 2 : index
      %c1_401 = arith.constant 1 : index
      %576 = vector.load %arg11[%c4_399, %c2_400, %c1_401] : memref<8x36x36xf32, #tpu.memory_space<vmem>>, vector<1x34x34xf32>
      %577 = vector.shape_cast %576 : vector<1x34x34xf32> to vector<34x34xf32>
      %578 = vector.broadcast %575 : f32 to vector<34x34xf32>
      %579 = arith.mulf %578, %577 : vector<34x34xf32>
      %580 = arith.addf %567, %579 : vector<34x34xf32>
      %c8_i32_402 = arith.constant 8 : i32
      %581 = arith.muli %7, %c8_i32_402 : i32
      %c4_i32_403 = arith.constant 4 : i32
      %582 = arith.addi %581, %c4_i32_403 : i32
      %c3_i32_404 = arith.constant 3 : i32
      %583 = arith.muli %582, %c3_i32_404 : i32
      %c2_i32_405 = arith.constant 2 : i32
      %584 = arith.addi %583, %c2_i32_405 : i32
      %c3_i32_406 = arith.constant 3 : i32
      %585 = arith.muli %584, %c3_i32_406 : i32
      %c2_i32_407 = arith.constant 2 : i32
      %586 = arith.addi %585, %c2_i32_407 : i32
      %587 = arith.index_cast %586 : i32 to index
      %588 = memref.load %arg3[%587] : memref<1152xf32, #tpu.memory_space<smem>>
      %c4_408 = arith.constant 4 : index
      %c2_409 = arith.constant 2 : index
      %c2_410 = arith.constant 2 : index
      %589 = vector.load %arg11[%c4_408, %c2_409, %c2_410] : memref<8x36x36xf32, #tpu.memory_space<vmem>>, vector<1x34x34xf32>
      %590 = vector.shape_cast %589 : vector<1x34x34xf32> to vector<34x34xf32>
      %591 = vector.broadcast %588 : f32 to vector<34x34xf32>
      %592 = arith.mulf %591, %590 : vector<34x34xf32>
      %593 = arith.addf %580, %592 : vector<34x34xf32>
      %c8_i32_411 = arith.constant 8 : i32
      %594 = arith.muli %7, %c8_i32_411 : i32
      %c5_i32 = arith.constant 5 : i32
      %595 = arith.addi %594, %c5_i32 : i32
      %c3_i32_412 = arith.constant 3 : i32
      %596 = arith.muli %595, %c3_i32_412 : i32
      %c0_i32_413 = arith.constant 0 : i32
      %597 = arith.addi %596, %c0_i32_413 : i32
      %c3_i32_414 = arith.constant 3 : i32
      %598 = arith.muli %597, %c3_i32_414 : i32
      %c0_i32_415 = arith.constant 0 : i32
      %599 = arith.addi %598, %c0_i32_415 : i32
      %600 = arith.index_cast %599 : i32 to index
      %601 = memref.load %arg3[%600] : memref<1152xf32, #tpu.memory_space<smem>>
      %c5 = arith.constant 5 : index
      %c0_416 = arith.constant 0 : index
      %c0_417 = arith.constant 0 : index
      %602 = vector.load %arg11[%c5, %c0_416, %c0_417] : memref<8x36x36xf32, #tpu.memory_space<vmem>>, vector<1x34x34xf32>
      %603 = vector.shape_cast %602 : vector<1x34x34xf32> to vector<34x34xf32>
      %604 = vector.broadcast %601 : f32 to vector<34x34xf32>
      %605 = arith.mulf %604, %603 : vector<34x34xf32>
      %606 = arith.addf %593, %605 : vector<34x34xf32>
      %c8_i32_418 = arith.constant 8 : i32
      %607 = arith.muli %7, %c8_i32_418 : i32
      %c5_i32_419 = arith.constant 5 : i32
      %608 = arith.addi %607, %c5_i32_419 : i32
      %c3_i32_420 = arith.constant 3 : i32
      %609 = arith.muli %608, %c3_i32_420 : i32
      %c0_i32_421 = arith.constant 0 : i32
      %610 = arith.addi %609, %c0_i32_421 : i32
      %c3_i32_422 = arith.constant 3 : i32
      %611 = arith.muli %610, %c3_i32_422 : i32
      %c1_i32_423 = arith.constant 1 : i32
      %612 = arith.addi %611, %c1_i32_423 : i32
      %613 = arith.index_cast %612 : i32 to index
      %614 = memref.load %arg3[%613] : memref<1152xf32, #tpu.memory_space<smem>>
      %c5_424 = arith.constant 5 : index
      %c0_425 = arith.constant 0 : index
      %c1_426 = arith.constant 1 : index
      %615 = vector.load %arg11[%c5_424, %c0_425, %c1_426] : memref<8x36x36xf32, #tpu.memory_space<vmem>>, vector<1x34x34xf32>
      %616 = vector.shape_cast %615 : vector<1x34x34xf32> to vector<34x34xf32>
      %617 = vector.broadcast %614 : f32 to vector<34x34xf32>
      %618 = arith.mulf %617, %616 : vector<34x34xf32>
      %619 = arith.addf %606, %618 : vector<34x34xf32>
      %c8_i32_427 = arith.constant 8 : i32
      %620 = arith.muli %7, %c8_i32_427 : i32
      %c5_i32_428 = arith.constant 5 : i32
      %621 = arith.addi %620, %c5_i32_428 : i32
      %c3_i32_429 = arith.constant 3 : i32
      %622 = arith.muli %621, %c3_i32_429 : i32
      %c0_i32_430 = arith.constant 0 : i32
      %623 = arith.addi %622, %c0_i32_430 : i32
      %c3_i32_431 = arith.constant 3 : i32
      %624 = arith.muli %623, %c3_i32_431 : i32
      %c2_i32_432 = arith.constant 2 : i32
      %625 = arith.addi %624, %c2_i32_432 : i32
      %626 = arith.index_cast %625 : i32 to index
      %627 = memref.load %arg3[%626] : memref<1152xf32, #tpu.memory_space<smem>>
      %c5_433 = arith.constant 5 : index
      %c0_434 = arith.constant 0 : index
      %c2_435 = arith.constant 2 : index
      %628 = vector.load %arg11[%c5_433, %c0_434, %c2_435] : memref<8x36x36xf32, #tpu.memory_space<vmem>>, vector<1x34x34xf32>
      %629 = vector.shape_cast %628 : vector<1x34x34xf32> to vector<34x34xf32>
      %630 = vector.broadcast %627 : f32 to vector<34x34xf32>
      %631 = arith.mulf %630, %629 : vector<34x34xf32>
      %632 = arith.addf %619, %631 : vector<34x34xf32>
      %c8_i32_436 = arith.constant 8 : i32
      %633 = arith.muli %7, %c8_i32_436 : i32
      %c5_i32_437 = arith.constant 5 : i32
      %634 = arith.addi %633, %c5_i32_437 : i32
      %c3_i32_438 = arith.constant 3 : i32
      %635 = arith.muli %634, %c3_i32_438 : i32
      %c1_i32_439 = arith.constant 1 : i32
      %636 = arith.addi %635, %c1_i32_439 : i32
      %c3_i32_440 = arith.constant 3 : i32
      %637 = arith.muli %636, %c3_i32_440 : i32
      %c0_i32_441 = arith.constant 0 : i32
      %638 = arith.addi %637, %c0_i32_441 : i32
      %639 = arith.index_cast %638 : i32 to index
      %640 = memref.load %arg3[%639] : memref<1152xf32, #tpu.memory_space<smem>>
      %c5_442 = arith.constant 5 : index
      %c1_443 = arith.constant 1 : index
      %c0_444 = arith.constant 0 : index
      %641 = vector.load %arg11[%c5_442, %c1_443, %c0_444] : memref<8x36x36xf32, #tpu.memory_space<vmem>>, vector<1x34x34xf32>
      %642 = vector.shape_cast %641 : vector<1x34x34xf32> to vector<34x34xf32>
      %643 = vector.broadcast %640 : f32 to vector<34x34xf32>
      %644 = arith.mulf %643, %642 : vector<34x34xf32>
      %645 = arith.addf %632, %644 : vector<34x34xf32>
      %c8_i32_445 = arith.constant 8 : i32
      %646 = arith.muli %7, %c8_i32_445 : i32
      %c5_i32_446 = arith.constant 5 : i32
      %647 = arith.addi %646, %c5_i32_446 : i32
      %c3_i32_447 = arith.constant 3 : i32
      %648 = arith.muli %647, %c3_i32_447 : i32
      %c1_i32_448 = arith.constant 1 : i32
      %649 = arith.addi %648, %c1_i32_448 : i32
      %c3_i32_449 = arith.constant 3 : i32
      %650 = arith.muli %649, %c3_i32_449 : i32
      %c1_i32_450 = arith.constant 1 : i32
      %651 = arith.addi %650, %c1_i32_450 : i32
      %652 = arith.index_cast %651 : i32 to index
      %653 = memref.load %arg3[%652] : memref<1152xf32, #tpu.memory_space<smem>>
      %c5_451 = arith.constant 5 : index
      %c1_452 = arith.constant 1 : index
      %c1_453 = arith.constant 1 : index
      %654 = vector.load %arg11[%c5_451, %c1_452, %c1_453] : memref<8x36x36xf32, #tpu.memory_space<vmem>>, vector<1x34x34xf32>
      %655 = vector.shape_cast %654 : vector<1x34x34xf32> to vector<34x34xf32>
      %656 = vector.broadcast %653 : f32 to vector<34x34xf32>
      %657 = arith.mulf %656, %655 : vector<34x34xf32>
      %658 = arith.addf %645, %657 : vector<34x34xf32>
      %c8_i32_454 = arith.constant 8 : i32
      %659 = arith.muli %7, %c8_i32_454 : i32
      %c5_i32_455 = arith.constant 5 : i32
      %660 = arith.addi %659, %c5_i32_455 : i32
      %c3_i32_456 = arith.constant 3 : i32
      %661 = arith.muli %660, %c3_i32_456 : i32
      %c1_i32_457 = arith.constant 1 : i32
      %662 = arith.addi %661, %c1_i32_457 : i32
      %c3_i32_458 = arith.constant 3 : i32
      %663 = arith.muli %662, %c3_i32_458 : i32
      %c2_i32_459 = arith.constant 2 : i32
      %664 = arith.addi %663, %c2_i32_459 : i32
      %665 = arith.index_cast %664 : i32 to index
      %666 = memref.load %arg3[%665] : memref<1152xf32, #tpu.memory_space<smem>>
      %c5_460 = arith.constant 5 : index
      %c1_461 = arith.constant 1 : index
      %c2_462 = arith.constant 2 : index
      %667 = vector.load %arg11[%c5_460, %c1_461, %c2_462] : memref<8x36x36xf32, #tpu.memory_space<vmem>>, vector<1x34x34xf32>
      %668 = vector.shape_cast %667 : vector<1x34x34xf32> to vector<34x34xf32>
      %669 = vector.broadcast %666 : f32 to vector<34x34xf32>
      %670 = arith.mulf %669, %668 : vector<34x34xf32>
      %671 = arith.addf %658, %670 : vector<34x34xf32>
      %c8_i32_463 = arith.constant 8 : i32
      %672 = arith.muli %7, %c8_i32_463 : i32
      %c5_i32_464 = arith.constant 5 : i32
      %673 = arith.addi %672, %c5_i32_464 : i32
      %c3_i32_465 = arith.constant 3 : i32
      %674 = arith.muli %673, %c3_i32_465 : i32
      %c2_i32_466 = arith.constant 2 : i32
      %675 = arith.addi %674, %c2_i32_466 : i32
      %c3_i32_467 = arith.constant 3 : i32
      %676 = arith.muli %675, %c3_i32_467 : i32
      %c0_i32_468 = arith.constant 0 : i32
      %677 = arith.addi %676, %c0_i32_468 : i32
      %678 = arith.index_cast %677 : i32 to index
      %679 = memref.load %arg3[%678] : memref<1152xf32, #tpu.memory_space<smem>>
      %c5_469 = arith.constant 5 : index
      %c2_470 = arith.constant 2 : index
      %c0_471 = arith.constant 0 : index
      %680 = vector.load %arg11[%c5_469, %c2_470, %c0_471] : memref<8x36x36xf32, #tpu.memory_space<vmem>>, vector<1x34x34xf32>
      %681 = vector.shape_cast %680 : vector<1x34x34xf32> to vector<34x34xf32>
      %682 = vector.broadcast %679 : f32 to vector<34x34xf32>
      %683 = arith.mulf %682, %681 : vector<34x34xf32>
      %684 = arith.addf %671, %683 : vector<34x34xf32>
      %c8_i32_472 = arith.constant 8 : i32
      %685 = arith.muli %7, %c8_i32_472 : i32
      %c5_i32_473 = arith.constant 5 : i32
      %686 = arith.addi %685, %c5_i32_473 : i32
      %c3_i32_474 = arith.constant 3 : i32
      %687 = arith.muli %686, %c3_i32_474 : i32
      %c2_i32_475 = arith.constant 2 : i32
      %688 = arith.addi %687, %c2_i32_475 : i32
      %c3_i32_476 = arith.constant 3 : i32
      %689 = arith.muli %688, %c3_i32_476 : i32
      %c1_i32_477 = arith.constant 1 : i32
      %690 = arith.addi %689, %c1_i32_477 : i32
      %691 = arith.index_cast %690 : i32 to index
      %692 = memref.load %arg3[%691] : memref<1152xf32, #tpu.memory_space<smem>>
      %c5_478 = arith.constant 5 : index
      %c2_479 = arith.constant 2 : index
      %c1_480 = arith.constant 1 : index
      %693 = vector.load %arg11[%c5_478, %c2_479, %c1_480] : memref<8x36x36xf32, #tpu.memory_space<vmem>>, vector<1x34x34xf32>
      %694 = vector.shape_cast %693 : vector<1x34x34xf32> to vector<34x34xf32>
      %695 = vector.broadcast %692 : f32 to vector<34x34xf32>
      %696 = arith.mulf %695, %694 : vector<34x34xf32>
      %697 = arith.addf %684, %696 : vector<34x34xf32>
      %c8_i32_481 = arith.constant 8 : i32
      %698 = arith.muli %7, %c8_i32_481 : i32
      %c5_i32_482 = arith.constant 5 : i32
      %699 = arith.addi %698, %c5_i32_482 : i32
      %c3_i32_483 = arith.constant 3 : i32
      %700 = arith.muli %699, %c3_i32_483 : i32
      %c2_i32_484 = arith.constant 2 : i32
      %701 = arith.addi %700, %c2_i32_484 : i32
      %c3_i32_485 = arith.constant 3 : i32
      %702 = arith.muli %701, %c3_i32_485 : i32
      %c2_i32_486 = arith.constant 2 : i32
      %703 = arith.addi %702, %c2_i32_486 : i32
      %704 = arith.index_cast %703 : i32 to index
      %705 = memref.load %arg3[%704] : memref<1152xf32, #tpu.memory_space<smem>>
      %c5_487 = arith.constant 5 : index
      %c2_488 = arith.constant 2 : index
      %c2_489 = arith.constant 2 : index
      %706 = vector.load %arg11[%c5_487, %c2_488, %c2_489] : memref<8x36x36xf32, #tpu.memory_space<vmem>>, vector<1x34x34xf32>
      %707 = vector.shape_cast %706 : vector<1x34x34xf32> to vector<34x34xf32>
      %708 = vector.broadcast %705 : f32 to vector<34x34xf32>
      %709 = arith.mulf %708, %707 : vector<34x34xf32>
      %710 = arith.addf %697, %709 : vector<34x34xf32>
      %c8_i32_490 = arith.constant 8 : i32
      %711 = arith.muli %7, %c8_i32_490 : i32
      %c6_i32 = arith.constant 6 : i32
      %712 = arith.addi %711, %c6_i32 : i32
      %c3_i32_491 = arith.constant 3 : i32
      %713 = arith.muli %712, %c3_i32_491 : i32
      %c0_i32_492 = arith.constant 0 : i32
      %714 = arith.addi %713, %c0_i32_492 : i32
      %c3_i32_493 = arith.constant 3 : i32
      %715 = arith.muli %714, %c3_i32_493 : i32
      %c0_i32_494 = arith.constant 0 : i32
      %716 = arith.addi %715, %c0_i32_494 : i32
      %717 = arith.index_cast %716 : i32 to index
      %718 = memref.load %arg3[%717] : memref<1152xf32, #tpu.memory_space<smem>>
      %c6 = arith.constant 6 : index
      %c0_495 = arith.constant 0 : index
      %c0_496 = arith.constant 0 : index
      %719 = vector.load %arg11[%c6, %c0_495, %c0_496] : memref<8x36x36xf32, #tpu.memory_space<vmem>>, vector<1x34x34xf32>
      %720 = vector.shape_cast %719 : vector<1x34x34xf32> to vector<34x34xf32>
      %721 = vector.broadcast %718 : f32 to vector<34x34xf32>
      %722 = arith.mulf %721, %720 : vector<34x34xf32>
      %723 = arith.addf %710, %722 : vector<34x34xf32>
      %c8_i32_497 = arith.constant 8 : i32
      %724 = arith.muli %7, %c8_i32_497 : i32
      %c6_i32_498 = arith.constant 6 : i32
      %725 = arith.addi %724, %c6_i32_498 : i32
      %c3_i32_499 = arith.constant 3 : i32
      %726 = arith.muli %725, %c3_i32_499 : i32
      %c0_i32_500 = arith.constant 0 : i32
      %727 = arith.addi %726, %c0_i32_500 : i32
      %c3_i32_501 = arith.constant 3 : i32
      %728 = arith.muli %727, %c3_i32_501 : i32
      %c1_i32_502 = arith.constant 1 : i32
      %729 = arith.addi %728, %c1_i32_502 : i32
      %730 = arith.index_cast %729 : i32 to index
      %731 = memref.load %arg3[%730] : memref<1152xf32, #tpu.memory_space<smem>>
      %c6_503 = arith.constant 6 : index
      %c0_504 = arith.constant 0 : index
      %c1_505 = arith.constant 1 : index
      %732 = vector.load %arg11[%c6_503, %c0_504, %c1_505] : memref<8x36x36xf32, #tpu.memory_space<vmem>>, vector<1x34x34xf32>
      %733 = vector.shape_cast %732 : vector<1x34x34xf32> to vector<34x34xf32>
      %734 = vector.broadcast %731 : f32 to vector<34x34xf32>
      %735 = arith.mulf %734, %733 : vector<34x34xf32>
      %736 = arith.addf %723, %735 : vector<34x34xf32>
      %c8_i32_506 = arith.constant 8 : i32
      %737 = arith.muli %7, %c8_i32_506 : i32
      %c6_i32_507 = arith.constant 6 : i32
      %738 = arith.addi %737, %c6_i32_507 : i32
      %c3_i32_508 = arith.constant 3 : i32
      %739 = arith.muli %738, %c3_i32_508 : i32
      %c0_i32_509 = arith.constant 0 : i32
      %740 = arith.addi %739, %c0_i32_509 : i32
      %c3_i32_510 = arith.constant 3 : i32
      %741 = arith.muli %740, %c3_i32_510 : i32
      %c2_i32_511 = arith.constant 2 : i32
      %742 = arith.addi %741, %c2_i32_511 : i32
      %743 = arith.index_cast %742 : i32 to index
      %744 = memref.load %arg3[%743] : memref<1152xf32, #tpu.memory_space<smem>>
      %c6_512 = arith.constant 6 : index
      %c0_513 = arith.constant 0 : index
      %c2_514 = arith.constant 2 : index
      %745 = vector.load %arg11[%c6_512, %c0_513, %c2_514] : memref<8x36x36xf32, #tpu.memory_space<vmem>>, vector<1x34x34xf32>
      %746 = vector.shape_cast %745 : vector<1x34x34xf32> to vector<34x34xf32>
      %747 = vector.broadcast %744 : f32 to vector<34x34xf32>
      %748 = arith.mulf %747, %746 : vector<34x34xf32>
      %749 = arith.addf %736, %748 : vector<34x34xf32>
      %c8_i32_515 = arith.constant 8 : i32
      %750 = arith.muli %7, %c8_i32_515 : i32
      %c6_i32_516 = arith.constant 6 : i32
      %751 = arith.addi %750, %c6_i32_516 : i32
      %c3_i32_517 = arith.constant 3 : i32
      %752 = arith.muli %751, %c3_i32_517 : i32
      %c1_i32_518 = arith.constant 1 : i32
      %753 = arith.addi %752, %c1_i32_518 : i32
      %c3_i32_519 = arith.constant 3 : i32
      %754 = arith.muli %753, %c3_i32_519 : i32
      %c0_i32_520 = arith.constant 0 : i32
      %755 = arith.addi %754, %c0_i32_520 : i32
      %756 = arith.index_cast %755 : i32 to index
      %757 = memref.load %arg3[%756] : memref<1152xf32, #tpu.memory_space<smem>>
      %c6_521 = arith.constant 6 : index
      %c1_522 = arith.constant 1 : index
      %c0_523 = arith.constant 0 : index
      %758 = vector.load %arg11[%c6_521, %c1_522, %c0_523] : memref<8x36x36xf32, #tpu.memory_space<vmem>>, vector<1x34x34xf32>
      %759 = vector.shape_cast %758 : vector<1x34x34xf32> to vector<34x34xf32>
      %760 = vector.broadcast %757 : f32 to vector<34x34xf32>
      %761 = arith.mulf %760, %759 : vector<34x34xf32>
      %762 = arith.addf %749, %761 : vector<34x34xf32>
      %c8_i32_524 = arith.constant 8 : i32
      %763 = arith.muli %7, %c8_i32_524 : i32
      %c6_i32_525 = arith.constant 6 : i32
      %764 = arith.addi %763, %c6_i32_525 : i32
      %c3_i32_526 = arith.constant 3 : i32
      %765 = arith.muli %764, %c3_i32_526 : i32
      %c1_i32_527 = arith.constant 1 : i32
      %766 = arith.addi %765, %c1_i32_527 : i32
      %c3_i32_528 = arith.constant 3 : i32
      %767 = arith.muli %766, %c3_i32_528 : i32
      %c1_i32_529 = arith.constant 1 : i32
      %768 = arith.addi %767, %c1_i32_529 : i32
      %769 = arith.index_cast %768 : i32 to index
      %770 = memref.load %arg3[%769] : memref<1152xf32, #tpu.memory_space<smem>>
      %c6_530 = arith.constant 6 : index
      %c1_531 = arith.constant 1 : index
      %c1_532 = arith.constant 1 : index
      %771 = vector.load %arg11[%c6_530, %c1_531, %c1_532] : memref<8x36x36xf32, #tpu.memory_space<vmem>>, vector<1x34x34xf32>
      %772 = vector.shape_cast %771 : vector<1x34x34xf32> to vector<34x34xf32>
      %773 = vector.broadcast %770 : f32 to vector<34x34xf32>
      %774 = arith.mulf %773, %772 : vector<34x34xf32>
      %775 = arith.addf %762, %774 : vector<34x34xf32>
      %c8_i32_533 = arith.constant 8 : i32
      %776 = arith.muli %7, %c8_i32_533 : i32
      %c6_i32_534 = arith.constant 6 : i32
      %777 = arith.addi %776, %c6_i32_534 : i32
      %c3_i32_535 = arith.constant 3 : i32
      %778 = arith.muli %777, %c3_i32_535 : i32
      %c1_i32_536 = arith.constant 1 : i32
      %779 = arith.addi %778, %c1_i32_536 : i32
      %c3_i32_537 = arith.constant 3 : i32
      %780 = arith.muli %779, %c3_i32_537 : i32
      %c2_i32_538 = arith.constant 2 : i32
      %781 = arith.addi %780, %c2_i32_538 : i32
      %782 = arith.index_cast %781 : i32 to index
      %783 = memref.load %arg3[%782] : memref<1152xf32, #tpu.memory_space<smem>>
      %c6_539 = arith.constant 6 : index
      %c1_540 = arith.constant 1 : index
      %c2_541 = arith.constant 2 : index
      %784 = vector.load %arg11[%c6_539, %c1_540, %c2_541] : memref<8x36x36xf32, #tpu.memory_space<vmem>>, vector<1x34x34xf32>
      %785 = vector.shape_cast %784 : vector<1x34x34xf32> to vector<34x34xf32>
      %786 = vector.broadcast %783 : f32 to vector<34x34xf32>
      %787 = arith.mulf %786, %785 : vector<34x34xf32>
      %788 = arith.addf %775, %787 : vector<34x34xf32>
      %c8_i32_542 = arith.constant 8 : i32
      %789 = arith.muli %7, %c8_i32_542 : i32
      %c6_i32_543 = arith.constant 6 : i32
      %790 = arith.addi %789, %c6_i32_543 : i32
      %c3_i32_544 = arith.constant 3 : i32
      %791 = arith.muli %790, %c3_i32_544 : i32
      %c2_i32_545 = arith.constant 2 : i32
      %792 = arith.addi %791, %c2_i32_545 : i32
      %c3_i32_546 = arith.constant 3 : i32
      %793 = arith.muli %792, %c3_i32_546 : i32
      %c0_i32_547 = arith.constant 0 : i32
      %794 = arith.addi %793, %c0_i32_547 : i32
      %795 = arith.index_cast %794 : i32 to index
      %796 = memref.load %arg3[%795] : memref<1152xf32, #tpu.memory_space<smem>>
      %c6_548 = arith.constant 6 : index
      %c2_549 = arith.constant 2 : index
      %c0_550 = arith.constant 0 : index
      %797 = vector.load %arg11[%c6_548, %c2_549, %c0_550] : memref<8x36x36xf32, #tpu.memory_space<vmem>>, vector<1x34x34xf32>
      %798 = vector.shape_cast %797 : vector<1x34x34xf32> to vector<34x34xf32>
      %799 = vector.broadcast %796 : f32 to vector<34x34xf32>
      %800 = arith.mulf %799, %798 : vector<34x34xf32>
      %801 = arith.addf %788, %800 : vector<34x34xf32>
      %c8_i32_551 = arith.constant 8 : i32
      %802 = arith.muli %7, %c8_i32_551 : i32
      %c6_i32_552 = arith.constant 6 : i32
      %803 = arith.addi %802, %c6_i32_552 : i32
      %c3_i32_553 = arith.constant 3 : i32
      %804 = arith.muli %803, %c3_i32_553 : i32
      %c2_i32_554 = arith.constant 2 : i32
      %805 = arith.addi %804, %c2_i32_554 : i32
      %c3_i32_555 = arith.constant 3 : i32
      %806 = arith.muli %805, %c3_i32_555 : i32
      %c1_i32_556 = arith.constant 1 : i32
      %807 = arith.addi %806, %c1_i32_556 : i32
      %808 = arith.index_cast %807 : i32 to index
      %809 = memref.load %arg3[%808] : memref<1152xf32, #tpu.memory_space<smem>>
      %c6_557 = arith.constant 6 : index
      %c2_558 = arith.constant 2 : index
      %c1_559 = arith.constant 1 : index
      %810 = vector.load %arg11[%c6_557, %c2_558, %c1_559] : memref<8x36x36xf32, #tpu.memory_space<vmem>>, vector<1x34x34xf32>
      %811 = vector.shape_cast %810 : vector<1x34x34xf32> to vector<34x34xf32>
      %812 = vector.broadcast %809 : f32 to vector<34x34xf32>
      %813 = arith.mulf %812, %811 : vector<34x34xf32>
      %814 = arith.addf %801, %813 : vector<34x34xf32>
      %c8_i32_560 = arith.constant 8 : i32
      %815 = arith.muli %7, %c8_i32_560 : i32
      %c6_i32_561 = arith.constant 6 : i32
      %816 = arith.addi %815, %c6_i32_561 : i32
      %c3_i32_562 = arith.constant 3 : i32
      %817 = arith.muli %816, %c3_i32_562 : i32
      %c2_i32_563 = arith.constant 2 : i32
      %818 = arith.addi %817, %c2_i32_563 : i32
      %c3_i32_564 = arith.constant 3 : i32
      %819 = arith.muli %818, %c3_i32_564 : i32
      %c2_i32_565 = arith.constant 2 : i32
      %820 = arith.addi %819, %c2_i32_565 : i32
      %821 = arith.index_cast %820 : i32 to index
      %822 = memref.load %arg3[%821] : memref<1152xf32, #tpu.memory_space<smem>>
      %c6_566 = arith.constant 6 : index
      %c2_567 = arith.constant 2 : index
      %c2_568 = arith.constant 2 : index
      %823 = vector.load %arg11[%c6_566, %c2_567, %c2_568] : memref<8x36x36xf32, #tpu.memory_space<vmem>>, vector<1x34x34xf32>
      %824 = vector.shape_cast %823 : vector<1x34x34xf32> to vector<34x34xf32>
      %825 = vector.broadcast %822 : f32 to vector<34x34xf32>
      %826 = arith.mulf %825, %824 : vector<34x34xf32>
      %827 = arith.addf %814, %826 : vector<34x34xf32>
      %c8_i32_569 = arith.constant 8 : i32
      %828 = arith.muli %7, %c8_i32_569 : i32
      %c7_i32 = arith.constant 7 : i32
      %829 = arith.addi %828, %c7_i32 : i32
      %c3_i32_570 = arith.constant 3 : i32
      %830 = arith.muli %829, %c3_i32_570 : i32
      %c0_i32_571 = arith.constant 0 : i32
      %831 = arith.addi %830, %c0_i32_571 : i32
      %c3_i32_572 = arith.constant 3 : i32
      %832 = arith.muli %831, %c3_i32_572 : i32
      %c0_i32_573 = arith.constant 0 : i32
      %833 = arith.addi %832, %c0_i32_573 : i32
      %834 = arith.index_cast %833 : i32 to index
      %835 = memref.load %arg3[%834] : memref<1152xf32, #tpu.memory_space<smem>>
      %c7 = arith.constant 7 : index
      %c0_574 = arith.constant 0 : index
      %c0_575 = arith.constant 0 : index
      %836 = vector.load %arg11[%c7, %c0_574, %c0_575] : memref<8x36x36xf32, #tpu.memory_space<vmem>>, vector<1x34x34xf32>
      %837 = vector.shape_cast %836 : vector<1x34x34xf32> to vector<34x34xf32>
      %838 = vector.broadcast %835 : f32 to vector<34x34xf32>
      %839 = arith.mulf %838, %837 : vector<34x34xf32>
      %840 = arith.addf %827, %839 : vector<34x34xf32>
      %c8_i32_576 = arith.constant 8 : i32
      %841 = arith.muli %7, %c8_i32_576 : i32
      %c7_i32_577 = arith.constant 7 : i32
      %842 = arith.addi %841, %c7_i32_577 : i32
      %c3_i32_578 = arith.constant 3 : i32
      %843 = arith.muli %842, %c3_i32_578 : i32
      %c0_i32_579 = arith.constant 0 : i32
      %844 = arith.addi %843, %c0_i32_579 : i32
      %c3_i32_580 = arith.constant 3 : i32
      %845 = arith.muli %844, %c3_i32_580 : i32
      %c1_i32_581 = arith.constant 1 : i32
      %846 = arith.addi %845, %c1_i32_581 : i32
      %847 = arith.index_cast %846 : i32 to index
      %848 = memref.load %arg3[%847] : memref<1152xf32, #tpu.memory_space<smem>>
      %c7_582 = arith.constant 7 : index
      %c0_583 = arith.constant 0 : index
      %c1_584 = arith.constant 1 : index
      %849 = vector.load %arg11[%c7_582, %c0_583, %c1_584] : memref<8x36x36xf32, #tpu.memory_space<vmem>>, vector<1x34x34xf32>
      %850 = vector.shape_cast %849 : vector<1x34x34xf32> to vector<34x34xf32>
      %851 = vector.broadcast %848 : f32 to vector<34x34xf32>
      %852 = arith.mulf %851, %850 : vector<34x34xf32>
      %853 = arith.addf %840, %852 : vector<34x34xf32>
      %c8_i32_585 = arith.constant 8 : i32
      %854 = arith.muli %7, %c8_i32_585 : i32
      %c7_i32_586 = arith.constant 7 : i32
      %855 = arith.addi %854, %c7_i32_586 : i32
      %c3_i32_587 = arith.constant 3 : i32
      %856 = arith.muli %855, %c3_i32_587 : i32
      %c0_i32_588 = arith.constant 0 : i32
      %857 = arith.addi %856, %c0_i32_588 : i32
      %c3_i32_589 = arith.constant 3 : i32
      %858 = arith.muli %857, %c3_i32_589 : i32
      %c2_i32_590 = arith.constant 2 : i32
      %859 = arith.addi %858, %c2_i32_590 : i32
      %860 = arith.index_cast %859 : i32 to index
      %861 = memref.load %arg3[%860] : memref<1152xf32, #tpu.memory_space<smem>>
      %c7_591 = arith.constant 7 : index
      %c0_592 = arith.constant 0 : index
      %c2_593 = arith.constant 2 : index
      %862 = vector.load %arg11[%c7_591, %c0_592, %c2_593] : memref<8x36x36xf32, #tpu.memory_space<vmem>>, vector<1x34x34xf32>
      %863 = vector.shape_cast %862 : vector<1x34x34xf32> to vector<34x34xf32>
      %864 = vector.broadcast %861 : f32 to vector<34x34xf32>
      %865 = arith.mulf %864, %863 : vector<34x34xf32>
      %866 = arith.addf %853, %865 : vector<34x34xf32>
      %c8_i32_594 = arith.constant 8 : i32
      %867 = arith.muli %7, %c8_i32_594 : i32
      %c7_i32_595 = arith.constant 7 : i32
      %868 = arith.addi %867, %c7_i32_595 : i32
      %c3_i32_596 = arith.constant 3 : i32
      %869 = arith.muli %868, %c3_i32_596 : i32
      %c1_i32_597 = arith.constant 1 : i32
      %870 = arith.addi %869, %c1_i32_597 : i32
      %c3_i32_598 = arith.constant 3 : i32
      %871 = arith.muli %870, %c3_i32_598 : i32
      %c0_i32_599 = arith.constant 0 : i32
      %872 = arith.addi %871, %c0_i32_599 : i32
      %873 = arith.index_cast %872 : i32 to index
      %874 = memref.load %arg3[%873] : memref<1152xf32, #tpu.memory_space<smem>>
      %c7_600 = arith.constant 7 : index
      %c1_601 = arith.constant 1 : index
      %c0_602 = arith.constant 0 : index
      %875 = vector.load %arg11[%c7_600, %c1_601, %c0_602] : memref<8x36x36xf32, #tpu.memory_space<vmem>>, vector<1x34x34xf32>
      %876 = vector.shape_cast %875 : vector<1x34x34xf32> to vector<34x34xf32>
      %877 = vector.broadcast %874 : f32 to vector<34x34xf32>
      %878 = arith.mulf %877, %876 : vector<34x34xf32>
      %879 = arith.addf %866, %878 : vector<34x34xf32>
      %c8_i32_603 = arith.constant 8 : i32
      %880 = arith.muli %7, %c8_i32_603 : i32
      %c7_i32_604 = arith.constant 7 : i32
      %881 = arith.addi %880, %c7_i32_604 : i32
      %c3_i32_605 = arith.constant 3 : i32
      %882 = arith.muli %881, %c3_i32_605 : i32
      %c1_i32_606 = arith.constant 1 : i32
      %883 = arith.addi %882, %c1_i32_606 : i32
      %c3_i32_607 = arith.constant 3 : i32
      %884 = arith.muli %883, %c3_i32_607 : i32
      %c1_i32_608 = arith.constant 1 : i32
      %885 = arith.addi %884, %c1_i32_608 : i32
      %886 = arith.index_cast %885 : i32 to index
      %887 = memref.load %arg3[%886] : memref<1152xf32, #tpu.memory_space<smem>>
      %c7_609 = arith.constant 7 : index
      %c1_610 = arith.constant 1 : index
      %c1_611 = arith.constant 1 : index
      %888 = vector.load %arg11[%c7_609, %c1_610, %c1_611] : memref<8x36x36xf32, #tpu.memory_space<vmem>>, vector<1x34x34xf32>
      %889 = vector.shape_cast %888 : vector<1x34x34xf32> to vector<34x34xf32>
      %890 = vector.broadcast %887 : f32 to vector<34x34xf32>
      %891 = arith.mulf %890, %889 : vector<34x34xf32>
      %892 = arith.addf %879, %891 : vector<34x34xf32>
      %c8_i32_612 = arith.constant 8 : i32
      %893 = arith.muli %7, %c8_i32_612 : i32
      %c7_i32_613 = arith.constant 7 : i32
      %894 = arith.addi %893, %c7_i32_613 : i32
      %c3_i32_614 = arith.constant 3 : i32
      %895 = arith.muli %894, %c3_i32_614 : i32
      %c1_i32_615 = arith.constant 1 : i32
      %896 = arith.addi %895, %c1_i32_615 : i32
      %c3_i32_616 = arith.constant 3 : i32
      %897 = arith.muli %896, %c3_i32_616 : i32
      %c2_i32_617 = arith.constant 2 : i32
      %898 = arith.addi %897, %c2_i32_617 : i32
      %899 = arith.index_cast %898 : i32 to index
      %900 = memref.load %arg3[%899] : memref<1152xf32, #tpu.memory_space<smem>>
      %c7_618 = arith.constant 7 : index
      %c1_619 = arith.constant 1 : index
      %c2_620 = arith.constant 2 : index
      %901 = vector.load %arg11[%c7_618, %c1_619, %c2_620] : memref<8x36x36xf32, #tpu.memory_space<vmem>>, vector<1x34x34xf32>
      %902 = vector.shape_cast %901 : vector<1x34x34xf32> to vector<34x34xf32>
      %903 = vector.broadcast %900 : f32 to vector<34x34xf32>
      %904 = arith.mulf %903, %902 : vector<34x34xf32>
      %905 = arith.addf %892, %904 : vector<34x34xf32>
      %c8_i32_621 = arith.constant 8 : i32
      %906 = arith.muli %7, %c8_i32_621 : i32
      %c7_i32_622 = arith.constant 7 : i32
      %907 = arith.addi %906, %c7_i32_622 : i32
      %c3_i32_623 = arith.constant 3 : i32
      %908 = arith.muli %907, %c3_i32_623 : i32
      %c2_i32_624 = arith.constant 2 : i32
      %909 = arith.addi %908, %c2_i32_624 : i32
      %c3_i32_625 = arith.constant 3 : i32
      %910 = arith.muli %909, %c3_i32_625 : i32
      %c0_i32_626 = arith.constant 0 : i32
      %911 = arith.addi %910, %c0_i32_626 : i32
      %912 = arith.index_cast %911 : i32 to index
      %913 = memref.load %arg3[%912] : memref<1152xf32, #tpu.memory_space<smem>>
      %c7_627 = arith.constant 7 : index
      %c2_628 = arith.constant 2 : index
      %c0_629 = arith.constant 0 : index
      %914 = vector.load %arg11[%c7_627, %c2_628, %c0_629] : memref<8x36x36xf32, #tpu.memory_space<vmem>>, vector<1x34x34xf32>
      %915 = vector.shape_cast %914 : vector<1x34x34xf32> to vector<34x34xf32>
      %916 = vector.broadcast %913 : f32 to vector<34x34xf32>
      %917 = arith.mulf %916, %915 : vector<34x34xf32>
      %918 = arith.addf %905, %917 : vector<34x34xf32>
      %c8_i32_630 = arith.constant 8 : i32
      %919 = arith.muli %7, %c8_i32_630 : i32
      %c7_i32_631 = arith.constant 7 : i32
      %920 = arith.addi %919, %c7_i32_631 : i32
      %c3_i32_632 = arith.constant 3 : i32
      %921 = arith.muli %920, %c3_i32_632 : i32
      %c2_i32_633 = arith.constant 2 : i32
      %922 = arith.addi %921, %c2_i32_633 : i32
      %c3_i32_634 = arith.constant 3 : i32
      %923 = arith.muli %922, %c3_i32_634 : i32
      %c1_i32_635 = arith.constant 1 : i32
      %924 = arith.addi %923, %c1_i32_635 : i32
      %925 = arith.index_cast %924 : i32 to index
      %926 = memref.load %arg3[%925] : memref<1152xf32, #tpu.memory_space<smem>>
      %c7_636 = arith.constant 7 : index
      %c2_637 = arith.constant 2 : index
      %c1_638 = arith.constant 1 : index
      %927 = vector.load %arg11[%c7_636, %c2_637, %c1_638] : memref<8x36x36xf32, #tpu.memory_space<vmem>>, vector<1x34x34xf32>
      %928 = vector.shape_cast %927 : vector<1x34x34xf32> to vector<34x34xf32>
      %929 = vector.broadcast %926 : f32 to vector<34x34xf32>
      %930 = arith.mulf %929, %928 : vector<34x34xf32>
      %931 = arith.addf %918, %930 : vector<34x34xf32>
      %c8_i32_639 = arith.constant 8 : i32
      %932 = arith.muli %7, %c8_i32_639 : i32
      %c7_i32_640 = arith.constant 7 : i32
      %933 = arith.addi %932, %c7_i32_640 : i32
      %c3_i32_641 = arith.constant 3 : i32
      %934 = arith.muli %933, %c3_i32_641 : i32
      %c2_i32_642 = arith.constant 2 : i32
      %935 = arith.addi %934, %c2_i32_642 : i32
      %c3_i32_643 = arith.constant 3 : i32
      %936 = arith.muli %935, %c3_i32_643 : i32
      %c2_i32_644 = arith.constant 2 : i32
      %937 = arith.addi %936, %c2_i32_644 : i32
      %938 = arith.index_cast %937 : i32 to index
      %939 = memref.load %arg3[%938] : memref<1152xf32, #tpu.memory_space<smem>>
      %c7_645 = arith.constant 7 : index
      %c2_646 = arith.constant 2 : index
      %c2_647 = arith.constant 2 : index
      %940 = vector.load %arg11[%c7_645, %c2_646, %c2_647] : memref<8x36x36xf32, #tpu.memory_space<vmem>>, vector<1x34x34xf32>
      %941 = vector.shape_cast %940 : vector<1x34x34xf32> to vector<34x34xf32>
      %942 = vector.broadcast %939 : f32 to vector<34x34xf32>
      %943 = arith.mulf %942, %941 : vector<34x34xf32>
      %944 = arith.addf %931, %943 : vector<34x34xf32>
      %cst_648 = arith.constant dense<0.000000e+00> : vector<34x17xf32>
      %945 = tpu.matmul %944, %3, %cst_648 {dimension_numbers = #tpu.dot_dimension_numbers<[1], [0], [0], [1], [0, 0, 1, 1], [], []>} : vector<34x34xf32>, vector<34x17xf32>, vector<34x17xf32> -> vector<34x17xf32>
      %cst_649 = arith.constant dense<0.000000e+00> : vector<17x17xf32>
      %946 = tpu.matmul %2, %945, %cst_649 {dimension_numbers = #tpu.dot_dimension_numbers<[1], [0], [0], [1], [0, 0, 1, 1], [], []>} : vector<17x34xf32>, vector<34x17xf32>, vector<17x17xf32> -> vector<17x17xf32>
      %cst_650 = arith.constant 2.500000e-01 : f32
      %947 = vector.broadcast %cst_650 : f32 to vector<17x17xf32>
      %948 = arith.mulf %946, %947 : vector<17x17xf32>
      %949 = arith.index_cast %7 : i32 to index
      %950 = memref.load %arg4[%949] : memref<16xf32, #tpu.memory_space<smem>>
      %951 = vector.broadcast %950 : f32 to vector<17x17xf32>
      %952 = arith.addf %948, %951 : vector<17x17xf32>
      %c0_651 = arith.constant 0 : index
      %953 = arith.index_cast %7 : i32 to index
      %c0_652 = arith.constant 0 : index
      %c0_653 = arith.constant 0 : index
      %954 = vector.load %arg10[%c0_651, %953, %c0_652, %c0_653] : memref<1x16x17x17xf32, #tpu.memory_space<vmem>>, vector<1x1x17x17xf32>
      %955 = vector.shape_cast %954 : vector<1x1x17x17xf32> to vector<17x17xf32>
      %956 = vector.shape_cast %952 : vector<17x17xf32> to vector<1x1x17x17xf32>
      tpu.vector_store %arg10[%c0_651, %953, %c0_652, %c0_653], %956 {strides = array<i32>} : memref<1x16x17x17xf32, #tpu.memory_space<vmem>>, vector<1x1x17x17xf32>,
    }
    %c16_i32_10 = arith.constant 16 : i32
    return
  }
  func.func @transform_0(%arg0: i32) -> i32 {
    %c0_i32 = arith.constant 0 : i32
    %c0_i32_0 = arith.constant 0 : i32
    return %c0_i32 : i32
  }
  func.func @transform_1(%arg0: i32) -> i32 {
    %c0_i32 = arith.constant 0 : i32
    %c0_i32_0 = arith.constant 0 : i32
    return %c0_i32 : i32
  }
  func.func @transform_2(%arg0: i32) -> i32 {
    %c0_i32 = arith.constant 0 : i32
    %c0_i32_0 = arith.constant 0 : i32
    return %c0_i32 : i32
  }
  func.func @transform_3(%arg0: i32) -> i32 {
    %c0_i32 = arith.constant 0 : i32
    %c0_i32_0 = arith.constant 0 : i32
    return %c0_i32 : i32
  }
  func.func @transform_4(%arg0: i32) -> (i32, i32, i32) {
    %c0_i32 = arith.constant 0 : i32
    %c0_i32_0 = arith.constant 0 : i32
    %c0_i32_1 = arith.constant 0 : i32
    return %arg0, %c0_i32, %c0_i32_0 : i32, i32, i32
  }
  func.func @transform_5(%arg0: i32) -> (i32, i32) {
    %c0_i32 = arith.constant 0 : i32
    %c0_i32_0 = arith.constant 0 : i32
    %c0_i32_1 = arith.constant 0 : i32
    return %c0_i32, %c0_i32_0 : i32, i32
  }
  func.func @transform_6(%arg0: i32) -> (i32, i32) {
    %c0_i32 = arith.constant 0 : i32
    %c0_i32_0 = arith.constant 0 : i32
    %c0_i32_1 = arith.constant 0 : i32
    return %c0_i32, %c0_i32_0 : i32, i32
  }
  func.func @transform_7(%arg0: i32) -> (i32, i32) {
    %c0_i32 = arith.constant 0 : i32
    %c0_i32_0 = arith.constant 0 : i32
    %c0_i32_1 = arith.constant 0 : i32
    return %c0_i32, %c0_i32_0 : i32, i32
  }
  func.func @transform_8(%arg0: i32) -> (i32, i32) {
    %c0_i32 = arith.constant 0 : i32
    %c0_i32_0 = arith.constant 0 : i32
    %c0_i32_1 = arith.constant 0 : i32
    return %c0_i32, %c0_i32_0 : i32, i32
  }
  func.func @transform_9(%arg0: i32) -> (i32, i32, i32, i32) {
    %c0_i32 = arith.constant 0 : i32
    %c0_i32_0 = arith.constant 0 : i32
    %c0_i32_1 = arith.constant 0 : i32
    %c0_i32_2 = arith.constant 0 : i32
    return %arg0, %c0_i32, %c0_i32_0, %c0_i32_1 : i32, i32, i32, i32
  }
}

</mosaic_0001>

<bundles_post_ra>
// kernel: _lambda_.3
= control target key start
LH: loop header
LB: loop body
LE: loop exit
PB: predicated region body
PF: predicated region fallthrough
CT: control target
= control target key end

     0   :  { %12 = vsyncpa [#allocation3], 0  ;;  %s5041_s0 = inlined_call_operand.vmem [shape: f32[2,4624], index: 0, kind: input, shape index: {}]   ;;  %s5042_s1 = inlined_call_operand.hbm [shape: bf16[4624,128], index: 1, kind: input, shape index: {}]   ;;  %s5043_s2 = inlined_call_operand.hbm [shape: f32[1,128], index: 2, kind: input, shape index: {}]   ;;  %s5044_s3 = inlined_call_operand.hbm [shape: bf16[128,64], index: 3, kind: input, shape index: {}]   ;;  %s5045_s4 = inlined_call_operand.hbm [shape: f32[1,64], index: 4, kind: input, shape index: {}]   ;;  %s5046_s5 = inlined_call_operand.hbm [shape: bf16[64,10], index: 5, kind: input, shape index: {}]   ;;  %s5047_s6 = inlined_call_operand.hbm [shape: f32[1,10], index: 6, kind: input, shape index: {}]   ;;  %s5048_s7 = inlined_call_operand.hbm [shape: f32[2,10], index: 7, kind: output, shape index: {}]  }
   0x1   :  { %13 = vsyncpa [#allocation6], 0 }
   0x2   :  { %14 = vsyncpa [#allocation9], 0 }
   0x3   :  { %15 = vsyncpa [#allocation12], 0  ;;  %s37_s26 = sshll.u32 %s5043_s2, 4  ;;  %s38_s26 = int_to_ptr.hbm [resolvable:$true] %s37_s26 }
   0x4   :  { %16 = vsyncpa [#allocation4], 0  ;;  %s4924_s27 = smov [#allocation5]   ;;  %s61_s8 = sshll.u32 %s5045_s4, 4  ;;  %s62_s8 = int_to_ptr.hbm [resolvable:$true] %s61_s8 }
   0x5   :  { %s39_s28 = sshll.u32 %s4924_s27, 4  ;;  %s4925_s9 = smov [#allocation8]   ;;  %s40_s28 = int_to_ptr.vmem [resolvable:$true] %s39_s28 }
   0x6   :  { %42 = dma.hbm_to_vmem [thread:$0]  %s38_s26, 16, %s40_s28, [#allocation6]  }
   0x7   :  { %s63_s10 = sshll.u32 %s4925_s9, 4  ;;  %s23_s13 = sshll.u32 %s5042_s1, 4  ;;  %s64_s10 = int_to_ptr.vmem [resolvable:$true] %s63_s10  ;;  %s24_s13 = int_to_ptr.hbm [resolvable:$true] %s23_s13 }
   0x8   :  { %66 = dma.hbm_to_vmem [thread:$0]  %s62_s8, 16, %s64_s10, [#allocation9]  }
   0x9   :  { %s4926_s2 = smov [#allocation2]   ;;  %s47_s17 = sshll.u32 %s5044_s3, 4  ;;  %s48_s17 = int_to_ptr.hbm [resolvable:$true] %s47_s17 }
   0xa   :  { %s25_s14 = sshll.u32 %s4926_s2, 4  ;;  %s4927_s18 = smov 64   ;;  %s26_s14 = int_to_ptr.vmem [resolvable:$true] %s25_s14 }
   0xb   :  { %s4928_s4 = smov 4   ;;  %s4929_s19 = smov [#allocation7]  }
   0xc   :  { %31 = dma.hbm_to_vmem [thread:$0]  %s24_s13, 36992, %s26_s14, [#allocation3], %s4927_s18, %s4927_s18, %s4928_s4  }
   0xd   :  { %s49_s20 = sshll.u32 %s4929_s19, 4  ;;  %s71_s1 = sshll.u32 %s5046_s5, 4  ;;  %s50_s20 = int_to_ptr.vmem [resolvable:$true] %s49_s20  ;;  %s72_s1 = int_to_ptr.hbm [resolvable:$true] %s71_s1 }
   0xe   :  { %55 = dma.hbm_to_vmem [thread:$0]  %s48_s17, 1024, %s50_s20, [#allocation6], %s4927_s18, %s4927_s18, %s4928_s4  }
   0xf   :  { %s85_s25 = sshll.u32 %s5047_s6, 4  ;;  %s4930_s26 = smov [#allocation10]   ;;  %s86_s25 = int_to_ptr.hbm [resolvable:$true] %s85_s25 }
  0x10   :  { %s73_s27 = sshll.u32 %s4930_s26, 4  ;;  %s4931_s3 = smov [#allocation11]   ;;  %s74_s27 = int_to_ptr.vmem [resolvable:$true] %s73_s27 }
  0x11   :  { %79 = dma.hbm_to_vmem [thread:$0]  %s72_s1, 512, %s74_s27, [#allocation9], %s4927_s18, %s4927_s18, %s4928_s4  }
  0x12   :  { %s87_s28 = sshll.u32 %s4931_s3, 4  ;;  %s88_s28 = int_to_ptr.vmem [resolvable:$true] %s87_s28 }
  0x13   :  { %90 = dma.hbm_to_vmem [thread:$0]  %s86_s25, 16, %s88_s28, [#allocation12]  }
  0x14   :  { %4914 = dma.done.wait [#allocation3], 36992  }
  0x15   :  { %4915 = vsyncadd [#allocation3], 4294930304 }
  0x16   :  { %4916 = dma.done.wait [#allocation6], 1040  }
  0x17   :  { %4917 = vsyncadd [#allocation6], 4294966256 }
  0x18   :  { %4918 = dma.done.wait [#allocation9], 528  }
  0x19   :  { %4919 = vsyncadd [#allocation9], 4294966768 }
  0x1a   :  { %4920 = dma.done.wait [#allocation12], 16  }
  0x1b   :  { %4921 = vsyncadd [#allocation12], 4294967280  ;;  %v4440_v0 = vld [vmem:[#allocation2 + $0x38] sm:$0xff]  ;;  %v4439_v4 = vld [vmem:[#allocation2 + $0x30] sm:$0xff]  ;;  %vm2584_vm0 = vcmask 130048   ;;  %vm3188_vm1 = vcmask 523264  }
  0x1c   :  { %v4456_v1 = vld [vmem:[#allocation2 + $0xb8] sm:$0xff]  ;;  %2588 = vmatpush.bf16.msra.mxu0 %v4440_v0  ;;  %v4455_v5 = vld [vmem:[#allocation2 + $0xb0] sm:$0xff]  ;;  %v4438_v8 = vld [vmem:[#allocation2 + $0x28] sm:$0xff]  ;;  %s3214_s24 = sshll.u32 %s5048_s7, 4  ;;  %vm3205_vm2 = vcmask 74752   ;;  %s3215_s24 = int_to_ptr.hbm [resolvable:$true] %s3214_s24 }
  0x1d   :  { %v4464_v2 = vld [vmem:[#allocation2 + $0xf8] sm:$0xff]  ;;  %2614 = vmatpush.bf16.msra.mxu2 %v4456_v1  ;;  %v4463_v6 = vld [vmem:[#allocation2 + $0xf0] sm:$0xff]  ;;  %v4454_v9 = vld [vmem:[#allocation2 + $0xa8] sm:$0xff] }
  0x1e   :  { %v4448_v3 = vld [vmem:[#allocation2 + $0x78] sm:$0xff]  ;;  %2627 = vmatpush.bf16.msra.mxu3 %v4464_v2  ;;  %v4447_v7 = vld [vmem:[#allocation2 + $0x70] sm:$0xff]  ;;  %v4462_v10 = vld [vmem:[#allocation2 + $0xe8] sm:$0xff] }
  0x1f   :  { %2601 = vmatpush.bf16.msra.mxu1 %v4448_v3  ;;  %v4446_v11 = vld [vmem:[#allocation2 + $0x68] sm:$0xff]  ;;  %v4437_v12 = vld [vmem:[#allocation2 + $0x20] sm:$0xff]  ;;  %v4436_v16 = vld [vmem:[#allocation2 + $0x18] sm:$0xff] }
  0x20   :  { %2589 = vmatpush.bf16.msra.mxu0 %v4439_v4  ;;  %v4453_v13 = vld [vmem:[#allocation2 + $0xa0] sm:$0xff]  ;;  %v4452_v17 = vld [vmem:[#allocation2 + $0x98] sm:$0xff]  ;;  %v4435_v21 = vld [vmem:[#allocation2 + $0x10] sm:$0xff] }
  0x21   :  { %2615 = vmatpush.bf16.msra.mxu2 %v4455_v5  ;;  %v4461_v14 = vld [vmem:[#allocation2 + $0xe0] sm:$0xff]  ;;  %v4460_v18 = vld [vmem:[#allocation2 + $0xd8] sm:$0xff]  ;;  %v4451_v22 = vld [vmem:[#allocation2 + $0x90] sm:$0xff] }
  0x22   :  { %2628 = vmatpush.bf16.msra.mxu3 %v4463_v6  ;;  %v4445_v15 = vld [vmem:[#allocation2 + $0x60] sm:$0xff]  ;;  %v4444_v19 = vld [vmem:[#allocation2 + $0x58] sm:$0xff]  ;;  %v4459_v23 = vld [vmem:[#allocation2 + $0xd0] sm:$0xff] }
  0x23   :  { %2602 = vmatpush.bf16.msra.mxu1 %v4447_v7  ;;  %v116_v20 = vld [vmem:[%s5041_s0] sm:$0xff]  ;;  %v4443_v25 = vld [vmem:[#allocation2 + $0x50] sm:$0xff]  ;;  %v4434_v26 = vld [vmem:[#allocation2 + $0x8] sm:$0xff] }
  0x24   :  { %2590 = vmatpush.bf16.msra.mxu0 %v4438_v8  ;;  %v126_v24 = vmax.f32 %v116_v20, 0.0  ;;  %v4450_v27 = vld [vmem:[#allocation2 + $0x88] sm:$0xff]  ;;  %v117_v31 = vld [vmem:[%s5041_s0 + $0x8] sm:$0xff]  ;;  %v4472_v37 = vld [vmem:[#allocation2 + $0x138] sm:$0xff] }
  0x25   :  { %2616 = vmatpush.bf16.msra.mxu2 %v4454_v9  ;;  %v118_v28 = vld [vmem:[%s5041_s0 + $0x10] sm:$0xff]  ;;  %v127_v32 = vmax.f32 %v117_v31, 0.0  ;;  %v4433_v33 = vld [vmem:[#allocation2] sm:$0xff]  ;;  %v4488_v38 = vld [vmem:[#allocation2 + $0x1b8] sm:$0xff] }
  0x26   :  { %2629 = vmatpush.bf16.msra.mxu3 %v4462_v10  ;;  %146 = vst [vmem:[#allocation1] ss:$4 sm:$0xff] %v126_v24  ;;  %v4458_v29 = vld [vmem:[#allocation2 + $0xc8] sm:$0xff]  ;;  %v4449_v34 = vld [vmem:[#allocation2 + $0x80] sm:$0xff]  ;;  %v128_v36 = vmax.f32 %v118_v28, 0.0  ;;  %v4496_v39 = vld [vmem:[#allocation2 + $0x1f8] sm:$0xff] }
  0x27   :  { %2603 = vmatpush.bf16.msra.mxu1 %v4446_v11  ;;  %v4442_v30 = vld [vmem:[#allocation2 + $0x48] sm:$0xff]  ;;  %v4457_v35 = vld [vmem:[#allocation2 + $0xc0] sm:$0xff]  ;;  %148 = vst [vmem:[#allocation1 + $0x20] ss:$4 sm:$0xff] %v127_v32  ;;  %v4480_v46 = vld [vmem:[#allocation2 + $0x178] sm:$0xff] }
  0x28   :  { %2591 = vmatpush.bf16.msra.mxu0 %v4437_v12  ;;  %v4441_v44 = vld [vmem:[#allocation2 + $0x40] sm:$0xff]  ;;  %v4471_v48 = vld [vmem:[#allocation2 + $0x130] sm:$0xff]  ;;  %v4470_v54 = vld [vmem:[#allocation2 + $0x128] sm:$0xff] }
  0x29   :  { %2617 = vmatpush.bf16.msra.mxu2 %v4453_v13  ;;  %v4487_v50 = vld [vmem:[#allocation2 + $0x1b0] sm:$0xff]  ;;  %v4486_v55 = vld [vmem:[#allocation2 + $0x1a8] sm:$0xff]  ;;  %v4469_v58 = vld [vmem:[#allocation2 + $0x120] sm:$0xff] }
  0x2a   :  { %2630 = vmatpush.bf16.msra.mxu3 %v4461_v14  ;;  %v4495_v51 = vld [vmem:[#allocation2 + $0x1f0] sm:$0xff]  ;;  %v4494_v56 = vld [vmem:[#allocation2 + $0x1e8] sm:$0xff]  ;;  %v4485_v61 = vld [vmem:[#allocation2 + $0x1a0] sm:$0xff] }
  0x2b   :  { %2604 = vmatpush.bf16.msra.mxu1 %v4445_v15  ;;  %v4479_v53 = vld [vmem:[#allocation2 + $0x170] sm:$0xff]  ;;  %v4478_v57 = vld [vmem:[#allocation2 + $0x168] sm:$0xff]  ;;  %v4493_v62 = vld [vmem:[#allocation2 + $0x1e0] sm:$0xff] }
  0x2c   :  { %2592 = vmatpush.bf16.msra.mxu0 %v4436_v16  ;;  %v119_v60 = vld [vmem:[%s5041_s0 + $0x18] sm:$0xff]  ;;  %v4477_v3 = vld [vmem:[#allocation2 + $0x160] sm:$0xff]  ;;  %v4468_v4 = vld [vmem:[#allocation2 + $0x118] sm:$0xff] }
  0x2d   :  { %2618 = vmatpush.bf16.msra.mxu2 %v4452_v17  ;;  %v151_v40 = vld.sshfl [vmem:[#allocation1 + $0x10] sm:$0xff pattern:$0x73625140]  ;;  %v149_v41 = vld.sshfl [vmem:[#allocation1] sm:$0xff pattern:$0x73625140] }
  0x2e   :  { %2631 = vmatpush.bf16.msra.mxu3 %v4460_v18  ;;  %v152_v42 = vld.sshfl [vmem:[#allocation1 + $0x18] sm:$0xff pattern:$0x73625140]  ;;  %v150_v43 = vld.sshfl [vmem:[#allocation1 + $0x8] sm:$0xff pattern:$0x73625140]  ;;  %v233_v45 = vpack.c.bf16 %v151_v40, %v151_v40  ;;  %v231_v47 = vpack.c.bf16 %v149_v41, %v149_v41 }
  0x2f   :  { %2605 = vmatpush.bf16.msra.mxu1 %v4444_v19  ;;  %157 = vst [vmem:[#allocation1] ss:$4 sm:$0xff] %v128_v36  ;;  %v234_v49 = vpack.c.bf16 %v152_v42, %v152_v42  ;;  %v232_v52 = vpack.c.bf16 %v150_v43, %v150_v43  ;;  %v5000_v59 = vld.sshfl [vmem:[#allocation1 + $0x30] sm:$0xff pattern:$0x73625140]  ;;  %v129_v0 = vmax.f32 %v119_v60, 0.0 }
  0x30   :  { %2593 = vmatpush.bf16.msra.mxu0 %v4435_v21  ;;  %v153_v63 = vld.sshfl [vmem:[#allocation1 + $0x20] sm:$0xff pattern:$0x73625140]  ;;  %v156_v1 = vld.sshfl [vmem:[#allocation1 + $0x38] sm:$0xff pattern:$0x73625140]  ;;  %v237_v24 = vpack.c.bf16 %v5000_v59, %v5000_v59 }
  0x31   :  { %2619 = vmatpush.bf16.msra.mxu2 %v4451_v22  ;;  %v5005_v2 = vld.sshfl [vmem:[#allocation1 + $0x28] sm:$0xff pattern:$0x73625140]  ;;  %v4484_v5 = vld [vmem:[#allocation2 + $0x198] sm:$0xff]  ;;  %v4467_v8 = vld [vmem:[#allocation2 + $0x110] sm:$0xff] }
  0x32   :  { %2632 = vmatpush.bf16.msra.mxu3 %v4459_v23  ;;  %158 = vst [vmem:[#allocation1 + $0x20] ss:$4 sm:$0xff] %v129_v0  ;;  %v4492_v6 = vld [vmem:[#allocation2 + $0x1d8] sm:$0xff]  ;;  %v4483_v9 = vld [vmem:[#allocation2 + $0x190] sm:$0xff]  ;;  %v4466_v12 = vld [vmem:[#allocation2 + $0x108] sm:$0xff] }
  0x33   :  { %2606 = vmatpush.bf16.msra.mxu1 %v4443_v25  ;;  %v4476_v7 = vld [vmem:[#allocation2 + $0x158] sm:$0xff]  ;;  %v4491_v10 = vld [vmem:[#allocation2 + $0x1d0] sm:$0xff]  ;;  %v4482_v13 = vld [vmem:[#allocation2 + $0x188] sm:$0xff]  ;;  %v235_v25 = vpack.c.bf16 %v153_v63, %v153_v63 }
  0x34   :  { %2594 = vmatpush.bf16.msra.mxu0 %v4434_v26  ;;  %v4475_v11 = vld [vmem:[#allocation2 + $0x150] sm:$0xff]  ;;  %v4490_v14 = vld [vmem:[#allocation2 + $0x1c8] sm:$0xff]  ;;  %v4465_v16 = vld [vmem:[#allocation2 + $0x100] sm:$0xff]  ;;  %v238_v26 = vpack.c.bf16 %v156_v1, %v156_v1 }
  0x35   :  { %2620 = vmatpush.bf16.msra.mxu2 %v4450_v27  ;;  %v4474_v15 = vld [vmem:[#allocation2 + $0x148] sm:$0xff]  ;;  %v4481_v17 = vld [vmem:[#allocation2 + $0x180] sm:$0xff]  ;;  %v4504_v19 = vld [vmem:[#allocation2 + $0x238] sm:$0xff] }
  0x36   :  { %2633 = vmatpush.bf16.msra.mxu3 %v4458_v29  ;;  %v4489_v18 = vld [vmem:[#allocation2 + $0x1c0] sm:$0xff]  ;;  %v4520_v20 = vld [vmem:[#allocation2 + $0x2b8] sm:$0xff]  ;;  %v4503_v27 = vld [vmem:[#allocation2 + $0x230] sm:$0xff] }
  0x37   :  { %2607 = vmatpush.bf16.msra.mxu1 %v4442_v30  ;;  %v4528_v21 = vld [vmem:[#allocation2 + $0x2f8] sm:$0xff]  ;;  %v4473_v22 = vld [vmem:[#allocation2 + $0x140] sm:$0xff]  ;;  %v4519_v28 = vld [vmem:[#allocation2 + $0x2b0] sm:$0xff]  ;;  %v236_v30 = vpack.c.bf16 %v5005_v2, %v5005_v2 }
  0x38   :  { %2595 = vmatpush.bf16.msra.mxu0 %v4433_v33  ;;  %v4512_v23 = vld [vmem:[#allocation2 + $0x278] sm:$0xff]  ;;  %v4527_v29 = vld [vmem:[#allocation2 + $0x2f0] sm:$0xff]  ;;  %v4502_v32 = vld [vmem:[#allocation2 + $0x228] sm:$0xff] }
  0x39   :  { %2621 = vmatpush.bf16.msra.mxu2 %v4449_v34  ;;  %v4511_v31 = vld [vmem:[#allocation2 + $0x270] sm:$0xff]  ;;  %v4518_v33 = vld [vmem:[#allocation2 + $0x2a8] sm:$0xff]  ;;  %v4501_v36 = vld [vmem:[#allocation2 + $0x220] sm:$0xff] }
  0x3a   :  { %2634 = vmatpush.bf16.msra.mxu3 %v4457_v35  ;;  %v4526_v34 = vld [vmem:[#allocation2 + $0x2e8] sm:$0xff]  ;;  %v4500_v40 = vld [vmem:[#allocation2 + $0x218] sm:$0xff]  ;;  %v162_v60 = vld.sshfl [vmem:[#allocation1 + $0x18] sm:$0xff pattern:$0x73625140] }
  0x3b   :  { %2608 = vmatpush.bf16.msra.mxu1 %v4441_v44  ;;  %2596 = vmatmul.bf16.vlgmr.msra.gmra.mxu0 %v231_v47  ;;  %v4510_v35 = vld [vmem:[#allocation2 + $0x268] sm:$0xff]  ;;  %v4516_v41 = vld [vmem:[#allocation2 + $0x298] sm:$0xff]  ;;  %v4499_v44 = vld [vmem:[#allocation2 + $0x210] sm:$0xff]  ;;  %v242_v2 = vpack.c.bf16 %v162_v60, %v162_v60 }
  0x3c   :  { %2640 = vmatpush.bf16.msrb.mxu0 %v4472_v37  ;;  %2622 = vmatmul.bf16.vlgmr.msra.gmra.mxu2 %v233_v45  ;;  %v4517_v37 = vld [vmem:[#allocation2 + $0x2a0] sm:$0xff]  ;;  %v4524_v42 = vld [vmem:[#allocation2 + $0x2d8] sm:$0xff]  ;;  %v4515_v45 = vld [vmem:[#allocation2 + $0x290] sm:$0xff] }
  0x3d   :  { %2666 = vmatpush.bf16.msrb.mxu2 %v4488_v38  ;;  %2635 = vmatmul.bf16.vlgmr.msra.gmra.mxu3 %v234_v49  ;;  %v4525_v38 = vld [vmem:[#allocation2 + $0x2e0] sm:$0xff]  ;;  %v4508_v43 = vld [vmem:[#allocation2 + $0x258] sm:$0xff]  ;;  %v4507_v47 = vld [vmem:[#allocation2 + $0x250] sm:$0xff] }
  0x3e   :  { %2679 = vmatpush.bf16.msrb.mxu3 %v4496_v39  ;;  %2609 = vmatmul.bf16.vlgmr.msra.gmra.mxu1 %v232_v52  ;;  %v4509_v39 = vld [vmem:[#allocation2 + $0x260] sm:$0xff]  ;;  %v4514_v49 = vld [vmem:[#allocation2 + $0x288] sm:$0xff]  ;;  %v4560_v59 = vld [vmem:[#allocation2 + $0x3f8] sm:$0xff] }
  0x3f   :  { %2653 = vmatpush.bf16.msrb.mxu1 %v4480_v46  ;;  %v4523_v46 = vld [vmem:[#allocation2 + $0x2d0] sm:$0xff]  ;;  %v4497_v52 = vld [vmem:[#allocation2 + $0x200] sm:$0xff]  ;;  %v4544_v1 = vld [vmem:[#allocation2 + $0x378] sm:$0xff] }
  0x40   :  { %2641 = vmatpush.bf16.msrb.mxu0 %v4471_v48  ;;  %v4498_v48 = vld [vmem:[#allocation2 + $0x208] sm:$0xff]  ;;  %v160_v63 = vld.sshfl [vmem:[#allocation1 + $0x8] sm:$0xff pattern:$0x73625140]  ;;  %v4588_v60 = vld [vmem:[#allocation2 + $0x4d8] sm:$0xff] }
  0x41   :  { %2667 = vmatpush.bf16.msrb.mxu2 %v4487_v50  ;;  %v4522_v50 = vld [vmem:[#allocation2 + $0x2c8] sm:$0xff] }
  0x42   :  { %2680 = vmatpush.bf16.msrb.mxu3 %v4495_v51  ;;  %v4506_v51 = vld [vmem:[#allocation2 + $0x248] sm:$0xff] }
  0x43   :  { %2654 = vmatpush.bf16.msrb.mxu1 %v4479_v53  ;;  %v4513_v53 = vld [vmem:[#allocation2 + $0x280] sm:$0xff] }
  0x44   :  { %2642 = vmatpush.bf16.msrb.mxu0 %v4470_v54  ;;  %v159_v54 = vld.sshfl [vmem:[#allocation1] sm:$0xff pattern:$0x73625140] }
  0x45   :  { %2668 = vmatpush.bf16.msrb.mxu2 %v4486_v55  ;;  %v4521_v55 = vld [vmem:[#allocation2 + $0x2c0] sm:$0xff] }
  0x46   :  { %2681 = vmatpush.bf16.msrb.mxu3 %v4494_v56  ;;  %v4536_v56 = vld [vmem:[#allocation2 + $0x338] sm:$0xff] }
  0x47   :  { %2655 = vmatpush.bf16.msrb.mxu1 %v4478_v57  ;;  %v161_v57 = vld.sshfl [vmem:[#allocation1 + $0x10] sm:$0xff pattern:$0x73625140] }
  0x48   :  { %2643 = vmatpush.bf16.msrb.mxu0 %v4469_v58  ;;  %v4552_v58 = vld [vmem:[#allocation2 + $0x3b8] sm:$0xff]  ;;  %v241_v0 = vpack.c.bf16 %v161_v57, %v161_v57  ;;  %v4573_v57 = vld [vmem:[#allocation2 + $0x460] sm:$0xff] }
  0x49   :  { %2669 = vmatpush.bf16.msrb.mxu2 %v4485_v61  ;;  %v4505_v61 = vld [vmem:[#allocation2 + $0x240] sm:$0xff] }
  0x4a   :  { %2682 = vmatpush.bf16.msrb.mxu3 %v4493_v62  ;;  %v239_v62 = vpack.c.bf16 %v159_v54, %v159_v54  ;;  %v4565_v54 = vld [vmem:[#allocation2 + $0x420] sm:$0xff] }
  0x4b   :  { %2656 = vmatpush.bf16.msrb.mxu1 %v4477_v3  ;;  %v4535_v3 = vld [vmem:[#allocation2 + $0x330] sm:$0xff] }
  0x4c   :  { %2644 = vmatpush.bf16.msrb.mxu0 %v4468_v4  ;;  %v240_v4 = vpack.c.bf16 %v160_v63, %v160_v63  ;;  %v4579_v63 = vld [vmem:[#allocation2 + $0x490] sm:$0xff] }
  0x4d   :  { %2670 = vmatpush.bf16.msrb.mxu2 %v4484_v5  ;;  %v4551_v5 = vld [vmem:[#allocation2 + $0x3b0] sm:$0xff] }
  0x4e   :  { %2683 = vmatpush.bf16.msrb.mxu3 %v4492_v6  ;;  %v4559_v6 = vld [vmem:[#allocation2 + $0x3f0] sm:$0xff] }
  0x4f   :  { %2657 = vmatpush.bf16.msrb.mxu1 %v4476_v7  ;;  %v4543_v7 = vld [vmem:[#allocation2 + $0x370] sm:$0xff] }
  0x50   :  { %2645 = vmatpush.bf16.msrb.mxu0 %v4467_v8  ;;  %v4534_v8 = vld [vmem:[#allocation2 + $0x328] sm:$0xff] }
  0x51   :  { %2671 = vmatpush.bf16.msrb.mxu2 %v4483_v9  ;;  %v4550_v9 = vld [vmem:[#allocation2 + $0x3a8] sm:$0xff] }
  0x52   :  { %2684 = vmatpush.bf16.msrb.mxu3 %v4491_v10  ;;  %v4558_v10 = vld [vmem:[#allocation2 + $0x3e8] sm:$0xff] }
  0x53   :  { %2658 = vmatpush.bf16.msrb.mxu1 %v4475_v11  ;;  %v4542_v11 = vld [vmem:[#allocation2 + $0x368] sm:$0xff] }
  0x54   :  { %2646 = vmatpush.bf16.msrb.mxu0 %v4466_v12  ;;  %v4533_v12 = vld [vmem:[#allocation2 + $0x320] sm:$0xff] }
  0x55   :  { %2672 = vmatpush.bf16.msrb.mxu2 %v4482_v13  ;;  %v4549_v13 = vld [vmem:[#allocation2 + $0x3a0] sm:$0xff] }
  0x56   :  { %2685 = vmatpush.bf16.msrb.mxu3 %v4490_v14  ;;  %v4557_v14 = vld [vmem:[#allocation2 + $0x3e0] sm:$0xff] }
  0x57   :  { %2659 = vmatpush.bf16.msrb.mxu1 %v4474_v15  ;;  %v4541_v15 = vld [vmem:[#allocation2 + $0x360] sm:$0xff] }
  0x58   :  { %2647 = vmatpush.bf16.msrb.mxu0 %v4465_v16  ;;  %v4532_v16 = vld [vmem:[#allocation2 + $0x318] sm:$0xff] }
  0x59   :  { %2673 = vmatpush.bf16.msrb.mxu2 %v4481_v17  ;;  %v4548_v17 = vld [vmem:[#allocation2 + $0x398] sm:$0xff] }
  0x5a   :  { %2686 = vmatpush.bf16.msrb.mxu3 %v4489_v18  ;;  %v4556_v18 = vld [vmem:[#allocation2 + $0x3d8] sm:$0xff] }
  0x5b   :  { %2660 = vmatpush.bf16.msrb.mxu1 %v4473_v22  ;;  %2648 = vmatmul.bf16.vlgmr.msrb.gmra.mxu0 %v235_v25  ;;  %v4555_v22 = vld [vmem:[#allocation2 + $0x3d0] sm:$0xff] }
  0x5c   :  { %2692 = vmatpush.bf16.msra.mxu0 %v4504_v19  ;;  %2674 = vmatmul.bf16.vlgmr.msrb.gmra.mxu2 %v237_v24  ;;  %v4540_v19 = vld [vmem:[#allocation2 + $0x358] sm:$0xff]  ;;  %v4539_v24 = vld [vmem:[#allocation2 + $0x350] sm:$0xff] }
  0x5d   :  { %2718 = vmatpush.bf16.msra.mxu2 %v4520_v20  ;;  %2687 = vmatmul.bf16.vlgmr.msrb.gmra.mxu3 %v238_v26  ;;  %v4531_v20 = vld [vmem:[#allocation2 + $0x310] sm:$0xff]  ;;  %v4530_v26 = vld [vmem:[#allocation2 + $0x308] sm:$0xff] }
  0x5e   :  { %2731 = vmatpush.bf16.msra.mxu3 %v4528_v21  ;;  %2661 = vmatmul.bf16.vlgmr.msrb.gmra.mxu1 %v236_v30  ;;  %v4547_v21 = vld [vmem:[#allocation2 + $0x390] sm:$0xff]  ;;  %v4529_v30 = vld [vmem:[#allocation2 + $0x300] sm:$0xff] }
  0x5f   :  { %2705 = vmatpush.bf16.msra.mxu1 %v4512_v23  ;;  %v120_v23 = vld [vmem:[%s5041_s0 + $0x20] sm:$0xff] }
  0x60   :  { %2693 = vmatpush.bf16.msra.mxu0 %v4503_v27  ;;  %v130_v25 = vmax.f32 %v120_v23, 0.0  ;;  %v4546_v27 = vld [vmem:[#allocation2 + $0x388] sm:$0xff] }
  0x61   :  { %2719 = vmatpush.bf16.msra.mxu2 %v4519_v28  ;;  %v4554_v28 = vld [vmem:[#allocation2 + $0x3c8] sm:$0xff] }
  0x62   :  { %2732 = vmatpush.bf16.msra.mxu3 %v4527_v29  ;;  %167 = vst [vmem:[#allocation1] ss:$4 sm:$0xff] %v130_v25  ;;  %v4538_v29 = vld [vmem:[#allocation2 + $0x348] sm:$0xff]  ;;  %v4615_v25 = vld [vmem:[#allocation2 + $0x5b0] sm:$0xff] }
  0x63   :  { %2706 = vmatpush.bf16.msra.mxu1 %v4511_v31  ;;  %v4545_v31 = vld [vmem:[#allocation2 + $0x380] sm:$0xff] }
  0x64   :  { %2694 = vmatpush.bf16.msra.mxu0 %v4502_v32  ;;  %v4568_v32 = vld [vmem:[#allocation2 + $0x438] sm:$0xff] }
  0x65   :  { %2720 = vmatpush.bf16.msra.mxu2 %v4518_v33  ;;  %v163_v33 = vld.sshfl [vmem:[#allocation1 + $0x20] sm:$0xff pattern:$0x73625140] }
  0x66   :  { %2733 = vmatpush.bf16.msra.mxu3 %v4526_v34  ;;  %v165_v34 = vld.sshfl [vmem:[#allocation1 + $0x30] sm:$0xff pattern:$0x73625140] }
  0x67   :  { %2707 = vmatpush.bf16.msra.mxu1 %v4510_v35  ;;  %v4553_v35 = vld [vmem:[#allocation2 + $0x3c0] sm:$0xff] }
  0x68   :  { %2695 = vmatpush.bf16.msra.mxu0 %v4501_v36  ;;  %v4584_v36 = vld [vmem:[#allocation2 + $0x4b8] sm:$0xff] }
  0x69   :  { %2721 = vmatpush.bf16.msra.mxu2 %v4517_v37  ;;  %v166_v37 = vld.sshfl [vmem:[#allocation1 + $0x38] sm:$0xff pattern:$0x73625140] }
  0x6a   :  { %2734 = vmatpush.bf16.msra.mxu3 %v4525_v38  ;;  %v4592_v38 = vld [vmem:[#allocation2 + $0x4f8] sm:$0xff] }
  0x6b   :  { %2708 = vmatpush.bf16.msra.mxu1 %v4509_v39  ;;  %v4537_v39 = vld [vmem:[#allocation2 + $0x340] sm:$0xff] }
  0x6c   :  { %2696 = vmatpush.bf16.msra.mxu0 %v4500_v40  ;;  %v164_v40 = vld.sshfl [vmem:[#allocation1 + $0x28] sm:$0xff pattern:$0x73625140] }
  0x6d   :  { %2722 = vmatpush.bf16.msra.mxu2 %v4516_v41  ;;  %v243_v41 = vpack.c.bf16 %v163_v33, %v163_v33  ;;  %v4597_v33 = vld [vmem:[#allocation2 + $0x520] sm:$0xff] }
  0x6e   :  { %2735 = vmatpush.bf16.msra.mxu3 %v4524_v42  ;;  %v245_v42 = vpack.c.bf16 %v165_v34, %v165_v34  ;;  %v4613_v34 = vld [vmem:[#allocation2 + $0x5a0] sm:$0xff] }
  0x6f   :  { %2709 = vmatpush.bf16.msra.mxu1 %v4508_v43  ;;  %v4576_v43 = vld [vmem:[#allocation2 + $0x478] sm:$0xff] }
  0x70   :  { %2697 = vmatpush.bf16.msra.mxu0 %v4499_v44  ;;  %v246_v44 = vpack.c.bf16 %v166_v37, %v166_v37 }
  0x71   :  { %2723 = vmatpush.bf16.msra.mxu2 %v4515_v45  ;;  %v244_v45 = vpack.c.bf16 %v164_v40, %v164_v40 }
  0x72   :  { %2736 = vmatpush.bf16.msra.mxu3 %v4523_v46  ;;  %v4567_v46 = vld [vmem:[#allocation2 + $0x430] sm:$0xff] }
  0x73   :  { %2710 = vmatpush.bf16.msra.mxu1 %v4507_v47  ;;  %v4583_v47 = vld [vmem:[#allocation2 + $0x4b0] sm:$0xff] }
  0x74   :  { %2698 = vmatpush.bf16.msra.mxu0 %v4498_v48  ;;  %v4591_v48 = vld [vmem:[#allocation2 + $0x4f0] sm:$0xff] }
  0x75   :  { %2724 = vmatpush.bf16.msra.mxu2 %v4514_v49  ;;  %v4575_v49 = vld [vmem:[#allocation2 + $0x470] sm:$0xff] }
  0x76   :  { %2737 = vmatpush.bf16.msra.mxu3 %v4522_v50  ;;  %v4566_v50 = vld [vmem:[#allocation2 + $0x428] sm:$0xff] }
  0x77   :  { %2711 = vmatpush.bf16.msra.mxu1 %v4506_v51  ;;  %v4582_v51 = vld [vmem:[#allocation2 + $0x4a8] sm:$0xff] }
  0x78   :  { %2699 = vmatpush.bf16.msra.mxu0 %v4497_v52  ;;  %v4590_v52 = vld [vmem:[#allocation2 + $0x4e8] sm:$0xff] }
  0x79   :  { %2725 = vmatpush.bf16.msra.mxu2 %v4513_v53  ;;  %v4574_v53 = vld [vmem:[#allocation2 + $0x468] sm:$0xff] }
  0x7a   :  { %2738 = vmatpush.bf16.msra.mxu3 %v4521_v55  ;;  %v4581_v55 = vld [vmem:[#allocation2 + $0x4a0] sm:$0xff] }
  0x7b   :  { %2712 = vmatpush.bf16.msra.mxu1 %v4505_v61  ;;  %2700 = vmatmul.bf16.vlgmr.msra.gmra.mxu0 %v239_v62  ;;  %v4572_v61 = vld [vmem:[#allocation2 + $0x458] sm:$0xff]  ;;  %v4563_v62 = vld [vmem:[#allocation2 + $0x410] sm:$0xff] }
  0x7c   :  { %2744 = vmatpush.bf16.msrb.mxu0 %v4536_v56  ;;  %2726 = vmatmul.bf16.vlgmr.msra.gmra.mxu2 %v241_v0  ;;  %v4589_v56 = vld [vmem:[#allocation2 + $0x4e0] sm:$0xff]  ;;  %v4587_v0 = vld [vmem:[#allocation2 + $0x4d0] sm:$0xff] }
  0x7d   :  { %2770 = vmatpush.bf16.msrb.mxu2 %v4552_v58  ;;  %2739 = vmatmul.bf16.vlgmr.msra.gmra.mxu3 %v242_v2  ;;  %v4564_v58 = vld [vmem:[#allocation2 + $0x418] sm:$0xff]  ;;  %v4571_v2 = vld [vmem:[#allocation2 + $0x450] sm:$0xff] }
  0x7e   :  { %2783 = vmatpush.bf16.msrb.mxu3 %v4560_v59  ;;  %2713 = vmatmul.bf16.vlgmr.msra.gmra.mxu1 %v240_v4  ;;  %v4580_v59 = vld [vmem:[#allocation2 + $0x498] sm:$0xff]  ;;  %v4562_v4 = vld [vmem:[#allocation2 + $0x408] sm:$0xff] }
  0x7f   :  { %2757 = vmatpush.bf16.msrb.mxu1 %v4544_v1  ;;  %v121_v1 = vld [vmem:[%s5041_s0 + $0x28] sm:$0xff] }
  0x80   :  { %2745 = vmatpush.bf16.msrb.mxu0 %v4535_v3  ;;  %v131_v3 = vmax.f32 %v121_v1, 0.0 }
  0x81   :  { %2771 = vmatpush.bf16.msrb.mxu2 %v4551_v5  ;;  %v4578_v5 = vld [vmem:[#allocation2 + $0x488] sm:$0xff] }
  0x82   :  { %2784 = vmatpush.bf16.msrb.mxu3 %v4559_v6  ;;  %v4586_v6 = vld [vmem:[#allocation2 + $0x4c8] sm:$0xff]  ;;  %168 = vst [vmem:[#allocation1 + $0x20] ss:$4 sm:$0xff] %v131_v3 }
  0x83   :  { %2758 = vmatpush.bf16.msrb.mxu1 %v4543_v7  ;;  %v4570_v7 = vld [vmem:[#allocation2 + $0x448] sm:$0xff] }
  0x84   :  { %2746 = vmatpush.bf16.msrb.mxu0 %v4534_v8  ;;  %v4561_v8 = vld [vmem:[#allocation2 + $0x400] sm:$0xff] }
  0x85   :  { %2772 = vmatpush.bf16.msrb.mxu2 %v4550_v9  ;;  %v4577_v9 = vld [vmem:[#allocation2 + $0x480] sm:$0xff] }
  0x86   :  { %2785 = vmatpush.bf16.msrb.mxu3 %v4558_v10  ;;  %v4585_v10 = vld [vmem:[#allocation2 + $0x4c0] sm:$0xff] }
  0x87   :  { %2759 = vmatpush.bf16.msrb.mxu1 %v4542_v11  ;;  %v169_v11 = vld.sshfl [vmem:[#allocation1] sm:$0xff pattern:$0x73625140] }
  0x88   :  { %2747 = vmatpush.bf16.msrb.mxu0 %v4533_v12  ;;  %v171_v12 = vld.sshfl [vmem:[#allocation1 + $0x10] sm:$0xff pattern:$0x73625140] }
  0x89   :  { %2773 = vmatpush.bf16.msrb.mxu2 %v4549_v13  ;;  %v4600_v13 = vld [vmem:[#allocation2 + $0x538] sm:$0xff]  ;;  %v175_v3 = vld.sshfl [vmem:[#allocation1 + $0x30] sm:$0xff pattern:$0x73625140] }
  0x8a   :  { %2786 = vmatpush.bf16.msrb.mxu3 %v4557_v14  ;;  %v4616_v14 = vld [vmem:[#allocation2 + $0x5b8] sm:$0xff] }
  0x8b   :  { %2760 = vmatpush.bf16.msrb.mxu1 %v4541_v15  ;;  %v172_v15 = vld.sshfl [vmem:[#allocation1 + $0x18] sm:$0xff pattern:$0x73625140] }
  0x8c   :  { %2748 = vmatpush.bf16.msrb.mxu0 %v4532_v16  ;;  %v4624_v16 = vld [vmem:[#allocation2 + $0x5f8] sm:$0xff] }
  0x8d   :  { %2774 = vmatpush.bf16.msrb.mxu2 %v4548_v17  ;;  %v4569_v17 = vld [vmem:[#allocation2 + $0x440] sm:$0xff] }
  0x8e   :  { %2787 = vmatpush.bf16.msrb.mxu3 %v4556_v18  ;;  %v170_v18 = vld.sshfl [vmem:[#allocation1 + $0x8] sm:$0xff pattern:$0x73625140] }
  0x8f   :  { %2761 = vmatpush.bf16.msrb.mxu1 %v4540_v19  ;;  %v247_v19 = vpack.c.bf16 %v169_v11, %v169_v11  ;;  %v248_v23 = vpack.c.bf16 %v170_v18, %v170_v18  ;;  %v253_v11 = vpack.c.bf16 %v175_v3, %v175_v3  ;;  %v4639_v18 = vld [vmem:[#allocation2 + $0x670] sm:$0xff] }
  0x90   :  { %2749 = vmatpush.bf16.msrb.mxu0 %v4531_v20  ;;  %v249_v20 = vpack.c.bf16 %v171_v12, %v171_v12  ;;  %v4640_v12 = vld [vmem:[#allocation2 + $0x678] sm:$0xff] }
  0x91   :  { %2775 = vmatpush.bf16.msrb.mxu2 %v4547_v21  ;;  %v4608_v21 = vld [vmem:[#allocation2 + $0x578] sm:$0xff] }
  0x92   :  { %2788 = vmatpush.bf16.msrb.mxu3 %v4555_v22  ;;  %v250_v22 = vpack.c.bf16 %v172_v15, %v172_v15  ;;  %v4631_v15 = vld [vmem:[#allocation2 + $0x630] sm:$0xff] }
  0x93   :  { %2762 = vmatpush.bf16.msrb.mxu1 %v4539_v24  ;;  %v4599_v24 = vld [vmem:[#allocation2 + $0x530] sm:$0xff] }
  0x94   :  { %2750 = vmatpush.bf16.msrb.mxu0 %v4530_v26  ;;  %v4623_v26 = vld [vmem:[#allocation2 + $0x5f0] sm:$0xff] }
  0x95   :  { %2776 = vmatpush.bf16.msrb.mxu2 %v4546_v27  ;;  %v4607_v27 = vld [vmem:[#allocation2 + $0x570] sm:$0xff] }
  0x96   :  { %2789 = vmatpush.bf16.msrb.mxu3 %v4554_v28  ;;  %v4598_v28 = vld [vmem:[#allocation2 + $0x528] sm:$0xff] }
  0x97   :  { %2763 = vmatpush.bf16.msrb.mxu1 %v4538_v29  ;;  %v4614_v29 = vld [vmem:[#allocation2 + $0x5a8] sm:$0xff] }
  0x98   :  { %2751 = vmatpush.bf16.msrb.mxu0 %v4529_v30  ;;  %v4622_v30 = vld [vmem:[#allocation2 + $0x5e8] sm:$0xff] }
  0x99   :  { %2777 = vmatpush.bf16.msrb.mxu2 %v4545_v31  ;;  %v4743_v31 = vld [vmem:[#allocation5] ss:$0 sm:$0xff] }
  0x9a   :  { %2790 = vmatpush.bf16.msrb.mxu3 %v4553_v35  ;;  %v4621_v35 = vld [vmem:[#allocation2 + $0x5e0] sm:$0xff] }
  0x9b   :  { %2764 = vmatpush.bf16.msrb.mxu1 %v4537_v39  ;;  %2752 = vmatmul.bf16.vlgmr.msrb.gmra.mxu0 %v243_v41  ;;  %v4596_v39 = vld [vmem:[#allocation2 + $0x518] sm:$0xff] }
  0x9c   :  { %2796 = vmatpush.bf16.msra.mxu0 %v4568_v32  ;;  %2778 = vmatmul.bf16.vlgmr.msrb.gmra.mxu2 %v245_v42  ;;  %v4606_v32 = vld [vmem:[#allocation2 + $0x568] sm:$0xff]  ;;  %v4612_v41 = vld [vmem:[#allocation2 + $0x598] sm:$0xff] }
  0x9d   :  { %2822 = vmatpush.bf16.msra.mxu2 %v4584_v36  ;;  %2791 = vmatmul.bf16.vlgmr.msrb.gmra.mxu3 %v246_v44  ;;  %v4620_v42 = vld [vmem:[#allocation2 + $0x5d8] sm:$0xff] }
  0x9e   :  { %2835 = vmatpush.bf16.msra.mxu3 %v4592_v38  ;;  %2765 = vmatmul.bf16.vlgmr.msrb.gmra.mxu1 %v244_v45  ;;  %v4605_v38 = vld [vmem:[#allocation2 + $0x560] sm:$0xff]  ;;  %v4604_v45 = vld [vmem:[#allocation2 + $0x558] sm:$0xff] }
  0x9f   :  { %2809 = vmatpush.bf16.msra.mxu1 %v4576_v43 }
  0xa0   :  { %2797 = vmatpush.bf16.msra.mxu0 %v4567_v46 }
  0xa1   :  { %2823 = vmatpush.bf16.msra.mxu2 %v4583_v47  ;;  %v4595_v47 = vld [vmem:[#allocation2 + $0x510] sm:$0xff] }
  0xa2   :  { %2836 = vmatpush.bf16.msra.mxu3 %v4591_v48 }
  0xa3   :  { %2810 = vmatpush.bf16.msra.mxu1 %v4575_v49  ;;  %v4611_v49 = vld [vmem:[#allocation2 + $0x590] sm:$0xff] }
  0xa4   :  { %2798 = vmatpush.bf16.msra.mxu0 %v4566_v50  ;;  %v4619_v50 = vld [vmem:[#allocation2 + $0x5d0] sm:$0xff] }
  0xa5   :  { %2824 = vmatpush.bf16.msra.mxu2 %v4582_v51 }
  0xa6   :  { %2837 = vmatpush.bf16.msra.mxu3 %v4590_v52 }
  0xa7   :  { %2811 = vmatpush.bf16.msra.mxu1 %v4574_v53  ;;  %v122_v53 = vld [vmem:[%s5041_s0 + $0x30] sm:$0xff] }
  0xa8   :  { %2799 = vmatpush.bf16.msra.mxu0 %v4565_v54  ;;  %v4603_v54 = vld [vmem:[#allocation2 + $0x550] sm:$0xff] }
  0xa9   :  { %2825 = vmatpush.bf16.msra.mxu2 %v4581_v55  ;;  %v132_v55 = vmax.f32 %v122_v53, 0.0  ;;  %v4625_v53 = vld [vmem:[#allocation2 + $0x600] sm:$0xff] }
  0xaa   :  { %2838 = vmatpush.bf16.msra.mxu3 %v4589_v56  ;;  %v4594_v56 = vld [vmem:[#allocation2 + $0x508] sm:$0xff] }
  0xab   :  { %2812 = vmatpush.bf16.msra.mxu1 %v4573_v57  ;;  %177 = vst [vmem:[#allocation1] ss:$4 sm:$0xff] %v132_v55  ;;  %v4649_v55 = vld [vmem:[#allocation2 + $0x6c0] sm:$0xff] }
  0xac   :  { %2800 = vmatpush.bf16.msra.mxu0 %v4564_v58  ;;  %v4610_v58 = vld [vmem:[#allocation2 + $0x588] sm:$0xff] }
  0xad   :  { %2826 = vmatpush.bf16.msra.mxu2 %v4580_v59  ;;  %v4618_v59 = vld [vmem:[#allocation2 + $0x5c8] sm:$0xff] }
  0xae   :  { %2839 = vmatpush.bf16.msra.mxu3 %v4588_v60 }
  0xaf   :  { %2813 = vmatpush.bf16.msra.mxu1 %v4572_v61  ;;  %v4602_v61 = vld [vmem:[#allocation2 + $0x548] sm:$0xff] }
  0xb0   :  { %2801 = vmatpush.bf16.msra.mxu0 %v4563_v62  ;;  %v4593_v62 = vld [vmem:[#allocation2 + $0x500] sm:$0xff] }
  0xb1   :  { %2827 = vmatpush.bf16.msra.mxu2 %v4579_v63  ;;  %v4609_v63 = vld [vmem:[#allocation2 + $0x580] sm:$0xff] }
  0xb2   :  { %2840 = vmatpush.bf16.msra.mxu3 %v4587_v0  ;;  %v4617_v0 = vld [vmem:[#allocation2 + $0x5c0] sm:$0xff] }
  0xb3   :  { %2814 = vmatpush.bf16.msra.mxu1 %v4571_v2  ;;  %v173_v2 = vld.sshfl [vmem:[#allocation1 + $0x20] sm:$0xff pattern:$0x73625140] }
  0xb4   :  { %2802 = vmatpush.bf16.msra.mxu0 %v4562_v4  ;;  %v4632_v4 = vld [vmem:[#allocation2 + $0x638] sm:$0xff] }
  0xb5   :  { %2828 = vmatpush.bf16.msra.mxu2 %v4578_v5  ;;  %v4648_v5 = vld [vmem:[#allocation2 + $0x6b8] sm:$0xff] }
  0xb6   :  { %2841 = vmatpush.bf16.msra.mxu3 %v4586_v6  ;;  %v176_v6 = vld.sshfl [vmem:[#allocation1 + $0x38] sm:$0xff pattern:$0x73625140] }
  0xb7   :  { %2815 = vmatpush.bf16.msra.mxu1 %v4570_v7  ;;  %v4656_v7 = vld [vmem:[#allocation2 + $0x6f8] sm:$0xff] }
  0xb8   :  { %2803 = vmatpush.bf16.msra.mxu0 %v4561_v8  ;;  %v2597_v36 = vpop.f32.mrf.mxu0  ;;  %v4601_v8 = vld [vmem:[#allocation2 + $0x540] sm:$0xff] }
  0xb9   :  { %2829 = vmatpush.bf16.msra.mxu2 %v4577_v9  ;;  %v2598_v37 = vadd.f32 %v4743_v31, %v2597_v36  ;;  %v174_v9 = vld.sshfl [vmem:[#allocation1 + $0x28] sm:$0xff pattern:$0x73625140] }
  0xba   :  { %2842 = vmatpush.bf16.msra.mxu3 %v4585_v10  ;;  %v251_v10 = vpack.c.bf16 %v173_v2, %v173_v2  ;;  %v4672_v2 = vld [vmem:[#allocation2 + $0x778] sm:$0xff] }
  0xbb   :  { %2816 = vmatpush.bf16.msra.mxu1 %v4569_v17  ;;  %2804 = vmatmul.bf16.vlgmr.msra.gmra.mxu0 %v247_v19  ;;  %v2610_v40 = vpop.f32.mrf.mxu1  ;;  %v4655_v17 = vld [vmem:[#allocation2 + $0x6f0] sm:$0xff]  ;;  %v4630_v19 = vld [vmem:[#allocation2 + $0x628] sm:$0xff] }
  0xbc   :  { %2848 = vmatpush.bf16.msrb.mxu0 %v4600_v13  ;;  %2830 = vmatmul.bf16.vlgmr.msra.gmra.mxu2 %v249_v20  ;;  %v2611_v43 = vadd.f32 %v2610_v40, %v2598_v37  ;;  %v254_v13 = vpack.c.bf16 %v176_v6, %v176_v6  ;;  %v4646_v20 = vld [vmem:[#allocation2 + $0x6a8] sm:$0xff]  ;;  %v4651_v40 = vld [vmem:[#allocation2 + $0x6d0] sm:$0xff] }
  0xbd   :  { %2874 = vmatpush.bf16.msrb.mxu2 %v4616_v14  ;;  %2843 = vmatmul.bf16.vlgmr.msra.gmra.mxu3 %v250_v22  ;;  %v252_v14 = vpack.c.bf16 %v174_v9, %v174_v9  ;;  %v4638_v22 = vld [vmem:[#allocation2 + $0x668] sm:$0xff]  ;;  %v4679_v6 = vld [vmem:[#allocation2 + $0x7b0] sm:$0xff] }
  0xbe   :  { %2887 = vmatpush.bf16.msrb.mxu3 %v4624_v16  ;;  %2817 = vmatmul.bf16.vlgmr.msra.gmra.mxu1 %v248_v23  ;;  %v4647_v16 = vld [vmem:[#allocation2 + $0x6b0] sm:$0xff]  ;;  %v4629_v23 = vld [vmem:[#allocation2 + $0x620] sm:$0xff]  ;;  %v4662_v9 = vld [vmem:[#allocation2 + $0x728] sm:$0xff] }
  0xbf   :  { %2861 = vmatpush.bf16.msrb.mxu1 %v4608_v21  ;;  %v2623_v44 = vpop.f32.mrf.mxu2  ;;  %v4654_v21 = vld [vmem:[#allocation2 + $0x6e8] sm:$0xff] }
  0xc0   :  { %2849 = vmatpush.bf16.msrb.mxu0 %v4599_v24  ;;  %v2624_v46 = vadd.f32 %v2623_v44, %v2611_v43  ;;  %v2636_v48 = vpop.f32.mrf.mxu3  ;;  %v2599_v52 = vpop.f32.mrf.mxu0  ;;  %v4645_v24 = vld [vmem:[#allocation2 + $0x6a0] sm:$0xff]  ;;  %v123_v43 = vld [vmem:[%s5041_s0 + $0x38] sm:$0xff] }
  0xc1   :  { %2875 = vmatpush.bf16.msrb.mxu2 %v4615_v25  ;;  %v4653_v25 = vld [vmem:[#allocation2 + $0x6e0] sm:$0xff]  ;;  %v4635_v44 = vld [vmem:[#allocation2 + $0x650] sm:$0xff] }
  0xc2   :  { %2888 = vmatpush.bf16.msrb.mxu3 %v4623_v26  ;;  %v5017_v51 = vadd.f32 %v2636_v48, %v2624_v46  ;;  %v133_v46 = vmax.f32 %v123_v43, 0.0  ;;  %v4642_v48 = vld [vmem:[#allocation2 + $0x688] sm:$0xff]  ;;  %v4657_v43 = vld [vmem:[#allocation2 + $0x700] sm:$0xff] }
  0xc3   :  { %2862 = vmatpush.bf16.msrb.mxu1 %v4607_v27  ;;  %v2612_v57 = vpop.f32.mrf.mxu1 }
  0xc4   :  { %2850 = vmatpush.bf16.msrb.mxu0 %v4598_v28  ;;  %v4637_v28 = vld [vmem:[#allocation2 + $0x660] sm:$0xff]  ;;  %178 = vst [vmem:[#allocation1 + $0x20] ss:$4 sm:$0xff] %v133_v46  ;;  %v181_v57 = vld.sshfl [vmem:[#allocation1 + $0x10] sm:$0xff pattern:$0x73625140] }
  0xc5   :  { %2876 = vmatpush.bf16.msrb.mxu2 %v4614_v29 }
  0xc6   :  { %2889 = vmatpush.bf16.msrb.mxu3 %v4622_v30  ;;  %v4628_v30 = vld [vmem:[#allocation2 + $0x618] sm:$0xff] }
  0xc7   :  { %2863 = vmatpush.bf16.msrb.mxu1 %v4606_v32  ;;  %v2625_v60 = vpop.f32.mrf.mxu2  ;;  %v4644_v32 = vld [vmem:[#allocation2 + $0x698] sm:$0xff] }
  0xc8   :  { %2851 = vmatpush.bf16.msrb.mxu0 %v4597_v33  ;;  %v2638_v1 = vpop.f32.mrf.mxu3  ;;  %v4652_v33 = vld [vmem:[#allocation2 + $0x6d8] sm:$0xff]  ;;  %v182_v60 = vld.sshfl [vmem:[#allocation1 + $0x18] sm:$0xff pattern:$0x73625140] }
  0xc9   :  { %2877 = vmatpush.bf16.msrb.mxu2 %v4613_v34  ;;  %v257_v1 = vpack.c.bf16 %v181_v57, %v181_v57  ;;  %v258_v3 = vpack.c.bf16 %v182_v60, %v182_v60  ;;  %v4711_v60 = vld [vmem:[#allocation2 + $0x8b0] sm:$0xff] }
  0xca   :  { %2890 = vmatpush.bf16.msrb.mxu3 %v4621_v35  ;;  %v4636_v35 = vld [vmem:[#allocation2 + $0x658] sm:$0xff] }
  0xcb   :  { %2864 = vmatpush.bf16.msrb.mxu1 %v4605_v38  ;;  %v4627_v38 = vld [vmem:[#allocation2 + $0x610] sm:$0xff]  ;;  %v183_v46 = vld.sshfl [vmem:[#allocation1 + $0x20] sm:$0xff pattern:$0x73625140] }
  0xcc   :  { %2852 = vmatpush.bf16.msrb.mxu0 %v4596_v39  ;;  %v4643_v39 = vld [vmem:[#allocation2 + $0x690] sm:$0xff] }
  0xcd   :  { %2878 = vmatpush.bf16.msrb.mxu2 %v4612_v41 }
  0xce   :  { %2891 = vmatpush.bf16.msrb.mxu3 %v4620_v42 }
  0xcf   :  { %2865 = vmatpush.bf16.msrb.mxu1 %v4604_v45 }
  0xd0   :  { %2853 = vmatpush.bf16.msrb.mxu0 %v4595_v47  ;;  %v4626_v47 = vld [vmem:[#allocation2 + $0x608] sm:$0xff] }
  0xd1   :  { %2879 = vmatpush.bf16.msrb.mxu2 %v4611_v49  ;;  %v4650_v49 = vld [vmem:[#allocation2 + $0x6c8] sm:$0xff] }
  0xd2   :  { %2892 = vmatpush.bf16.msrb.mxu3 %v4619_v50 }
  0xd3   :  { %2866 = vmatpush.bf16.msrb.mxu1 %v4603_v54  ;;  %v4641_v54 = vld [vmem:[#allocation2 + $0x680] sm:$0xff] }
  0xd4   :  { %2854 = vmatpush.bf16.msrb.mxu0 %v4594_v56  ;;  %v179_v56 = vld.sshfl [vmem:[#allocation1] sm:$0xff pattern:$0x73625140] }
  0xd5   :  { %2880 = vmatpush.bf16.msrb.mxu2 %v4610_v58  ;;  %v4664_v58 = vld [vmem:[#allocation2 + $0x738] sm:$0xff] }
  0xd6   :  { %2893 = vmatpush.bf16.msrb.mxu3 %v4618_v59  ;;  %v4680_v59 = vld [vmem:[#allocation2 + $0x7b8] sm:$0xff] }
  0xd7   :  { %2867 = vmatpush.bf16.msrb.mxu1 %v4602_v61  ;;  %v4688_v61 = vld [vmem:[#allocation2 + $0x7f8] sm:$0xff] }
  0xd8   :  { %2855 = vmatpush.bf16.msrb.mxu0 %v4593_v62  ;;  %v2649_v26 = vpop.f32.mrf.mxu0  ;;  %v4633_v62 = vld [vmem:[#allocation2 + $0x640] sm:$0xff] }
  0xd9   :  { %2881 = vmatpush.bf16.msrb.mxu2 %v4609_v63  ;;  %v2650_v27 = vadd.f32 %v2649_v26, %v5017_v51  ;;  %v4634_v51 = vld [vmem:[#allocation2 + $0x648] sm:$0xff]  ;;  %v180_v63 = vld.sshfl [vmem:[#allocation1 + $0x8] sm:$0xff pattern:$0x73625140]  ;;  %v4668_v26 = vld [vmem:[#allocation2 + $0x758] sm:$0xff] }
  0xda   :  { %2894 = vmatpush.bf16.msrb.mxu3 %v4617_v0  ;;  %v255_v0 = vpack.c.bf16 %v179_v56, %v179_v56  ;;  %v4704_v56 = vld [vmem:[#allocation2 + $0x878] sm:$0xff] }
  0xdb   :  { %2868 = vmatpush.bf16.msrb.mxu1 %v4601_v8  ;;  %2856 = vmatmul.bf16.vlgmr.msrb.gmra.mxu0 %v251_v10  ;;  %v2662_v29 = vpop.f32.mrf.mxu1  ;;  %v4671_v8 = vld [vmem:[#allocation2 + $0x770] sm:$0xff]  ;;  %v4678_v10 = vld [vmem:[#allocation2 + $0x7a8] sm:$0xff] }
  0xdc   :  { %2900 = vmatpush.bf16.msra.mxu0 %v4632_v4  ;;  %2882 = vmatmul.bf16.vlgmr.msrb.gmra.mxu2 %v253_v11  ;;  %v2663_v31 = vadd.f32 %v2662_v29, %v2650_v27  ;;  %v256_v4 = vpack.c.bf16 %v180_v63, %v180_v63  ;;  %v4686_v11 = vld [vmem:[#allocation2 + $0x7e8] sm:$0xff]  ;;  %v4659_v29 = vld [vmem:[#allocation2 + $0x710] sm:$0xff]  ;;  %v125_v63 = vld [vmem:[%s5041_s0 + $0x48] sm:$0x3] }
  0xdd   :  { %2926 = vmatpush.bf16.msra.mxu2 %v4648_v5  ;;  %2895 = vmatmul.bf16.vlgmr.msrb.gmra.mxu3 %v254_v13  ;;  %v4663_v5 = vld [vmem:[#allocation2 + $0x730] sm:$0xff] }
  0xde   :  { %2939 = vmatpush.bf16.msra.mxu3 %v4656_v7  ;;  %2869 = vmatmul.bf16.vlgmr.msrb.gmra.mxu1 %v252_v14  ;;  %v4687_v7 = vld [vmem:[#allocation2 + $0x7f0] sm:$0xff] }
  0xdf   :  { %2913 = vmatpush.bf16.msra.mxu1 %v4640_v12  ;;  %v2675_v34 = vpop.f32.mrf.mxu2  ;;  %v4670_v12 = vld [vmem:[#allocation2 + $0x768] sm:$0xff] }
  0xe0   :  { %2901 = vmatpush.bf16.msra.mxu0 %v4631_v15  ;;  %v2676_v36 = vadd.f32 %v2675_v34, %v2663_v31  ;;  %v2688_v37 = vpop.f32.mrf.mxu3  ;;  %v2651_v42 = vpop.f32.mrf.mxu0  ;;  %v4661_v15 = vld [vmem:[#allocation2 + $0x720] sm:$0xff]  ;;  %v4675_v31 = vld [vmem:[#allocation2 + $0x790] sm:$0xff]  ;;  %v124_v34 = vld [vmem:[%s5041_s0 + $0x40] sm:$0xff]  ;;  %s4932_s0 = smov [#allocation13]  }
  0xe1   :  { %2927 = vmatpush.bf16.msra.mxu2 %v4647_v16  ;;  %v4677_v16 = vld [vmem:[#allocation2 + $0x7a0] sm:$0xff]  ;;  %s3212_s22 = sshll.u32 %s4932_s0, 4  ;;  %s3213_s22 = int_to_ptr.vmem [resolvable:$true] %s3212_s22 }
  0xe2   :  { %2940 = vmatpush.bf16.msra.mxu3 %v4655_v17  ;;  %v5023_v41 = vadd.f32 %v2688_v37, %v2676_v36  ;;  %v4685_v17 = vld [vmem:[#allocation2 + $0x7e0] sm:$0xff]  ;;  %v134_v36 = vmax.f32 %v124_v34, 0.0  ;;  %v4658_v37 = vld [vmem:[#allocation2 + $0x708] sm:$0xff] }
  0xe3   :  { %2914 = vmatpush.bf16.msra.mxu1 %v4639_v18  ;;  %v2664_v45 = vpop.f32.mrf.mxu1  ;;  %v4705_v34 = vld [vmem:[#allocation2 + $0x880] sm:$0xff] }
  0xe4   :  { %2902 = vmatpush.bf16.msra.mxu0 %v4630_v19  ;;  %187 = vst [vmem:[#allocation1] ss:$4 sm:$0xff] %v134_v36  ;;  %v4681_v45 = vld [vmem:[#allocation2 + $0x7c0] sm:$0xff] }
  0xe5   :  { %2928 = vmatpush.bf16.msra.mxu2 %v4646_v20  ;;  %v4669_v20 = vld [vmem:[#allocation2 + $0x760] sm:$0xff] }
  0xe6   :  { %2941 = vmatpush.bf16.msra.mxu3 %v4654_v21  ;;  %v4660_v21 = vld [vmem:[#allocation2 + $0x718] sm:$0xff] }
  0xe7   :  { %2915 = vmatpush.bf16.msra.mxu1 %v4638_v22  ;;  %v2677_v50 = vpop.f32.mrf.mxu2  ;;  %v4676_v22 = vld [vmem:[#allocation2 + $0x798] sm:$0xff] }
  0xe8   :  { %2903 = vmatpush.bf16.msra.mxu0 %v4629_v23  ;;  %v2690_v52 = vpop.f32.mrf.mxu3  ;;  %v4684_v23 = vld [vmem:[#allocation2 + $0x7d8] sm:$0xff]  ;;  %v186_v50 = vld.sshfl [vmem:[#allocation1 + $0x38] sm:$0xff pattern:$0x73625140] }
  0xe9   :  { %2929 = vmatpush.bf16.msra.mxu2 %v4645_v24  ;;  %v4665_v52 = vld [vmem:[#allocation2 + $0x740] sm:$0xff]  ;;  %v262_v57 = vpack.c.bf16 %v186_v50, %v186_v50 }
  0xea   :  { %2942 = vmatpush.bf16.msra.mxu3 %v4653_v25 }
  0xeb   :  { %2916 = vmatpush.bf16.msra.mxu1 %v4637_v28  ;;  %v189_v36 = vld.sshfl [vmem:[#allocation1] sm:$0xff pattern:$0x73625140] }
  0xec   :  { %2904 = vmatpush.bf16.msra.mxu0 %v4628_v30 }
  0xed   :  { %2930 = vmatpush.bf16.msra.mxu2 %v4644_v32  ;;  %v4683_v32 = vld [vmem:[#allocation2 + $0x7d0] sm:$0xff] }
  0xee   :  { %2943 = vmatpush.bf16.msra.mxu3 %v4652_v33 }
  0xef   :  { %2917 = vmatpush.bf16.msra.mxu1 %v4636_v35  ;;  %v4667_v35 = vld [vmem:[#allocation2 + $0x750] sm:$0xff] }
  0xf0   :  { %2905 = vmatpush.bf16.msra.mxu0 %v4627_v38  ;;  %v4674_v38 = vld [vmem:[#allocation2 + $0x788] sm:$0xff] }
  0xf1   :  { %2931 = vmatpush.bf16.msra.mxu2 %v4643_v39  ;;  %v4682_v39 = vld [vmem:[#allocation2 + $0x7c8] sm:$0xff] }
  0xf2   :  { %2944 = vmatpush.bf16.msra.mxu3 %v4651_v40 }
  0xf3   :  { %2918 = vmatpush.bf16.msra.mxu1 %v4635_v44  ;;  %v4673_v44 = vld [vmem:[#allocation2 + $0x780] sm:$0xff] }
  0xf4   :  { %2906 = vmatpush.bf16.msra.mxu0 %v4626_v47  ;;  %v185_v47 = vld.sshfl [vmem:[#allocation1 + $0x30] sm:$0xff pattern:$0x73625140] }
  0xf5   :  { %2932 = vmatpush.bf16.msra.mxu2 %v4642_v48  ;;  %v4696_v48 = vld [vmem:[#allocation2 + $0x838] sm:$0xff] }
  0xf6   :  { %2945 = vmatpush.bf16.msra.mxu3 %v4650_v49  ;;  %v4712_v49 = vld [vmem:[#allocation2 + $0x8b8] sm:$0xff] }
  0xf7   :  { %2919 = vmatpush.bf16.msra.mxu1 %v4634_v51  ;;  %v4720_v51 = vld [vmem:[#allocation2 + $0x8f8] sm:$0xff] }
  0xf8   :  { %2907 = vmatpush.bf16.msra.mxu0 %v4625_v53  ;;  %v2701_v13 = vpop.f32.mrf.mxu0  ;;  %v184_v53 = vld.sshfl [vmem:[#allocation1 + $0x28] sm:$0xff pattern:$0x73625140] }
  0xf9   :  { %2933 = vmatpush.bf16.msra.mxu2 %v4641_v54  ;;  %v2702_v14 = vadd.f32 %v2701_v13, %v5023_v41  ;;  %v4666_v41 = vld [vmem:[#allocation2 + $0x748] sm:$0xff]  ;;  %v259_v54 = vpack.c.bf16 %v183_v46, %v183_v46  ;;  %v4692_v13 = vld [vmem:[#allocation2 + $0x818] sm:$0xff] }
  0xfa   :  { %2946 = vmatpush.bf16.msra.mxu3 %v4649_v55  ;;  %v261_v55 = vpack.c.bf16 %v185_v47, %v185_v47 }
  0xfb   :  { %2920 = vmatpush.bf16.msra.mxu1 %v4633_v62  ;;  %2908 = vmatmul.bf16.vlgmr.msra.gmra.mxu0 %v255_v0  ;;  %v2714_v18 = vpop.f32.mrf.mxu1  ;;  %v4703_v62 = vld [vmem:[#allocation2 + $0x870] sm:$0xff]  ;;  %v4694_v0 = vld [vmem:[#allocation2 + $0x828] sm:$0xff] }
  0xfc   :  { %2952 = vmatpush.bf16.msrb.mxu0 %v4664_v58  ;;  %2934 = vmatmul.bf16.vlgmr.msra.gmra.mxu2 %v257_v1  ;;  %v2715_v19 = vadd.f32 %v2714_v18, %v2702_v14  ;;  %v260_v58 = vpack.c.bf16 %v184_v53, %v184_v53  ;;  %v135_v1 = vmax.f32 %v125_v63, 0.0  ;;  %v4708_v14 = vld [vmem:[#allocation2 + $0x898] sm:$0xff] }
  0xfd   :  { %2978 = vmatpush.bf16.msrb.mxu2 %v4680_v59  ;;  %2947 = vmatmul.bf16.vlgmr.msra.gmra.mxu3 %v258_v3  ;;  %v4695_v59 = vld [vmem:[#allocation2 + $0x830] sm:$0xff]  ;;  %v4718_v3 = vld [vmem:[#allocation2 + $0x8e8] sm:$0xff] }
  0xfe   :  { %2991 = vmatpush.bf16.msrb.mxu3 %v4688_v61  ;;  %2921 = vmatmul.bf16.vlgmr.msra.gmra.mxu1 %v256_v4  ;;  %v4719_v61 = vld [vmem:[#allocation2 + $0x8f0] sm:$0xff]  ;;  %188 = vst [vmem:[#allocation1 + $0x20] ss:$4 sm:$0xff] %v135_v1  ;;  %v4702_v4 = vld [vmem:[#allocation2 + $0x868] sm:$0xff] }
  0xff   :  { %2965 = vmatpush.bf16.msrb.mxu1 %v4672_v2  ;;  %v2727_v24 = vpop.f32.mrf.mxu2  ;;  %v4710_v2 = vld [vmem:[#allocation2 + $0x8a8] sm:$0xff] }
 0x100   :  { %2953 = vmatpush.bf16.msrb.mxu0 %v4663_v5  ;;  %v2728_v25 = vadd.f32 %v2727_v24, %v2715_v19  ;;  %v2740_v27 = vpop.f32.mrf.mxu3  ;;  %v2703_v28 = vpop.f32.mrf.mxu0  ;;  %v4700_v19 = vld [vmem:[#allocation2 + $0x858] sm:$0xff]  ;;  %v4715_v24 = vld [vmem:[#allocation2 + $0x8d0] sm:$0xff] }
 0x101   :  { %2979 = vmatpush.bf16.msrb.mxu2 %v4679_v6  ;;  %v4706_v28 = vld [vmem:[#allocation2 + $0x888] sm:$0xff] }
 0x102   :  { %2992 = vmatpush.bf16.msrb.mxu3 %v4687_v7  ;;  %v5029_v30 = vadd.f32 %v2740_v27, %v2728_v25  ;;  %v4693_v7 = vld [vmem:[#allocation2 + $0x820] sm:$0xff]  ;;  %v4690_v27 = vld [vmem:[#allocation2 + $0x808] sm:$0xff] }
 0x103   :  { %2966 = vmatpush.bf16.msrb.mxu1 %v4671_v8  ;;  %v2716_v33 = vpop.f32.mrf.mxu1  ;;  %v4709_v8 = vld [vmem:[#allocation2 + $0x8a0] sm:$0xff] }
 0x104   :  { %2954 = vmatpush.bf16.msrb.mxu0 %v4662_v9  ;;  %v4717_v9 = vld [vmem:[#allocation2 + $0x8e0] sm:$0xff] }
 0x105   :  { %2980 = vmatpush.bf16.msrb.mxu2 %v4678_v10  ;;  %v4689_v33 = vld [vmem:[#allocation2 + $0x800] sm:$0xff]  ;;  %v193_v50 = vld.sshfl [vmem:[#allocation1 + $0x20] sm:$0xff pattern:$0x73625140] }
 0x106   :  { %2993 = vmatpush.bf16.msrb.mxu3 %v4686_v11 }
 0x107   :  { %2967 = vmatpush.bf16.msrb.mxu1 %v4670_v12  ;;  %v2729_v40 = vpop.f32.mrf.mxu2  ;;  %v4701_v12 = vld [vmem:[#allocation2 + $0x860] sm:$0xff] }
 0x108   :  { %2955 = vmatpush.bf16.msrb.mxu0 %v4661_v15  ;;  %v2742_v42 = vpop.f32.mrf.mxu3  ;;  %v4716_v15 = vld [vmem:[#allocation2 + $0x8d8] sm:$0xff]  ;;  %v4697_v40 = vld [vmem:[#allocation2 + $0x840] sm:$0xff] }
 0x109   :  { %2981 = vmatpush.bf16.msrb.mxu2 %v4677_v16  ;;  %v190_v42 = vld.sshfl [vmem:[#allocation1 + $0x8] sm:$0xff pattern:$0x73625140] }
 0x10a   :  { %2994 = vmatpush.bf16.msrb.mxu3 %v4685_v17 }
 0x10b   :  { %2968 = vmatpush.bf16.msrb.mxu1 %v4669_v20 }
 0x10c   :  { %2956 = vmatpush.bf16.msrb.mxu0 %v4660_v21 }
 0x10d   :  { %2982 = vmatpush.bf16.msrb.mxu2 %v4676_v22  ;;  %v4691_v22 = vld [vmem:[#allocation2 + $0x810] sm:$0xff] }
 0x10e   :  { %2995 = vmatpush.bf16.msrb.mxu3 %v4684_v23  ;;  %v4707_v23 = vld [vmem:[#allocation2 + $0x890] sm:$0xff] }
 0x10f   :  { %2969 = vmatpush.bf16.msrb.mxu1 %v4668_v26  ;;  %v4699_v26 = vld [vmem:[#allocation2 + $0x850] sm:$0xff] }
 0x110   :  { %2957 = vmatpush.bf16.msrb.mxu0 %v4659_v29  ;;  %v4714_v29 = vld [vmem:[#allocation2 + $0x8c8] sm:$0xff] }
 0x111   :  { %2983 = vmatpush.bf16.msrb.mxu2 %v4675_v31 }
 0x112   :  { %2996 = vmatpush.bf16.msrb.mxu3 %v4683_v32  ;;  %v4698_v32 = vld [vmem:[#allocation2 + $0x848] sm:$0xff] }
 0x113   :  { %2970 = vmatpush.bf16.msrb.mxu1 %v4667_v35  ;;  %v4713_v35 = vld [vmem:[#allocation2 + $0x8c0] sm:$0xff] }
 0x114   :  { %2958 = vmatpush.bf16.msrb.mxu0 %v4658_v37  ;;  %v191_v37 = vld.sshfl [vmem:[#allocation1 + $0x10] sm:$0xff pattern:$0x73625140] }
 0x115   :  { %2984 = vmatpush.bf16.msrb.mxu2 %v4674_v38  ;;  %v192_v38 = vld.sshfl [vmem:[#allocation1 + $0x18] sm:$0xff pattern:$0x73625140] }
 0x116   :  { %2997 = vmatpush.bf16.msrb.mxu3 %v4682_v39  ;;  %v4721_v39 = vld [vmem:[#allocation2 + $0x900] sm:$0xff] }
 0x117   :  { %2971 = vmatpush.bf16.msrb.mxu1 %v4666_v41  ;;  %v263_v41 = vpack.c.bf16 %v189_v36, %v189_v36  ;;  %v4733_v36 = vld [vmem:[#allocation10 + $0x18] sm:$0xff] }
 0x118   :  { %2959 = vmatpush.bf16.msrb.mxu0 %v4657_v43  ;;  %v2753_v5 = vpop.f32.mrf.mxu0  ;;  %v265_v43 = vpack.c.bf16 %v191_v37, %v191_v37 }
 0x119   :  { %2985 = vmatpush.bf16.msrb.mxu2 %v4673_v44  ;;  %v2754_v6 = vadd.f32 %v2753_v5, %v5029_v30  ;;  %v266_v44 = vpack.c.bf16 %v192_v38, %v192_v38  ;;  %v4732_v38 = vld [vmem:[#allocation10 + $0x10] sm:$0xff] }
 0x11a   :  { %2998 = vmatpush.bf16.msrb.mxu3 %v4681_v45  ;;  %v264_v45 = vpack.c.bf16 %v190_v42, %v190_v42 }
 0x11b   :  { %2972 = vmatpush.bf16.msrb.mxu1 %v4665_v52  ;;  %2960 = vmatmul.bf16.vlgmr.msrb.gmra.mxu0 %v259_v54  ;;  %v2766_v10 = vpop.f32.mrf.mxu1  ;;  %v267_v52 = vpack.c.bf16 %v193_v50, %v193_v50 }
 0x11c   :  { %3004 = vmatpush.bf16.msra.mxu0 %v4696_v48  ;;  %2986 = vmatmul.bf16.vlgmr.msrb.gmra.mxu2 %v261_v55  ;;  %v2767_v11 = vadd.f32 %v2766_v10, %v2754_v6 }
 0x11d   :  { %3030 = vmatpush.bf16.msra.mxu2 %v4712_v49  ;;  %2999 = vmatmul.bf16.vlgmr.msrb.gmra.mxu3 %v262_v57 }
 0x11e   :  { %3043 = vmatpush.bf16.msra.mxu3 %v4720_v51  ;;  %2973 = vmatmul.bf16.vlgmr.msrb.gmra.mxu1 %v260_v58 }
 0x11f   :  { %3017 = vmatpush.bf16.msra.mxu1 %v4704_v56  ;;  %v2779_v16 = vpop.f32.mrf.mxu2 }
 0x120   :  { %3005 = vmatpush.bf16.msra.mxu0 %v4695_v59  ;;  %v2780_v17 = vadd.f32 %v2779_v16, %v2767_v11  ;;  %v2792_v18 = vpop.f32.mrf.mxu3  ;;  %v2755_v20 = vpop.f32.mrf.mxu0  ;;  %v4727_v16 = vld [vmem:[#allocation7 + $0x28] sm:$0xff] }
 0x121   :  { %3031 = vmatpush.bf16.msra.mxu2 %v4711_v60 }
 0x122   :  { %3044 = vmatpush.bf16.msra.mxu3 %v4719_v61  ;;  %v2793_v21 = vadd.f32 %v2792_v18, %v2780_v17 }
 0x123   :  { %3018 = vmatpush.bf16.msra.mxu1 %v4703_v62  ;;  %v2768_v25 = vpop.f32.mrf.mxu1 }
 0x124   :  { %3006 = vmatpush.bf16.msra.mxu0 %v4694_v0 }
 0x125   :  { %3032 = vmatpush.bf16.msra.mxu2 %v4710_v2 }
 0x126   :  { %3045 = vmatpush.bf16.msra.mxu3 %v4718_v3 }
 0x127   :  { %3019 = vmatpush.bf16.msra.mxu1 %v4702_v4  ;;  %v2781_v30 = vpop.f32.mrf.mxu2 }
 0x128   :  { %3007 = vmatpush.bf16.msra.mxu0 %v4693_v7  ;;  %v2794_v31 = vpop.f32.mrf.mxu3 }
 0x129   :  { %3033 = vmatpush.bf16.msra.mxu2 %v4709_v8 }
 0x12a   :  { %3046 = vmatpush.bf16.msra.mxu3 %v4717_v9 }
 0x12b   :  { %3020 = vmatpush.bf16.msra.mxu1 %v4701_v12  ;;  %v4729_v12 = vld [vmem:[#allocation7 + $0x38] sm:$0xff] }
 0x12c   :  { %3008 = vmatpush.bf16.msra.mxu0 %v4692_v13 }
 0x12d   :  { %3034 = vmatpush.bf16.msra.mxu2 %v4708_v14  ;;  %v4728_v14 = vld [vmem:[#allocation7 + $0x30] sm:$0xff] }
 0x12e   :  { %3047 = vmatpush.bf16.msra.mxu3 %v4716_v15 }
 0x12f   :  { %3021 = vmatpush.bf16.msra.mxu1 %v4700_v19  ;;  %v4726_v19 = vld [vmem:[#allocation7 + $0x20] sm:$0xff] }
 0x130   :  { %3009 = vmatpush.bf16.msra.mxu0 %v4691_v22  ;;  %v4725_v22 = vld [vmem:[#allocation7 + $0x18] sm:$0xff] }
 0x131   :  { %3035 = vmatpush.bf16.msra.mxu2 %v4707_v23 }
 0x132   :  { %3048 = vmatpush.bf16.msra.mxu3 %v4715_v24  ;;  %v4724_v24 = vld [vmem:[#allocation7 + $0x10] sm:$0xff] }
 0x133   :  { %3022 = vmatpush.bf16.msra.mxu1 %v4699_v26 }
 0x134   :  { %3010 = vmatpush.bf16.msra.mxu0 %v4690_v27 }
 0x135   :  { %3036 = vmatpush.bf16.msra.mxu2 %v4706_v28 }
 0x136   :  { %3049 = vmatpush.bf16.msra.mxu3 %v4714_v29  ;;  %v4723_v29 = vld [vmem:[#allocation7 + $0x8] sm:$0xff] }
 0x137   :  { %3023 = vmatpush.bf16.msra.mxu1 %v4698_v32  ;;  %v4722_v32 = vld [vmem:[#allocation7] sm:$0xff] }
 0x138   :  { %3011 = vmatpush.bf16.msra.mxu0 %v4689_v33  ;;  %v2805_v46 = vpop.f32.mrf.mxu0 }
 0x139   :  { %3037 = vmatpush.bf16.msra.mxu2 %v4705_v34  ;;  %v2806_v47 = vadd.f32 %v2805_v46, %v2793_v21 }
 0x13a   :  { %3050 = vmatpush.bf16.msra.mxu3 %v4713_v35 }
 0x13b   :  { %3024 = vmatpush.bf16.msra.mxu1 %v4697_v40  ;;  %3012 = vmatmul.bf16.vlgmr.msra.gmra.mxu0 %v263_v41  ;;  %v2818_v48 = vpop.f32.mrf.mxu1  ;;  %v4731_v40 = vld [vmem:[#allocation10 + $0x8] sm:$0xff] }
 0x13c   :  { %3063 = vmatpush.bf16.msrb.mxu0 %v4721_v39  ;;  %3038 = vmatmul.bf16.vlgmr.msra.gmra.mxu2 %v265_v43  ;;  %v2819_v49 = vadd.f32 %v2818_v48, %v2806_v47 }
 0x13d   :  { %3051 = vmatmul.bf16.vlgmr.msra.gmra.mxu3 %v266_v44  ;;  %3196 = vmatpush.bf16.msrb.mxu2 %v4733_v36 }
 0x13e   :  { %3025 = vmatmul.bf16.vlgmr.msra.gmra.mxu1 %v264_v45 }
 0x13f   :  { %v2831_v51 = vpop.f32.mrf.mxu2  ;;  %3138 = vmatpush.bf16.msrb.mxu1 %v4729_v12 }
 0x140   :  { %v2832_v53 = vadd.f32 %v2831_v51, %v2819_v49  ;;  %v2844_v54 = vpop.f32.mrf.mxu3  ;;  %v2807_v55 = vpop.f32.mrf.mxu0 }
 0x141   :  { %3197 = vmatpush.bf16.msrb.mxu2 %v4732_v38 }
 0x142   :  { %v2845_v56 = vadd.f32 %v2844_v54, %v2832_v53 }
 0x143   :  { %v2820_v57 = vpop.f32.mrf.mxu1  ;;  %3139 = vmatpush.bf16.msrb.mxu1 %v4728_v14 }
 0x145   :  { %3198 = vmatpush.bf16.msrb.mxu2 %v4731_v40 }
 0x147   :  { %v2833_v58 = vpop.f32.mrf.mxu2  ;;  %3140 = vmatpush.bf16.msrb.mxu1 %v4727_v16 }
 0x148   :  { %v2846_v59 = vpop.f32.mrf.mxu3 }
 0x149   :  { %v4730_v59 = vld [vmem:[#allocation10] sm:$0xff] }
 0x14a   :  { %3199 = vmatpush.bf16.msrb.mxu2 %v4730_v59 }
 0x14b   :  { %4383 = vmatmul.msk.bf16.vlgmr.msrb.gmra.mxu0 %vm2584_vm0, %v267_v52  ;;  %3141 = vmatpush.bf16.msrb.mxu1 %v4726_v19 }
 0x14f   :  { %3142 = vmatpush.bf16.msrb.mxu1 %v4725_v22 }
 0x153   :  { %3143 = vmatpush.bf16.msrb.mxu1 %v4724_v24 }
 0x157   :  { %3144 = vmatpush.bf16.msrb.mxu1 %v4723_v29 }
 0x158   :  { %v2857_v60 = vpop.f32.mrf.mxu0 }
 0x159   :  { %v2858_v61 = vadd.f32 %v2857_v60, %v2845_v56  ;;  %v4744_v60 = vld [vmem:[#allocation8] ss:$0 sm:$0xff] }
 0x15b   :  { %v2870_v62 = vpop.f32.mrf.mxu1  ;;  %3145 = vmatpush.bf16.msrb.mxu1 %v4722_v32 }
 0x15c   :  { %v2871_v63 = vadd.f32 %v2870_v62, %v2858_v61 }
 0x15f   :  { %v2883_v0 = vpop.f32.mrf.mxu2 }
 0x160   :  { %v2884_v1 = vadd.f32 %v2883_v0, %v2871_v63  ;;  %v2896_v2 = vpop.f32.mrf.mxu3  ;;  %v2859_v3 = vpop.f32.mrf.mxu0 }
 0x162   :  { %v2897_v4 = vadd.f32 %v2896_v2, %v2884_v1  ;;  %v4745_v1 = vld [vmem:[#allocation11] ss:$0 sm:$0xff] }
 0x163   :  { %v2872_v5 = vpop.f32.mrf.mxu1 }
 0x167   :  { %v2885_v6 = vpop.f32.mrf.mxu2 }
 0x168   :  { %v2898_v7 = vpop.f32.mrf.mxu3 }
 0x178   :  { %v2909_v8 = vpop.f32.mrf.mxu0 }
 0x179   :  { %v2910_v27 = vadd.f32 %v2909_v8, %v2897_v4 }
 0x17b   :  { %v2922_v9 = vpop.f32.mrf.mxu1 }
 0x17c   :  { %v2923_v30 = vadd.f32 %v2922_v9, %v2910_v27 }
 0x17f   :  { %v2935_v10 = vpop.f32.mrf.mxu2 }
 0x180   :  { %v2948_v11 = vpop.f32.mrf.mxu3  ;;  %v2911_v13 = vpop.f32.mrf.mxu0  ;;  %v2936_v34 = vadd.f32 %v2935_v10, %v2923_v30 }
 0x182   :  { %v2949_v35 = vadd.f32 %v2948_v11, %v2936_v34 }
 0x183   :  { %v2924_v15 = vpop.f32.mrf.mxu1 }
 0x187   :  { %v2937_v17 = vpop.f32.mrf.mxu2 }
 0x188   :  { %v2950_v18 = vpop.f32.mrf.mxu3 }
 0x198   :  { %v2961_v20 = vpop.f32.mrf.mxu0 }
 0x199   :  { %v2962_v37 = vadd.f32 %v2961_v20, %v2949_v35 }
 0x19b   :  { %v2974_v21 = vpop.f32.mrf.mxu1 }
 0x19c   :  { %v2975_v39 = vadd.f32 %v2974_v21, %v2962_v37 }
 0x19f   :  { %v2987_v23 = vpop.f32.mrf.mxu2 }
 0x1a0   :  { %v3000_v25 = vpop.f32.mrf.mxu3  ;;  %v2963_v26 = vpop.f32.mrf.mxu0  ;;  %v2988_v41 = vadd.f32 %v2987_v23, %v2975_v39 }
 0x1a2   :  { %v3001_v43 = vadd.f32 %v3000_v25, %v2988_v41 }
 0x1a3   :  { %v2976_v28 = vpop.f32.mrf.mxu1 }
 0x1a7   :  { %v2989_v31 = vpop.f32.mrf.mxu2 }
 0x1a8   :  { %v3002_v33 = vpop.f32.mrf.mxu3 }
 0x1b8   :  { %v3013_v42 = vpop.f32.mrf.mxu0 }
 0x1b9   :  { %v3014_v45 = vadd.f32 %v3013_v42, %v3001_v43 }
 0x1bb   :  { %v3026_v44 = vpop.f32.mrf.mxu1 }
 0x1bc   :  { %v3027_v49 = vadd.f32 %v3026_v44, %v3014_v45 }
 0x1bf   :  { %v3039_v46 = vpop.f32.mrf.mxu2 }
 0x1c0   :  { %v3052_v47 = vpop.f32.mrf.mxu3  ;;  %v3015_v48 = vpop.f32.mrf.mxu0  ;;  %v3040_v50 = vadd.f32 %v3039_v46, %v3027_v49 }
 0x1c2   :  { %v3053_v52 = vadd.f32 %v3052_v47, %v3040_v50 }
 0x1c3   :  { %v3028_v51 = vpop.f32.mrf.mxu1 }
 0x1c7   :  { %v3041_v53 = vpop.f32.mrf.mxu2 }
 0x1c8   :  { %v3054_v54 = vpop.f32.mrf.mxu3  ;;  %v3065_v55 = vpop.f32.mrf.mxu0 }
 0x1c9   :  { %v3066_v56 = vadd.f32 %v3065_v55, %v3053_v52 }
 0x1cb   :  { %v3069_v57 = vpack.c.bf16 %v3066_v56, %v3066_v56 }
 0x1cd   :  { %3146 = vmatmul.bf16.vlgmr.msrb.gmra.mxu1 %v3069_v57 }
 0x1d0   :  { %v3067_v58 = vpop.f32.mrf.mxu0 }
 0x24a   :  { %v3147_v61 = vpop.f32.mrf.mxu1 }
 0x24b   :  { %v3148_v62 = vadd.f32 %v4744_v60, %v3147_v61 }
 0x24d   :  { %v3151_v63 = vpack.c.bf16 %v3148_v62, %v3148_v62 }
 0x24f   :  { %4432 = vmatmul.msk.bf16.vlgmr.msrb.gmra.mxu2 %vm3188_vm1, %v3151_v63 }
 0x252   :  { %v3149_v0 = vpop.f32.mrf.mxu1 }
 0x2d2   :  { %v3201_v2 = vpop.f32.mrf.mxu2 }
 0x2d3   :  { %v3202_v3 = vadd.f32 %v4745_v1, %v3201_v2 }
 0x2d5   :  { %3206 = vst.msk [vmem:[#allocation13] sm:$0x3] %vm3205_vm2, %v3202_v3 }
 0x2d6   :  { %3217 = dma.vmem_to_hbm [thread:$0]  %s3213_s22, 32, %s3215_s24, [#allocation4]  }
 0x2da   :  { %v3203_v4 = vpop.f32.mrf.mxu2 }
 0x2db   :  { %4922 = dma.done.wait [#allocation4], 32  }
 0x2dc   :  { %4923 = vsyncadd [#allocation4], 4294967264 }
 0x2dd   :  { %3222 = vsyncpa [#allocation3], 1 }
 0x2de   :  { %3223 = vsyncpa [#allocation6], 1 }
 0x2df   :  { %3224 = vsyncpa [#allocation9], 1 }
 0x2e0   :  { %3225 = vsyncpa [#allocation12], 1 }
 0x2e1   :  { %3226 = vsyncpa [#allocation4], 1 }

// kernel: _lambda_.2
= control target key start
LH: loop header
LB: loop body
LE: loop exit
PB: predicated region body
PF: predicated region fallthrough
CT: control target
= control target key end

     0   :  { %s9110_s0 = inlined_call_operand.hbm [shape: f32[200], index: 0, kind: input, shape index: {}]   ;;  %s9111_s1 = inlined_call_operand.hbm [shape: f32[8], index: 1, kind: input, shape index: {}]   ;;  %s9112_s2 = inlined_call_operand.hbm [shape: f32[1152], index: 2, kind: input, shape index: {}]   ;;  %s9113_s3 = inlined_call_operand.hbm [shape: f32[16], index: 3, kind: input, shape index: {}]   ;;  %s9114_s4 = inlined_call_operand.hbm [shape: f32[2,112,112], index: 4, kind: input, shape index: {}]   ;;  %s9115_s5 = inlined_call_operand.hbm [shape: f32[36,108], index: 5, kind: input, shape index: {}]   ;;  %s9116_s6 = inlined_call_operand.hbm [shape: f32[108,36], index: 6, kind: input, shape index: {}]   ;;  %s9117_s7 = inlined_call_operand.hbm [shape: f32[17,34], index: 7, kind: input, shape index: {}]   ;;  %s9118_s8 = inlined_call_operand.hbm [shape: f32[34,17], index: 8, kind: input, shape index: {}]   ;;  %s9119_s9 = inlined_call_operand.vmem [shape: f32[2,16,17,17], index: 9, kind: output, shape index: {}]  }
   0x1   :  { %9153 = sst [smem:[#allocation74_spill]] %s9110_s0 }
   0x2   :  { %14 = vsyncpa [#allocation5], 0 }
   0x3   :  { %15 = vsyncpa [#allocation7], 0 }
   0x4   :  { %16 = vsyncpa [#allocation10], 0 }
   0x5   :  { %17 = vsyncpa [#allocation4], 0 }
   0x6   :  { %19 = vsyncpa [#allocation4 + $0x1], 0 }
   0x7   :  { %20 = vsyncpa [#allocation13], 0 }
   0x8   :  { %21 = vsyncpa [#allocation16], 0  ;;  %s5571_s30 = smov 0   ;;  %s5573_s10 = smov 0  }
   0x9   :  { %s5575_s11 = smov 0   ;;  %s5577_s12 = smov 0  }
   0xa LB: > { %s274_s15 = sshll.u32 %s9111_s1, 4  ;;  %s5595_s16 = sadd.s32 4294967295, %s5495_s12   ;;  %s5495_s12 = sphi %s5577_s12, %s9285_s12   ;;  %s5491_s11 = sphi %s5575_s11, %s9284_s11   ;;  %s5487_s10 = sphi %s5573_s10, %s9283_s10   ;;  %s5483_s30 = sphi %s5571_s30, %s9282_s30   ;;  %s275_s15 = int_to_ptr.hbm [resolvable:$true] %s274_s15 }
   0xb   : > { %p4974_p0 = scmp.ge.s32.totalorder %s5495_s12, 1  ;;  %p132_p1 = scmp.eq.s32.totalorder %s5595_s16, 0 }
   0xc   : > { %p252_p2 = scmp.lt.s32.totalorder %s5495_s12, 3  ;;  %s303_s20 = sshll.u32 %s9115_s5, 4  ;;  %s304_s20 = int_to_ptr.hbm [resolvable:$true] %s303_s20 }
   0xd   : > { %s5505_s21 = smov [#allocation12]   ;;  %s331_s26 = sshll.u32 %s9117_s7, 4  ;;  %s332_s26 = int_to_ptr.hbm [resolvable:$true] %s331_s26 }
   0xe   : > { %p5600_p3 = pnand %p4974_p0, %p252_p2  ;;  %s305_s22 = sshll.u32 %s5505_s21, 4  ;;  %s306_s22 = int_to_ptr.vmem [resolvable:$true] %s305_s22 }
   0xf   : > { %s5506_s27 = smov [#allocation6]   ;;  %s9120_s28 = smov 128  }
  0x10   : > { %p5105_p4 = pneg %p5600_p3  ;;  %s9121_s29 = smov 8  }
  0x11   : > { %s9156_s0 = sld [smem:[#allocation74_spill]]  ;;  %s5509_s19 = smov [#allocation15]  }
  0x12   : > { %p5611_p5 = pnand %p5105_p4, %p132_p1  ;;  %s333_s21 = sshll.u32 %s5509_s19, 4  ;;  %s334_s21 = int_to_ptr.vmem [resolvable:$true] %s333_s21 }
  0x13   : > { %s294_s13 = sshll.u32 %s9113_s3, 4  ;;  %s5511_s14 = smov [#allocation8]   ;;  %s295_s13 = int_to_ptr.hbm [resolvable:$true] %s294_s13 }
  0x14   : > { %5111 = dma.hbm_to_smem (!%p5611_p5), %s275_s15, 16, %s5506_s27, [#allocation7]  }
  0x15   : > { %5120 = dma.hbm_to_vmem [thread:$0]  (!%p5611_p5), %s304_s20, 640, %s306_s22, [#allocation13], %s9120_s28, %s9120_s28, %s9121_s29  }
  0x16   : > { %5126 = dma.hbm_to_vmem [thread:$0]  (!%p5611_p5), %s332_s26, 384, %s334_s21, [#allocation16], %s9120_s28, %s9120_s28, %s9121_s29  }
  0x17   : > { %s264_s18 = sshll.u32 %s9156_s0, 4  ;;  %s5510_s15 = smov [#allocation3]   ;;  %s265_s18 = int_to_ptr.hbm [resolvable:$true] %s264_s18 }
  0x18   : > { %5108 = dma.hbm_to_smem (!%p5611_p5), %s265_s18, 32, %s5510_s15, [#allocation5]  }
  0x19   : > { %s284_s22 = sshll.u32 %s9112_s2, 4  ;;  %s5512_s26 = smov [#allocation9]   ;;  %s285_s22 = int_to_ptr.hbm [resolvable:$true] %s284_s22 }
  0x1a   : > { %5114 = dma.hbm_to_smem (!%p5611_p5), %s285_s22, 144, %s5511_s14, [#allocation7]  }
  0x1b   : > { %5117 = dma.hbm_to_smem (!%p5611_p5), %s295_s13, 16, %s5512_s26, [#allocation10]  }
  0x1c   : > { %s317_s21 = sshll.u32 %s9116_s6, 4  ;;  %s5513_s15 = smov [#allocation14]   ;;  %s318_s21 = int_to_ptr.hbm [resolvable:$true] %s317_s21 }
  0x1d   : > { %s319_s24 = sshll.u32 %s5513_s15, 4  ;;  %s345_s25 = sshll.u32 %s9118_s8, 4  ;;  %s320_s24 = int_to_ptr.vmem [resolvable:$true] %s319_s24  ;;  %s346_s25 = int_to_ptr.hbm [resolvable:$true] %s345_s25 }
  0x1e   : > { %5123 = dma.hbm_to_vmem [thread:$0]  (!%p5611_p5), %s318_s21, 1792, %s320_s24, [#allocation13], %s9120_s28, %s9120_s28, %s9121_s29  }
  0x1f   : > { %s5514_s27 = smov [#allocation17]   ;;  %s5662_s14 = sadd.s32 1, %s5495_s12  }
  0x20   : > { %s347_s13 = sshll.u32 %s5514_s27, 4  ;;  %s118_s26 = sadd.s32 1, %s5491_s11  ;;  %s348_s13 = int_to_ptr.vmem [resolvable:$true] %s347_s13 }
  0x21   : > { %5129 = dma.hbm_to_vmem [thread:$0]  (!%p5611_p5), %s346_s25, 640, %s348_s13, [#allocation16], %s9120_s28, %s9120_s28, %s9121_s29  }
  0x22   : > { %s115_s18 = ssub.s32 %s5495_s12, %s5662_s14  ;;  %p125_p6 = scmp.ne.s32.totalorder %s5491_s11, %s5487_s10 }
  0x23   : > { %p116_p7 = scmp.eq.s32.totalorder %s115_s18, 0  ;;  %p126_p8 = scmp.eq.s32.totalorder %s5495_s12, 0 }
  0x24   : > { %p131_p9 = scmp.ne.s32.totalorder %s5487_s10, %s5483_s30  ;;  %p5142_p10 = scmp.lt.s32.totalorder %s5495_s12, 2 }
  0x25   : > { %s5674_s19 = scalar_select %p116_p7, %s5491_s11, %s118_s26  }
  0x26   : > { %p127_p11 = por %p126_p8, %p125_p6  ;;  %p5678_p12 = por %p132_p1, %p131_p9 }
  0x27   : > { %s361_s21 = sand.u32 1, %s5491_s11   ;;  %s5068_s15 = smul.u32 112, %s5495_s12 }
  0x28   : > { %s5067_s24 = smul.u32 112, %s361_s21  ;;  %p5687_p13 = pnand %p5142_p10, %p127_p11 }
  0x29   : > { %s370_s25 = scalar_lea.hbm %s9114_s4, %s5068_s15  ;;  %s362_s18 = scalar_lea.sflag [#allocation4], %s361_s21 }
  0x2a   : > { %s371_s30 = sshll.u32 %s370_s25, 4  ;;  %s365_s13 = scalar_lea.vmem [#allocation11], %s5067_s24  ;;  %s372_s30 = int_to_ptr.hbm [resolvable:$true] %s371_s30 }
  0x2b   : > { %s373_s26 = sshll.u32 %s365_s13, 4  ;;  %s5403_s28 = sshra.s32 %s372_s30, 4  ;;  %s374_s26 = int_to_ptr.vmem [resolvable:$true] %s373_s26  ;;  %s5404_s28 = int_to_ptr.hbm [resolvable:$true] %s5403_s28 }
  0x2c   : > { %s5405_s29 = scalar_lea.hbm %s5404_s28, 112  ;;  %p5407_p2 = pneg %p5687_p13 }
  0x2d   : > { %p5406_p0 = scmp.ne.s32.totalorder %s5404_s28, %s5405_s29  ;;  %s5410_s20 = scalar_lea.hbm %s9114_s4, 224 }
  0x2e   : > { %p5411_p6 = scmp.lt.s32.totalorder %s5404_s28, %s9114_s4  ;;  %p5412_p7 = scmp.lt.s32.totalorder %s5410_s20, %s5405_s29 }
  0x2f   : > { %p5408_p4 = pnand %p5407_p2, %p5406_p0 }
  0x30   : > { %p5413_p8 = por %p5412_p7, %p5411_p6 }
  0x31   : > { %p5409_p5 = pneg %p5408_p4 }
  0x33   : > { %p5414_p9 = pnand %p5413_p8, %p5409_p5 }
  0x35   : > { %5417 = shalt.err (!%p5414_p9)
}
  0x36   : > { %s9159_s21 = smov 8   ;;  %s9160_s24 = smov 128  }
  0x37   : > { %5133 = dma.hbm_to_vmem [thread:$0]  (!%p5687_p13), %s372_s30, 1792, %s374_s26, %s362_s18, %s9160_s24, %s9160_s24, %s9159_s21  }
  0x38   : > { %385 = sbr.rel (%p5600_p3) target bundleno = 2317 (0x90d), region = 56 }
  0x3d   : > { %5458 = dma.done.wait (%p132_p1), [#allocation5], 32  }
  0x3e   : > { %5460 = vsyncadd (%p132_p1), [#allocation5], 4294967264 }
  0x3f   : > { %5462 = dma.done.wait (%p132_p1), [#allocation7], 160  }
  0x40   : > { %5464 = vsyncadd (%p132_p1), [#allocation7], 4294967136 }
  0x41   : > { %5466 = dma.done.wait (%p132_p1), [#allocation10], 16  }
  0x42   : > { %5468 = vsyncadd (%p132_p1), [#allocation10], 4294967280  ;;  %s407_s0 = sand.u32 1, %s5487_s10  }
  0x43   : > { %s5069_s17 = smul.u32 112, %s407_s0  ;;  %s408_s28 = scalar_lea.sflag [#allocation4], %s407_s0 }
  0x45   : > { %s5719_s29 = scalar_lea.vmem [#allocation11], %s5069_s17 }
  0x46   : > { %5470 = dma.done.wait (%p5678_p12), %s408_s28, 1792  }
  0x47   : > { %5472 = vsyncadd (%p5678_p12), %s408_s28, 4294965504 }
  0x48   : > { %5474 = dma.done.wait (%p132_p1), [#allocation13], 2432  }
  0x49   : > { %5476 = vsyncadd (%p132_p1), [#allocation13], 4294964864 }
  0x4a   : > { %5478 = dma.done.wait (%p132_p1), [#allocation16], 1024  }
  0x4b   : > { %5480 = vsyncadd (%p132_p1), [#allocation16], 4294966272 }
  0x4c   : > { %437 = sfence }
  0x4d   : > { %p468_p3 = scmp.lt.s32.totalorder %s5595_s16, 1  ;;  %v5734_v0 = vld [vmem:[#allocation12] sm:$0xff]  ;;  %v5736_v1 = vld [vmem:[#allocation12 + $0x8] sm:$0xff]  ;;  %v5738_v2 = vld [vmem:[#allocation12 + $0x10] sm:$0xff] }
  0x4e   : > { %9161 = vst [vmem:[#allocation24_spill] sm:$0xff] %v5734_v0  ;;  %v5740_v3 = vld [vmem:[#allocation12 + $0x18] sm:$0xff]  ;;  %v5742_v4 = vld [vmem:[#allocation12 + $0x20] sm:$0xf]  ;;  %v5744_v5 = vld [vmem:[#allocation14] sm:$0xff] }
  0x4f   : > { %9162 = vst [vmem:[#allocation25_spill] sm:$0xff] %v5736_v1  ;;  %s9287_s16 = smov (!%p468_p3, %s5595_s16), 1  ;;  %v5747_v6 = vld [vmem:[#allocation14 + $0x8] sm:$0xff]  ;;  %v5749_v7 = vld [vmem:[#allocation14 + $0x10] sm:$0xff]  ;;  %v5751_v8 = vld [vmem:[#allocation14 + $0x18] sm:$0xff] }
  0x50   : > { %9163 = vst [vmem:[#allocation26_spill] sm:$0xff] %v5738_v2  ;;  %v5753_v9 = vld [vmem:[#allocation14 + $0x20] sm:$0xff]  ;;  %v5755_v10 = vld [vmem:[#allocation14 + $0x28] sm:$0xff]  ;;  %v5757_v11 = vld [vmem:[#allocation14 + $0x30] sm:$0xff]  ;;  %s5070_s23 = smul.u32 384, %s9287_s16  ;;  %s5794_s16 = smov 0  }
  0x51   : > { %9164 = vst [vmem:[#allocation27_spill] sm:$0xff] %v5740_v3  ;;  %v5759_v12 = vld [vmem:[#allocation14 + $0x38] sm:$0xff]  ;;  %v5761_v13 = vld [vmem:[#allocation14 + $0x40] sm:$0xff]  ;;  %v5763_v14 = vld [vmem:[#allocation14 + $0x48] sm:$0xff] }
  0x52   : > { %9165 = vst [vmem:[#allocation28_spill] sm:$0xff] %v5742_v4  ;;  %v5765_v15 = vld [vmem:[#allocation14 + $0x50] sm:$0xff]  ;;  %v5767_v16 = vld [vmem:[#allocation14 + $0x58] sm:$0xff]  ;;  %v5769_v17 = vld [vmem:[#allocation14 + $0x60] sm:$0xff]  ;;  %s5774_s30 = scalar_lea.vmem %s9119_s9, %s5070_s23 }
  0x53   : > { %9166 = vst [vmem:[#allocation29_spill] sm:$0xff] %v5744_v5  ;;  %v5776_v18 = vld [vmem:[#allocation14 + $0x68] sm:$0xf]  ;;  %v5778_v19 = vld [vmem:[#allocation15] sm:$0xff]  ;;  %v5780_v20 = vld [vmem:[#allocation15 + $0x8] sm:$0xff] }
  0x54   : > { %9167 = vst [vmem:[#allocation30_spill] sm:$0xff] %v5747_v6  ;;  %v5782_v21 = vld [vmem:[#allocation15 + $0x10] sm:$0x1]  ;;  %v5784_v22 = vld [vmem:[#allocation17] sm:$0xff]  ;;  %v5786_v23 = vld [vmem:[#allocation17 + $0x8] sm:$0xff] }
  0x55   : > { %9168 = vst [vmem:[#allocation31_spill] sm:$0xff] %v5749_v7  ;;  %v5788_v24 = vld [vmem:[#allocation17 + $0x10] sm:$0xff]  ;;  %v5790_v25 = vld [vmem:[#allocation17 + $0x18] sm:$0xff]  ;;  %v5792_v26 = vld [vmem:[#allocation17 + $0x20] sm:$0x3] }
  0x56   : > { %9169 = vst [vmem:[#allocation32_spill] sm:$0xff] %v5751_v8 }
  0x57   : > { %9170 = vst [vmem:[#allocation33_spill] sm:$0xff] %v5753_v9 }
  0x58   : > { %9171 = vst [vmem:[#allocation34_spill] sm:$0xff] %v5755_v10 }
  0x59   : > { %9172 = vst [vmem:[#allocation35_spill] sm:$0xff] %v5757_v11 }
  0x5a   : > { %9173 = vst [vmem:[#allocation36_spill] sm:$0xff] %v5759_v12 }
  0x5b   : > { %9174 = vst [vmem:[#allocation37_spill] sm:$0xff] %v5761_v13 }
  0x5c   : > { %9175 = vst [vmem:[#allocation38_spill] sm:$0xff] %v5763_v14 }
  0x5d   : > { %9176 = vst [vmem:[#allocation39_spill] sm:$0xff] %v5765_v15 }
  0x5e   : > { %9177 = vst [vmem:[#allocation40_spill] sm:$0xff] %v5767_v16 }
  0x5f   : > { %9178 = vst [vmem:[#allocation41_spill] sm:$0xff] %v5769_v17 }
  0x60   : > { %9179 = vst [vmem:[#allocation42_spill] sm:$0xff] %v5776_v18 }
  0x61   : > { %9180 = vst [vmem:[#allocation43_spill] sm:$0xff] %v5778_v19 }
  0x62   : > { %9181 = vst [vmem:[#allocation44_spill] sm:$0xff] %v5780_v20 }
  0x63   : > { %9182 = vst [vmem:[#allocation45_spill] sm:$0xff] %v5782_v21 }
  0x64   : > { %9183 = vst [vmem:[#allocation46_spill] sm:$0xff] %v5784_v22 }
  0x65   : > { %9184 = vst [vmem:[#allocation47_spill] sm:$0xff] %v5786_v23 }
  0x66   : > { %9185 = vst [vmem:[#allocation48_spill] sm:$0xff] %v5788_v24 }
  0x67   : > { %9186 = vst [vmem:[#allocation49_spill] sm:$0xff] %v5790_v25 }
  0x68   : > { %9187 = vst [vmem:[#allocation50_spill] sm:$0xff] %v5792_v26 }
  0x69 LB: >> { %s5800_s13 = smul.u32 25, %s5499_s16  ;;  %v5804_v27 = vld [vmem:[%s5719_s29 + $0x20] sm:$0xff]  ;;  %v5807_v28 = vld [vmem:[%s5719_s29 + $0x10] sm:$0xff]  ;;  %s5515_s12 = smov 127   ;;  %v5819_v34 = vld [vmem:[%s5719_s29 + $0x28] sm:$0xff]  ;;  %vm2514_vm0 = vcmask 1043456   ;;  %s5499_s16 = sphi %s5794_s16, %s505_s16  }
  0x6a   : >> { %v5810_v29 = vld [vmem:[%s5719_s29] sm:$0xff]  ;;  %v5822_v35 = vld [vmem:[%s5719_s29 + $0x18] sm:$0xff]  ;;  %v5825_v36 = vld [vmem:[%s5719_s29 + $0x8] sm:$0xff]  ;;  %s5516_s22 = smov 126   ;;  %s5517_s0 = smov 125   ;;  %vm2471_vm1 = vcmask 883712  }
  0x6b   : >> { %s551_s26 = sadd.s32 1, %s5800_s13  ;;  %v5834_v40 = vld [vmem:[%s5719_s29 + $0x40] sm:$0xff]  ;;  %v5837_v41 = vld [vmem:[%s5719_s29 + $0x38] sm:$0xff]  ;;  %v5840_v42 = vld [vmem:[%s5719_s29 + $0x30] sm:$0xff]  ;;  %s638_s15 = sadd.s32 2, %s5800_s13  ;;  %vm2641_vm2 = vcmask 293888  }
  0x6c   : >> { %s552_s18 = sld [smem:[#allocation3 + %s551_s26]]  ;;  %v5850_v46 = vld [vmem:[%s5719_s29 + $0x58] sm:$0xff]  ;;  %v5853_v47 = vld [vmem:[%s5719_s29 + $0x50] sm:$0xff]  ;;  %v5856_v48 = vld [vmem:[%s5719_s29 + $0x48] sm:$0xff]  ;;  %s725_s21 = sadd.s32 3, %s5800_s13  ;;  %vm2646_vm3 = vcmask 289792  }
  0x6d   : >> { %s639_s20 = sld [smem:[#allocation3 + %s638_s15]]  ;;  %v5865_v53 = vld [vmem:[%s5719_s29 + $0x68] sm:$0xf]  ;;  %v5868_v54 = vld [vmem:[%s5719_s29 + $0x60] sm:$0xff]  ;;  %s812_s17 = sadd.s32 4, %s5800_s13  ;;  %v6024_v19 = vld [vmem:[%s5719_s29 + $0x31] sm:$0xff] }
  0x6e   : >> { %9188 = vst [vmem:[#allocation51_spill] sm:$0xff] %v5868_v54  ;;  %s726_s24 = sld [smem:[#allocation3 + %s725_s21]]  ;;  %s5518_s23 = smov 124   ;;  %v6010_v21 = vld [vmem:[%s5719_s29 + $0x9] sm:$0xff]  ;;  %v6034_v24 = vld [vmem:[%s5719_s29 + $0x21] sm:$0xff]  ;;  %v6058_v1 = vld [vmem:[%s5719_s29 + $0x39] sm:$0xff] }
  0x6f   : >> { %s813_s28 = sld [smem:[#allocation3 + %s812_s17]]  ;;  %s944_s25 = sadd.s32 6, %s5800_s13  ;;  %v6027_v20 = vld [vmem:[%s5719_s29 + $0x29] sm:$0xff]  ;;  %v6051_v4 = vld [vmem:[%s5719_s29 + $0x41] sm:$0xff]  ;;  %v6076_v6 = vld [vmem:[%s5719_s29 + $0x59] sm:$0xff] }
  0x70   : >> { %s945_s27 = sld [smem:[#allocation3 + %s944_s25]]  ;;  %v6048_v26 = vld [vmem:[%s5719_s29 + $0x49] sm:$0xff]  ;;  %s1031_s26 = sadd.s32 7, %s5800_s13  ;;  %v6073_v5 = vld [vmem:[%s5719_s29 + $0x61] sm:$0xff]  ;;  %v6083_v9 = vld [vmem:[%s5719_s29 + $0x51] sm:$0xff] }
  0x71   : >> { %v6103_v14 = vld [vmem:[%s5719_s29 + $0x69] sm:$0xf]  ;;  %s507_s15 = sld [smem:[#allocation3 + %s5800_s13]] }
  0x72   : >> { %v553_v30 = vstv %s552_s18  ;;  %s1032_s18 = sld [smem:[#allocation3 + %s1031_s26]] }
  0x73   : >> { %v558_v31 = vmul.f32 %v553_v30, %v5804_v27  ;;  %v556_v32 = vmul.f32 %v553_v30, %v5807_v28  ;;  %v554_v33 = vmul.f32 %v553_v30, %v5810_v29  ;;  %v559_v37 = vmul.f32 %v553_v30, %v5819_v34 }
  0x74   : >> { %v557_v38 = vmul.f32 %v553_v30, %v5822_v35  ;;  %v555_v39 = vmul.f32 %v553_v30, %v5825_v36  ;;  %v562_v43 = vmul.f32 %v553_v30, %v5834_v40  ;;  %v561_v44 = vmul.f32 %v553_v30, %v5837_v41 }
  0x75   : >> { %590 = vrot.lane.b32.xlu2 %v558_v31, %s5515_s12  ;;  %586 = vrot.lane.b32.xlu1 %v556_v32, %s5515_s12  ;;  %v560_v45 = vmul.f32 %v553_v30, %v5840_v42  ;;  %v565_v49 = vmul.f32 %v553_v30, %v5850_v46  ;;  %v564_v50 = vmul.f32 %v553_v30, %v5853_v47  ;;  %v640_v52 = vstv %s639_s20  ;;  %s899_s20 = sadd.s32 5, %s5800_s13 }
  0x76   : >> { %582 = vrot.lane.b32.xlu0 %v554_v33, %s5515_s12  ;;  %v563_v51 = vmul.f32 %v553_v30, %v5856_v48  ;;  %v641_v55 = vmul.f32 %v640_v52, %v5810_v29  ;;  %v567_v56 = vmul.f32 %v553_v30, %v5865_v53  ;;  %v566_v57 = vmul.f32 %v553_v30, %v5868_v54  ;;  %s900_s21 = sld [smem:[#allocation3 + %s899_s20]]  ;;  %s1292_s20 = sadd.s32 10, %s5800_s13 }
  0x77   : >> { %v644_v58 = vmul.f32 %v640_v52, %v5822_v35  ;;  %v643_v59 = vmul.f32 %v640_v52, %v5807_v28  ;;  %v642_v60 = vmul.f32 %v640_v52, %v5825_v36  ;;  %v647_v61 = vmul.f32 %v640_v52, %v5840_v42 }
  0x78   : >> { %v646_v62 = vmul.f32 %v640_v52, %v5819_v34  ;;  %v645_v63 = vmul.f32 %v640_v52, %v5804_v27  ;;  %v650_v30 = vmul.f32 %v640_v52, %v5856_v48  ;;  %v649_v31 = vmul.f32 %v640_v52, %v5834_v40 }
  0x79   : >> { %v648_v32 = vmul.f32 %v640_v52, %v5837_v41  ;;  %v653_v33 = vmul.f32 %v640_v52, %v5868_v54  ;;  %v6096_v11 = vstv %s1032_s18  ;;  %s1424_s18 = sadd.s32 12, %s5800_s13 }
  0x7a   : >> { %v1035_v16 = vmul.f32 %v6096_v11, %v6010_v21 }
  0x7d   : >> { %592 = vrot.lane.b32.xlu2 %v559_v37, %s5515_s12  ;;  %588 = vrot.lane.b32.xlu1 %v557_v38, %s5515_s12  ;;  %v652_v37 = vmul.f32 %v640_v52, %v5850_v46  ;;  %v651_v38 = vmul.f32 %v640_v52, %v5853_v47 }
  0x7e   : >> { %584 = vrot.lane.b32.xlu0 %v555_v39, %s5515_s12  ;;  %v727_v39 = vstv %s726_s24  ;;  %s1118_s24 = sadd.s32 8, %s5800_s13 }
  0x7f   : >> { %s1119_s17 = sld [smem:[#allocation3 + %s1118_s24]]  ;;  %s1511_s24 = sadd.s32 13, %s5800_s13 }
  0x85   : >> { %598 = vrot.lane.b32.xlu2 %v562_v43, %s5515_s12  ;;  %596 = vrot.lane.b32.xlu1 %v561_v44, %s5515_s12  ;;  %v729_v43 = vmul.f32 %v727_v39, %v5825_v36  ;;  %v728_v44 = vmul.f32 %v727_v39, %v5810_v29 }
  0x86   : >> { %594 = vrot.lane.b32.xlu0 %v560_v45, %s5515_s12  ;;  %v654_v45 = vmul.f32 %v640_v52, %v5865_v53  ;;  %v735_v52 = vmul.f32 %v727_v39, %v5837_v41 }
  0x8d   : >> { %604 = vrot.lane.b32.xlu2 %v565_v49, %s5515_s12  ;;  %602 = vrot.lane.b32.xlu1 %v564_v50, %s5515_s12  ;;  %v732_v49 = vmul.f32 %v727_v39, %v5804_v27  ;;  %v731_v50 = vmul.f32 %v727_v39, %v5822_v35 }
  0x8e   : >> { %600 = vrot.lane.b32.xlu0 %v563_v51, %s5515_s12  ;;  %v730_v51 = vmul.f32 %v727_v39, %v5807_v28 }
  0x95   : >> { %669 = vrot.lane.b32.xlu2 %v641_v55, %s5516_s22  ;;  %608 = vrot.lane.b32.xlu1 %v567_v56, %s5515_s12  ;;  %v734_v55 = vmul.f32 %v727_v39, %v5840_v42  ;;  %v733_v56 = vmul.f32 %v727_v39, %v5819_v34 }
  0x96   : >> { %606 = vrot.lane.b32.xlu0 %v566_v57, %s5515_s12 }
  0x9d   : >> { %675 = vrot.lane.b32.xlu2 %v644_v58, %s5516_s22  ;;  %673 = vrot.lane.b32.xlu1 %v643_v59, %s5516_s22  ;;  %v738_v58 = vmul.f32 %v727_v39, %v5853_v47  ;;  %v737_v59 = vmul.f32 %v727_v39, %v5856_v48 }
  0x9e   : >> { %671 = vrot.lane.b32.xlu0 %v642_v60, %s5516_s22  ;;  %v736_v60 = vmul.f32 %v727_v39, %v5834_v40 }
  0xa5   : >> { %681 = vrot.lane.b32.xlu2 %v647_v61, %s5516_s22  ;;  %679 = vrot.lane.b32.xlu1 %v646_v62, %s5516_s22  ;;  %v741_v62 = vmul.f32 %v727_v39, %v5865_v53 }
  0xa6   : >> { %677 = vrot.lane.b32.xlu0 %v645_v63, %s5516_s22  ;;  %v740_v63 = vmul.f32 %v727_v39, %v5868_v54 }
  0xad   : >> { %687 = vrot.lane.b32.xlu2 %v650_v30, %s5516_s22  ;;  %685 = vrot.lane.b32.xlu1 %v649_v31, %s5516_s22  ;;  %v739_v30 = vmul.f32 %v727_v39, %v5850_v46  ;;  %v814_v31 = vstv %s813_s28  ;;  %s1205_s28 = sadd.s32 9, %s5800_s13 }
  0xae   : >> { %683 = vrot.lane.b32.xlu0 %v648_v32, %s5516_s22  ;;  %s1206_s25 = sld [smem:[#allocation3 + %s1205_s28]]  ;;  %s1598_s28 = sadd.s32 14, %s5800_s13 }
  0xb5   : >> { %693 = vrot.lane.b32.xlu2 %v653_v33, %s5516_s22  ;;  %691 = vrot.lane.b32.xlu1 %v652_v37, %s5516_s22  ;;  %v817_v33 = vmul.f32 %v814_v31, %v5807_v28  ;;  %v816_v37 = vmul.f32 %v814_v31, %v5825_v36 }
  0xb6   : >> { %689 = vrot.lane.b32.xlu0 %v651_v38, %s5516_s22  ;;  %v815_v38 = vmul.f32 %v814_v31, %v5810_v29 }
  0xbd   : >> { %758 = vrot.lane.b32.xlu2 %v729_v43, %s5517_s0  ;;  %756 = vrot.lane.b32.xlu1 %v728_v44, %s5517_s0 }
  0xbe   : >> { %695 = vrot.lane.b32.xlu0 %v654_v45, %s5516_s22  ;;  %v820_v45 = vmul.f32 %v814_v31, %v5819_v34 }
  0xc5   : >> { %764 = vrot.lane.b32.xlu2 %v732_v49, %s5517_s0  ;;  %762 = vrot.lane.b32.xlu1 %v731_v50, %s5517_s0  ;;  %v819_v49 = vmul.f32 %v814_v31, %v5804_v27  ;;  %v818_v50 = vmul.f32 %v814_v31, %v5822_v35 }
  0xc6   : >> { %760 = vrot.lane.b32.xlu0 %v730_v51, %s5517_s0 }
  0xcd   : >> { %770 = vrot.lane.b32.xlu2 %v735_v52, %s5517_s0  ;;  %768 = vrot.lane.b32.xlu1 %v734_v55, %s5517_s0 }
  0xce   : >> { %766 = vrot.lane.b32.xlu0 %v733_v56, %s5517_s0  ;;  %v823_v56 = vmul.f32 %v814_v31, %v5834_v40 }
  0xcf   : >> { %v5919_v57 = vpop.permute.xlu2 %590 }
  0xd5   : >> { %776 = vrot.lane.b32.xlu2 %v738_v58, %s5517_s0  ;;  %774 = vrot.lane.b32.xlu1 %v737_v59, %s5517_s0  ;;  %v822_v58 = vmul.f32 %v814_v31, %v5837_v41  ;;  %v821_v59 = vmul.f32 %v814_v31, %v5840_v42 }
  0xd6   : >> { %772 = vrot.lane.b32.xlu0 %v736_v60, %s5517_s0 }
  0xd7   : >> { %v5928_v61 = vpop.permute.xlu2 %592 }
  0xdd   : >> { %782 = vrot.lane.b32.xlu2 %v741_v62, %s5517_s0  ;;  %780 = vrot.lane.b32.xlu1 %v740_v63, %s5517_s0 }
  0xde   : >> { %778 = vrot.lane.b32.xlu0 %v739_v30, %s5517_s0  ;;  %v826_v30 = vmul.f32 %v814_v31, %v5850_v46 }
  0xdf   : >> { %v5936_v32 = vpop.permute.xlu2 %598 }
  0xe5   : >> { %847 = vrot.lane.b32.xlu2 %v817_v33, %s5518_s23  ;;  %845 = vrot.lane.b32.xlu1 %v816_v37, %s5518_s23  ;;  %v825_v33 = vmul.f32 %v814_v31, %v5853_v47  ;;  %v824_v37 = vmul.f32 %v814_v31, %v5856_v48 }
  0xe6   : >> { %843 = vrot.lane.b32.xlu0 %v815_v38, %s5518_s23  ;;  %v5982_v38 = vld [vmem:[%s5719_s29 + $0x1] sm:$0xff] }
  0xe7   : >> { %v5944_v39 = vpop.permute.xlu2 %604  ;;  %v5946_v43 = vpop.permute.xlu1 %586 }
  0xe8   : >> { %v5948_v44 = vpop.permute.xlu0 %582 }
  0xed   : >> { %853 = vrot.lane.b32.xlu2 %v820_v45, %s5518_s23  ;;  %851 = vrot.lane.b32.xlu1 %v819_v49, %s5518_s23  ;;  %v5984_v45 = vstv %s945_s27  ;;  %s1337_s27 = sadd.s32 11, %s5800_s13 }
  0xee   : >> { %849 = vrot.lane.b32.xlu0 %v818_v50, %s5518_s23  ;;  %v947_v48 = vmul.f32 %v5984_v45, %v5982_v38  ;;  %s1338_s26 = sld [smem:[#allocation3 + %s1337_s27]]  ;;  %s1817_s27 = sadd.s32 17, %s5800_s13 }
  0xef   : >> { %v5956_v51 = vpop.permute.xlu2 %669  ;;  %v5958_v52 = vpop.permute.xlu1 %588 }
  0xf0   : >> { %v5960_v55 = vpop.permute.xlu0 %584 }
  0xf5   : >> { %859 = vrot.lane.b32.xlu2 %v823_v56, %s5518_s23  ;;  %857 = vrot.lane.b32.xlu1 %v822_v58, %s5518_s23  ;;  %v828_v56 = vmul.f32 %v814_v31, %v5865_v53  ;;  %v827_v58 = vmul.f32 %v814_v31, %v5868_v54 }
  0xf6   : >> { %855 = vrot.lane.b32.xlu0 %v821_v59, %s5518_s23  ;;  %v6000_v59 = vld [vmem:[%s5719_s29 + $0x19] sm:$0xff] }
  0xf7   : >> { %v5969_v60 = vpop.permute.xlu2 %675  ;;  %v5971_v62 = vpop.permute.xlu1 %596 }
  0xf8   : >> { %v5973_v63 = vpop.permute.xlu0 %594 }
  0xfd   : >> { %865 = vrot.lane.b32.xlu2 %v826_v30, %s5518_s23  ;;  %863 = vrot.lane.b32.xlu1 %v825_v33, %s5518_s23  ;;  %v6003_v30 = vld [vmem:[%s5719_s29 + $0x11] sm:$0xff] }
  0xfe   : >> { %861 = vrot.lane.b32.xlu0 %v824_v37, %s5518_s23 }
  0xff   : >> { %v5986_v49 = vpop.permute.xlu2 %681  ;;  %v5988_v50 = vpop.permute.xlu1 %602 }
 0x100   : >> { %9189 = vst [vmem:[#allocation52_spill] sm:$0xff] %v5988_v50  ;;  %v5990_v47 = vpop.permute.xlu0 %600 }
 0x101   : >> { %9190 = vst [vmem:[#allocation53_spill] sm:$0xff] %v5990_v47  ;;  %v1041_v47 = vmul.f32 %v6096_v11, %v6058_v1 }
 0x105   : >> { %975 = vrot.lane.b32.xlu2 %v947_v48, %s5515_s12  ;;  %869 = vrot.lane.b32.xlu1 %v828_v56, %s5518_s23  ;;  %v950_v48 = vmul.f32 %v5984_v45, %v6000_v59  ;;  %v949_v56 = vmul.f32 %v5984_v45, %v6003_v30 }
 0x106   : >> { %867 = vrot.lane.b32.xlu0 %v827_v58, %s5518_s23  ;;  %v948_v58 = vmul.f32 %v5984_v45, %v6010_v21 }
 0x107   : >> { %v6005_v33 = vpop.permute.xlu2 %687  ;;  %v6007_v37 = vpop.permute.xlu1 %608 }
 0x108   : >> { %9191 = vst [vmem:[#allocation54_spill] sm:$0xff] %v6005_v33  ;;  %v6012_v31 = vpop.permute.xlu0 %606 }
 0x109   : >> { %9192 = vst [vmem:[#allocation55_spill] sm:$0xff] %v6007_v37 }
 0x10a   : >> { %9193 = vst [vmem:[#allocation56_spill] sm:$0xff] %v6012_v31 }
 0x10d   : >> { %981 = vrot.lane.b32.xlu2 %v950_v48, %s5515_s12  ;;  %979 = vrot.lane.b32.xlu1 %v949_v56, %s5515_s12  ;;  %v953_v48 = vmul.f32 %v5984_v45, %v6024_v19  ;;  %v952_v56 = vmul.f32 %v5984_v45, %v6027_v20 }
 0x10e   : >> { %977 = vrot.lane.b32.xlu0 %v948_v58, %s5515_s12  ;;  %v951_v58 = vmul.f32 %v5984_v45, %v6034_v24 }
 0x10f   : >> { %v6029_v22 = vpop.permute.xlu2 %693  ;;  %v6031_v23 = vpop.permute.xlu1 %673 }
 0x110   : >> { %9194 = vst [vmem:[#allocation57_spill] sm:$0xff] %v6029_v22  ;;  %v6036_v25 = vpop.permute.xlu0 %671  ;;  %v1040_v22 = vmul.f32 %v6096_v11, %v6024_v19 }
 0x115   : >> { %987 = vrot.lane.b32.xlu2 %v953_v48, %s5515_s12  ;;  %985 = vrot.lane.b32.xlu1 %v952_v56, %s5515_s12  ;;  %v956_v48 = vmul.f32 %v5984_v45, %v6048_v26  ;;  %v955_v56 = vmul.f32 %v5984_v45, %v6051_v4 }
 0x116   : >> { %983 = vrot.lane.b32.xlu0 %v951_v58, %s5515_s12  ;;  %v954_v58 = vmul.f32 %v5984_v45, %v6058_v1 }
 0x117   : >> { %v6053_v3 = vpop.permute.xlu2 %758  ;;  %v6055_v2 = vpop.permute.xlu1 %679 }
 0x118   : >> { %v6060_v0 = vpop.permute.xlu0 %677 }
 0x11d   : >> { %993 = vrot.lane.b32.xlu2 %v956_v48, %s5515_s12  ;;  %991 = vrot.lane.b32.xlu1 %v955_v56, %s5515_s12  ;;  %v959_v48 = vmul.f32 %v5984_v45, %v6073_v5  ;;  %v958_v56 = vmul.f32 %v5984_v45, %v6076_v6 }
 0x11e   : >> { %989 = vrot.lane.b32.xlu0 %v954_v58, %s5515_s12  ;;  %v957_v58 = vmul.f32 %v5984_v45, %v6083_v9 }
 0x11f   : >> { %v6078_v7 = vpop.permute.xlu2 %764  ;;  %v6080_v8 = vpop.permute.xlu1 %685 }
 0x120   : >> { %v6085_v10 = vpop.permute.xlu0 %683 }
 0x125   : >> { %999 = vrot.lane.b32.xlu2 %v959_v48, %s5515_s12  ;;  %997 = vrot.lane.b32.xlu1 %v958_v56, %s5515_s12  ;;  %v1034_v48 = vmul.f32 %v6096_v11, %v5982_v38  ;;  %v960_v56 = vmul.f32 %v5984_v45, %v6103_v14  ;;  %v1037_v45 = vmul.f32 %v6096_v11, %v6000_v59 }
 0x126   : >> { %995 = vrot.lane.b32.xlu0 %v957_v58, %s5515_s12 }
 0x127   : >> { %v6098_v12 = vpop.permute.xlu2 %770  ;;  %v6100_v13 = vpop.permute.xlu1 %691 }
 0x128   : >> { %v6105_v15 = vpop.permute.xlu0 %689 }
 0x129   : >> { %9195 = vst [vmem:[#allocation58_spill] sm:$0xff] %v6105_v15  ;;  %v1038_v15 = vmul.f32 %v6096_v11, %v6034_v24 }
 0x12d   : >> { %1064 = vrot.lane.b32.xlu2 %v1035_v16, %s5516_s22  ;;  %1062 = vrot.lane.b32.xlu1 %v1034_v48, %s5516_s22  ;;  %v1036_v16 = vmul.f32 %v6096_v11, %v6003_v30  ;;  %v6130_v48 = vstv %s507_s15  ;;  %s1425_s15 = sld [smem:[#allocation3 + %s1424_s18]] }
 0x12e   : >> { %1001 = vrot.lane.b32.xlu0 %v960_v56, %s5515_s12  ;;  %9198 = vst [vmem:[#allocation61_spill] sm:$0xff] %v6130_v48  ;;  %v525_v56 = vmul.f32 %v6130_v48, %v5807_v28  ;;  %s1818_s18 = sld [smem:[#allocation3 + %s1817_s27]]  ;;  %s2210_s27 = sadd.s32 22, %s5800_s13 }
 0x12f   : >> { %v6117_v58 = vpop.permute.xlu2 %776  ;;  %v6119_v17 = vpop.permute.xlu1 %756 }
 0x130   : >> { %9196 = vst [vmem:[#allocation59_spill] sm:$0xff] %v6117_v58  ;;  %v6121_v18 = vpop.permute.xlu0 %695 }
 0x131   : >> { %9197 = vst [vmem:[#allocation60_spill] sm:$0xff] %v6121_v18  ;;  %v6148_v18 = vstv %s900_s21  ;;  %s1293_s21 = sld [smem:[#allocation3 + %s1292_s20]]  ;;  %s1904_s20 = sadd.s32 18, %s5800_s13 }
 0x132   : >> { %9200 = vst [vmem:[#allocation63_spill] sm:$0xff] %v6148_v18 }
 0x135   : >> { %1070 = vrot.lane.b32.xlu2 %v1038_v15, %s5516_s22  ;;  %1068 = vrot.lane.b32.xlu1 %v1037_v45, %s5516_s22  ;;  %v626_v15 = vadd.f32 %v5946_v43, %v525_v56  ;;  %v1039_v45 = vmul.f32 %v6096_v11, %v6027_v20  ;;  %v918_v43 = vmul.f32 %v6148_v18, %v6003_v30 }
 0x136   : >> { %1066 = vrot.lane.b32.xlu0 %v1036_v16, %s5516_s22  ;;  %v528_v16 = vmul.f32 %v6130_v48, %v5819_v34  ;;  %v1042_v34 = vmul.f32 %v6096_v11, %v6051_v4 }
 0x137   : >> { %v6137_v58 = vpop.permute.xlu2 %782  ;;  %v6139_v50 = vpop.permute.xlu1 %762  ;;  %v713_v28 = vadd.f32 %v6031_v23, %v626_v15  ;;  %v1044_v23 = vmul.f32 %v6096_v11, %v6083_v9 }
 0x138   : >> { %9199 = vst [vmem:[#allocation62_spill] sm:$0xff] %v6137_v58  ;;  %v761_v33 = vpop.permute.xlu0 %760 }
 0x139   : >> { %v800_v58 = vadd.f32 %v761_v33, %v713_v28 }
 0x13d   : >> { %1076 = vrot.lane.b32.xlu2 %v1041_v47, %s5516_s22  ;;  %1074 = vrot.lane.b32.xlu1 %v1040_v22, %s5516_s22  ;;  %v1043_v22 = vmul.f32 %v6096_v11, %v6048_v26  ;;  %v629_v47 = vadd.f32 %v5928_v61, %v528_v16  ;;  %v921_v61 = vmul.f32 %v6148_v18, %v6027_v20 }
 0x13e   : >> { %1072 = vrot.lane.b32.xlu0 %v1039_v45, %s5516_s22 }
 0x13f   : >> { %v848_v56 = vpop.permute.xlu2 %847  ;;  %v6158_v31 = vpop.permute.xlu1 %768  ;;  %v716_v15 = vadd.f32 %v6055_v2, %v629_v47  ;;  %v1047_v2 = vmul.f32 %v6096_v11, %v6103_v14  ;;  %v534_v47 = vmul.f32 %v6130_v48, %v5850_v46 }
 0x140   : >> { %v887_v37 = vadd.f32 %v848_v56, %v800_v58  ;;  %v767_v54 = vpop.permute.xlu0 %766  ;;  %v531_v58 = vmul.f32 %v6130_v48, %v5834_v40  ;;  %v1046_v56 = vmul.f32 %v6096_v11, %v6073_v5 }
 0x141   : >> { %v803_v45 = vadd.f32 %v767_v54, %v716_v15  ;;  %v1045_v54 = vmul.f32 %v6096_v11, %v6076_v6  ;;  %v924_v11 = vmul.f32 %v6148_v18, %v6051_v4 }
 0x142   : >> { %v6167_v33 = vadd.f32 %v918_v43, %v887_v37  ;;  %v632_v40 = vadd.f32 %v5936_v32, %v531_v58  ;;  %v6197_v32 = vstv %s1119_s17  ;;  %s1512_s17 = sld [smem:[#allocation3 + %s1511_s24]]  ;;  %s1991_s24 = sadd.s32 19, %s5800_s13 }
 0x145   : >> { %1082 = vrot.lane.b32.xlu2 %v1044_v23, %s5516_s22  ;;  %1080 = vrot.lane.b32.xlu1 %v1043_v22, %s5516_s22  ;;  %v719_v22 = vadd.f32 %v6080_v8, %v632_v40  ;;  %v523_v8 = vmul.f32 %v6130_v48, %v5810_v29 }
 0x146   : >> { %1078 = vrot.lane.b32.xlu0 %v1042_v34, %s5516_s22  ;;  %v524_v34 = vmul.f32 %v6130_v48, %v5825_v36  ;;  %v1122_v36 = vmul.f32 %v6197_v32, %v6010_v21 }
 0x147   : >> { %v854_v28 = vpop.permute.xlu2 %853  ;;  %v6178_v37 = vpop.permute.xlu1 %774  ;;  %v624_v29 = vadd.f32 %v5948_v44, %v523_v8  ;;  %v917_v44 = vmul.f32 %v6148_v18, %v6010_v21 }
 0x148   : >> { %9201 = vst [vmem:[#allocation64_spill] sm:$0xff] %v6178_v37  ;;  %v890_v16 = vadd.f32 %v854_v28, %v803_v45  ;;  %v773_v43 = vpop.permute.xlu0 %772  ;;  %v1123_v28 = vmul.f32 %v6197_v32, %v6003_v30 }
 0x149   : >> { %v806_v15 = vadd.f32 %v773_v43, %v719_v22  ;;  %v625_v43 = vadd.f32 %v5960_v55, %v524_v34  ;;  %v527_v22 = vmul.f32 %v6130_v48, %v5804_v27  ;;  %v916_v34 = vmul.f32 %v6148_v18, %v5982_v38 }
 0x14a   : >> { %v6187_v23 = vadd.f32 %v921_v61, %v890_v16  ;;  %v635_v16 = vadd.f32 %v5944_v39, %v534_v47 }
 0x14b   : >> { %v712_v40 = vadd.f32 %v6036_v25, %v625_v43  ;;  %v526_v25 = vmul.f32 %v6130_v48, %v5822_v35 }
 0x14d   : >> { %1088 = vrot.lane.b32.xlu2 %v1047_v2, %s5516_s22  ;;  %1086 = vrot.lane.b32.xlu1 %v1046_v56, %s5516_s22  ;;  %v1121_v2 = vmul.f32 %v6197_v32, %v5982_v38  ;;  %v799_v39 = vadd.f32 %v6053_v3, %v712_v40 }
 0x14e   : >> { %1084 = vrot.lane.b32.xlu0 %v1045_v54, %s5516_s22  ;;  %v722_v54 = vadd.f32 %v6100_v13, %v635_v16  ;;  %v927_v13 = vmul.f32 %v6148_v18, %v6076_v6  ;;  %v627_v16 = vadd.f32 %v5958_v52, %v526_v25  ;;  %v920_v52 = vmul.f32 %v6148_v18, %v6034_v24 }
 0x14f   : >> { %v860_v58 = vpop.permute.xlu2 %859  ;;  %v6203_v46 = vpop.permute.xlu1 %780 }
 0x150   : >> { %v893_v45 = vadd.f32 %v860_v58, %v806_v15  ;;  %v779_v61 = vpop.permute.xlu0 %778  ;;  %v711_v15 = vadd.f32 %v5956_v51, %v624_v29  ;;  %v714_v29 = vadd.f32 %v5969_v60, %v627_v16  ;;  %v6306_v16 = vstv %s1206_s25  ;;  %s1599_s25 = sld [smem:[#allocation3 + %s1598_s28]]  ;;  %s2123_s28 = sadd.s32 21, %s5800_s13 }
 0x151   : >> { %v809_v55 = vadd.f32 %v779_v61, %v722_v54  ;;  %v1125_v61 = vmul.f32 %v6197_v32, %v6034_v24 }
 0x152   : >> { %v6213_v56 = vadd.f32 %v924_v11, %v893_v45  ;;  %v798_v27 = vadd.f32 %v6119_v17, %v711_v15  ;;  %v1126_v45 = vmul.f32 %v6197_v32, %v6027_v20  ;;  %v1124_v17 = vmul.f32 %v6197_v32, %v6000_v59 }
 0x153   : >> { %v801_v60 = vadd.f32 %v6139_v50, %v714_v29  ;;  %v919_v15 = vmul.f32 %v6148_v18, %v6000_v59 }
 0x155   : >> { %1153 = vrot.lane.b32.xlu2 %v1123_v28, %s5517_s0  ;;  %1151 = vrot.lane.b32.xlu1 %v1122_v36, %s5517_s0  ;;  %v628_v28 = vadd.f32 %v5919_v57, %v527_v22  ;;  %v530_v57 = vmul.f32 %v6130_v48, %v5837_v41 }
 0x156   : >> { %1149 = vrot.lane.b32.xlu0 %v1121_v2, %s5517_s0 }
 0x157   : >> { %v866_v51 = vpop.permute.xlu2 %865  ;;  %v846_v47 = vpop.permute.xlu1 %845  ;;  %v715_v2 = vadd.f32 %v6060_v0, %v628_v28  ;;  %v529_v0 = vmul.f32 %v6130_v48, %v5840_v42  ;;  %v1127_v42 = vmul.f32 %v6197_v32, %v6024_v19 }
 0x158   : >> { %v896_v3 = vadd.f32 %v866_v51, %v809_v55  ;;  %v886_v11 = vadd.f32 %v846_v47, %v799_v39  ;;  %v844_v8 = vpop.permute.xlu0 %843  ;;  %v1129_v55 = vmul.f32 %v6197_v32, %v6051_v4 }
 0x159   : >> { %v885_v58 = vadd.f32 %v844_v8, %v798_v27  ;;  %v802_v40 = vadd.f32 %v6078_v7, %v715_v2  ;;  %v630_v25 = vadd.f32 %v5973_v63, %v529_v0  ;;  %v9202_v2 = vld [vmem:[#allocation51_spill] sm:$0xff]  ;;  %v1208_v0 = vmul.f32 %v6306_v16, %v5982_v38 }
 0x15a   : >> { %v6241_v35 = vadd.f32 %v917_v44, %v886_v11  ;;  %v6243_v36 = vadd.f32 %v927_v13, %v896_v3  ;;  %v1128_v44 = vmul.f32 %v6197_v32, %v6058_v1  ;;  %v631_v13 = vadd.f32 %v5971_v62, %v530_v57 }
 0x15b   : >> { %v6246_v43 = vadd.f32 %v916_v34, %v885_v58  ;;  %v717_v47 = vadd.f32 %v5986_v49, %v630_v25  ;;  %v923_v34 = vmul.f32 %v6148_v18, %v6058_v1  ;;  %v535_v29 = vmul.f32 %v6130_v48, %v9202_v2 }
 0x15c   : >> { %v718_v51 = vadd.f32 %v6085_v10, %v631_v13  ;;  %v922_v10 = vmul.f32 %v6148_v18, %v6024_v19  ;;  %v929_v25 = vmul.f32 %v6148_v18, %v6103_v14 }
 0x15d   : >> { %1159 = vrot.lane.b32.xlu2 %v1126_v45, %s5517_s0  ;;  %1157 = vrot.lane.b32.xlu1 %v1125_v61, %s5517_s0  ;;  %v804_v63 = vadd.f32 %v6158_v31, %v717_v47  ;;  %v1131_v45 = vmul.f32 %v6197_v32, %v6083_v9  ;;  %v1130_v61 = vmul.f32 %v6197_v32, %v6048_v26 }
 0x15e   : >> { %1155 = vrot.lane.b32.xlu0 %v1124_v17, %s5517_s0  ;;  %v805_v62 = vadd.f32 %v6098_v12, %v718_v51  ;;  %v1132_v12 = vmul.f32 %v6197_v32, %v6076_v6  ;;  %v536_v17 = vmul.f32 %v6130_v48, %v5865_v53  ;;  %v9205_v53 = vld [vmem:[#allocation55_spill] sm:$0xff] }
 0x15f   : >> { %v6261_v54 = vpop.permute.xlu2 %975  ;;  %v852_v22 = vpop.permute.xlu1 %851 }
 0x160   : >> { %v889_v41 = vadd.f32 %v852_v22, %v802_v40  ;;  %v850_v39 = vpop.permute.xlu0 %849  ;;  %v637_v22 = vadd.f32 %v9205_v53, %v536_v17  ;;  %v1218_v53 = vmul.f32 %v6306_v16, %v6083_v9  ;;  %v1017_v37 = vadd.f32 %v6261_v54, %v6246_v43 }
 0x161   : >> { %v888_v7 = vadd.f32 %v850_v39, %v801_v60  ;;  %v1134_v60 = vmul.f32 %v6197_v32, %v6103_v14 }
 0x162   : >> { %v6272_v50 = vadd.f32 %v920_v52, %v889_v41  ;;  %v9206_v41 = vld [vmem:[#allocation56_spill] sm:$0xff] }
 0x163   : >> { %v6275_v27 = vadd.f32 %v919_v15, %v888_v7  ;;  %v1133_v15 = vmul.f32 %v6197_v32, %v6073_v5  ;;  %v636_v39 = vadd.f32 %v9206_v41, %v535_v29  ;;  %v9207_v7 = vld [vmem:[#allocation60_spill] sm:$0xff] }
 0x164   : >> { %v6400_v41 = vld [vmem:[%s5719_s29 + $0x2] sm:$0xff] }
 0x165   : >> { %1165 = vrot.lane.b32.xlu2 %v1129_v55, %s5517_s0  ;;  %1163 = vrot.lane.b32.xlu1 %v1128_v44, %s5517_s0  ;;  %v724_v55 = vadd.f32 %v9207_v7, %v637_v22  ;;  %v9208_v44 = vld [vmem:[#allocation57_spill] sm:$0xff] }
 0x166   : >> { %1161 = vrot.lane.b32.xlu0 %v1127_v42, %s5517_s0  ;;  %v723_v13 = vadd.f32 %v9208_v44, %v636_v39  ;;  %v9209_v42 = vld [vmem:[#allocation62_spill] sm:$0xff] }
 0x167   : >> { %v6287_v3 = vpop.permute.xlu2 %981  ;;  %v858_v11 = vpop.permute.xlu1 %857  ;;  %v811_v38 = vadd.f32 %v9209_v42, %v724_v55  ;;  %v6397_v22 = vld [vmem:[%s5719_s29 + $0xa] sm:$0xff]  ;;  %v1221_v55 = vmul.f32 %v6306_v16, %v6103_v14  ;;  %v6416_v44 = vld [vmem:[%s5719_s29 + $0x22] sm:$0xff] }
 0x168   : >> { %v892_v49 = vadd.f32 %v858_v11, %v805_v62  ;;  %v856_v8 = vpop.permute.xlu0 %855  ;;  %v810_v51 = vadd.f32 %v6203_v46, %v723_v13  ;;  %v928_v62 = vmul.f32 %v6148_v18, %v6073_v5  ;;  %v6419_v13 = vld [vmem:[%s5719_s29 + $0x1a] sm:$0xff] }
 0x169   : >> { %v891_v58 = vadd.f32 %v856_v8, %v804_v63  ;;  %v1209_v8 = vmul.f32 %v6306_v16, %v6010_v21  ;;  %v1214_v21 = vmul.f32 %v6306_v16, %v6024_v19  ;;  %v1217_v19 = vmul.f32 %v6306_v16, %v6048_v26 }
 0x16a   : >> { %v6297_v28 = vadd.f32 %v923_v34, %v892_v49  ;;  %v1210_v49 = vmul.f32 %v6306_v16, %v6003_v30  ;;  %v1213_v30 = vmul.f32 %v6306_v16, %v6027_v20  ;;  %v1216_v20 = vmul.f32 %v6306_v16, %v6051_v4 }
 0x16b   : >> { %v6299_v31 = vadd.f32 %v922_v10, %v891_v58  ;;  %v1211_v10 = vmul.f32 %v6306_v16, %v6000_v59  ;;  %v1220_v4 = vmul.f32 %v6306_v16, %v6073_v5 }
 0x16d   : >> { %1171 = vrot.lane.b32.xlu2 %v1132_v12, %s5517_s0  ;;  %1169 = vrot.lane.b32.xlu1 %v1131_v45, %s5517_s0 }
 0x16e   : >> { %1167 = vrot.lane.b32.xlu0 %v1130_v61, %s5517_s0  ;;  %v1212_v61 = vmul.f32 %v6306_v16, %v6034_v24  ;;  %v1215_v24 = vmul.f32 %v6306_v16, %v6058_v1  ;;  %v1219_v1 = vmul.f32 %v6306_v16, %v6076_v6 }
 0x16f   : >> { %v6310_v57 = vpop.permute.xlu2 %987  ;;  %v6312_v40 = vpop.permute.xlu1 %863 }
 0x170   : >> { %9203 = vst [vmem:[#allocation51_spill] sm:$0xff] %v6312_v40  ;;  %v6314_v52 = vpop.permute.xlu0 %861 }
 0x171   : >> { %9204 = vst [vmem:[#allocation65_spill] sm:$0xff] %v6314_v52 }
 0x175   : >> { %1236 = vrot.lane.b32.xlu2 %v1208_v0, %s5518_s23  ;;  %1175 = vrot.lane.b32.xlu1 %v1134_v60, %s5517_s0 }
 0x176   : >> { %1173 = vrot.lane.b32.xlu0 %v1133_v15, %s5517_s0  ;;  %v1339_v15 = vstv %s1338_s26  ;;  %s1730_s26 = sadd.s32 16, %s5800_s13 }
 0x177   : >> { %v6333_v32 = vpop.permute.xlu2 %993  ;;  %v870_v47 = vpop.permute.xlu1 %869  ;;  %v1341_v9 = vmul.f32 %v1339_v15, %v6397_v22  ;;  %v1340_v7 = vmul.f32 %v1339_v15, %v6400_v41  ;;  %v1344_v16 = vmul.f32 %v1339_v15, %v6416_v44 }
 0x178   : >> { %9210 = vst [vmem:[#allocation55_spill] sm:$0xff] %v6333_v32  ;;  %v898_v34 = vadd.f32 %v870_v47, %v811_v38  ;;  %v868_v63 = vpop.permute.xlu0 %867 }
 0x179   : >> { %v897_v11 = vadd.f32 %v868_v63, %v810_v51  ;;  %v1343_v51 = vmul.f32 %v1339_v15, %v6419_v13 }
 0x17a   : >> { %v6343_v58 = vadd.f32 %v929_v25, %v898_v34  ;;  %v6426_v25 = vld [vmem:[%s5719_s29 + $0x12] sm:$0xff] }
 0x17b   : >> { %v6345_v46 = vadd.f32 %v928_v62, %v897_v11  ;;  %v1342_v47 = vmul.f32 %v1339_v15, %v6426_v25  ;;  %v6437_v62 = vld [vmem:[%s5719_s29 + $0x3a] sm:$0xff]  ;;  %v6440_v34 = vld [vmem:[%s5719_s29 + $0x32] sm:$0xff] }
 0x17c   : >> { %9211 = vst [vmem:[#allocation56_spill] sm:$0xff] %v6343_v58 }
 0x17d   : >> { %1242 = vrot.lane.b32.xlu2 %v1211_v10, %s5518_s23  ;;  %1240 = vrot.lane.b32.xlu1 %v1210_v49, %s5518_s23  ;;  %v6447_v10 = vld [vmem:[%s5719_s29 + $0x2a] sm:$0xff] }
 0x17e   : >> { %1238 = vrot.lane.b32.xlu0 %v1209_v8, %s5518_s23  ;;  %v1347_v8 = vmul.f32 %v1339_v15, %v6437_v62 }
 0x17f   : >> { %v6350_v12 = vpop.permute.xlu2 %999  ;;  %v6352_v59 = vpop.permute.xlu1 %979 }
 0x180   : >> { %v6354_v45 = vpop.permute.xlu0 %977 }
 0x185   : >> { %1248 = vrot.lane.b32.xlu2 %v1214_v21, %s5518_s23  ;;  %1246 = vrot.lane.b32.xlu1 %v1213_v30, %s5518_s23  ;;  %v1346_v21 = vmul.f32 %v1339_v15, %v6440_v34  ;;  %v1345_v30 = vmul.f32 %v1339_v15, %v6447_v10 }
 0x186   : >> { %1244 = vrot.lane.b32.xlu0 %v1212_v61, %s5518_s23  ;;  %v6458_v61 = vld [vmem:[%s5719_s29 + $0x52] sm:$0xff] }
 0x187   : >> { %v6365_v17 = vpop.permute.xlu2 %1064  ;;  %v6367_v2 = vpop.permute.xlu1 %985 }
 0x188   : >> { %v6369_v29 = vpop.permute.xlu0 %983 }
 0x18d   : >> { %1254 = vrot.lane.b32.xlu2 %v1217_v19, %s5518_s23  ;;  %1252 = vrot.lane.b32.xlu1 %v1216_v20, %s5518_s23  ;;  %v6461_v19 = vld [vmem:[%s5719_s29 + $0x4a] sm:$0xff] }
 0x18e   : >> { %1250 = vrot.lane.b32.xlu0 %v1215_v24, %s5518_s23 }
 0x18f   : >> { %v6381_v0 = vpop.permute.xlu2 %1070  ;;  %v6383_v60 = vpop.permute.xlu1 %991 }
 0x190   : >> { %v6385_v26 = vpop.permute.xlu0 %989 }
 0x195   : >> { %1260 = vrot.lane.b32.xlu2 %v1220_v4, %s5518_s23  ;;  %1258 = vrot.lane.b32.xlu1 %v1219_v1, %s5518_s23  ;;  %v6468_v4 = vld [vmem:[%s5719_s29 + $0x42] sm:$0xff] }
 0x196   : >> { %1256 = vrot.lane.b32.xlu0 %v1218_v53, %s5518_s23  ;;  %v1350_v53 = vmul.f32 %v1339_v15, %v6458_v61 }
 0x197   : >> { %v6402_v5 = vpop.permute.xlu2 %1076  ;;  %v6404_v6 = vpop.permute.xlu1 %997 }
 0x198   : >> { %v6406_v39 = vpop.permute.xlu0 %995 }
 0x199   : >> { %9212 = vst [vmem:[#allocation60_spill] sm:$0xff] %v6406_v39 }
 0x19d   : >> { %1370 = vrot.lane.b32.xlu2 %v1341_v9, %s5515_s12  ;;  %1368 = vrot.lane.b32.xlu1 %v1340_v7, %s5515_s12  ;;  %v1349_v9 = vmul.f32 %v1339_v15, %v6461_v19  ;;  %v1348_v7 = vmul.f32 %v1339_v15, %v6468_v4 }
 0x19e   : >> { %1262 = vrot.lane.b32.xlu0 %v1221_v55, %s5518_s23  ;;  %v6480_v55 = vld [vmem:[%s5719_s29 + $0x6a] sm:$0xf] }
 0x19f   : >> { %v6421_v42 = vpop.permute.xlu2 %1082  ;;  %v6423_v38 = vpop.permute.xlu1 %1062 }
 0x1a0   : >> { %9213 = vst [vmem:[#allocation57_spill] sm:$0xff] %v6421_v42  ;;  %v6428_v14 = vpop.permute.xlu0 %1001 }
 0x1a1   : >> { %9214 = vst [vmem:[#allocation62_spill] sm:$0xff] %v6428_v14 }
 0x1a5   : >> { %1376 = vrot.lane.b32.xlu2 %v1344_v16, %s5515_s12  ;;  %1374 = vrot.lane.b32.xlu1 %v1343_v51, %s5515_s12  ;;  %v6483_v16 = vld [vmem:[%s5719_s29 + $0x62] sm:$0xff] }
 0x1a6   : >> { %1372 = vrot.lane.b32.xlu0 %v1342_v47, %s5515_s12 }
 0x1a7   : >> { %v6442_v63 = vpop.permute.xlu2 %1088  ;;  %v6444_v11 = vpop.permute.xlu1 %1068 }
 0x1a8   : >> { %9215 = vst [vmem:[#allocation66_spill] sm:$0xff] %v6442_v63  ;;  %v6449_v49 = vpop.permute.xlu0 %1066 }
 0x1ad   : >> { %1382 = vrot.lane.b32.xlu2 %v1347_v8, %s5515_s12  ;;  %1380 = vrot.lane.b32.xlu1 %v1346_v21, %s5515_s12  ;;  %v6490_v8 = vld [vmem:[%s5719_s29 + $0x5a] sm:$0xff] }
 0x1ae   : >> { %1378 = vrot.lane.b32.xlu0 %v1345_v30, %s5515_s12  ;;  %v1353_v30 = vmul.f32 %v1339_v15, %v6480_v55 }
 0x1af   : >> { %v6463_v20 = vpop.permute.xlu2 %1153  ;;  %v6465_v24 = vpop.permute.xlu1 %1074 }
 0x1b0   : >> { %v6470_v1 = vpop.permute.xlu0 %1072 }
 0x1b5   : >> { %1388 = vrot.lane.b32.xlu2 %v1350_v53, %s5515_s12  ;;  %1386 = vrot.lane.b32.xlu1 %v1349_v9, %s5515_s12  ;;  %v1352_v53 = vmul.f32 %v1339_v15, %v6483_v16  ;;  %v1351_v9 = vmul.f32 %v1339_v15, %v6490_v8 }
 0x1b6   : >> { %1384 = vrot.lane.b32.xlu0 %v1348_v7, %s5515_s12  ;;  %v6500_v7 = vstv %s1425_s15  ;;  %s1731_s15 = sld [smem:[#allocation3 + %s1730_s26]] }
 0x1b7   : >> { %v6485_v51 = vpop.permute.xlu2 %1159  ;;  %v6487_v47 = vpop.permute.xlu1 %1080  ;;  %v1428_v15 = vmul.f32 %v6500_v7, %v6397_v22  ;;  %v1432_v18 = vmul.f32 %v6500_v7, %v6447_v10  ;;  %v1431_v52 = vmul.f32 %v6500_v7, %v6416_v44  ;;  %s2211_s26 = sld [smem:[#allocation3 + %s2210_s27]] }
 0x1b8   : >> { %9216 = vst [vmem:[#allocation67_spill] sm:$0xff] %v6487_v47  ;;  %v6492_v21 = vpop.permute.xlu0 %1078  ;;  %v1429_v47 = vmul.f32 %v6500_v7, %v6426_v25 }
 0x1bd   : >> { %1394 = vrot.lane.b32.xlu2 %v1353_v30, %s5515_s12  ;;  %1392 = vrot.lane.b32.xlu1 %v1352_v53, %s5515_s12  ;;  %v1427_v30 = vmul.f32 %v6500_v7, %v6400_v41 }
 0x1be   : >> { %1390 = vrot.lane.b32.xlu0 %v1351_v9, %s5515_s12 }
 0x1bf   : >> { %v6502_v42 = vpop.permute.xlu2 %1165  ;;  %v6504_v39 = vpop.permute.xlu1 %1086 }
 0x1c0   : >> { %v6506_v40 = vpop.permute.xlu0 %1084 }
 0x1c5   : >> { %1459 = vrot.lane.b32.xlu2 %v1429_v47, %s5516_s22  ;;  %1457 = vrot.lane.b32.xlu1 %v1428_v15, %s5516_s22  ;;  %v1430_v47 = vmul.f32 %v6500_v7, %v6419_v13  ;;  %v6530_v15 = vstv %s1293_s21  ;;  %s1905_s21 = sld [smem:[#allocation3 + %s1904_s20]]  ;;  %s2384_s20 = sadd.s32 24, %s5800_s13 }
 0x1c6   : >> { %1455 = vrot.lane.b32.xlu0 %v1427_v30, %s5516_s22  ;;  %v1104_v30 = vadd.f32 %v6423_v38, %v1017_v37  ;;  %v1309_v63 = vmul.f32 %v6530_v15, %v6400_v41  ;;  %v1434_v37 = vmul.f32 %v6500_v7, %v6437_v62 }
 0x1c7   : >> { %v6518_v53 = vpop.permute.xlu2 %1171  ;;  %v6520_v9 = vpop.permute.xlu1 %1151 }
 0x1c8   : >> { %9217 = vst [vmem:[#allocation68_spill] sm:$0xff] %v6518_v53  ;;  %v1150_v32 = vpop.permute.xlu0 %1149  ;;  %v1435_v53 = vmul.f32 %v6500_v7, %v6468_v4 }
 0x1c9   : >> { %v1191_v48 = vadd.f32 %v1150_v32, %v1104_v30  ;;  %v1436_v30 = vmul.f32 %v6500_v7, %v6461_v19 }
 0x1cd   : >> { %1465 = vrot.lane.b32.xlu2 %v1432_v18, %s5516_s22  ;;  %1463 = vrot.lane.b32.xlu1 %v1431_v52, %s5516_s22  ;;  %v1020_v18 = vadd.f32 %v6287_v3, %v6275_v27  ;;  %v1433_v52 = vmul.f32 %v6500_v7, %v6440_v34  ;;  %v1312_v27 = vmul.f32 %v6530_v15, %v6419_v13 }
 0x1ce   : >> { %1461 = vrot.lane.b32.xlu0 %v1430_v47, %s5516_s22 }
 0x1cf   : >> { %v1237_v14 = vpop.permute.xlu2 %1236  ;;  %v6538_v43 = vpop.permute.xlu1 %1157  ;;  %v1107_v38 = vadd.f32 %v6444_v11, %v1020_v18  ;;  %v1438_v11 = vmul.f32 %v6500_v7, %v6490_v8  ;;  %v6574_v18 = vstv %s1512_s17  ;;  %s1992_s17 = sld [smem:[#allocation3 + %s1991_s24]]  ;;  %s1685_s24 = sadd.s32 15, %s5800_s13 }
 0x1d0   : >> { %v1278_v54 = vadd.f32 %v1237_v14, %v1191_v48  ;;  %v1156_v58 = vpop.permute.xlu0 %1155 }
 0x1d1   : >> { %v1194_v48 = vadd.f32 %v1156_v58, %v1107_v38  ;;  %v1023_v58 = vadd.f32 %v6310_v57, %v6299_v31  ;;  %v1315_v31 = vmul.f32 %v6530_v15, %v6440_v34 }
 0x1d2   : >> { %v6548_v32 = vadd.f32 %v1309_v63, %v1278_v54 }
 0x1d3   : >> { %v1110_v13 = vadd.f32 %v6465_v24, %v1023_v58  ;;  %v1019_v58 = vadd.f32 %v6352_v59, %v6167_v33 }
 0x1d5   : >> { %1471 = vrot.lane.b32.xlu2 %v1435_v53, %s5516_s22  ;;  %1469 = vrot.lane.b32.xlu1 %v1434_v37, %s5516_s22  ;;  %v1437_v53 = vmul.f32 %v6500_v7, %v6458_v61 }
 0x1d6   : >> { %1467 = vrot.lane.b32.xlu0 %v1433_v52, %s5516_s22 }
 0x1d7   : >> { %v1243_v3 = vpop.permute.xlu2 %1242  ;;  %v6557_v14 = vpop.permute.xlu1 %1163 }
 0x1d8   : >> { %v1281_v63 = vadd.f32 %v1243_v3, %v1194_v48  ;;  %v1162_v47 = vpop.permute.xlu0 %1161  ;;  %v1514_v48 = vmul.f32 %v6574_v18, %v6400_v41  ;;  %v1439_v3 = vmul.f32 %v6500_v7, %v6483_v16 }
 0x1d9   : >> { %v1197_v37 = vadd.f32 %v1162_v47, %v1110_v13  ;;  %v6595_v47 = vstv %s1599_s25  ;;  %v1523_v13 = vmul.f32 %v6574_v18, %v6461_v19  ;;  %s2124_s25 = sld [smem:[#allocation3 + %s2123_s28]]  ;;  %s2078_s28 = sadd.s32 20, %s5800_s13 }
 0x1da   : >> { %v6567_v54 = vadd.f32 %v1312_v27, %v1281_v63  ;;  %v1440_v27 = vmul.f32 %v6500_v7, %v6480_v55 }
 0x1dc   : >> { %9218 = vst [vmem:[#allocation69_spill] sm:$0xff] %v6567_v54 }
 0x1dd   : >> { %1477 = vrot.lane.b32.xlu2 %v1438_v11, %s5516_s22  ;;  %1475 = vrot.lane.b32.xlu1 %v1437_v53, %s5516_s22 }
 0x1de   : >> { %1473 = vrot.lane.b32.xlu0 %v1436_v30, %s5516_s22  ;;  %v1610_v30 = vmul.f32 %v6595_v47, %v6461_v19 }
 0x1df   : >> { %v1249_v57 = vpop.permute.xlu2 %1248  ;;  %v6578_v52 = vpop.permute.xlu1 %1169 }
 0x1e0   : >> { %v1284_v38 = vadd.f32 %v1249_v57, %v1197_v37  ;;  %v6580_v24 = vpop.permute.xlu0 %1167  ;;  %v1029_v37 = vadd.f32 %v6350_v12, %v6345_v46  ;;  %v1018_v57 = vadd.f32 %v6354_v45, %v6241_v35  ;;  %v6622_v12 = vld [vmem:[%s5719_s29 + $0x4b] sm:$0xff]  ;;  %v1311_v35 = vmul.f32 %v6530_v15, %v6426_v25 }
 0x1e1   : >> { %v1321_v45 = vmul.f32 %v6530_v15, %v6483_v16 }
 0x1e2   : >> { %v6588_v63 = vadd.f32 %v1315_v31, %v1284_v38  ;;  %v1515_v31 = vmul.f32 %v6574_v18, %v6397_v22  ;;  %v1106_v38 = vadd.f32 %v6449_v49, %v1019_v58  ;;  %v1116_v33 = vadd.f32 %v6504_v39, %v1029_v37 }
 0x1e3   : >> { %v1105_v59 = vadd.f32 %v6365_v17, %v1018_v57  ;;  %v1524_v37 = vmul.f32 %v6574_v18, %v6458_v61 }
 0x1e4   : >> { %9219 = vst [vmem:[#allocation70_spill] sm:$0xff] %v6588_v63 }
 0x1e5   : >> { %1542 = vrot.lane.b32.xlu2 %v1514_v48, %s5517_s0  ;;  %1481 = vrot.lane.b32.xlu1 %v1440_v27, %s5516_s22  ;;  %v1193_v48 = vadd.f32 %v6463_v20, %v1106_v38  ;;  %v6624_v27 = vstv %s1818_s18  ;;  %v1192_v17 = vadd.f32 %v6520_v9, %v1105_v59  ;;  %v6631_v20 = vstv %s1731_s15  ;;  %s2297_s18 = sadd.s32 23, %s5800_s13  ;;  %s2632_s13 = sld [smem:[#allocation6 + %s5499_s16]] }
 0x1e6   : >> { %1479 = vrot.lane.b32.xlu0 %v1439_v3, %s5516_s22  ;;  %v1310_v3 = vmul.f32 %v6530_v15, %v6397_v22  ;;  %v1829_v25 = vmul.f32 %v6624_v27, %v6622_v12  ;;  %v1022_v9 = vadd.f32 %v6367_v2, %v6187_v23  ;;  %v1021_v22 = vadd.f32 %v6369_v29, %v6272_v50  ;;  %s2298_s15 = sld [smem:[#allocation3 + %s2297_s18]] }
 0x1e7   : >> { %v6597_v11 = vpop.permute.xlu2 %1254  ;;  %v6599_v53 = vpop.permute.xlu1 %1175  ;;  %v6658_v2 = vstv %s1905_s21  ;;  %v1314_v50 = vmul.f32 %v6530_v15, %v6447_v10  ;;  %s2385_s21 = sld [smem:[#allocation3 + %s2384_s20]] }
 0x1e8   : >> { %v1174_v7 = vpop.permute.xlu0 %1173  ;;  %v1109_v59 = vadd.f32 %v6470_v1, %v1022_v9 }
 0x1e9   : >> { %v1203_v46 = vadd.f32 %v1174_v7, %v1116_v33 }
 0x1ea   : >> { %v1196_v23 = vadd.f32 %v6485_v51, %v1109_v59 }
 0x1ed   : >> { %1647 = vrot.lane.b32.xlu2 %v1610_v30, %s5518_s23  ;;  %1560 = vrot.lane.b32.xlu1 %v1523_v13, %s5517_s0 }
 0x1ee   : >> { %1544 = vrot.lane.b32.xlu0 %v1515_v31, %s5517_s0  ;;  %v1742_v31 = vmul.f32 %v6631_v20, %v6622_v12 }
 0x1ef   : >> { %v1261_v39 = vpop.permute.xlu2 %1260  ;;  %v1241_v49 = vpop.permute.xlu1 %1240 }
 0x1f0   : >> { %v1290_v7 = vadd.f32 %v1261_v39, %v1203_v46  ;;  %v1280_v58 = vadd.f32 %v1241_v49, %v1193_v48  ;;  %v1239_v30 = vpop.permute.xlu0 %1238  ;;  %v1108_v48 = vadd.f32 %v6381_v0, %v1021_v22  ;;  %v1313_v0 = vmul.f32 %v6530_v15, %v6416_v44 }
 0x1f1   : >> { %v1279_v13 = vadd.f32 %v1239_v30, %v1192_v17  ;;  %v1916_v17 = vmul.f32 %v6658_v2, %v6622_v12  ;;  %v1611_v39 = vmul.f32 %v6595_v47, %v6458_v61  ;;  %v1025_v49 = vadd.f32 %v6383_v60, %v6213_v56  ;;  %v6688_v60 = vld [vmem:[%s5719_s29 + $0x53] sm:$0xff] }
 0x1f2   : >> { %v6643_v57 = vadd.f32 %v1311_v35, %v1280_v58  ;;  %v6645_v38 = vadd.f32 %v1321_v45, %v1290_v7  ;;  %v1195_v29 = vadd.f32 %v6538_v43, %v1108_v48  ;;  %v1518_v43 = vmul.f32 %v6574_v18, %v6416_v44 }
 0x1f3   : >> { %v6649_v33 = vadd.f32 %v1310_v3, %v1279_v13  ;;  %v1024_v7 = vadd.f32 %v6385_v26, %v6297_v28  ;;  %v1112_v30 = vadd.f32 %v6492_v21, %v1025_v49  ;;  %v1317_v28 = vmul.f32 %v6530_v15, %v6468_v4  ;;  %v9222_v49 = vld [vmem:[#allocation56_spill] sm:$0xff] }
 0x1f4   : >> { %9220 = vst [vmem:[#allocation71_spill] sm:$0xff] %v6643_v57  ;;  %v1743_v22 = vmul.f32 %v6631_v20, %v6688_v60  ;;  %v1028_v4 = vadd.f32 %v6404_v6, %v6243_v36  ;;  %v6718_v36 = vld [vmem:[%s5719_s29 + $0x23] sm:$0xff]  ;;  %v1320_v6 = vmul.f32 %v6530_v15, %v6490_v8 }
 0x1f5   : >> { %1866 = vrot.lane.b32.xlu2 %v1829_v25, %s5516_s22  ;;  %1562 = vrot.lane.b32.xlu1 %v1524_v37, %s5517_s0  ;;  %v1111_v13 = vadd.f32 %v6402_v5, %v1024_v7  ;;  %v1199_v56 = vadd.f32 %v6502_v42, %v1112_v30  ;;  %v6690_v25 = vstv %s1992_s17  ;;  %v1316_v37 = vmul.f32 %v6530_v15, %v6437_v62  ;;  %v9224_v30 = vld [vmem:[#allocation66_spill] sm:$0xff]  ;;  %s1686_s17 = sld [smem:[#allocation3 + %s1685_s24]] }
 0x1f6   : >> { %1779 = vrot.lane.b32.xlu0 %v1742_v31, %s5515_s12  ;;  %v2003_v59 = vmul.f32 %v6690_v25, %v6622_v12 }
 0x1f7   : >> { %v6663_v46 = vpop.permute.xlu2 %1370  ;;  %v1247_v1 = vpop.permute.xlu1 %1246  ;;  %v1198_v26 = vadd.f32 %v6557_v14, %v1111_v13  ;;  %v1605_v14 = vmul.f32 %v6595_v47, %v6416_v44 }
 0x1f8   : >> { %v1283_v35 = vadd.f32 %v1247_v1, %v1196_v23  ;;  %v1245_v45 = vpop.permute.xlu0 %1244 }
 0x1f9   : >> { %v1282_v51 = vadd.f32 %v1245_v45, %v1195_v29  ;;  %v9221_v29 = vld [vmem:[#allocation68_spill] sm:$0xff]  ;;  %v1830_v45 = vmul.f32 %v6624_v27, %v6688_v60 }
 0x1fa   : >> { %v6675_v3 = vadd.f32 %v1314_v50, %v1283_v35  ;;  %v1115_v50 = vadd.f32 %v6506_v40, %v1028_v4 }
 0x1fb   : >> { %v6679_v58 = vadd.f32 %v1313_v0, %v1282_v51  ;;  %v1737_v51 = vmul.f32 %v6631_v20, %v6718_v36 }
 0x1fc   : >> { %v1202_v1 = vadd.f32 %v9221_v29, %v1115_v50 }
 0x1fd   : >> { %1953 = vrot.lane.b32.xlu2 %v1916_v17, %s5517_s0  ;;  %1649 = vrot.lane.b32.xlu1 %v1611_v39, %s5518_s23  ;;  %v1525_v17 = vmul.f32 %v6574_v18, %v6490_v8 }
 0x1fe   : >> { %1550 = vrot.lane.b32.xlu0 %v1518_v43, %s5517_s0  ;;  %v9223_v43 = vld [vmem:[#allocation62_spill] sm:$0xff] }
 0x1ff   : >> { %v6695_v21 = vpop.permute.xlu2 %1376  ;;  %v1253_v5 = vpop.permute.xlu1 %1252  ;;  %v1030_v7 = vadd.f32 %v9223_v43, %v9222_v49  ;;  %v1911_v49 = vmul.f32 %v6658_v2, %v6718_v36  ;;  %v1606_v43 = vmul.f32 %v6595_v47, %v6447_v10 }
 0x200   : >> { %v1286_v42 = vadd.f32 %v1253_v5, %v1199_v56  ;;  %v1251_v9 = vpop.permute.xlu0 %1250  ;;  %v6747_v5 = vld [vmem:[%s5719_s29 + $0x4c] sm:$0xff] }
 0x201   : >> { %v1285_v31 = vadd.f32 %v1251_v9, %v1198_v26  ;;  %v1117_v13 = vadd.f32 %v9224_v30, %v1030_v7  ;;  %9225 = vst [vmem:[#allocation68_spill] sm:$0xff] %v6747_v5  ;;  %v6799_v7 = vld [vmem:[%s5719_s29 + $0x5b] sm:$0xff] }
 0x202   : >> { %v6707_v48 = vadd.f32 %v1317_v28, %v1286_v42  ;;  %v1322_v42 = vmul.f32 %v6530_v15, %v6480_v55 }
 0x203   : >> { %v6709_v23 = vadd.f32 %v1316_v37, %v1285_v31  ;;  %v1204_v56 = vadd.f32 %v6599_v53, %v1117_v13  ;;  %v6749_v37 = vstv %s2124_s25  ;;  %v1519_v53 = vmul.f32 %v6574_v18, %v6447_v10  ;;  %s2079_s25 = sld [smem:[#allocation3 + %s2078_s28]] }
 0x204   : >> { %v1998_v10 = vmul.f32 %v6690_v25, %v6718_v36 }
 0x205   : >> { %1781 = vrot.lane.b32.xlu2 %v1743_v22, %s5515_s12  ;;  %2040 = vrot.lane.b32.xlu1 %v2003_v59, %s5518_s23  ;;  %v1612_v22 = vmul.f32 %v6595_v47, %v6490_v8  ;;  %v2135_v59 = vmul.f32 %v6749_v37, %v6747_v5 }
 0x206   : >> { %1637 = vrot.lane.b32.xlu0 %v1605_v14, %s5518_s23  ;;  %v6764_v14 = vstv %s2211_s26 }
 0x207   : >> { %v6722_v44 = vpop.permute.xlu2 %1382  ;;  %v1259_v0 = vpop.permute.xlu1 %1258 }
 0x208   : >> { %v1289_v40 = vadd.f32 %v1259_v0, %v1202_v1  ;;  %v6724_v35 = vpop.permute.xlu0 %1256  ;;  %v2222_v1 = vmul.f32 %v6764_v14, %v6747_v5  ;;  %v1824_v0 = vmul.f32 %v6624_v27, %v6718_v36 }
 0x20a   : >> { %v6732_v39 = vadd.f32 %v1320_v6, %v1289_v40  ;;  %v1917_v6 = vmul.f32 %v6658_v2, %v6688_v60 }
 0x20d   : >> { %1868 = vrot.lane.b32.xlu2 %v1830_v45, %s5516_s22  ;;  %1769 = vrot.lane.b32.xlu1 %v1737_v51, %s5515_s12 }
 0x20e   : >> { %1564 = vrot.lane.b32.xlu0 %v1525_v17, %s5517_s0  ;;  %v2004_v17 = vmul.f32 %v6690_v25, %v6688_v60 }
 0x20f   : >> { %v6742_v28 = vpop.permute.xlu2 %1388  ;;  %v6744_v26 = vpop.permute.xlu1 %1368 }
 0x210   : >> { %v1263_v9 = vpop.permute.xlu0 %1262 }
 0x211   : >> { %v1291_v31 = vadd.f32 %v1263_v9, %v1204_v56  ;;  %v6805_v56 = vstv %s2298_s15  ;;  %v1744_v9 = vmul.f32 %v6631_v20, %v6799_v7 }
 0x213   : >> { %v6759_v4 = vadd.f32 %v1322_v42, %v1291_v31  ;;  %v2309_v31 = vmul.f32 %v6805_v56, %v6747_v5 }
 0x215   : >> { %1651 = vrot.lane.b32.xlu2 %v1612_v22, %s5518_s23  ;;  %1552 = vrot.lane.b32.xlu1 %v1519_v53, %s5517_s0  ;;  %v6818_v53 = vld [vmem:[%s5719_s29 + $0x2b] sm:$0xff] }
 0x216   : >> { %2172 = vrot.lane.b32.xlu0 %v2135_v59, %s5515_s12 }
 0x217   : >> { %v6766_v50 = vpop.permute.xlu2 %1394  ;;  %v6768_v29 = vpop.permute.xlu1 %1374 }
 0x218   : >> { %9226 = vst [vmem:[#allocation56_spill] sm:$0xff] %v6768_v29  ;;  %v6770_v8 = vpop.permute.xlu0 %1372 }
 0x219   : >> { %9227 = vst [vmem:[#allocation62_spill] sm:$0xff] %v6770_v8 }
 0x21d   : >> { %2259 = vrot.lane.b32.xlu2 %v2222_v1, %s5516_s22  ;;  %1955 = vrot.lane.b32.xlu1 %v1917_v6, %s5517_s0  ;;  %v6822_v6 = vstv %s2385_s21 }
 0x21e   : >> { %1856 = vrot.lane.b32.xlu0 %v1824_v0, %s5516_s22 }
 0x21f   : >> { %v6782_v40 = vpop.permute.xlu2 %1459  ;;  %v6784_v45 = vpop.permute.xlu1 %1380 }
 0x220   : >> { %9228 = vst [vmem:[#allocation66_spill] sm:$0xff] %v6782_v40  ;;  %v6786_v51 = vpop.permute.xlu0 %1378 }
 0x221   : >> { %9229 = vst [vmem:[#allocation72_spill] sm:$0xff] %v6784_v45 }
 0x225   : >> { %2042 = vrot.lane.b32.xlu2 %v2004_v17, %s5518_s23  ;;  %1943 = vrot.lane.b32.xlu1 %v1911_v49, %s5517_s0  ;;  %v1738_v49 = vmul.f32 %v6631_v20, %v6818_v53 }
 0x226   : >> { %1639 = vrot.lane.b32.xlu0 %v1606_v43, %s5518_s23  ;;  %v1526_v43 = vmul.f32 %v6574_v18, %v6483_v16 }
 0x227   : >> { %v6801_v30 = vpop.permute.xlu2 %1465  ;;  %v6803_v13 = vpop.permute.xlu1 %1386 }
 0x228   : >> { %v1385_v42 = vpop.permute.xlu0 %1384 }
 0x229   : >> { %v1418_v22 = vadd.f32 %v1385_v42, %v6707_v48  ;;  %v2396_v48 = vmul.f32 %v6822_v6, %v6747_v5  ;;  %v5215_v42 = vld [vmem:[%s5719_s29 + $0x48] sm:$0xff]  ;;  %v9236_v5 = vld [vmem:[#allocation63_spill] sm:$0xff] }
 0x22d   : >> { %2030 = vrot.lane.b32.xlu2 %v1998_v10, %s5518_s23  ;;  %1783 = vrot.lane.b32.xlu1 %v1744_v9, %s5515_s12  ;;  %v9231_v10 = vld [vmem:[#allocation61_spill] sm:$0xff] }
 0x22e   : >> { %2346 = vrot.lane.b32.xlu0 %v2309_v31, %s5517_s0  ;;  %v532_v9 = vmul.f32 %v5215_v42, %v9231_v10  ;;  %v9233_v42 = vld [vmem:[#allocation54_spill] sm:$0xff] }
 0x22f   : >> { %v1472_v59 = vpop.permute.xlu2 %1471  ;;  %v6820_v1 = vpop.permute.xlu1 %1392 }
 0x230   : >> { %v6824_v0 = vadd.f32 %v1472_v59, %v1418_v22  ;;  %v1391_v17 = vpop.permute.xlu0 %1390  ;;  %v6839_v22 = vld [vmem:[%s5719_s29 + $0x54] sm:$0xff] }
 0x231   : >> { %v1421_v31 = vadd.f32 %v1391_v17, %v6732_v39  ;;  %v9232_v59 = vld [vmem:[#allocation53_spill] sm:$0xff]  ;;  %v2136_v39 = vmul.f32 %v6749_v37, %v6839_v22  ;;  %v1831_v17 = vmul.f32 %v6624_v27, %v6799_v7 }
 0x232   : >> { %9230 = vst [vmem:[#allocation73_spill] sm:$0xff] %v6824_v0  ;;  %v633_v29 = vadd.f32 %v9232_v59, %v532_v9  ;;  %v1410_v9 = vadd.f32 %v6744_v26, %v6548_v32  ;;  %v9235_v59 = vld [vmem:[#allocation65_spill] sm:$0xff] }
 0x234   : >> { %v720_v0 = vadd.f32 %v9233_v42, %v633_v29 }
 0x235   : >> { %1771 = vrot.lane.b32.xlu2 %v1738_v49, %s5515_s12  ;;  %1566 = vrot.lane.b32.xlu1 %v1526_v43, %s5517_s0  ;;  %v1520_v49 = vmul.f32 %v6574_v18, %v6440_v34  ;;  %v9234_v43 = vld [vmem:[#allocation64_spill] sm:$0xff] }
 0x236   : >> { %2433 = vrot.lane.b32.xlu0 %v2396_v48, %s5518_s23  ;;  %v807_v48 = vadd.f32 %v9234_v43, %v720_v0  ;;  %v1918_v43 = vmul.f32 %v6658_v2, %v6799_v7 }
 0x237   : >> { %v1478_v54 = vpop.permute.xlu2 %1477  ;;  %v6842_v40 = vpop.permute.xlu1 %1457 }
 0x238   : >> { %v6844_v8 = vadd.f32 %v1478_v54, %v1421_v31  ;;  %v1456_v57 = vpop.permute.xlu0 %1455  ;;  %v894_v54 = vadd.f32 %v9235_v59, %v807_v48  ;;  %v5216_v31 = vld [vmem:[%s5719_s29 + $0x49] sm:$0xff] }
 0x239   : >> { %v925_v45 = vmul.f32 %v5216_v31, %v9236_v5  ;;  %v1497_v29 = vadd.f32 %v1456_v57, %v1410_v9  ;;  %v1613_v57 = vmul.f32 %v6595_v47, %v6483_v16  ;;  %v9238_v48 = vld [vmem:[#allocation67_spill] sm:$0xff] }
 0x23a   : >> { %v5217_v16 = vld [vmem:[%s5719_s29 + $0x50] sm:$0xff] }
 0x23b   : >> { %v939_v26 = vadd.f32 %v925_v45, %v894_v54  ;;  %v1417_v45 = vadd.f32 %v6722_v44, %v6709_v23  ;;  %v1318_v23 = vmul.f32 %v6530_v15, %v6461_v19  ;;  %v2223_v44 = vmul.f32 %v6764_v14, %v6839_v22 }
 0x23d   : >> { %1554 = vrot.lane.b32.xlu2 %v1520_v49, %s5517_s0  ;;  %2174 = vrot.lane.b32.xlu1 %v2136_v39, %s5515_s12  ;;  %v1825_v49 = vmul.f32 %v6624_v27, %v6818_v53  ;;  %v9237_v39 = vld [vmem:[#allocation55_spill] sm:$0xff] }
 0x23e   : >> { %1870 = vrot.lane.b32.xlu0 %v1831_v17, %s5516_s22  ;;  %v1026_v17 = vadd.f32 %v9237_v39, %v939_v26  ;;  %v9239_v39 = vld [vmem:[#allocation52_spill] sm:$0xff] }
 0x23f   : >> { %v1543_v42 = vpop.permute.xlu2 %1542  ;;  %v6862_v63 = vpop.permute.xlu1 %1463 }
 0x240   : >> { %v6864_v0 = vadd.f32 %v1543_v42, %v1497_v29  ;;  %v6866_v32 = vpop.permute.xlu0 %1461  ;;  %v1113_v9 = vadd.f32 %v9238_v48, %v1026_v17  ;;  %v6885_v29 = vld [vmem:[%s5719_s29 + $0x24] sm:$0xff]  ;;  %v533_v42 = vmul.f32 %v5217_v16, %v9231_v10 }
 0x242   : >> { %v1200_v59 = vadd.f32 %v6580_v24, %v1113_v9  ;;  %v1607_v24 = vmul.f32 %v6595_v47, %v6440_v34  ;;  %v634_v10 = vadd.f32 %v9239_v39, %v533_v42  ;;  %v2217_v42 = vmul.f32 %v6764_v14, %v6885_v29 }
 0x245   : >> { %1957 = vrot.lane.b32.xlu2 %v1918_v43, %s5517_s0  ;;  %1858 = vrot.lane.b32.xlu1 %v1825_v49, %s5516_s22  ;;  %v1287_v49 = vadd.f32 %v6597_v11, %v1200_v59  ;;  %v9240_v11 = vld [vmem:[#allocation58_spill] sm:$0xff] }
 0x246   : >> { %1653 = vrot.lane.b32.xlu0 %v1613_v57, %s5518_s23  ;;  %v2130_v57 = vmul.f32 %v6749_v37, %v6885_v29  ;;  %v721_v48 = vadd.f32 %v9240_v11, %v634_v10  ;;  %v1423_v10 = vadd.f32 %v6766_v50, %v6759_v4  ;;  %v1422_v11 = vadd.f32 %v6820_v1, %v6645_v38 }
 0x247   : >> { %v6882_v54 = vpop.permute.xlu2 %1647  ;;  %v1470_v31 = vpop.permute.xlu1 %1469  ;;  %v1332_v17 = vadd.f32 %v1318_v23, %v1287_v49  ;;  %v2005_v49 = vmul.f32 %v6690_v25, %v6799_v7  ;;  %v9242_v23 = vld [vmem:[#allocation51_spill] sm:$0xff]  ;;  %v1999_v4 = vmul.f32 %v6690_v25, %v6818_v53  ;;  %v2310_v38 = vmul.f32 %v6805_v56, %v6839_v22 }
 0x248   : >> { %v6889_v26 = vadd.f32 %v1470_v31, %v1417_v45  ;;  %v6891_v43 = vpop.permute.xlu0 %1467  ;;  %v9241_v45 = vld [vmem:[#allocation59_spill] sm:$0xff] }
 0x249   : >> { %v1419_v34 = vadd.f32 %v6803_v13, %v1332_v17  ;;  %v808_v59 = vadd.f32 %v9241_v45, %v721_v48  ;;  %v6928_v17 = vld [vmem:[%s5719_s29 + $0x63] sm:$0xff] }
 0x24a   : >> { %v1745_v50 = vmul.f32 %v6631_v20, %v6928_v17 }
 0x24d   : >> { %1641 = vrot.lane.b32.xlu2 %v1607_v24, %s5518_s23  ;;  %2261 = vrot.lane.b32.xlu1 %v2223_v44, %s5516_s22  ;;  %v895_v24 = vadd.f32 %v9242_v23, %v808_v59  ;;  %v5218_v44 = vld [vmem:[%s5719_s29 + $0x51] sm:$0xff] }
 0x24e   : >> { %2162 = vrot.lane.b32.xlu0 %v2130_v57, %s5515_s12  ;;  %v926_v13 = vmul.f32 %v5218_v44, %v9236_v5  ;;  %v1912_v57 = vmul.f32 %v6658_v2, %v6818_v53 }
 0x24f   : >> { %v6908_v19 = vpop.permute.xlu2 %1866  ;;  %v1476_v9 = vpop.permute.xlu1 %1475 }
 0x250   : >> { %v1474_v31 = vpop.permute.xlu0 %1473  ;;  %v940_v39 = vadd.f32 %v926_v13, %v895_v24  ;;  %v1411_v24 = vadd.f32 %v6663_v46, %v6649_v33  ;;  %v1319_v13 = vmul.f32 %v6530_v15, %v6458_v61  ;;  %v1527_v46 = vmul.f32 %v6574_v18, %v6480_v55 }
 0x251   : >> { %v6911_v16 = vadd.f32 %v1474_v31, %v1419_v34  ;;  %v9243_v34 = vld [vmem:[#allocation60_spill] sm:$0xff]  ;;  %v2304_v61 = vmul.f32 %v6805_v56, %v6885_v29 }
 0x252   : >> { %v1027_v45 = vadd.f32 %v9243_v34, %v940_v39 }
 0x255   : >> { %2249 = vrot.lane.b32.xlu2 %v2217_v42, %s5516_s22  ;;  %2044 = vrot.lane.b32.xlu1 %v2005_v49, %s5518_s23  ;;  %v9244_v49 = vld [vmem:[#allocation57_spill] sm:$0xff] }
 0x256   : >> { %1945 = vrot.lane.b32.xlu0 %v1912_v57, %s5517_s0  ;;  %v1114_v23 = vadd.f32 %v9244_v49, %v1027_v45  ;;  %v1498_v57 = vadd.f32 %v6842_v40, %v1411_v24  ;;  %v1832_v49 = vmul.f32 %v6624_v27, %v6928_v17 }
 0x257   : >> { %v6932_v48 = vpop.permute.xlu2 %1953  ;;  %v1482_v5 = vpop.permute.xlu1 %1481 }
 0x258   : >> { %v6935_v59 = vadd.f32 %v1482_v5, %v1423_v10  ;;  %v1480_v31 = vpop.permute.xlu0 %1479  ;;  %v1201_v1 = vadd.f32 %v6578_v52, %v1114_v23  ;;  %v6972_v5 = vld [vmem:[%s5719_s29 + $0x5c] sm:$0xff]  ;;  %v1414_v23 = vadd.f32 %v6695_v21, %v6679_v58 }
 0x259   : >> { %v6937_v42 = vadd.f32 %v1480_v31, %v1422_v11  ;;  %v6975_v31 = vld [vmem:[%s5719_s29 + $0x33] sm:$0xff] }
 0x25a   : >> { %v1288_v44 = vadd.f32 %v6724_v35, %v1201_v1  ;;  %v2397_v35 = vmul.f32 %v6822_v6, %v6839_v22  ;;  %v1501_v24 = vadd.f32 %v6862_v63, %v1414_v23  ;;  %v1521_v63 = vmul.f32 %v6574_v18, %v6437_v62 }
 0x25c   : >> { %v1333_v11 = vadd.f32 %v1319_v13, %v1288_v44 }
 0x25d   : >> { %2032 = vrot.lane.b32.xlu2 %v1999_v4, %s5518_s23  ;;  %1785 = vrot.lane.b32.xlu1 %v1745_v50, %s5515_s12 }
 0x25e   : >> { %2348 = vrot.lane.b32.xlu0 %v2310_v38, %s5517_s0  ;;  %v1420_v15 = vadd.f32 %v6742_v28, %v1333_v11  ;;  %v2137_v28 = vmul.f32 %v6749_v37, %v6972_v5  ;;  %v6987_v38 = vstv %s1686_s17  ;;  %v2391_v11 = vmul.f32 %v6822_v6, %v6885_v29 }
 0x25f   : >> { %v1782_v39 = vpop.permute.xlu2 %1781  ;;  %v6956_v52 = vpop.permute.xlu1 %1560  ;;  %v1712_v1 = vmul.f32 %v6987_v38, %v6688_v60  ;;  %v1614_v60 = vmul.f32 %v6595_v47, %v6480_v55  ;;  %v7017_v55 = vld [vmem:[%s5719_s29 + $0x2c] sm:$0xff] }
 0x260   : >> { %v1545_v10 = vpop.permute.xlu0 %1544  ;;  %v1507_v40 = vadd.f32 %v1476_v9, %v1420_v15  ;;  %v1739_v9 = vmul.f32 %v6631_v20, %v6975_v31  ;;  %v2131_v23 = vmul.f32 %v6749_v37, %v7017_v55 }
 0x261   : >> { %v6958_v33 = vadd.f32 %v1545_v10, %v1498_v57  ;;  %v9245_v57 = vld [vmem:[#allocation42_spill] sm:$0xff] }
 0x262   : >> { %5030 = vmatpush.msk.msra.mxu3 %vm2514_vm0, %v9245_v57  ;;  %5029 = vmatpush.msk.msra.mxu2 %vm2514_vm0, %v9245_v57 }
 0x263   : >> { %4995 = vmatpush.msk.msra.mxu0 %vm2514_vm0, %v9245_v57 }
 0x265   : >> { %1568 = vrot.lane.b32.xlu2 %v1527_v46, %s5517_s0  ;;  %2435 = vrot.lane.b32.xlu1 %v2397_v35, %s5518_s23  ;;  %v9246_v46 = vld [vmem:[#allocation41_spill] sm:$0xff] }
 0x266   : >> { %2336 = vrot.lane.b32.xlu0 %v2304_v61, %s5517_s0  ;;  %5032 = vmatpush.msra.mxu3 %v9246_v46  ;;  %v9247_v61 = vld [vmem:[#allocation40_spill] sm:$0xff] }
 0x267   : >> { %v1869_v34 = vpop.permute.xlu2 %1868  ;;  %v1563_v45 = vpop.permute.xlu1 %1562  ;;  %5031 = vmatpush.msra.mxu2 %v9246_v46  ;;  %2521 = vmatpush.msra.mxu0 %v9246_v46 }
 0x268   : >> { %v1594_v4 = vadd.f32 %v1563_v45, %v1507_v40  ;;  %v6977_v50 = vpop.permute.xlu0 %1779  ;;  %5034 = vmatpush.msra.mxu3 %v9247_v61  ;;  %v9248_v45 = vld [vmem:[#allocation39_spill] sm:$0xff] }
 0x269   : >> { %5033 = vmatpush.msra.mxu2 %v9247_v61  ;;  %2522 = vmatpush.msra.mxu0 %v9247_v61 }
 0x26a   : >> { %5036 = vmatpush.msra.mxu3 %v9248_v45 }
 0x26b   : >> { %5035 = vmatpush.msra.mxu2 %v9248_v45  ;;  %2523 = vmatpush.msra.mxu0 %v9248_v45 }
 0x26d   : >> { %2176 = vrot.lane.b32.xlu2 %v2137_v28, %s5515_s12  ;;  %1872 = vrot.lane.b32.xlu1 %v1832_v49, %s5516_s22  ;;  %v9249_v49 = vld [vmem:[#allocation38_spill] sm:$0xff] }
 0x26e   : >> { %1773 = vrot.lane.b32.xlu0 %v1739_v9, %s5515_s12  ;;  %5038 = vmatpush.msra.mxu3 %v9249_v49 }
 0x26f   : >> { %v1652_v44 = vpop.permute.xlu2 %1651  ;;  %v1650_v13 = vpop.permute.xlu1 %1649  ;;  %5037 = vmatpush.msra.mxu2 %v9249_v49  ;;  %2524 = vmatpush.msra.mxu0 %v9249_v49 }
 0x270   : >> { %v1681_v58 = vadd.f32 %v1650_v13, %v1594_v4  ;;  %v1551_v21 = vpop.permute.xlu0 %1550  ;;  %v9250_v13 = vld [vmem:[#allocation37_spill] sm:$0xff] }
 0x271   : >> { %v1588_v10 = vadd.f32 %v1551_v21, %v1501_v24  ;;  %v1706_v24 = vmul.f32 %v6987_v38, %v6718_v36  ;;  %5040 = vmatpush.msra.mxu3 %v9250_v13  ;;  %5039 = vmatpush.msra.mxu2 %v9250_v13 }
 0x272   : >> { %v1726_v35 = vadd.f32 %v1712_v1, %v1681_v58  ;;  %v1826_v1 = vmul.f32 %v6624_v27, %v6975_v31  ;;  %2525 = vmatpush.msra.mxu0 %v9250_v13  ;;  %v9251_v58 = vld [vmem:[#allocation36_spill] sm:$0xff]  ;;  %v7127_v13 = vstv %s2079_s25 }
 0x273   : >> { %5042 = vmatpush.msra.mxu3 %v9251_v58  ;;  %5041 = vmatpush.msra.mxu2 %v9251_v58 }
 0x274   : >> { %v1813_v15 = vadd.f32 %v1782_v39, %v1726_v35  ;;  %2526 = vmatpush.msra.mxu0 %v9251_v58 }
 0x275   : >> { %1655 = vrot.lane.b32.xlu2 %v1614_v60, %s5518_s23  ;;  %1556 = vrot.lane.b32.xlu1 %v1521_v63, %s5517_s0 }
 0x276   : >> { %2423 = vrot.lane.b32.xlu0 %v2391_v11, %s5518_s23  ;;  %v7019_v40 = vadd.f32 %v1869_v34, %v1813_v15  ;;  %v1919_v34 = vmul.f32 %v6658_v2, %v6928_v17  ;;  %v9253_v11 = vld [vmem:[#allocation34_spill] sm:$0xff] }
 0x277   : >> { %v7022_v4 = vpop.permute.xlu2 %2259  ;;  %v7024_v28 = vpop.permute.xlu1 %2040 }
 0x278   : >> { %v1638_v39 = vpop.permute.xlu0 %1637 }
 0x279   : >> { %v1675_v9 = vadd.f32 %v1638_v39, %v1588_v10  ;;  %v9252_v10 = vld [vmem:[#allocation35_spill] sm:$0xff]  ;;  %v1608_v39 = vmul.f32 %v6595_v47, %v6437_v62  ;;  %v1415_v62 = vadd.f32 %v6786_v51, %v6675_v3 }
 0x27a   : >> { %5044 = vmatpush.msra.mxu3 %v9252_v10  ;;  %5043 = vmatpush.msra.mxu2 %v9252_v10 }
 0x27b   : >> { %v1720_v21 = vadd.f32 %v1706_v24, %v1675_v9  ;;  %v1601_v9 = vmul.f32 %v6595_v47, %v6400_v41  ;;  %2527 = vmatpush.msra.mxu0 %v9252_v10  ;;  %v1502_v41 = vadd.f32 %v6801_v30, %v1415_v62  ;;  %v9256_v24 = vld [vmem:[#allocation31_spill] sm:$0xff]  ;;  %v2218_v30 = vmul.f32 %v6764_v14, %v7017_v55 }
 0x27c   : >> { %5046 = vmatpush.msra.mxu3 %v9253_v11  ;;  %5045 = vmatpush.msra.mxu2 %v9253_v11 }
 0x27d   : >> { %2164 = vrot.lane.b32.xlu2 %v2131_v23, %s5515_s12  ;;  %1959 = vrot.lane.b32.xlu1 %v1919_v34, %s5517_s0  ;;  %v2224_v23 = vmul.f32 %v6764_v14, %v6972_v5  ;;  %v9254_v34 = vld [vmem:[#allocation33_spill] sm:$0xff] }
 0x27e   : >> { %1860 = vrot.lane.b32.xlu0 %v1826_v1, %s5516_s22  ;;  %5048 = vmatpush.msra.mxu3 %v9254_v34 }
 0x27f   : >> { %v7047_v60 = vpop.permute.xlu2 %2042  ;;  %v1770_v36 = vpop.permute.xlu1 %1769  ;;  %2528 = vmatpush.msra.mxu0 %v9253_v11  ;;  %5047 = vmatpush.msra.mxu2 %v9254_v34  ;;  %v1707_v11 = vmul.f32 %v6987_v38, %v6818_v53  ;;  %v2305_v53 = vmul.f32 %v6805_v56, %v7017_v55 }
 0x280   : >> { %v1807_v63 = vadd.f32 %v1770_v36, %v1720_v21  ;;  %v1565_v35 = vpop.permute.xlu0 %1564 }
 0x281   : >> { %v1595_v15 = vadd.f32 %v1565_v35, %v6844_v8  ;;  %v9255_v8 = vld [vmem:[#allocation32_spill] sm:$0xff]  ;;  %2529 = vmatpush.msra.mxu0 %v9254_v34  ;;  %v9257_v35 = vld [vmem:[#allocation30_spill] sm:$0xff] }
 0x282   : >> { %5050 = vmatpush.msra.mxu3 %v9255_v8  ;;  %5049 = vmatpush.msra.mxu2 %v9255_v8 }
 0x283   : >> { %v7062_v1 = vadd.f32 %v1652_v44, %v1595_v15  ;;  %v1593_v44 = vadd.f32 %v6956_v52, %v6911_v16  ;;  %v2006_v15 = vmul.f32 %v6690_v25, %v6928_v17  ;;  %2530 = vmatpush.msra.mxu0 %v9255_v8  ;;  %v1913_v16 = vmul.f32 %v6658_v2, %v6975_v31  ;;  %v9258_v52 = vld [vmem:[#allocation29_spill] sm:$0xff] }
 0x284   : >> { %5052 = vmatpush.msra.mxu3 %v9256_v24  ;;  %5051 = vmatpush.msra.mxu2 %v9256_v24 }
 0x285   : >> { %1643 = vrot.lane.b32.xlu2 %v1608_v39, %s5518_s23  ;;  %1629 = vrot.lane.b32.xlu1 %v1601_v9, %s5518_s23  ;;  %v1680_v39 = vadd.f32 %v6882_v54, %v1593_v44  ;;  %v1711_v9 = vmul.f32 %v6987_v38, %v6622_v12 }
 0x286   : >> { %2263 = vrot.lane.b32.xlu0 %v2224_v23, %s5516_s22  ;;  %5054 = vmatpush.msra.mxu3 %v9257_v35  ;;  %v7100_v23 = vld [vmem:[%s5719_s29 + $0x6b] sm:$0xf] }
 0x287   : >> { %v2031_v21 = vpop.permute.xlu2 %2030  ;;  %v1553_v36 = vpop.permute.xlu1 %1552  ;;  %2531 = vmatpush.msra.mxu0 %v9256_v24  ;;  %5053 = vmatpush.msra.mxu2 %v9257_v35  ;;  %v1725_v62 = vadd.f32 %v1711_v9, %v1680_v39  ;;  %v9259_v39 = vld [vmem:[#allocation70_spill] sm:$0xff]  ;;  %v9260_v9 = vld [vmem:[#allocation72_spill] sm:$0xff] }
 0x288   : >> { %v1589_v3 = vadd.f32 %v1553_v36, %v1502_v41  ;;  %v7078_v51 = vpop.permute.xlu0 %2172  ;;  %5056 = vmatpush.msra.mxu3 %v9258_v52  ;;  %v1416_v8 = vadd.f32 %v9260_v9, %v9259_v39 }
 0x289   : >> { %2532 = vmatpush.msra.mxu0 %v9257_v35  ;;  %5055 = vmatpush.msra.mxu2 %v9258_v52  ;;  %v1812_v44 = vadd.f32 %v6977_v50, %v1725_v62 }
 0x28a   : >> { %v1503_v50 = vadd.f32 %v6891_v43, %v1416_v8  ;;  %v2398_v8 = vmul.f32 %v6822_v6, %v6972_v5 }
 0x28b   : >> { %2533 = vmatpush.msra.mxu0 %v9258_v52  ;;  %v1899_v10 = vadd.f32 %v6908_v19, %v1812_v44 }
 0x28d   : >> { %2251 = vrot.lane.b32.xlu2 %v2218_v30, %s5516_s22  ;;  %2046 = vrot.lane.b32.xlu1 %v2006_v15, %s5518_s23  ;;  %v2000_v30 = vmul.f32 %v6690_v25, %v6975_v31  ;;  %v1746_v15 = vmul.f32 %v6631_v20, %v7100_v23  ;;  %v1986_v44 = vadd.f32 %v6932_v48, %v1899_v10 }
 0x28e   : >> { %1947 = vrot.lane.b32.xlu0 %v1913_v16, %s5517_s0  ;;  %v2311_v16 = vmul.f32 %v6805_v56, %v6972_v5 }
 0x28f   : >> { %v1772_v54 = vpop.permute.xlu2 %1771  ;;  %v7103_v41 = vpop.permute.xlu1 %1955 }
 0x290   : >> { %v1857_v12 = vpop.permute.xlu0 %1856 }
 0x291   : >> { %v1894_v36 = vadd.f32 %v1857_v12, %v1807_v63  ;;  %v7123_v63 = vld [vmem:[%s5719_s29 + $0x3] sm:$0xff] }
 0x292   : >> { %v1733_v43 = vmul.f32 %v6631_v20, %v7123_v63 }
 0x295   : >> { %2034 = vrot.lane.b32.xlu2 %v2000_v30, %s5518_s23  ;;  %1787 = vrot.lane.b32.xlu1 %v1746_v15, %s5515_s12 }
 0x296   : >> { %2350 = vrot.lane.b32.xlu0 %v2311_v16, %s5517_s0  ;;  %v2073_v16 = vadd.f32 %v7024_v28, %v1986_v44 }
 0x297   : >> { %v1555_v62 = vpop.permute.xlu2 %1554  ;;  %v1944_v12 = vpop.permute.xlu1 %1943 }
 0x298   : >> { %v1590_v39 = vadd.f32 %v1555_v62, %v1503_v50  ;;  %v1981_v9 = vadd.f32 %v1944_v12, %v1894_v36  ;;  %v1640_v19 = vpop.permute.xlu0 %1639  ;;  %v1713_v36 = vmul.f32 %v6987_v38, %v6799_v7  ;;  %v9261_v50 = vld [vmem:[#allocation68_spill] sm:$0xff] }
 0x299   : >> { %v1676_v30 = vadd.f32 %v1640_v19, %v1589_v3  ;;  %v2104_v48 = vmul.f32 %v7127_v13, %v9261_v50  ;;  %v7148_v62 = vld [vmem:[%s5719_s29 + $0x64] sm:$0xff]  ;;  %v7151_v19 = vld [vmem:[%s5719_s29 + $0x3b] sm:$0xff] }
 0x29a   : >> { %v7134_v15 = vadd.f32 %v2031_v21, %v1981_v9  ;;  %v1727_v21 = vadd.f32 %v1713_v36, %v7062_v1  ;;  %v1740_v1 = vmul.f32 %v6631_v20, %v7151_v19 }
 0x29b   : >> { %v1721_v10 = vadd.f32 %v1707_v11, %v1676_v30  ;;  %v2118_v12 = vadd.f32 %v2104_v48, %v2073_v16  ;;  %v2138_v30 = vmul.f32 %v6749_v37, %v7148_v62 }
 0x29d   : >> { %1761 = vrot.lane.b32.xlu2 %v1733_v43, %s5515_s12  ;;  %2437 = vrot.lane.b32.xlu1 %v2398_v8, %s5518_s23  ;;  %v1808_v3 = vadd.f32 %v1772_v54, %v1721_v10  ;;  %v2205_v11 = vadd.f32 %v7078_v51, %v2118_v12  ;;  %v1833_v54 = vmul.f32 %v6624_v27, %v7100_v23 }
 0x29e   : >> { %2338 = vrot.lane.b32.xlu0 %v2305_v53, %s5517_s0  ;;  %v1708_v51 = vmul.f32 %v6987_v38, %v6975_v31 }
 0x29f   : >> { %v1958_v9 = vpop.permute.xlu2 %1957  ;;  %v1784_v7 = vpop.permute.xlu1 %1783  ;;  %v2292_v43 = vadd.f32 %v7022_v4, %v2205_v11  ;;  %v1820_v4 = vmul.f32 %v6624_v27, %v7123_v63 }
 0x2a0   : >> { %v1814_v28 = vadd.f32 %v1784_v7, %v1727_v21  ;;  %v2347_v44 = vpop.permute.xlu0 %2346  ;;  %v5219_v21 = vld [vmem:[%s5719_s29 + $0x42] sm:$0xff]  ;;  %v2392_v7 = vmul.f32 %v6822_v6, %v7017_v55 }
 0x2a1   : >> { %v2379_v8 = vadd.f32 %v2347_v44, %v2292_v43  ;;  %v1522_v12 = vmul.f32 %v5219_v21, %v6574_v18  ;;  %v1827_v43 = vmul.f32 %v6624_v27, %v7151_v19 }
 0x2a5   : >> { %2178 = vrot.lane.b32.xlu2 %v2138_v30, %s5515_s12  ;;  %1874 = vrot.lane.b32.xlu1 %v1833_v54, %s5516_s22 }
 0x2a6   : >> { %1775 = vrot.lane.b32.xlu0 %v1740_v1, %s5515_s12  ;;  %v1920_v1 = vmul.f32 %v6658_v2, %v7100_v23 }
 0x2a7   : >> { %v1642_v53 = vpop.permute.xlu2 %1641  ;;  %v1567_v36 = vpop.permute.xlu1 %1566 }
 0x2a8   : >> { %v1677_v16 = vadd.f32 %v1642_v53, %v1590_v39  ;;  %v1596_v50 = vadd.f32 %v1567_v36, %v6937_v42  ;;  %v2434_v48 = vpop.permute.xlu0 %2433  ;;  %v7180_v42 = vld [vmem:[%s5719_s29 + $0x34] sm:$0xff] }
 0x2a9   : >> { %v2466_v10 = vadd.f32 %v2434_v48, %v2379_v8  ;;  %v2132_v54 = vmul.f32 %v6749_v37, %v7180_v42  ;;  %v1609_v48 = vmul.f32 %v5219_v21, %v6595_v47  ;;  %v1914_v21 = vmul.f32 %v6658_v2, %v7151_v19 }
 0x2aa   : >> { %v7173_v31 = vadd.f32 %v1708_v51, %v1677_v16 }
 0x2ab   : >> { %5005 = vmatmul.msk.f32.vlgmr.msra.gmra.mxu3 %vm2471_vm1, %v2466_v10  ;;  %v5220_v10 = vld [vmem:[%s5719_s29 + $0xa] sm:$0xff] }
 0x2ad   : >> { %1848 = vrot.lane.b32.xlu2 %v1820_v4, %s5516_s22  ;;  %1558 = vrot.lane.b32.xlu1 %v1522_v12, %s5517_s0  ;;  %v1602_v4 = vmul.f32 %v5220_v10, %v6595_v47  ;;  %v2219_v10 = vmul.f32 %v6764_v14, %v7180_v42 }
 0x2ae   : >> { %2425 = vrot.lane.b32.xlu0 %v2392_v7, %s5518_s23 }
 0x2af   : >> { %v7182_v39 = vpop.permute.xlu2 %2249  ;;  %v2175_v44 = vpop.permute.xlu1 %2174 }
 0x2b0   : >> { %v1871_v11 = vpop.permute.xlu0 %1870 }
 0x2b1   : >> { %v1901_v30 = vadd.f32 %v1871_v11, %v1814_v28 }
 0x2b3   : >> { %v7190_v51 = vadd.f32 %v1958_v9, %v1901_v30  ;;  %v2225_v9 = vmul.f32 %v6764_v14, %v7148_v62  ;;  %v1907_v30 = vmul.f32 %v6658_v2, %v7123_v63 }
 0x2b5   : >> { %2166 = vrot.lane.b32.xlu2 %v2132_v54, %s5515_s12  ;;  %1961 = vrot.lane.b32.xlu1 %v1920_v1, %s5517_s0 }
 0x2b6   : >> { %1862 = vrot.lane.b32.xlu0 %v1827_v43, %s5516_s22 }
 0x2b7   : >> { %v2033_v8 = vpop.permute.xlu2 %2032  ;;  %v1859_v53 = vpop.permute.xlu1 %1858 }
 0x2b8   : >> { %v1895_v28 = vadd.f32 %v1859_v53, %v1808_v3  ;;  %v1654_v36 = vpop.permute.xlu0 %1653 }
 0x2b9   : >> { %v1683_v16 = vadd.f32 %v1654_v36, %v1596_v50  ;;  %v2007_v50 = vmul.f32 %v6690_v25, %v7100_v23  ;;  %v1994_v36 = vmul.f32 %v6690_v25, %v7123_v63 }
 0x2bd   : >> { %1645 = vrot.lane.b32.xlu2 %v1609_v48, %s5518_s23  ;;  %1631 = vrot.lane.b32.xlu1 %v1602_v4, %s5518_s23  ;;  %v2312_v48 = vmul.f32 %v6805_v56, %v7148_v62  ;;  %v1714_v4 = vmul.f32 %v6987_v38, %v6928_v17 }
 0x2be   : >> { %2265 = vrot.lane.b32.xlu0 %v2225_v9, %s5516_s22 }
 0x2bf   : >> { %v1569_v12 = vpop.permute.xlu2 %1568  ;;  %v2262_v7 = vpop.permute.xlu1 %2261 }
 0x2c0   : >> { %v1597_v3 = vadd.f32 %v1569_v12, %v6935_v59  ;;  %v2163_v11 = vpop.permute.xlu0 %2162  ;;  %v1987_v59 = vadd.f32 %v7103_v41, %v7019_v40  ;;  %v2105_v40 = vmul.f32 %v7127_v13, %v6839_v22  ;;  %v1728_v41 = vadd.f32 %v1714_v4, %v1683_v16  ;;  %v7257_v4 = vld [vmem:[%s5719_s29 + $0xb] sm:$0xff] }
 0x2c1   : >> { %v2399_v22 = vmul.f32 %v6822_v6, %v7148_v62  ;;  %v2001_v16 = vmul.f32 %v6690_v25, %v7151_v19 }
 0x2c2   : >> { %v2074_v12 = vadd.f32 %v7047_v60, %v1987_v59  ;;  %v2306_v59 = vmul.f32 %v6805_v56, %v7180_v42 }
 0x2c5   : >> { %2048 = vrot.lane.b32.xlu2 %v2007_v50, %s5518_s23  ;;  %1949 = vrot.lane.b32.xlu1 %v1914_v21, %s5517_s0 }
 0x2c6   : >> { %1935 = vrot.lane.b32.xlu0 %v1907_v30, %s5517_s0 }
 0x2c7   : >> { %v7213_v54 = vpop.permute.xlu2 %2176  ;;  %v7215_v1 = vpop.permute.xlu1 %2044 }
 0x2c8   : >> { %v1946_v43 = vpop.permute.xlu0 %1945 }
 0x2c9   : >> { %v1982_v53 = vadd.f32 %v1946_v43, %v1895_v28  ;;  %v1715_v28 = vmul.f32 %v6987_v38, %v7100_v23 }
 0x2cb   : >> { %v7227_v9 = vadd.f32 %v2033_v8, %v1982_v53  ;;  %v2119_v8 = vadd.f32 %v2105_v40, %v2074_v12 }
 0x2cd   : >> { %2022 = vrot.lane.b32.xlu2 %v1994_v36, %s5518_s23  ;;  %2352 = vrot.lane.b32.xlu1 %v2312_v48, %s5517_s0  ;;  %v2206_v43 = vadd.f32 %v2175_v44, %v2119_v8  ;;  %v7249_v36 = vld [vmem:[%s5719_s29 + $0x6c] sm:$0xf]  ;;  %v7252_v48 = vld [vmem:[%s5719_s29 + $0x43] sm:$0xff] }
 0x2ce   : >> { %2253 = vrot.lane.b32.xlu0 %v2219_v10, %s5516_s22 }
 0x2cf   : >> { %v1656_v50 = vpop.permute.xlu2 %1655  ;;  %v1786_v17 = vpop.permute.xlu1 %1785  ;;  %v2293_v53 = vadd.f32 %v2262_v7, %v2206_v43  ;;  %v2139_v7 = vmul.f32 %v6749_v37, %v7249_v36 }
 0x2d0   : >> { %v1684_v21 = vadd.f32 %v1656_v50, %v1597_v3  ;;  %v1815_v60 = vadd.f32 %v1786_v17, %v1728_v41  ;;  %v2349_v30 = vpop.permute.xlu0 %2348  ;;  %v1741_v41 = vmul.f32 %v6631_v20, %v7252_v48  ;;  %v2099_v50 = vmul.f32 %v7127_v13, %v6885_v29 }
 0x2d1   : >> { %v2380_v3 = vadd.f32 %v2349_v30, %v2293_v53  ;;  %v1821_v29 = vmul.f32 %v6624_v27, %v7257_v4 }
 0x2d2   : >> { %v7243_v23 = vadd.f32 %v1715_v28, %v1684_v21  ;;  %v1734_v28 = vmul.f32 %v6631_v20, %v7257_v4  ;;  %v2113_v17 = vadd.f32 %v2099_v50, %v7134_v15  ;;  %v7284_v15 = vld [vmem:[%s5719_s29 + $0x3c] sm:$0xff] }
 0x2d5   : >> { %2439 = vrot.lane.b32.xlu2 %v2399_v22, %s5518_s23  ;;  %2340 = vrot.lane.b32.xlu1 %v2306_v59, %s5517_s0  ;;  %v2200_v59 = vadd.f32 %v2163_v11, %v2113_v17 }
 0x2d6   : >> { %2036 = vrot.lane.b32.xlu0 %v2001_v16, %s5518_s23  ;;  %v5221_v16 = vld [vmem:[%s5719_s29 + $0x12] sm:$0xff] }
 0x2d7   : >> { %v7254_v10 = vpop.permute.xlu2 %2164  ;;  %v2436_v44 = vpop.permute.xlu1 %2435  ;;  %v1516_v53 = vmul.f32 %v5221_v16, %v6574_v18 }
 0x2d8   : >> { %v2467_v12 = vadd.f32 %v2436_v44, %v2380_v3  ;;  %v2337_v40 = vpop.permute.xlu0 %2336  ;;  %v2393_v3 = vmul.f32 %v6822_v6, %v7180_v42  ;;  %v2287_v44 = vadd.f32 %v7182_v39, %v2200_v59  ;;  %v2133_v39 = vmul.f32 %v6749_v37, %v7284_v15 }
 0x2da   : >> { %5006 = vmatmul.msk.f32.gmra.mxu3 %vm2471_vm1, %v2467_v12  ;;  %v2374_v11 = vadd.f32 %v2337_v40, %v2287_v44 }
 0x2dd   : >> { %2180 = vrot.lane.b32.xlu2 %v2139_v7, %s5515_s12  ;;  %1777 = vrot.lane.b32.xlu1 %v1741_v41, %s5515_s12 }
 0x2de   : >> { %1763 = vrot.lane.b32.xlu0 %v1734_v28, %s5515_s12 }
 0x2df   : >> { %v1644_v8 = vpop.permute.xlu2 %1643  ;;  %v1873_v21 = vpop.permute.xlu1 %1872 }
 0x2e0   : >> { %v1902_v30 = vadd.f32 %v1873_v21, %v1815_v60  ;;  %v1774_v22 = vpop.permute.xlu0 %1773  ;;  %v1828_v21 = vmul.f32 %v6624_v27, %v7252_v48 }
 0x2e1   : >> { %v1809_v43 = vadd.f32 %v1774_v22, %v7173_v31  ;;  %v7287_v31 = vld [vmem:[%s5719_s29 + $0x4] sm:$0xff] }
 0x2e2   : >> { %v2126_v50 = vmul.f32 %v6749_v37, %v7287_v31 }
 0x2e5   : >> { %1850 = vrot.lane.b32.xlu2 %v1821_v29, %s5516_s22  ;;  %1546 = vrot.lane.b32.xlu1 %v1516_v53, %s5517_s0  ;;  %v1603_v53 = vmul.f32 %v5221_v16, %v6595_v47  ;;  %v2220_v16 = vmul.f32 %v6764_v14, %v7284_v15 }
 0x2e6   : >> { %2427 = vrot.lane.b32.xlu0 %v2393_v3, %s5518_s23  ;;  %v2226_v3 = vmul.f32 %v6764_v14, %v7249_v36 }
 0x2e7   : >> { %v7289_v60 = vpop.permute.xlu2 %2251  ;;  %v1557_v12 = vpop.permute.xlu1 %1556 }
 0x2e8   : >> { %v1591_v7 = vadd.f32 %v1557_v12, %v6889_v26  ;;  %v2424_v41 = vpop.permute.xlu0 %2423 }
 0x2e9   : >> { %v2461_v28 = vadd.f32 %v2424_v41, %v2374_v11 }
 0x2ea   : >> { %v7296_v17 = vadd.f32 %v1644_v8, %v1591_v7  ;;  %v1908_v8 = vmul.f32 %v6658_v2, %v7257_v4  ;;  %v2213_v7 = vmul.f32 %v6764_v14, %v7287_v31 }
 0x2eb   : >> { %5000 = vmatmul.msk.f32.vlgmr.msra.gmra.mxu2 %vm2471_vm1, %v2461_v28  ;;  %v1915_v28 = vmul.f32 %v6658_v2, %v7252_v48 }
 0x2ed   : >> { %2168 = vrot.lane.b32.xlu2 %v2133_v39, %s5515_s12  ;;  %2154 = vrot.lane.b32.xlu1 %v2126_v50, %s5515_s12 }
 0x2ee   : >> { %1864 = vrot.lane.b32.xlu0 %v1828_v21, %s5516_s22 }
 0x2ef   : >> { %v2035_v26 = vpop.permute.xlu2 %2034  ;;  %v1960_v40 = vpop.permute.xlu1 %1959 }
 0x2f0   : >> { %v7304_v22 = vadd.f32 %v1960_v40, %v1902_v30  ;;  %v1861_v59 = vpop.permute.xlu0 %1860  ;;  %v1702_v30 = vmul.f32 %v6987_v38, %v7123_v63  ;;  %v1995_v40 = vmul.f32 %v6690_v25, %v7257_v4 }
 0x2f1   : >> { %v1896_v29 = vadd.f32 %v1861_v59, %v1809_v43  ;;  %v2002_v59 = vmul.f32 %v6690_v25, %v7252_v48 }
 0x2f5   : >> { %1937 = vrot.lane.b32.xlu2 %v1908_v8, %s5517_s0  ;;  %1633 = vrot.lane.b32.xlu1 %v1603_v53, %s5518_s23  ;;  %v2106_v8 = vmul.f32 %v7127_v13, %v6972_v5  ;;  %v2075_v53 = vadd.f32 %v7215_v1, %v7190_v51  ;;  %v2307_v1 = vmul.f32 %v6805_v56, %v7284_v15 }
 0x2f6   : >> { %2267 = vrot.lane.b32.xlu0 %v2226_v3, %s5516_s22  ;;  %v2313_v3 = vmul.f32 %v6805_v56, %v7249_v36 }
 0x2f7   : >> { %v1762_v44 = vpop.permute.xlu2 %1761  ;;  %v1630_v11 = vpop.permute.xlu1 %1629 }
 0x2f8   : >> { %v1671_v43 = vadd.f32 %v1630_v11, %v6864_v0  ;;  %v2264_v12 = vpop.permute.xlu0 %2263 }
 0x2fa   : >> { %v1716_v41 = vadd.f32 %v1702_v30, %v1671_v43 }
 0x2fc   : >> { %v1803_v39 = vadd.f32 %v1762_v44, %v1716_v41 }
 0x2fd   : >> { %2255 = vrot.lane.b32.xlu2 %v2220_v16, %s5516_s22  ;;  %2241 = vrot.lane.b32.xlu1 %v2213_v7, %s5516_s22  ;;  %v2300_v7 = vmul.f32 %v6805_v56, %v7287_v31 }
 0x2fe   : >> { %1951 = vrot.lane.b32.xlu0 %v1915_v28, %s5517_s0 }
 0x2ff   : >> { %v7326_v63 = vpop.permute.xlu2 %2178  ;;  %v7328_v0 = vpop.permute.xlu1 %2046 }
 0x300   : >> { %v1948_v50 = vpop.permute.xlu0 %1947 }
 0x301   : >> { %v1983_v21 = vadd.f32 %v1948_v50, %v1896_v29  ;;  %v2120_v29 = vadd.f32 %v2106_v8, %v2075_v53  ;;  %v7361_v50 = vld [vmem:[%s5719_s29 + $0x13] sm:$0xff]  ;;  %v1709_v8 = vmul.f32 %v6987_v38, %v7151_v19  ;;  %v2100_v53 = vmul.f32 %v7127_v13, %v7017_v55 }
 0x302   : >> { %v1822_v55 = vmul.f32 %v6624_v27, %v7361_v50 }
 0x303   : >> { %v7340_v30 = vadd.f32 %v2035_v26, %v1983_v21  ;;  %v2400_v26 = vmul.f32 %v6822_v6, %v7249_v36  ;;  %v2207_v16 = vadd.f32 %v7213_v54, %v2120_v29  ;;  %v2387_v54 = vmul.f32 %v6822_v6, %v7287_v31 }
 0x304   : >> { %v2114_v19 = vadd.f32 %v2100_v53, %v7227_v9 }
 0x305   : >> { %2024 = vrot.lane.b32.xlu1 %v1995_v40, %s5518_s23  ;;  %2038 = vrot.lane.b32.xlu2 %v2002_v59, %s5518_s23  ;;  %v2294_v41 = vadd.f32 %v2264_v12, %v2207_v16  ;;  %v2394_v12 = vmul.f32 %v6822_v6, %v7284_v15  ;;  %v1735_v59 = vmul.f32 %v6631_v20, %v7361_v50 }
 0x306   : >> { %2354 = vrot.lane.b32.xlu0 %v2313_v3, %s5517_s0  ;;  %v7378_v3 = vld [vmem:[%s5719_s29 + $0xc] sm:$0xff] }
 0x307   : >> { %v1849_v44 = vpop.permute.xlu2 %1848  ;;  %v1788_v11 = vpop.permute.xlu1 %1787  ;;  %v2127_v16 = vmul.f32 %v6749_v37, %v7378_v3 }
 0x308   : >> { %v7345_v43 = vadd.f32 %v1849_v44, %v1803_v39  ;;  %v1816_v5 = vadd.f32 %v1788_v11, %v7243_v23  ;;  %v2351_v51 = vpop.permute.xlu0 %2350  ;;  %v1723_v11 = vadd.f32 %v1709_v8, %v7296_v17 }
 0x309   : >> { %v2381_v28 = vadd.f32 %v2351_v51, %v2294_v41 }
 0x30d   : >> { %2342 = vrot.lane.b32.xlu1 %v2307_v1, %s5517_s0  ;;  %2441 = vrot.lane.b32.xlu2 %v2400_v26, %s5518_s23 }
 0x30e   : >> { %2328 = vrot.lane.b32.xlu0 %v2300_v7, %s5517_s0  ;;  %v5222_v7 = vld [vmem:[%s5719_s29 + $0x1a] sm:$0xff] }
 0x30f   : >> { %v7358_v23 = vpop.permute.xlu2 %2166  ;;  %v2438_v39 = vpop.permute.xlu1 %2437  ;;  %v1517_v41 = vmul.f32 %v5222_v7, %v6574_v18 }
 0x310   : >> { %v2468_v21 = vadd.f32 %v2438_v39, %v2381_v28  ;;  %v2339_v40 = vpop.permute.xlu0 %2338  ;;  %v2201_v28 = vadd.f32 %v7254_v10, %v2114_v19  ;;  %v1604_v10 = vmul.f32 %v5222_v7, %v6595_v47  ;;  %v1996_v19 = vmul.f32 %v6690_v25, %v7361_v50 }
 0x312   : >> { %5007 = vmatmul.msk.f32.gmra.mxu3 %vm2471_vm1, %v2468_v21  ;;  %v2288_v39 = vadd.f32 %v7289_v60, %v2201_v28  ;;  %v7396_v21 = vld [vmem:[%s5719_s29 + $0x44] sm:$0xff]  ;;  %v1909_v60 = vmul.f32 %v6658_v2, %v7361_v50 }
 0x313   : >> { %v2134_v53 = vmul.f32 %v6749_v37, %v7396_v21  ;;  %v2308_v28 = vmul.f32 %v6805_v56, %v7396_v21 }
 0x314   : >> { %v2375_v9 = vadd.f32 %v2339_v40, %v2288_v39 }
 0x315   : >> { %2415 = vrot.lane.b32.xlu1 %v2387_v54, %s5518_s23  ;;  %2429 = vrot.lane.b32.xlu2 %v2394_v12, %s5518_s23  ;;  %v9262_v54 = vld [vmem:[#allocation73_spill] sm:$0xff] }
 0x316   : >> { %1765 = vrot.lane.b32.xlu0 %v1735_v59, %s5515_s12 }
 0x317   : >> { %v1646_v29 = vpop.permute.xlu2 %1645  ;;  %v1875_v44 = vpop.permute.xlu1 %1874 }
 0x318   : >> { %v1903_v51 = vadd.f32 %v1875_v44, %v1816_v5  ;;  %v1776_v1 = vpop.permute.xlu0 %1775 }
 0x319   : >> { %v1810_v26 = vadd.f32 %v1776_v1, %v1723_v11 }
 0x31d   : >> { %1852 = vrot.lane.b32.xlu1 %v1822_v55, %s5516_s22  ;;  %2156 = vrot.lane.b32.xlu2 %v2127_v16, %s5515_s12  ;;  %v2214_v55 = vmul.f32 %v6764_v14, %v7378_v3 }
 0x31e   : >> { %1548 = vrot.lane.b32.xlu0 %v1517_v41, %s5517_s0 }
 0x31f   : >> { %v7393_v17 = vpop.permute.xlu2 %2048  ;;  %v1559_v5 = vpop.permute.xlu1 %1558 }
 0x320   : >> { %v1592_v12 = vadd.f32 %v1559_v5, %v9262_v54  ;;  %v2426_v59 = vpop.permute.xlu0 %2425  ;;  %v2107_v5 = vmul.f32 %v7127_v13, %v7148_v62  ;;  %v2076_v54 = vadd.f32 %v7328_v0, %v7304_v22  ;;  %v2395_v62 = vmul.f32 %v6822_v6, %v7396_v21 }
 0x321   : >> { %v2462_v18 = vadd.f32 %v2426_v59, %v2375_v9  ;;  %v2301_v9 = vmul.f32 %v6805_v56, %v7378_v3  ;;  %v2388_v0 = vmul.f32 %v6822_v6, %v7378_v3 }
 0x322   : >> { %v7402_v8 = vadd.f32 %v1646_v29, %v1592_v12  ;;  %v2221_v29 = vmul.f32 %v6764_v14, %v7396_v21 }
 0x323   : >> { %5001 = vmatmul.msk.f32.gmra.mxu2 %vm2471_vm1, %v2462_v18 }
 0x325   : >> { %1635 = vrot.lane.b32.xlu1 %v1604_v10, %s5518_s23  ;;  %1939 = vrot.lane.b32.xlu2 %v1909_v60, %s5517_s0 }
 0x326   : >> { %2170 = vrot.lane.b32.xlu0 %v2134_v53, %s5515_s12 }
 0x327   : >> { %v2023_v40 = vpop.permute.xlu2 %2022  ;;  %v1962_v44 = vpop.permute.xlu1 %1961 }
 0x328   : >> { %v7410_v47 = vadd.f32 %v1962_v44, %v1903_v51  ;;  %v1863_v11 = vpop.permute.xlu0 %1862  ;;  %v7424_v51 = vld [vmem:[%s5719_s29 + $0x1b] sm:$0xff] }
 0x329   : >> { %v7412_v1 = vadd.f32 %v1863_v11, %v1810_v26  ;;  %v1736_v39 = vmul.f32 %v6631_v20, %v7424_v51  ;;  %v2121_v20 = vadd.f32 %v2107_v5, %v2076_v54  ;;  %v1823_v22 = vmul.f32 %v6624_v27, %v7424_v51  ;;  %v7458_v44 = vld [vmem:[%s5719_s29 + $0x14] sm:$0xff] }
 0x32a   : >> { %v1703_v5 = vmul.f32 %v6987_v38, %v7257_v4  ;;  %v2101_v54 = vmul.f32 %v7127_v13, %v7180_v42 }
 0x32b   : >> { %v2208_v60 = vadd.f32 %v7326_v63, %v2121_v20 }
 0x32d   : >> { %2257 = vrot.lane.b32.xlu1 %v2221_v29, %s5516_s22  ;;  %2026 = vrot.lane.b32.xlu2 %v1996_v19, %s5518_s23  ;;  %v1910_v19 = vmul.f32 %v6658_v2, %v7424_v51  ;;  %v2302_v2 = vmul.f32 %v6805_v56, %v7458_v44 }
 0x32e   : >> { %2243 = vrot.lane.b32.xlu0 %v2214_v55, %s5516_s22  ;;  %v2128_v55 = vmul.f32 %v6749_v37, %v7458_v44 }
 0x32f   : >> { %v2440_v16 = vpop.permute.xlu2 %2439  ;;  %v1632_v26 = vpop.permute.xlu1 %1631 }
 0x330   : >> { %v1672_v7 = vadd.f32 %v1632_v26, %v6958_v33  ;;  %v2266_v41 = vpop.permute.xlu0 %2265 }
 0x331   : >> { %v2295_v53 = vadd.f32 %v2266_v41, %v2208_v60 }
 0x335   : >> { %2344 = vrot.lane.b32.xlu1 %v2308_v28, %s5517_s0  ;;  %1767 = vrot.lane.b32.xlu2 %v1736_v39, %s5515_s12  ;;  %v1997_v39 = vmul.f32 %v6690_v25, %v7424_v51  ;;  %v7487_v25 = vld [vmem:[%s5719_s29 + $0x1c] sm:$0xff] }
 0x336   : >> { %2330 = vrot.lane.b32.xlu0 %v2301_v9, %s5517_s0  ;;  %v1710_v9 = vmul.f32 %v6987_v38, %v7252_v48  ;;  %v2216_v42 = vmul.f32 %v6764_v14, %v7487_v25  ;;  %v2129_v60 = vmul.f32 %v6749_v37, %v7487_v25 }
 0x337   : >> { %v7440_v33 = vpop.permute.xlu2 %2180  ;;  %v7442_v12 = vpop.permute.xlu1 %1949 }
 0x338   : >> { %v1936_v59 = vpop.permute.xlu0 %1935  ;;  %v1724_v20 = vadd.f32 %v1710_v9, %v7402_v8 }
 0x339   : >> { %v1977_v18 = vadd.f32 %v1936_v59, %v7345_v43 }
 0x33b   : >> { %v7451_v10 = vadd.f32 %v2023_v40, %v1977_v18  ;;  %v2215_v40 = vmul.f32 %v6764_v14, %v7458_v44  ;;  %v1717_v18 = vadd.f32 %v1703_v5, %v1672_v7  ;;  %v9263_v7 = vld [vmem:[#allocation71_spill] sm:$0xff]  ;;  %v9265_v14 = vld [vmem:[#allocation66_spill] sm:$0xff] }
 0x33d   : >> { %2431 = vrot.lane.b32.xlu1 %v2395_v62, %s5518_s23  ;;  %1854 = vrot.lane.b32.xlu2 %v1823_v22, %s5516_s22  ;;  %v2115_v22 = vadd.f32 %v2101_v54, %v7340_v30 }
 0x33e   : >> { %2417 = vrot.lane.b32.xlu0 %v2388_v0, %s5518_s23  ;;  %v2303_v0 = vmul.f32 %v6805_v56, %v7487_v25 }
 0x33f   : >> { %v2353_v43 = vpop.permute.xlu1 %2352  ;;  %v1851_v11 = vpop.permute.xlu2 %1850  ;;  %v2202_v8 = vadd.f32 %v7358_v23, %v2115_v22  ;;  %v1984_v22 = vadd.f32 %v7442_v12, %v7412_v1 }
 0x340   : >> { %v2382_v29 = vadd.f32 %v2353_v43, %v2295_v53  ;;  %v2254_v27 = vpop.permute.xlu0 %2253  ;;  %v9264_v43 = vld [vmem:[#allocation62_spill] sm:$0xff] }
 0x342   : >> { %v2469_v63 = vadd.f32 %v2440_v16, %v2382_v29  ;;  %v2389_v16 = vmul.f32 %v6822_v6, %v7458_v44  ;;  %v1412_v29 = vadd.f32 %v9264_v43, %v9263_v7 }
 0x344   : >> { %5008 = vmatmul.msk.f32.gmra.mxu3 %vm2471_vm1, %v2469_v63  ;;  %v1499_v63 = vadd.f32 %v9265_v14, %v1412_v29  ;;  %v2095_v29 = vmul.f32 %v7127_v13, %v7287_v31 }
 0x345   : >> { %1941 = vrot.lane.b32.xlu1 %v1910_v19, %s5517_s0  ;;  %2245 = vrot.lane.b32.xlu2 %v2215_v40, %s5516_s22  ;;  %v2289_v40 = vadd.f32 %v2254_v27, %v2202_v8 }
 0x346   : >> { %2158 = vrot.lane.b32.xlu0 %v2128_v55, %s5515_s12 }
 0x347   : >> { %v2341_v26 = vpop.permute.xlu1 %2340  ;;  %v2169_v28 = vpop.permute.xlu2 %2168 }
 0x348   : >> { %v2037_v41 = vpop.permute.xlu0 %2036  ;;  %v2376_v56 = vadd.f32 %v2341_v26, %v2289_v40  ;;  %v2077_v26 = vadd.f32 %v7393_v17, %v7410_v47 }
 0x34d   : >> { %2332 = vrot.lane.b32.xlu1 %v2302_v2, %s5517_s0  ;;  %2419 = vrot.lane.b32.xlu2 %v2389_v16, %s5518_s23  ;;  %v2390_v2 = vmul.f32 %v6822_v6, %v7487_v25 }
 0x34e   : >> { %2028 = vrot.lane.b32.xlu0 %v1997_v39, %s5518_s23 }
 0x34f   : >> { %v1778_v59 = vpop.permute.xlu1 %1777  ;;  %v1938_v19 = vpop.permute.xlu2 %1937 }
 0x350   : >> { %v1811_v62 = vadd.f32 %v1778_v59, %v1724_v20  ;;  %v1764_v48 = vpop.permute.xlu0 %1763 }
 0x351   : >> { %v1804_v4 = vadd.f32 %v1764_v48, %v1717_v18  ;;  %v2108_v18 = vmul.f32 %v7127_v13, %v7249_v36 }
 0x353   : >> { %v1891_v53 = vadd.f32 %v1851_v11, %v1804_v4  ;;  %v2122_v4 = vadd.f32 %v2108_v18, %v2077_v26  ;;  %v2096_v18 = vmul.f32 %v7127_v13, %v7378_v3  ;;  %v9267_v3 = vld [vmem:[#allocation56_spill] sm:$0xff] }
 0x355   : >> { %2247 = vrot.lane.b32.xlu1 %v2216_v42, %s5516_s22  ;;  %2334 = vrot.lane.b32.xlu2 %v2303_v0, %s5517_s0  ;;  %v7501_v30 = vadd.f32 %v1938_v19, %v1891_v53  ;;  %v2071_v0 = vadd.f32 %v2037_v41, %v1984_v22 }
 0x356   : >> { %2160 = vrot.lane.b32.xlu0 %v2129_v60, %s5515_s12  ;;  %v2209_v60 = vadd.f32 %v7440_v33, %v2122_v4  ;;  %v1704_v4 = vmul.f32 %v6987_v38, %v7361_v50  ;;  %s2639_s12 = smul.u32 40, %s5499_s16  ;;  %s505_s16 = sadd.s32 1, %s5499_s16  }
 0x357   : >> { %v1547_v37 = vpop.permute.xlu1 %1546  ;;  %v2256_v39 = vpop.permute.xlu2 %2255  ;;  %p502_p1 = scmp.ge.s32.totalorder %s505_s16, 8  }
 0x358   : >> { %v1586_v55 = vadd.f32 %v1547_v37, %v1499_v63  ;;  %v2428_v23 = vpop.permute.xlu0 %2427  ;;  %s2640_s22 = scalar_lea.vmem [#allocation2], %s2639_s12  ;;  %s7560_s0 = smov (%p502_p1), 0  }
 0x359   : >> { %v2463_v11 = vadd.f32 %v2428_v23, %v2376_v56 }
 0x35b   : >> { %5002 = vmatmul.msk.f32.gmra.mxu2 %vm2471_vm1, %v2463_v11 }
 0x35e   : >> { %2421 = vrot.lane.b32.xlu0 %v2390_v2, %s5518_s23 }
 0x35f   : >> { %v2155_v27 = vpop.permute.xlu1 %2154  ;;  %v2039_v59 = vpop.permute.xlu2 %2038 }
 0x360   : >> { %v1865_v16 = vpop.permute.xlu0 %1864 }
 0x361   : >> { %v1898_v9 = vadd.f32 %v1865_v16, %v1811_v62  ;;  %v2102_v62 = vmul.f32 %v7127_v13, %v7284_v15  ;;  %v2109_v15 = vadd.f32 %v2095_v29, %v7451_v10 }
 0x363   : >> { %v2116_v7 = vadd.f32 %v2102_v62, %v2071_v0  ;;  %v2196_v33 = vadd.f32 %v2155_v27, %v2109_v15 }
 0x365   : >> { %v2203_v36 = vadd.f32 %v2169_v28, %v2116_v7 }
 0x367   : >> { %v1634_v5 = vpop.permute.xlu1 %1633  ;;  %v2442_v42 = vpop.permute.xlu2 %2441  ;;  %v2290_v1 = vadd.f32 %v2256_v39, %v2203_v36 }
 0x368   : >> { %v1673_v54 = vadd.f32 %v1634_v5, %v1586_v55  ;;  %v2268_v20 = vpop.permute.xlu0 %2267 }
 0x369   : >> { %v2296_v8 = vadd.f32 %v2268_v20, %v2209_v60 }
 0x36a   : >> { %v1718_v60 = vadd.f32 %v1704_v4, %v1673_v54 }
 0x36f   : >> { %v2242_v48 = vpop.permute.xlu1 %2241  ;;  %v2430_v19 = vpop.permute.xlu2 %2429 }
 0x370   : >> { %v1952_v6 = vpop.permute.xlu0 %1951  ;;  %v2283_v63 = vadd.f32 %v2242_v48, %v2196_v33 }
 0x371   : >> { %v1985_v20 = vadd.f32 %v1952_v6, %v1898_v9 }
 0x373   : >> { %v2072_v22 = vadd.f32 %v2039_v59, %v1985_v20 }
 0x377   : >> { %v2025_v53 = vpop.permute.xlu1 %2024  ;;  %v2157_v37 = vpop.permute.xlu2 %2156 }
 0x378   : >> { %v2355_v17 = vpop.permute.xlu0 %2354  ;;  %v2065_v26 = vadd.f32 %v2025_v53, %v7501_v30 }
 0x379   : >> { %v2383_v47 = vadd.f32 %v2355_v17, %v2296_v8 }
 0x37a   : >> { %v2110_v62 = vadd.f32 %v2096_v18, %v2065_v26 }
 0x37b   : >> { %v2470_v43 = vadd.f32 %v2442_v42, %v2383_v47  ;;  %v2103_v42 = vmul.f32 %v7127_v13, %v7396_v21  ;;  %v9266_v47 = vld [vmem:[#allocation69_spill] sm:$0xff] }
 0x37c   : >> { %v2197_v17 = vadd.f32 %v2157_v37, %v2110_v62 }
 0x37d   : >> { %5009 = vmatmul.msk.f32.gmra.mxu3 %vm2471_vm1, %v2470_v43  ;;  %v2117_v8 = vadd.f32 %v2103_v42, %v2072_v22  ;;  %v1413_v43 = vadd.f32 %v9267_v3, %v9266_v47 }
 0x37f   : >> { %v2343_v12 = vpop.permute.xlu1 %2342  ;;  %v1940_v31 = vpop.permute.xlu2 %1939  ;;  %v1500_v50 = vadd.f32 %v6866_v32, %v1413_v43 }
 0x380   : >> { %v2377_v41 = vadd.f32 %v2343_v12, %v2290_v1  ;;  %v2329_v40 = vpop.permute.xlu0 %2328 }
 0x381   : >> { %v2370_v56 = vadd.f32 %v2329_v40, %v2283_v63  ;;  %v1705_v40 = vmul.f32 %v6987_v38, %v7424_v51 }
 0x382   : >> { %v2464_v14 = vadd.f32 %v2430_v19, %v2377_v41 }
 0x384   : >> { %5003 = vmatmul.msk.f32.gmra.mxu2 %vm2471_vm1, %v2464_v14  ;;  %v2097_v14 = vmul.f32 %v7127_v13, %v7458_v44  ;;  %v2098_v44 = vmul.f32 %v7127_v13, %v7487_v25  ;;  %v2547_v13 = vpop.f32.mrf.mxu2 }
 0x387   : >> { %v2416_v28 = vpop.permute.xlu1 %2415  ;;  %v2027_v10 = vpop.permute.xlu2 %2026 }
 0x388   : >> { %v2457_v55 = vadd.f32 %v2416_v28, %v2370_v56  ;;  %v1766_v23 = vpop.permute.xlu0 %1765 }
 0x389   : >> { %v1805_v9 = vadd.f32 %v1766_v23, %v1718_v60  ;;  %v2562_v60 = vpop.f32.mrf.mxu3 }
 0x38a   : >> { %4996 = vmatmul.msk.f32.vlgmr.msra.gmra.mxu0 %vm2471_vm1, %v2457_v55 }
 0x38f   : >> { %v1853_v11 = vpop.permute.xlu1 %1852  ;;  %v1768_v48 = vpop.permute.xlu2 %1767 }
 0x390   : >> { %v1549_v2 = vpop.permute.xlu0 %1548  ;;  %v1892_v30 = vadd.f32 %v1853_v11, %v1805_v9 }
 0x391   : >> { %v1587_v15 = vadd.f32 %v1549_v2, %v1500_v50  ;;  %v9270_v50 = vld [vmem:[#allocation26_spill] sm:$0xff] }
 0x392   : >> { %v1979_v1 = vadd.f32 %v1940_v31, %v1892_v30 }
 0x394   : >> { %v2066_v63 = vadd.f32 %v2027_v10, %v1979_v1 }
 0x396   : >> { %v2111_v55 = vadd.f32 %v2097_v14, %v2066_v63 }
 0x397   : >> { %v1636_v16 = vpop.permute.xlu1 %1635  ;;  %v1855_v59 = vpop.permute.xlu2 %1854 }
 0x398   : >> { %v2171_v39 = vpop.permute.xlu0 %2170  ;;  %v1674_v33 = vadd.f32 %v1636_v16, %v1587_v15 }
 0x399   : >> { %v2204_v6 = vadd.f32 %v2171_v39, %v2117_v8  ;;  %v2565_v8 = vpop.f32.mrf.mxu3 }
 0x39a   : >> { %v1719_v56 = vadd.f32 %v1705_v40, %v1674_v33 }
 0x39c   : >> { %v1806_v31 = vadd.f32 %v1768_v48, %v1719_v56 }
 0x39e   : >> { %v1893_v2 = vadd.f32 %v1855_v59, %v1806_v31 }
 0x39f   : >> { %v2258_v5 = vpop.permute.xlu1 %2257  ;;  %v2246_v32 = vpop.permute.xlu2 %2245 }
 0x3a0   : >> { %v2244_v27 = vpop.permute.xlu0 %2243  ;;  %v2291_v53 = vadd.f32 %v2258_v5, %v2204_v6 }
 0x3a1   : >> { %v2284_v36 = vadd.f32 %v2244_v27, %v2197_v17 }
 0x3a6   : >> { %v2550_v25 = vpop.f32.mrf.mxu2 }
 0x3a7   : >> { %v2345_v0 = vpop.permute.xlu1 %2344  ;;  %v2420_v5 = vpop.permute.xlu2 %2419 }
 0x3a8   : >> { %v2331_v7 = vpop.permute.xlu0 %2330  ;;  %v2378_v29 = vadd.f32 %v2345_v0, %v2291_v53 }
 0x3a9   : >> { %v2371_v19 = vadd.f32 %v2331_v7, %v2284_v36  ;;  %v2568_v7 = vpop.f32.mrf.mxu3  ;;  %v9268_v36 = vld [vmem:[#allocation24_spill] sm:$0xff] }
 0x3af   : >> { %v2432_v21 = vpop.permute.xlu1 %2431  ;;  %v2335_v48 = vpop.permute.xlu2 %2334 }
 0x3b0   : >> { %v2465_v12 = vadd.f32 %v2432_v21, %v2378_v29  ;;  %v2418_v54 = vpop.permute.xlu0 %2417  ;;  %v9269_v29 = vld [vmem:[#allocation25_spill] sm:$0xff]  ;;  %v9272_v21 = vld [vmem:[#allocation28_spill] sm:$0xff] }
 0x3b1   : >> { %v2458_v41 = vadd.f32 %v2418_v54, %v2371_v19  ;;  %v9271_v19 = vld [vmem:[#allocation27_spill] sm:$0xff] }
 0x3b2   : >> { %5004 = vmatmul.msk.f32.gmra.mxu2 %vm2471_vm1, %v2465_v12  ;;  %v2633_v12 = vstv %s2632_s13 }
 0x3b3   : >> { %4997 = vmatmul.msk.f32.gmra.mxu0 %vm2471_vm1, %v2458_v41 }
 0x3b7   : >> { %v1942_v37 = vpop.permute.xlu1 %1941 }
 0x3b8   : >> { %v2159_v28 = vpop.permute.xlu0 %2158  ;;  %v1980_v51 = vadd.f32 %v1942_v37, %v1893_v2 }
 0x3b9   : >> { %v2198_v23 = vadd.f32 %v2159_v28, %v2111_v55 }
 0x3bb   : >> { %v2285_v11 = vadd.f32 %v2246_v32, %v2198_v23 }
 0x3bf   : >> { %v2333_v39 = vpop.permute.xlu1 %2332 }
 0x3c0   : >> { %v2372_v20 = vadd.f32 %v2333_v39, %v2285_v11  ;;  %v2029_v38 = vpop.permute.xlu0 %2028 }
 0x3c1   : >> { %v2067_v27 = vadd.f32 %v2029_v38, %v1980_v51 }
 0x3c2   : >> { %v2459_v16 = vadd.f32 %v2420_v5, %v2372_v20 }
 0x3c3   : >> { %v2112_v10 = vadd.f32 %v2098_v44, %v2067_v27 }
 0x3c4   : >> { %4998 = vmatmul.msk.f32.gmra.mxu0 %vm2471_vm1, %v2459_v16 }
 0x3c7   : >> { %v2248_v18 = vpop.permute.xlu1 %2247  ;;  %v2571_v9 = vpop.f32.mrf.mxu3 }
 0x3c8   : >> { %v2161_v26 = vpop.permute.xlu0 %2160 }
 0x3c9   : >> { %v2199_v22 = vadd.f32 %v2161_v26, %v2112_v10 }
 0x3cb   : >> { %v2286_v4 = vadd.f32 %v2248_v18, %v2199_v22 }
 0x3cd   : >> { %v2373_v42 = vadd.f32 %v2335_v48, %v2286_v4 }
 0x3d0   : >> { %v2422_v62 = vpop.permute.xlu0 %2421 }
 0x3d1   : >> { %v2460_v0 = vadd.f32 %v2422_v62, %v2373_v42 }
 0x3d3   : >> { %4999 = vmatmul.msk.f32.gmra.mxu0 %vm2471_vm1, %v2460_v0 }
 0x3de   : >> { %v2553_v17 = vpop.f32.mrf.mxu2 }
 0x400   : >> { %v2574_v6 = vpop.f32.mrf.mxu3 }
 0x401   : >> { %5010 = vmatpush.msk.msra.mxu1 %vm2514_vm0, %v2574_v6 }
 0x403   : >> { %2598 = vmatpush.msra.mxu1 %v2571_v9 }
 0x405   : >> { %2599 = vmatpush.msra.mxu1 %v2568_v7 }
 0x407   : >> { %2600 = vmatpush.msra.mxu1 %v2565_v8  ;;  %v2556_v30 = vpop.f32.mrf.mxu2  ;;  %v2535_v47 = vpop.f32.mrf.mxu0 }
 0x409   : >> { %2601 = vmatpush.msra.mxu1 %v2562_v60 }
 0x430   : >> { %v2538_v3 = vpop.f32.mrf.mxu0 }
 0x435   : >> { %v2559_v53 = vpop.f32.mrf.mxu2 }
 0x436   : >> { %2602 = vmatpush.msra.mxu1 %v2559_v53 }
 0x438   : >> { %2603 = vmatpush.msra.mxu1 %v2556_v30 }
 0x43a   : >> { %2604 = vmatpush.msra.mxu1 %v2553_v17 }
 0x43c   : >> { %2605 = vmatpush.msra.mxu1 %v2550_v25 }
 0x43e   : >> { %2606 = vmatpush.msra.mxu1 %v2547_v13 }
 0x441   : >> { %v2541_v43 = vpop.f32.mrf.mxu0 }
 0x450   : >> { %v2544_v59 = vpop.f32.mrf.mxu0 }
 0x451   : >> { %2607 = vmatpush.msra.mxu1 %v2544_v59 }
 0x453   : >> { %2608 = vmatpush.msra.mxu1 %v2541_v43 }
 0x455   : >> { %2609 = vmatpush.msra.mxu1 %v2538_v3 }
 0x457   : >> { %2610 = vmatpush.msra.mxu1 %v2535_v47 }
 0x458   : >> { %5011 = vmatmul.msk.f32.vlgmr.msra.gmra.mxu1 %vm2471_vm1, %v9268_v36 }
 0x460   : >> { %5012 = vmatmul.msk.f32.gmra.mxu1 %vm2471_vm1, %v9269_v29 }
 0x468   : >> { %5013 = vmatmul.msk.f32.gmra.mxu1 %vm2471_vm1, %v9270_v50 }
 0x470   : >> { %5014 = vmatmul.msk.f32.gmra.mxu1 %vm2471_vm1, %v9271_v19 }
 0x478   : >> { %5015 = vmatmul.msk.f32.gmra.mxu1 %vm2471_vm1, %v9272_v21 }
 0x4d5   : >> { %v2612_v1 = vpop.f32.mrf.mxu1 }
 0x4d6   : >> { %v2627_v54 = vmul.f32 0.11111111, %v2612_v1 }
 0x4d8   : >> { %v2634_v15 = vadd.f32 %v2633_v12, %v2627_v54 }
 0x4da   : >> { %2642 = vst.msk [vmem:[%s2640_s22] sm:$0xff] %vm2641_vm2, %v2634_v15 }
 0x4dd   : >> { %v2615_v41 = vpop.f32.mrf.mxu1 }
 0x4de   : >> { %v2628_v40 = vmul.f32 0.11111111, %v2615_v41 }
 0x4e0   : >> { %v2635_v33 = vadd.f32 %v2633_v12, %v2628_v40 }
 0x4e2   : >> { %2643 = vst.msk [vmem:[%s2640_s22 + $0x8] sm:$0xff] %vm2641_vm2, %v2635_v33 }
 0x4e5   : >> { %v2618_v14 = vpop.f32.mrf.mxu1 }
 0x4e6   : >> { %v2629_v63 = vmul.f32 0.11111111, %v2618_v14 }
 0x4e8   : >> { %v2636_v32 = vadd.f32 %v2633_v12, %v2629_v63 }
 0x4ea   : >> { %2644 = vst.msk [vmem:[%s2640_s22 + $0x10] sm:$0xff] %vm2641_vm2, %v2636_v32 }
 0x4ed   : >> { %v2621_v56 = vpop.f32.mrf.mxu1 }
 0x4ee   : >> { %v2630_v37 = vmul.f32 0.11111111, %v2621_v56 }
 0x4f0   : >> { %v2637_v28 = vadd.f32 %v2633_v12, %v2630_v37 }
 0x4f2   : >> { %2645 = vst.msk [vmem:[%s2640_s22 + $0x18] sm:$0xff] %vm2641_vm2, %v2637_v28 }
 0x4f5   : >> { %v2624_v55 = vpop.f32.mrf.mxu1 }
 0x4f6   : >> { %v2631_v23 = vmul.f32 0.11111111, %v2624_v55  ;;  %504 = sbr.rel (!%p502_p1) target bundleno = 105 (0x69), region = 152 }
 0x4f8   : >> { %v2638_v31 = vadd.f32 %v2633_v12, %v2631_v23 }
 0x4fa   : >> { %2647 = vst.msk [vmem:[%s2640_s22 + $0x20] sm:$0xf] %vm2646_vm3, %v2638_v31 }
 0x4fb LB: >> { %s7566_s23 = smul.u32 72, %s5503_s0  ;;  %s9151_s20 = smov 127   ;;  %vm4725_vm4 = vcmask 1041408   ;;  %vm4709_vm5 = vcmask 277504   ;;  %vm4808_vm6 = vcmask 138240   ;;  %vm4811_vm7 = vcmask 131072   ;;  %s5503_s0 = sphi %s7560_s0, %s2653_s0  }
 0x4fc   : >> { %s7577_s29 = smul.u32 24, %s5503_s0  ;;  %s5520_s17 = smov 126  }
 0x4fd   : >> { %s2672_s27 = sadd.s32 1, %s7566_s23  ;;  %s2705_s18 = sadd.s32 2, %s7566_s23 }
 0x4fe   : >> { %s2673_s26 = sld [smem:[#allocation8 + %s2672_s27]]  ;;  %s2739_s16 = sadd.s32 1, %s7577_s29 }
 0x4ff   : >> { %s2706_s15 = sld [smem:[#allocation8 + %s2705_s18]]  ;;  %s7590_s21 = smul.u32 3, %s2739_s16 }
 0x500   : >> { %s2824_s13 = sadd.s32 2, %s7577_s29  ;;  %s2655_s16 = sld [smem:[#allocation8 + %s7566_s23]] }
 0x501   : >> { %v7570_v11 = vld [vmem:[#allocation2 + $0x20] sm:$0x3]  ;;  %v7572_v2 = vld [vmem:[#allocation2 + $0x10] sm:$0xff]  ;;  %v7586_v34 = vld [vmem:[#allocation2 + $0x18] sm:$0xff]  ;;  %s2758_s24 = sadd.s32 1, %s7590_s21  ;;  %s2791_s25 = sadd.s32 2, %s7590_s21 }
 0x502   : >> { %v7574_v57 = vld [vmem:[#allocation2] sm:$0xff]  ;;  %v7588_v24 = vld [vmem:[#allocation2 + $0x8] sm:$0xff]  ;;  %s2759_s28 = sld [smem:[#allocation8 + %s2758_s24]]  ;;  %v7621_v4 = vld [vmem:[#allocation2 + $0x11] sm:$0xff]  ;;  %s7623_s22 = smul.u32 3, %s2824_s13 }
 0x503   : >> { %v7605_v51 = vld [vmem:[#allocation2 + $0x9] sm:$0xff]  ;;  %v7607_v27 = vld [vmem:[#allocation2 + $0x1] sm:$0xff]  ;;  %v7619_v22 = vld [vmem:[#allocation2 + $0x19] sm:$0xff]  ;;  %s2792_s12 = sld [smem:[#allocation8 + %s2791_s25]]  ;;  %s7655_s24 = sshll.u32 %s5503_s0, 3 }
 0x504   : >> { %v2674_v46 = vstv %s2673_s26  ;;  %v7617_v18 = vld [vmem:[#allocation2 + $0x21] sm:$0x3]  ;;  %s2843_s27 = sadd.s32 1, %s7623_s22  ;;  %s2876_s18 = sadd.s32 2, %s7623_s22  ;;  %v7649_v53 = vld [vmem:[#allocation2 + $0x12] sm:$0xff]  ;;  %v7652_v47 = vld [vmem:[#allocation2 + $0xa] sm:$0xff] }
 0x505   : >> { %v2679_v61 = vmul.f32 %v2674_v46, %v7570_v11  ;;  %v2677_v45 = vmul.f32 %v2674_v46, %v7572_v2  ;;  %v2675_v49 = vmul.f32 %v2674_v46, %v7574_v57  ;;  %v2707_v58 = vstv %s2706_s15  ;;  %s2844_s26 = sld [smem:[#allocation8 + %s2843_s27]]  ;;  %v7638_v9 = vld [vmem:[#allocation2 + $0x2] sm:$0xff]  ;;  %v7647_v30 = vld [vmem:[#allocation2 + $0x1a] sm:$0xff]  ;;  %v7690_v14 = vld [vmem:[#allocation2 + $0x30] sm:$0xff] }
 0x506   : >> { %v2708_v35 = vmul.f32 %v2707_v58, %v7574_v57  ;;  %v2678_v52 = vmul.f32 %v2674_v46, %v7586_v34  ;;  %v2676_v39 = vmul.f32 %v2674_v46, %v7588_v24  ;;  %v2711_v5 = vmul.f32 %v2707_v58, %v7586_v34  ;;  %s2877_s15 = sld [smem:[#allocation8 + %s2876_s18]]  ;;  %v7664_v29 = vld [vmem:[#allocation2 + $0x22] sm:$0x3]  ;;  %v7688_v40 = vld [vmem:[#allocation2 + $0x38] sm:$0xff]  ;;  %v7692_v63 = vld [vmem:[#allocation2 + $0x28] sm:$0xff] }
 0x507   : >> { %2693 = vrot.lane.b32.xlu2 %v2679_v61, %s9151_s20  ;;  %2689 = vrot.lane.b32.xlu1 %v2677_v45, %s9151_s20  ;;  %v2710_v20 = vmul.f32 %v2707_v58, %v7572_v2  ;;  %v2709_v38 = vmul.f32 %v2707_v58, %v7588_v24  ;;  %v2712_v26 = vmul.f32 %v2707_v58, %v7570_v11  ;;  %v7668_v50 = vstv %s2655_s16  ;;  %v7703_v55 = vld [vmem:[#allocation2 + $0x48] sm:$0x3]  ;;  %v7705_v23 = vld [vmem:[#allocation2 + $0x40] sm:$0xff] }
 0x508   : >> { %2685 = vrot.lane.b32.xlu0 %v2675_v49, %s9151_s20  ;;  %v2760_v16 = vstv %s2759_s28  ;;  %s2910_s28 = sadd.s32 1, %s7655_s24  ;;  %v7672_v19 = vmul.f32 %v7668_v50, %v7570_v11 }
 0x509   : >> { %v2762_v44 = vmul.f32 %v2760_v16, %v7605_v51  ;;  %v2761_v10 = vmul.f32 %v2760_v16, %v7607_v27  ;;  %v2765_v48 = vmul.f32 %v2760_v16, %v7617_v18  ;;  %v2764_v42 = vmul.f32 %v2760_v16, %v7619_v22  ;;  %s7666_s23 = smul.u32 9, %s2910_s28 }
 0x50a   : >> { %v2763_v62 = vmul.f32 %v2760_v16, %v7621_v4  ;;  %v2793_v0 = vstv %s2792_s12 }
 0x50b   : >> { %v2796_v60 = vmul.f32 %v2793_v0, %v7621_v4  ;;  %v2795_v8 = vmul.f32 %v2793_v0, %v7605_v51  ;;  %v2794_v7 = vmul.f32 %v2793_v0, %v7607_v27  ;;  %v2845_v6 = vstv %s2844_s26  ;;  %s2930_s25 = sadd.s32 1, %s7666_s23  ;;  %s2963_s12 = sadd.s32 2, %s7666_s23 }
 0x50c   : >> { %v2846_v13 = vmul.f32 %v2845_v6, %v7638_v9  ;;  %v2798_v25 = vmul.f32 %v2793_v0, %v7617_v18  ;;  %v2797_v17 = vmul.f32 %v2793_v0, %v7619_v22  ;;  %v2849_v3 = vmul.f32 %v2845_v6, %v7647_v30  ;;  %s2931_s13 = sld [smem:[#allocation8 + %s2930_s25]]  ;;  %s7694_s26 = smul.u32 3, %s2910_s28 }
 0x50d   : >> { %v2848_v43 = vmul.f32 %v2845_v6, %v7649_v53  ;;  %v2847_v59 = vmul.f32 %v2845_v6, %v7652_v47  ;;  %v2878_v36 = vstv %s2877_s15  ;;  %v2850_v12 = vmul.f32 %v2845_v6, %v7664_v29  ;;  %s2964_s27 = sld [smem:[#allocation8 + %s2963_s12]] }
 0x50e   : >> { %v2880_v21 = vmul.f32 %v2878_v36, %v7652_v47  ;;  %v2879_v1 = vmul.f32 %v2878_v36, %v7638_v9  ;;  %v2883_v54 = vmul.f32 %v2878_v36, %v7664_v29  ;;  %v2882_v15 = vmul.f32 %v2878_v36, %v7647_v30  ;;  %s2997_s18 = sadd.s32 1, %s7694_s26  ;;  %s2741_s12 = sld [smem:[#allocation8 + %s7590_s21]] }
 0x50f   : >> { %2718 = vrot.lane.b32.xlu2 %v2708_v35, %s5520_s17  ;;  %2691 = vrot.lane.b32.xlu1 %v2678_v52, %s9151_s20  ;;  %v2881_v41 = vmul.f32 %v2878_v36, %v7649_v53  ;;  %s7707_s15 = smul.u32 3, %s2997_s18  ;;  %v7724_v35 = vld [vmem:[#allocation2 + $0x31] sm:$0xff] }
 0x510   : >> { %2687 = vrot.lane.b32.xlu0 %v2676_v39, %s9151_s20  ;;  %v7726_v39 = vld [vmem:[#allocation2 + $0x29] sm:$0xff] }
 0x511   : >> { %s3016_s16 = sadd.s32 1, %s7707_s15  ;;  %s3049_s25 = sadd.s32 2, %s7707_s15 }
 0x512   : >> { %v2932_v33 = vstv %s2931_s13  ;;  %s3017_s28 = sld [smem:[#allocation8 + %s3016_s16]]  ;;  %s3082_s13 = sadd.s32 2, %s7694_s26 }
 0x513   : >> { %v2935_v32 = vmul.f32 %v2932_v33, %v7688_v40  ;;  %v2934_v56 = vmul.f32 %v2932_v33, %v7690_v14  ;;  %v2933_v37 = vmul.f32 %v2932_v33, %v7692_v63  ;;  %v2965_v28 = vstv %s2964_s27  ;;  %s3050_s27 = sld [smem:[#allocation8 + %s3049_s25]]  ;;  %s7743_s18 = smul.u32 3, %s3082_s13 }
 0x514   : >> { %v2966_v31 = vmul.f32 %v2965_v28, %v7692_v63  ;;  %v2937_v11 = vmul.f32 %v2932_v33, %v7703_v55  ;;  %v2936_v46 = vmul.f32 %v2932_v33, %v7705_v23  ;;  %v2969_v45 = vmul.f32 %v2965_v28, %v7705_v23  ;;  %s3167_s25 = sadd.s32 2, %s7655_s24  ;;  %s2826_s13 = sld [smem:[#allocation8 + %s7623_s22]] }
 0x515   : >> { %v2968_v49 = vmul.f32 %v2965_v28, %v7688_v40  ;;  %v2967_v58 = vmul.f32 %v2965_v28, %v7690_v14  ;;  %v2970_v16 = vmul.f32 %v2965_v28, %v7703_v55  ;;  %s3101_s21 = sadd.s32 1, %s7743_s18  ;;  %s3134_s16 = sadd.s32 2, %s7743_s18 }
 0x516   : >> { %s3102_s26 = sld [smem:[#allocation8 + %s3101_s21]] }
 0x517   : >> { %2724 = vrot.lane.b32.xlu2 %v2711_v5, %s5520_s17  ;;  %2722 = vrot.lane.b32.xlu1 %v2710_v20, %s5520_s17 }
 0x518   : >> { %2720 = vrot.lane.b32.xlu0 %v2709_v38, %s5520_s17  ;;  %v3018_v52 = vstv %s3017_s28  ;;  %s3135_s28 = sld [smem:[#allocation8 + %s3134_s16]]  ;;  %s7843_s16 = smul.u32 3, %s3167_s25 }
 0x519   : >> { %v3020_v20 = vmul.f32 %v3018_v52, %v7724_v35  ;;  %v3019_v38 = vmul.f32 %v3018_v52, %v7726_v39 }
 0x51f   : >> { %2773 = vrot.lane.b32.xlu2 %v2762_v44, %s9151_s20  ;;  %2771 = vrot.lane.b32.xlu1 %v2761_v10, %s9151_s20  ;;  %v7737_v44 = vld [vmem:[#allocation2 + $0x49] sm:$0x3]  ;;  %v7739_v10 = vld [vmem:[#allocation2 + $0x41] sm:$0xff] }
 0x520   : >> { %2726 = vrot.lane.b32.xlu0 %v2712_v26, %s5520_s17 }
 0x527   : >> { %2779 = vrot.lane.b32.xlu2 %v2765_v48, %s9151_s20  ;;  %2777 = vrot.lane.b32.xlu1 %v2764_v42, %s9151_s20  ;;  %v7741_v48 = vld [vmem:[#allocation2 + $0x39] sm:$0xff]  ;;  %v3023_v42 = vmul.f32 %v3018_v52, %v7737_v44 }
 0x528   : >> { %2775 = vrot.lane.b32.xlu0 %v2763_v62, %s9151_s20  ;;  %v3022_v62 = vmul.f32 %v3018_v52, %v7739_v10  ;;  %v3021_v0 = vmul.f32 %v3018_v52, %v7741_v48 }
 0x52f   : >> { %2808 = vrot.lane.b32.xlu2 %v2796_v60, %s5520_s17  ;;  %2806 = vrot.lane.b32.xlu1 %v2795_v8, %s5520_s17  ;;  %v2662_v60 = vmul.f32 %v7668_v50, %v7574_v57  ;;  %v2747_v8 = vstv %s2741_s12  ;;  %v2665_v57 = vmul.f32 %v7668_v50, %v7586_v34  ;;  %s7810_s12 = smul.u32 9, %s3167_s25 }
 0x530   : >> { %2804 = vrot.lane.b32.xlu0 %v2794_v7, %s5520_s17  ;;  %v3051_v7 = vstv %s3050_s27  ;;  %v2749_v52 = vmul.f32 %v2747_v8, %v7605_v51  ;;  %v3136_v51 = vstv %s3135_s28  ;;  %s3254_s28 = sadd.s32 1, %s7843_s16 }
 0x531   : >> { %v3052_v36 = vmul.f32 %v3051_v7, %v7726_v39  ;;  %s3187_s22 = sadd.s32 1, %s7810_s12  ;;  %s3220_s21 = sadd.s32 2, %s7810_s12 }
 0x532   : >> { %s3188_s27 = sld [smem:[#allocation8 + %s3187_s22]]  ;;  %s7861_s25 = smul.u32 3, %s3254_s28 }
 0x537   : >> { %2856 = vrot.lane.b32.xlu2 %v2846_v13, %s9151_s20  ;;  %2812 = vrot.lane.b32.xlu1 %v2798_v25, %s5520_s17 }
 0x538   : >> { %2810 = vrot.lane.b32.xlu0 %v2797_v17, %s5520_s17  ;;  %v2748_v17 = vmul.f32 %v2747_v8, %v7607_v27  ;;  %v7767_v27 = vld [vmem:[#allocation2 + $0x2a] sm:$0xff] }
 0x53f   : >> { %2862 = vrot.lane.b32.xlu2 %v2849_v3, %s9151_s20  ;;  %2860 = vrot.lane.b32.xlu1 %v2848_v43, %s9151_s20  ;;  %v3054_v43 = vmul.f32 %v3051_v7, %v7741_v48 }
 0x540   : >> { %2858 = vrot.lane.b32.xlu0 %v2847_v59, %s9151_s20  ;;  %v3053_v59 = vmul.f32 %v3051_v7, %v7724_v35 }
 0x547   : >> { %2891 = vrot.lane.b32.xlu2 %v2880_v21, %s5520_s17  ;;  %2889 = vrot.lane.b32.xlu1 %v2879_v1, %s5520_s17 }
 0x548   : >> { %2864 = vrot.lane.b32.xlu0 %v2850_v12, %s9151_s20  ;;  %v3103_v12 = vstv %s3102_s26  ;;  %s3221_s26 = sld [smem:[#allocation8 + %s3220_s21]]  ;;  %s3339_s21 = sadd.s32 2, %s7843_s16 }
 0x549   : >> { %v3104_v34 = vmul.f32 %v3103_v12, %v7767_v27 }
 0x54f   : >> { %2897 = vrot.lane.b32.xlu2 %v2883_v54, %s5520_s17  ;;  %2895 = vrot.lane.b32.xlu1 %v2882_v15, %s5520_s17 }
 0x550   : >> { %2893 = vrot.lane.b32.xlu0 %v2881_v41, %s5520_s17 }
 0x557   : >> { %2947 = vrot.lane.b32.xlu2 %v2935_v32, %s9151_s20  ;;  %2945 = vrot.lane.b32.xlu1 %v2934_v56, %s9151_s20  ;;  %v2751_v32 = vmul.f32 %v2747_v8, %v7619_v22  ;;  %v3056_v56 = vmul.f32 %v3051_v7, %v7737_v44 }
 0x558   : >> { %2943 = vrot.lane.b32.xlu0 %v2933_v37, %s9151_s20  ;;  %v2664_v37 = vmul.f32 %v7668_v50, %v7572_v2  ;;  %v7788_v2 = vld [vmem:[#allocation2 + $0x3a] sm:$0xff] }
 0x55f   : >> { %2976 = vrot.lane.b32.xlu2 %v2966_v31, %s5520_s17  ;;  %2951 = vrot.lane.b32.xlu1 %v2937_v11, %s9151_s20  ;;  %v3055_v31 = vmul.f32 %v3051_v7, %v7739_v10  ;;  %v2663_v11 = vmul.f32 %v7668_v50, %v7588_v24 }
 0x560   : >> { %2949 = vrot.lane.b32.xlu0 %v2936_v46, %s9151_s20 }
 0x561   : >> { %v7716_v61 = vpop.permute.xlu2 %2693 }
 0x567   : >> { %2982 = vrot.lane.b32.xlu2 %v2969_v45, %s5520_s17  ;;  %2980 = vrot.lane.b32.xlu1 %v2968_v49, %s5520_s17  ;;  %v2750_v45 = vmul.f32 %v2747_v8, %v7621_v4  ;;  %v7786_v49 = vld [vmem:[#allocation2 + $0x42] sm:$0xff]  ;;  %v3106_v4 = vmul.f32 %v3103_v12, %v7788_v2 }
 0x568   : >> { %2978 = vrot.lane.b32.xlu0 %v2967_v58, %s5520_s17 }
 0x569   : >> { %v2719_v5 = vpop.permute.xlu2 %2718 }
 0x56f   : >> { %3031 = vrot.lane.b32.xlu2 %v3020_v20, %s9151_s20  ;;  %3029 = vrot.lane.b32.xlu1 %v3019_v38, %s9151_s20 }
 0x570   : >> { %2984 = vrot.lane.b32.xlu0 %v2970_v16, %s5520_s17 }
 0x571   : >> { %v2725_v26 = vpop.permute.xlu2 %2724 }
 0x577   : >> { %3037 = vrot.lane.b32.xlu2 %v3023_v42, %s9151_s20  ;;  %3035 = vrot.lane.b32.xlu1 %v3022_v62, %s9151_s20 }
 0x578   : >> { %3033 = vrot.lane.b32.xlu0 %v3021_v0, %s9151_s20 }
 0x579   : >> { %v7754_v6 = vpop.permute.xlu2 %2773  ;;  %v2690_v13 = vpop.permute.xlu1 %2689 }
 0x57a   : >> { %v2686_v25 = vpop.permute.xlu0 %2685  ;;  %v2702_v22 = vadd.f32 %v2690_v13, %v2664_v37 }
 0x57b   : >> { %v2700_v3 = vadd.f32 %v2686_v25, %v2662_v60  ;;  %v2704_v60 = vadd.f32 %v7716_v61, %v7672_v19  ;;  %v2752_v25 = vmul.f32 %v2747_v8, %v7617_v18  ;;  %v2832_v18 = vstv %s2826_s13  ;;  %s2912_s13 = sld [smem:[#allocation8 + %s7666_s23]]  ;;  %s3273_s23 = sadd.s32 1, %s7861_s25 }
 0x57c   : >> { %s3274_s22 = sld [smem:[#allocation8 + %s3273_s23]] }
 0x57d   : >> { %v2733_v21 = vadd.f32 %v2719_v5, %v2700_v3  ;;  %v7791_v5 = vld [vmem:[#allocation2 + $0x32] sm:$0xff] }
 0x57e   : >> { %v3105_v62 = vmul.f32 %v3103_v12, %v7791_v5 }
 0x57f   : >> { %v7762_v1 = vadd.f32 %v2748_v17, %v2733_v21  ;;  %3066 = vrot.lane.b32.xlu2 %v3054_v43, %s5520_s17  ;;  %3064 = vrot.lane.b32.xlu1 %v3053_v59, %s5520_s17  ;;  %v7806_v17 = vld [vmem:[#allocation2 + $0x4a] sm:$0x3]  ;;  %v3138_v59 = vmul.f32 %v3136_v51, %v7791_v5 }
 0x580   : >> { %3062 = vrot.lane.b32.xlu0 %v3052_v36, %s5520_s17  ;;  %v3137_v36 = vmul.f32 %v3136_v51, %v7767_v27  ;;  %v3108_v21 = vmul.f32 %v3103_v12, %v7806_v17 }
 0x581   : >> { %v7769_v54 = vpop.permute.xlu2 %2779  ;;  %v2692_v15 = vpop.permute.xlu1 %2691 }
 0x582   : >> { %v2703_v41 = vadd.f32 %v2692_v15, %v2665_v57  ;;  %v2688_v33 = vpop.permute.xlu0 %2687  ;;  %v2835_v15 = vmul.f32 %v2832_v18, %v7649_v53  ;;  %v2834_v53 = vmul.f32 %v2832_v18, %v7652_v47 }
 0x583   : >> { %v2701_v58 = vadd.f32 %v2688_v33, %v2663_v11  ;;  %v3140_v33 = vmul.f32 %v3136_v51, %v7786_v49  ;;  %v7835_v11 = vld [vmem:[#allocation2 + $0x58] sm:$0xff] }
 0x584   : >> { %v2736_v28 = vadd.f32 %v2725_v26, %v2703_v41  ;;  %v3107_v26 = vmul.f32 %v3103_v12, %v7786_v49  ;;  %v3141_v12 = vmul.f32 %v3136_v51, %v7806_v17 }
 0x586   : >> { %v7780_v46 = vadd.f32 %v2751_v32, %v2736_v28  ;;  %v3139_v32 = vmul.f32 %v3136_v51, %v7788_v2  ;;  %v7833_v28 = vld [vmem:[#allocation2 + $0x60] sm:$0xff] }
 0x587   : >> { %3114 = vrot.lane.b32.xlu2 %v3104_v34, %s9151_s20  ;;  %3070 = vrot.lane.b32.xlu1 %v3056_v56, %s5520_s17 }
 0x588   : >> { %3068 = vrot.lane.b32.xlu0 %v3055_v31, %s5520_s17  ;;  %v3189_v31 = vstv %s3188_s27  ;;  %s3306_s27 = sadd.s32 2, %s7861_s25 }
 0x589   : >> { %v2809_v24 = vpop.permute.xlu2 %2808  ;;  %v2723_v50 = vpop.permute.xlu1 %2722  ;;  %s3307_s28 = sld [smem:[#allocation8 + %s3306_s27]]  ;;  %s3424_s27 = sadd.s32 3, %s7655_s24 }
 0x58a   : >> { %v2735_v20 = vadd.f32 %v2723_v50, %v2702_v22  ;;  %v2721_v38 = vpop.permute.xlu0 %2720  ;;  %v7839_v50 = vld [vmem:[#allocation2 + $0x50] sm:$0xff] }
 0x58b   : >> { %v2734_v16 = vadd.f32 %v2721_v38, %v2701_v58  ;;  %v3191_v38 = vmul.f32 %v3189_v31, %v7835_v11 }
 0x58c   : >> { %v2755_v42 = vadd.f32 %v2750_v45, %v2735_v20  ;;  %v3192_v20 = vmul.f32 %v3189_v31, %v7833_v28 }
 0x58d   : >> { %v2754_v0 = vadd.f32 %v2749_v52, %v2734_v16 }
 0x58f   : >> { %3120 = vrot.lane.b32.xlu2 %v3107_v26, %s9151_s20  ;;  %3118 = vrot.lane.b32.xlu1 %v3106_v4, %s9151_s20  ;;  %v2787_v37 = vadd.f32 %v7754_v6, %v2754_v0  ;;  %v2837_v4 = vmul.f32 %v2832_v18, %v7664_v29 }
 0x590   : >> { %3116 = vrot.lane.b32.xlu0 %v3105_v62, %s9151_s20  ;;  %v7855_v62 = vld [vmem:[#allocation2 + $0x70] sm:$0x3] }
 0x591   : >> { %v7803_v7 = vpop.permute.xlu2 %2856  ;;  %v2772_v13 = vpop.permute.xlu1 %2771  ;;  %v3194_v29 = vmul.f32 %v3189_v31, %v7855_v62 }
 0x592   : >> { %v2727_v3 = vpop.permute.xlu0 %2726  ;;  %v2786_v22 = vadd.f32 %v2772_v13, %v7762_v1  ;;  %v3190_v1 = vmul.f32 %v3189_v31, %v7839_v50  ;;  %v2836_v13 = vmul.f32 %v2832_v18, %v7647_v30  ;;  %v2919_v30 = vstv %s2912_s13 }
 0x593   : >> { %v2737_v43 = vadd.f32 %v2727_v3, %v2704_v60 }
 0x595   : >> { %v2757_v19 = vadd.f32 %v2752_v25, %v2737_v43  ;;  %v7859_v25 = vld [vmem:[#allocation2 + $0x68] sm:$0xff] }
 0x597   : >> { %3149 = vrot.lane.b32.xlu2 %v3138_v59, %s5520_s17  ;;  %3147 = vrot.lane.b32.xlu1 %v3137_v36, %s5520_s17 }
 0x598   : >> { %3122 = vrot.lane.b32.xlu0 %v3108_v21, %s9151_s20  ;;  %v3193_v21 = vmul.f32 %v3189_v31, %v7859_v25  ;;  %v3275_v31 = vstv %s3274_s22 }
 0x599   : >> { %v7819_v61 = vpop.permute.xlu2 %2862  ;;  %v2778_v8 = vpop.permute.xlu1 %2777 }
 0x59a   : >> { %v2776_v57 = vpop.permute.xlu0 %2775  ;;  %v2789_v0 = vadd.f32 %v2778_v8, %v7780_v46 }
 0x59b   : >> { %v2788_v41 = vadd.f32 %v2776_v57, %v2755_v42  ;;  %v3222_v42 = vstv %s3221_s26  ;;  %v2921_v57 = vmul.f32 %v2919_v30, %v7690_v14  ;;  %v2920_v14 = vmul.f32 %v2919_v30, %v7692_v63  ;;  %s2999_s26 = sld [smem:[#allocation8 + %s7707_s15]]  ;;  %s7909_s15 = smul.u32 3, %s3339_s21 }
 0x59c   : >> { %v3223_v59 = vmul.f32 %v3222_v42, %v7839_v50  ;;  %v3227_v63 = vmul.f32 %v3222_v42, %v7855_v62  ;;  %s3084_s21 = sld [smem:[#allocation8 + %s7743_s18]] }
 0x59d   : >> { %v2821_v34 = vadd.f32 %v2809_v24, %v2788_v41  ;;  %v2833_v24 = vmul.f32 %v2832_v18, %v7638_v9  ;;  %v2790_v9 = vadd.f32 %v7769_v54, %v2757_v19  ;;  %v3226_v41 = vmul.f32 %v3222_v42, %v7859_v25  ;;  %s3358_s16 = sadd.s32 1, %s7909_s15  ;;  %s3391_s23 = sadd.s32 2, %s7909_s15 }
 0x59e   : >> { %s3359_s13 = sld [smem:[#allocation8 + %s3358_s16]] }
 0x59f   : >> { %v7826_v56 = vadd.f32 %v2835_v15, %v2821_v34  ;;  %3155 = vrot.lane.b32.xlu2 %v3141_v12, %s5520_s17  ;;  %3153 = vrot.lane.b32.xlu1 %v3140_v33, %s5520_s17  ;;  %v3225_v12 = vmul.f32 %v3222_v42, %v7833_v28  ;;  %v3224_v33 = vmul.f32 %v3222_v42, %v7835_v11  ;;  %s3392_s22 = sld [smem:[#allocation8 + %s3391_s23]]  ;;  %s8000_s23 = smul.u32 3, %s3424_s27 }
 0x5a0   : >> { %3151 = vrot.lane.b32.xlu0 %v3139_v32, %s5520_s17 }
 0x5a1   : >> { %v2892_v45 = vpop.permute.xlu2 %2891  ;;  %v2807_v58 = vpop.permute.xlu1 %2806 }
 0x5a2   : >> { %v2820_v6 = vadd.f32 %v2807_v58, %v2787_v37  ;;  %v2805_v52 = vpop.permute.xlu0 %2804 }
 0x5a3   : >> { %v2819_v47 = vadd.f32 %v2805_v52, %v2786_v22  ;;  %v7885_v22 = vld [vmem:[#allocation2 + $0x51] sm:$0xff]  ;;  %v2924_v52 = vmul.f32 %v2919_v30, %v7703_v55 }
 0x5a4   : >> { %v2839_v16 = vadd.f32 %v2834_v53, %v2820_v6  ;;  %v7883_v53 = vld [vmem:[#allocation2 + $0x59] sm:$0xff] }
 0x5a5   : >> { %v2838_v26 = vadd.f32 %v2833_v24, %v2819_v47 }
 0x5a7   : >> { %3204 = vrot.lane.b32.xlu2 %v3192_v20, %s9151_s20  ;;  %3202 = vrot.lane.b32.xlu1 %v3191_v38, %s9151_s20  ;;  %v2871_v37 = vadd.f32 %v7803_v7, %v2838_v26  ;;  %v3277_v7 = vmul.f32 %v3275_v31, %v7883_v53  ;;  %v3276_v20 = vmul.f32 %v3275_v31, %v7885_v22  ;;  %v7900_v26 = vld [vmem:[#allocation2 + $0x71] sm:$0x3] }
 0x5a8   : >> { %3200 = vrot.lane.b32.xlu0 %v3190_v1, %s9151_s20 }
 0x5a9   : >> { %v2898_v51 = vpop.permute.xlu2 %2897  ;;  %v2813_v60 = vpop.permute.xlu1 %2812 }
 0x5aa   : >> { %v2823_v3 = vadd.f32 %v2813_v60, %v2790_v9  ;;  %v2811_v54 = vpop.permute.xlu0 %2810  ;;  %v7902_v9 = vld [vmem:[#allocation2 + $0x69] sm:$0xff]  ;;  %v2922_v60 = vmul.f32 %v2919_v30, %v7688_v40  ;;  %v3005_v40 = vstv %s2999_s26  ;;  %s7969_s26 = smul.u32 9, %s3424_s27  ;;  %s3169_s27 = sld [smem:[#allocation8 + %s7810_s12]] }
 0x5ab   : >> { %v2822_v43 = vadd.f32 %v2811_v54, %v2789_v0 }
 0x5ac   : >> { %v2842_v36 = vadd.f32 %v2837_v4, %v2823_v3  ;;  %v2923_v4 = vmul.f32 %v2919_v30, %v7705_v23  ;;  %s3444_s18 = sadd.s32 1, %s7969_s26  ;;  %s3477_s16 = sadd.s32 2, %s7969_s26 }
 0x5ad   : >> { %v2841_v46 = vadd.f32 %v2836_v13, %v2822_v43  ;;  %v7907_v13 = vld [vmem:[#allocation2 + $0x61] sm:$0xff]  ;;  %v3280_v43 = vmul.f32 %v3275_v31, %v7900_v26 }
 0x5ae   : >> { %v3278_v23 = vmul.f32 %v3275_v31, %v7907_v13 }
 0x5af   : >> { %3233 = vrot.lane.b32.xlu2 %v3223_v59, %s5520_s17  ;;  %3208 = vrot.lane.b32.xlu1 %v3194_v29, %s9151_s20  ;;  %v2874_v55 = vadd.f32 %v7819_v61, %v2841_v46  ;;  %v3279_v59 = vmul.f32 %v3275_v31, %v7902_v9 }
 0x5b0   : >> { %3206 = vrot.lane.b32.xlu0 %v3193_v21, %s9151_s20 }
 0x5b1   : >> { %v7870_v19 = vpop.permute.xlu2 %2947  ;;  %v2861_v18 = vpop.permute.xlu1 %2860 }
 0x5b2   : >> { %v2859_v8 = vpop.permute.xlu0 %2858  ;;  %v2873_v42 = vadd.f32 %v2861_v18, %v7826_v56  ;;  %v3006_v18 = vmul.f32 %v3005_v40, %v7726_v39  ;;  %v3360_v39 = vstv %s3359_s13  ;;  %s3478_s13 = sld [smem:[#allocation8 + %s3477_s16]] }
 0x5b3   : >> { %v2872_v15 = vadd.f32 %v2859_v8, %v2839_v16 }
 0x5b5   : >> { %v2905_v32 = vadd.f32 %v2892_v45, %v2872_v15 }
 0x5b7   : >> { %v7876_v34 = vadd.f32 %v2921_v57, %v2905_v32  ;;  %3239 = vrot.lane.b32.xlu2 %v3226_v41, %s5520_s17  ;;  %3237 = vrot.lane.b32.xlu1 %v3225_v12, %s5520_s17  ;;  %v7929_v32 = vld [vmem:[#allocation2 + $0x52] sm:$0xff] }
 0x5b8   : >> { %3235 = vrot.lane.b32.xlu0 %v3224_v33, %s5520_s17 }
 0x5b9   : >> { %v2977_v45 = vpop.permute.xlu2 %2976  ;;  %v2890_v58 = vpop.permute.xlu1 %2889 }
 0x5ba   : >> { %v2904_v24 = vadd.f32 %v2890_v58, %v2871_v37  ;;  %v2865_v6 = vpop.permute.xlu0 %2864 }
 0x5bb   : >> { %v2875_v47 = vadd.f32 %v2865_v6, %v2842_v36  ;;  %v3308_v36 = vstv %s3307_s28  ;;  %v3009_v6 = vmul.f32 %v3005_v40, %v7739_v10  ;;  %v7947_v10 = vld [vmem:[#allocation2 + $0x62] sm:$0xff]  ;;  %s3445_s28 = sld [smem:[#allocation8 + %s3444_s18]] }
 0x5bc   : >> { %v2925_v38 = vadd.f32 %v2920_v14, %v2904_v24  ;;  %v3311_v57 = vmul.f32 %v3308_v36, %v7907_v13  ;;  %v3310_v15 = vmul.f32 %v3308_v36, %v7883_v53  ;;  %v3309_v41 = vmul.f32 %v3308_v36, %v7885_v22 }
 0x5bd   : >> { %v2908_v16 = vadd.f32 %v2898_v51, %v2875_v47  ;;  %v3361_v24 = vmul.f32 %v3360_v39, %v7929_v32 }
 0x5bf   : >> { %v7894_v1 = vadd.f32 %v2924_v52, %v2908_v16  ;;  %3288 = vrot.lane.b32.xlu2 %v3277_v7, %s9151_s20  ;;  %3286 = vrot.lane.b32.xlu1 %v3276_v20, %s9151_s20  ;;  %v3312_v52 = vmul.f32 %v3308_v36, %v7902_v9 }
 0x5c0   : >> { %3241 = vrot.lane.b32.xlu0 %v3227_v63, %s5520_s17  ;;  %v7945_v63 = vld [vmem:[#allocation2 + $0x6a] sm:$0xff] }
 0x5c1   : >> { %v2983_v0 = vpop.permute.xlu2 %2982  ;;  %v2896_v51 = vpop.permute.xlu1 %2895 }
 0x5c2   : >> { %v2907_v3 = vadd.f32 %v2896_v51, %v2874_v55  ;;  %v2894_v61 = vpop.permute.xlu0 %2893 }
 0x5c3   : >> { %v2906_v54 = vadd.f32 %v2894_v61, %v2873_v42  ;;  %v3007_v42 = vmul.f32 %v3005_v40, %v7724_v35  ;;  %v3393_v35 = vstv %s3392_s22  ;;  %s3511_s22 = sadd.s32 1, %s8000_s23 }
 0x5c4   : >> { %v2928_v29 = vadd.f32 %v2923_v4, %v2907_v3  ;;  %v3363_v3 = vmul.f32 %v3360_v39, %v7947_v10 }
 0x5c5   : >> { %v2927_v56 = vadd.f32 %v2922_v60, %v2906_v54 }
 0x5c7   : >> { %3294 = vrot.lane.b32.xlu2 %v3280_v43, %s9151_s20  ;;  %3292 = vrot.lane.b32.xlu1 %v3279_v59, %s9151_s20  ;;  %v2960_v20 = vadd.f32 %v7870_v19, %v2927_v56  ;;  %v7965_v56 = vld [vmem:[#allocation2 + $0x72] sm:$0x3] }
 0x5c8   : >> { %3290 = vrot.lane.b32.xlu0 %v3278_v23, %s9151_s20 }
 0x5c9   : >> { %v7918_v21 = vpop.permute.xlu2 %3031  ;;  %v2946_v46 = vpop.permute.xlu1 %2945 }
 0x5ca   : >> { %v2944_v30 = vpop.permute.xlu0 %2943  ;;  %v2959_v16 = vadd.f32 %v2946_v46, %v7876_v34 }
 0x5cb   : >> { %v2958_v8 = vadd.f32 %v2944_v30, %v2925_v38  ;;  %v3008_v38 = vmul.f32 %v3005_v40, %v7741_v48  ;;  %v3364_v48 = vmul.f32 %v3360_v39, %v7945_v63 }
 0x5cd   : >> { %v2991_v12 = vadd.f32 %v2977_v45, %v2958_v8  ;;  %v3313_v45 = vmul.f32 %v3308_v36, %v7900_v26  ;;  %v3365_v8 = vmul.f32 %v3360_v39, %v7965_v56 }
 0x5cf   : >> { %v7924_v33 = vadd.f32 %v3006_v18, %v2991_v12  ;;  %3323 = vrot.lane.b32.xlu2 %v3311_v57, %s5520_s17  ;;  %3321 = vrot.lane.b32.xlu1 %v3310_v15, %s5520_s17  ;;  %v3394_v18 = vmul.f32 %v3393_v35, %v7929_v32  ;;  %v3398_v12 = vmul.f32 %v3393_v35, %v7965_v56 }
 0x5d0   : >> { %3319 = vrot.lane.b32.xlu0 %v3309_v41, %s5520_s17 }
 0x5d1   : >> { %v7931_v37 = vpop.permute.xlu2 %3037  ;;  %v2952_v14 = vpop.permute.xlu1 %2951 }
 0x5d2   : >> { %v2950_v31 = vpop.permute.xlu0 %2949  ;;  %v2962_v34 = vadd.f32 %v2952_v14, %v7894_v1 }
 0x5d3   : >> { %v2961_v58 = vadd.f32 %v2950_v31, %v2928_v29  ;;  %v3010_v29 = vmul.f32 %v3005_v40, %v7737_v44  ;;  %v3090_v44 = vstv %s3084_s21  ;;  %v3396_v31 = vmul.f32 %v3393_v35, %v7947_v10  ;;  %s8016_s21 = smul.u32 3, %s3511_s22 }
 0x5d4   : >> { %v3093_v14 = vmul.f32 %v3090_v44, %v7788_v2  ;;  %v3446_v2 = vstv %s3445_s28  ;;  %s3596_s28 = sadd.s32 2, %s8000_s23 }
 0x5d5   : >> { %v2994_v47 = vadd.f32 %v2983_v0, %v2961_v58  ;;  %v7951_v0 = vld [vmem:[#allocation2 + $0x5a] sm:$0xff]  ;;  %s3563_s12 = sadd.s32 2, %s8016_s21  ;;  %s3530_s18 = sadd.s32 1, %s8016_s21 }
 0x5d6   : >> { %v3362_v54 = vmul.f32 %v3360_v39, %v7951_v0  ;;  %v3395_v30 = vmul.f32 %v3393_v35, %v7951_v0  ;;  %v3397_v39 = vmul.f32 %v3393_v35, %v7945_v63  ;;  %s3564_s16 = sld [smem:[#allocation8 + %s3563_s12]]  ;;  %s8033_s22 = smul.u32 3, %s3596_s28 }
 0x5d7   : >> { %3371 = vrot.lane.b32.xlu2 %v3361_v24, %s9151_s20  ;;  %3327 = vrot.lane.b32.xlu1 %v3313_v45, %s5520_s17  ;;  %v7940_v7 = vadd.f32 %v3009_v6, %v2994_v47  ;;  %v3092_v6 = vmul.f32 %v3090_v44, %v7791_v5  ;;  %v7994_v47 = vld [vmem:[#allocation2 + $0x80] sm:$0xff]  ;;  %s3681_s12 = sadd.s32 4, %s7655_s24 }
 0x5d8   : >> { %3325 = vrot.lane.b32.xlu0 %v3312_v52, %s5520_s17  ;;  %v7992_v52 = vld [vmem:[#allocation2 + $0x88] sm:$0xff]  ;;  %s3648_s23 = sadd.s32 2, %s8033_s22 }
 0x5d9   : >> { %v3067_v55 = vpop.permute.xlu2 %3066  ;;  %v2981_v4 = vpop.permute.xlu1 %2980 }
 0x5da   : >> { %v2993_v19 = vadd.f32 %v2981_v4, %v2960_v20  ;;  %v2979_v51 = vpop.permute.xlu0 %2978 }
 0x5db   : >> { %v2992_v60 = vadd.f32 %v2979_v51, %v2959_v16  ;;  %v3448_v51 = vmul.f32 %v3446_v2, %v7994_v47 }
 0x5dc   : >> { %v3013_v61 = vadd.f32 %v3008_v38, %v2993_v19  ;;  %v3449_v19 = vmul.f32 %v3446_v2, %v7992_v52 }
 0x5dd   : >> { %v3012_v43 = vadd.f32 %v3007_v42, %v2992_v60 }
 0x5df   : >> { %3377 = vrot.lane.b32.xlu2 %v3364_v48, %s9151_s20  ;;  %3375 = vrot.lane.b32.xlu1 %v3363_v3, %s9151_s20  ;;  %v3045_v45 = vadd.f32 %v7918_v21, %v3012_v43  ;;  %v8002_v21 = vld [vmem:[#allocation2 + $0x78] sm:$0xff]  ;;  %v3095_v3 = vmul.f32 %v3090_v44, %v7806_v17 }
 0x5e0   : >> { %3373 = vrot.lane.b32.xlu0 %v3362_v54, %s9151_s20  ;;  %v8014_v54 = vld [vmem:[#allocation2 + $0x98] sm:$0x3] }
 0x5e1   : >> { %v7962_v59 = vpop.permute.xlu2 %3114  ;;  %v3030_v23 = vpop.permute.xlu1 %3029 }
 0x5e2   : >> { %v2985_v36 = vpop.permute.xlu0 %2984  ;;  %v3044_v20 = vadd.f32 %v3030_v23, %v7924_v33  ;;  %v3447_v33 = vmul.f32 %v3446_v2, %v8002_v21  ;;  %v3094_v23 = vmul.f32 %v3090_v44, %v7786_v49  ;;  %v3176_v49 = vstv %s3169_s27  ;;  %s3615_s27 = sadd.s32 1, %s8033_s22 }
 0x5e3   : >> { %v2995_v46 = vadd.f32 %v2985_v36, %v2962_v34  ;;  %s3616_s28 = sld [smem:[#allocation8 + %s3615_s27]] }
 0x5e5   : >> { %v3015_v1 = vadd.f32 %v3010_v29, %v2995_v46  ;;  %v8020_v29 = vld [vmem:[#allocation2 + $0x90] sm:$0xff] }
 0x5e7   : >> { %3406 = vrot.lane.b32.xlu2 %v3395_v30, %s5520_s17  ;;  %3404 = vrot.lane.b32.xlu1 %v3394_v18, %s5520_s17  ;;  %v3451_v30 = vmul.f32 %v3446_v2, %v8014_v54 }
 0x5e8   : >> { %3379 = vrot.lane.b32.xlu0 %v3365_v8, %s9151_s20  ;;  %v3450_v8 = vmul.f32 %v3446_v2, %v8020_v29 }
 0x5e9   : >> { %v7978_v40 = vpop.permute.xlu2 %3120  ;;  %v3036_v57 = vpop.permute.xlu1 %3035 }
 0x5ea   : >> { %v3034_v15 = vpop.permute.xlu0 %3033  ;;  %v3047_v43 = vadd.f32 %v3036_v57, %v7940_v7 }
 0x5eb   : >> { %v3046_v41 = vadd.f32 %v3034_v15, %v3013_v61  ;;  %v3479_v61 = vstv %s3478_s13  ;;  %s3531_s13 = sld [smem:[#allocation8 + %s3530_s18]] }
 0x5ec   : >> { %v3480_v17 = vmul.f32 %v3479_v61, %v8002_v21  ;;  %s3649_s18 = sld [smem:[#allocation8 + %s3648_s23]]  ;;  %s9273_s23 = smov 127  }
 0x5ed   : >> { %v3079_v58 = vadd.f32 %v3067_v55, %v3046_v41  ;;  %v3091_v55 = vmul.f32 %v3090_v44, %v7767_v27  ;;  %v3048_v27 = vadd.f32 %v7931_v37, %v3015_v1  ;;  %v3483_v41 = vmul.f32 %v3479_v61, %v8020_v29 }
 0x5ef   : >> { %3412 = vrot.lane.b32.xlu2 %v3398_v12, %s5520_s17  ;;  %3410 = vrot.lane.b32.xlu1 %v3397_v39, %s5520_s17  ;;  %v7987_v24 = vadd.f32 %v3093_v14, %v3079_v58  ;;  %v3482_v12 = vmul.f32 %v3479_v61, %v7992_v52  ;;  %v3178_v39 = vmul.f32 %v3176_v49, %v7835_v11  ;;  %v8050_v11 = vstv %s3564_s16 }
 0x5f0   : >> { %3408 = vrot.lane.b32.xlu0 %v3396_v31, %s5520_s17  ;;  %v3481_v14 = vmul.f32 %v3479_v61, %v7994_v47 }
 0x5f1   : >> { %v3150_v38 = vpop.permute.xlu2 %3149  ;;  %v3065_v16 = vpop.permute.xlu1 %3064  ;;  %v8052_v2 = vstv %s3531_s13  ;;  %s8067_s13 = sld [smem:[#allocation8 + %s7861_s25]]  ;;  %s8088_s25 = smul.u32 3, %s3681_s12 }
 0x5f2   : >> { %v3078_v5 = vadd.f32 %v3065_v16, %v3045_v45  ;;  %v3063_v4 = vpop.permute.xlu0 %3062 }
 0x5f3   : >> { %v3077_v42 = vadd.f32 %v3063_v4, %v3044_v20  ;;  %v3177_v20 = vmul.f32 %v3176_v49, %v7839_v50  ;;  %v3484_v50 = vmul.f32 %v3479_v61, %v8014_v54  ;;  %v3180_v61 = vmul.f32 %v3176_v49, %v7859_v25 }
 0x5f4   : >> { %v3097_v60 = vadd.f32 %v3092_v6, %v3078_v5  ;;  %v8048_v6 = vld [vmem:[#allocation2 + $0x89] sm:$0xff] }
 0x5f5   : >> { %v3096_v48 = vadd.f32 %v3091_v55, %v3077_v42  ;;  %v3568_v4 = vmul.f32 %v8050_v11, %v8048_v6  ;;  %v3535_v42 = vmul.f32 %v8052_v2, %v8048_v6 }
 0x5f7   : >> { %3461 = vrot.lane.b32.xlu2 %v3449_v19, %s9151_s20  ;;  %3459 = vrot.lane.b32.xlu1 %v3448_v51, %s9151_s20  ;;  %v3129_v45 = vadd.f32 %v7962_v59, %v3096_v48  ;;  %v3181_v19 = vmul.f32 %v3176_v49, %v7855_v62  ;;  %v8077_v62 = vstv %s3649_s18 }
 0x5f8   : >> { %3457 = vrot.lane.b32.xlu0 %v3447_v33, %s9151_s20 }
 0x5f9   : >> { %v3156_v35 = vpop.permute.xlu2 %3155  ;;  %v3071_v34 = vpop.permute.xlu1 %3070 }
 0x5fa   : >> { %v3081_v37 = vadd.f32 %v3071_v34, %v3048_v27  ;;  %v3069_v36 = vpop.permute.xlu0 %3068  ;;  %v8075_v27 = vld [vmem:[#allocation2 + $0x8a] sm:$0xff] }
 0x5fb   : >> { %v3080_v46 = vadd.f32 %v3069_v36, %v3047_v43 }
 0x5fc   : >> { %v3100_v18 = vadd.f32 %v3095_v3, %v3081_v37  ;;  %v8079_v3 = vld [vmem:[#allocation2 + $0x91] sm:$0xff]  ;;  %v8084_v37 = vstv %s3616_s28  ;;  %s3768_s28 = sadd.s32 1, %s8088_s25 }
 0x5fd   : >> { %v3099_v1 = vadd.f32 %v3094_v23, %v3080_v46  ;;  %v3179_v23 = vmul.f32 %v3176_v49, %v7833_v28  ;;  %v3536_v25 = vmul.f32 %v8052_v2, %v8079_v3  ;;  %v3262_v49 = vstv %s8067_s13 }
 0x5ff   : >> { %3490 = vrot.lane.b32.xlu2 %v3480_v17, %s5520_s17  ;;  %3465 = vrot.lane.b32.xlu1 %v3451_v30, %s9151_s20  ;;  %v3132_v48 = vadd.f32 %v7978_v40, %v3099_v1  ;;  %v3653_v17 = vmul.f32 %v8077_v62, %v8075_v27 }
 0x600   : >> { %3463 = vrot.lane.b32.xlu0 %v3450_v8, %s9151_s20  ;;  %s8057_s20 = smul.u32 9, %s3681_s12  ;;  %v8103_v8 = vld [vmem:[#allocation2 + $0xb0] sm:$0xff] }
 0x601   : >> { %v8031_v7 = vpop.permute.xlu2 %3204  ;;  %v3119_v44 = vpop.permute.xlu1 %3118 }
 0x602   : >> { %v3117_v57 = vpop.permute.xlu0 %3116  ;;  %s3701_s16 = sadd.s32 1, %s8057_s20  ;;  %v3131_v43 = vadd.f32 %v3119_v44, %v7987_v24  ;;  %v3620_v24 = vmul.f32 %v8084_v37, %v8075_v27  ;;  %s3734_s18 = sadd.s32 2, %s8057_s20 }
 0x603   : >> { %v3130_v15 = vadd.f32 %v3117_v57, %v3097_v60  ;;  %s3702_s27 = sld [smem:[#allocation8 + %s3701_s16]]  ;;  %s8110_s16 = smul.u32 3, %s3768_s28 }
 0x604   : >> { %s3735_s12 = sld [smem:[#allocation8 + %s3734_s18]] }
 0x605   : >> { %v3163_v31 = vadd.f32 %v3150_v38, %v3130_v15  ;;  %s3787_s13 = sadd.s32 1, %s8110_s16  ;;  %s3820_s18 = sadd.s32 2, %s8110_s16 }
 0x606   : >> { %s3821_s28 = sld [smem:[#allocation8 + %s3820_s18]] }
 0x607   : >> { %3496 = vrot.lane.b32.xlu2 %v3483_v41, %s5520_s17  ;;  %3494 = vrot.lane.b32.xlu1 %v3482_v12, %s5520_s17  ;;  %v8044_v58 = vadd.f32 %v3178_v39, %v3163_v31  ;;  %v3569_v31 = vmul.f32 %v8050_v11, %v8079_v3 }
 0x608   : >> { %3492 = vrot.lane.b32.xlu0 %v3481_v14, %s5520_s17  ;;  %v3263_v14 = vmul.f32 %v3262_v49, %v7885_v22 }
 0x609   : >> { %v3234_v38 = vpop.permute.xlu2 %3233  ;;  %v3148_v16 = vpop.permute.xlu1 %3147  ;;  %v8105_v1 = vstv %s3702_s27  ;;  %s3788_s27 = sld [smem:[#allocation8 + %s3787_s13]] }
 0x60a   : >> { %v3162_v59 = vadd.f32 %v3148_v16, %v3129_v45  ;;  %v3123_v55 = vpop.permute.xlu0 %3122  ;;  %v3706_v39 = vmul.f32 %v8105_v1, %v8103_v8  ;;  %v8125_v16 = vld [vmem:[#allocation2 + $0x99] sm:$0x3]  ;;  %s3341_s13 = sld [smem:[#allocation8 + %s7909_s15]] }
 0x60b   : >> { %v3133_v5 = vadd.f32 %v3123_v55, %v3100_v18  ;;  %v8101_v18 = vld [vmem:[#allocation2 + $0x92] sm:$0xff]  ;;  %v8129_v55 = vstv %s3735_s12  ;;  %s3853_s12 = sadd.s32 2, %s8088_s25 }
 0x60c   : >> { %v3182_v51 = vadd.f32 %v3177_v20, %v3162_v59  ;;  %v3621_v12 = vmul.f32 %v8084_v37, %v8101_v18 }
 0x60d   : >> { %v3166_v60 = vadd.f32 %v3156_v35, %v3133_v5 }
 0x60f   : >> { %3580 = vrot.lane.b32.xlu2 %v3568_v4, %s5520_s17  ;;  %3547 = vrot.lane.b32.xlu1 %v3535_v42, %s9273_s23  ;;  %v8071_v33 = vadd.f32 %v3181_v19, %v3166_v60  ;;  %v3654_v4 = vmul.f32 %v8077_v62, %v8101_v18  ;;  %v3537_v42 = vmul.f32 %v8052_v2, %v8125_v16 }
 0x610   : >> { %3498 = vrot.lane.b32.xlu0 %v3484_v50, %s5520_s17  ;;  %v3266_v19 = vmul.f32 %v3262_v49, %v7902_v9  ;;  %v3739_v50 = vmul.f32 %v8129_v55, %v8103_v8  ;;  %v8149_v9 = vstv %s3788_s27  ;;  %s8173_s27 = smul.u32 3, %s3853_s12  ;;  %s3513_s12 = sld [smem:[#allocation8 + %s8016_s21]] }
 0x611   : >> { %v3240_v35 = vpop.permute.xlu2 %3239  ;;  %v3154_v34 = vpop.permute.xlu1 %3153 }
 0x612   : >> { %v3165_v36 = vadd.f32 %v3154_v34, %v3132_v48  ;;  %v3152_v40 = vpop.permute.xlu0 %3151  ;;  %s3872_s15 = sadd.s32 1, %s8173_s27  ;;  %s3905_s18 = sadd.s32 2, %s8173_s27 }
 0x613   : >> { %v3164_v46 = vadd.f32 %v3152_v40, %v3131_v43  ;;  %v8147_v43 = vld [vmem:[#allocation2 + $0xb1] sm:$0xff]  ;;  %v3264_v40 = vmul.f32 %v3262_v49, %v7883_v53  ;;  %v8165_v53 = vstv %s3821_s28  ;;  %s3873_s25 = sld [smem:[#allocation8 + %s3872_s15]] }
 0x614   : >> { %v3185_v28 = vadd.f32 %v3180_v61, %v3165_v36  ;;  %v8145_v61 = vld [vmem:[#allocation2 + $0x79] sm:$0xff]  ;;  %s3906_s28 = sld [smem:[#allocation8 + %s3905_s18]] }
 0x615   : >> { %v3184_v30 = vadd.f32 %v3179_v23, %v3164_v46  ;;  %s3426_s15 = sld [smem:[#allocation8 + %s7969_s26]] }
 0x617   : >> { %3665 = vrot.lane.b32.xlu2 %v3653_v17, %s5520_s17  ;;  %3549 = vrot.lane.b32.xlu1 %v3536_v25, %s9273_s23  ;;  %v3217_v48 = vadd.f32 %v8031_v7, %v3184_v30  ;;  %v3533_v25 = vmul.f32 %v8052_v2, %v8145_v61 }
 0x618   : >> { %3632 = vrot.lane.b32.xlu0 %v3620_v24, %s9273_s23  ;;  %v3792_v24 = vmul.f32 %v8149_v9, %v8147_v43 }
 0x619   : >> { %v8108_v44 = vpop.permute.xlu2 %3288  ;;  %v3203_v57 = vpop.permute.xlu1 %3202 }
 0x61a   : >> { %v3201_v15 = vpop.permute.xlu0 %3200  ;;  %v3216_v34 = vadd.f32 %v3203_v57, %v8044_v58 }
 0x61b   : >> { %v3215_v41 = vadd.f32 %v3201_v15, %v3182_v51 }
 0x61d   : >> { %v3248_v45 = vadd.f32 %v3234_v38, %v3215_v41  ;;  %v3267_v41 = vmul.f32 %v3262_v49, %v7900_v26  ;;  %v3347_v26 = vstv %s3341_s13  ;;  %s3938_s13 = sadd.s32 5, %s7655_s24 }
 0x61e   : >> { %s8234_s21 = smul.u32 9, %s3938_s13 }
 0x61f   : >> { %3634 = vrot.lane.b32.xlu2 %v3621_v12, %s9273_s23  ;;  %3718 = vrot.lane.b32.xlu1 %v3706_v39, %s9273_s23  ;;  %v8122_v20 = vadd.f32 %v3263_v14, %v3248_v45  ;;  %v8171_v12 = vld [vmem:[#allocation2 + $0xb8] sm:$0xff]  ;;  %v3825_v45 = vmul.f32 %v8165_v53, %v8147_v43 }
 0x620   : >> { %3582 = vrot.lane.b32.xlu0 %v3569_v31, %s5520_s17  ;;  %v3566_v31 = vmul.f32 %v8050_v11, %v8145_v61  ;;  %s3958_s26 = sadd.s32 1, %s8234_s21  ;;  %s3991_s18 = sadd.s32 2, %s8234_s21 }
 0x621   : >> { %v8127_v59 = vpop.permute.xlu2 %3294  ;;  %v3209_v22 = vpop.permute.xlu1 %3208 }
 0x622   : >> { %v3207_v5 = vpop.permute.xlu0 %3206  ;;  %v3219_v58 = vadd.f32 %v3209_v22, %v8071_v33  ;;  %v3707_v33 = vmul.f32 %v8105_v1, %v8171_v12 }
 0x623   : >> { %v3218_v38 = vadd.f32 %v3207_v5, %v3185_v28  ;;  %v3570_v28 = vmul.f32 %v8050_v11, %v8125_v16 }
 0x625   : >> { %v3251_v51 = vadd.f32 %v3240_v35, %v3218_v38  ;;  %v3265_v35 = vmul.f32 %v3262_v49, %v7907_v13  ;;  %v8187_v38 = vld [vmem:[#allocation2 + $0x9a] sm:$0x3] }
 0x627   : >> { %3667 = vrot.lane.b32.xlu2 %v3654_v4, %s5520_s17  ;;  %3551 = vrot.lane.b32.xlu1 %v3537_v42, %s9273_s23  ;;  %v8141_v60 = vadd.f32 %v3266_v19, %v3251_v51  ;;  %v3740_v19 = vmul.f32 %v8129_v55, %v8171_v12  ;;  %v3350_v51 = vmul.f32 %v3347_v26, %v7947_v10 }
 0x628   : >> { %3751 = vrot.lane.b32.xlu0 %v3739_v50, %s5520_s17  ;;  %v3655_v50 = vmul.f32 %v8077_v62, %v8187_v38  ;;  %v3349_v10 = vmul.f32 %v3347_v26, %v7951_v0 }
 0x629   : >> { %v3324_v23 = vpop.permute.xlu2 %3323  ;;  %v3238_v36 = vpop.permute.xlu1 %3237 }
 0x62a   : >> { %v3250_v46 = vadd.f32 %v3238_v36, %v3217_v48  ;;  %v3236_v17 = vpop.permute.xlu0 %3235  ;;  %v3622_v48 = vmul.f32 %v8084_v37, %v8187_v38 }
 0x62b   : >> { %v3249_v7 = vadd.f32 %v3236_v17, %v3216_v34 }
 0x62c   : >> { %v3270_v13 = vadd.f32 %v3265_v35, %v3250_v46  ;;  %v8205_v46 = vld [vmem:[#allocation2 + $0xb9] sm:$0xff] }
 0x62d   : >> { %v3269_v30 = vadd.f32 %v3264_v40, %v3249_v7  ;;  %v8203_v40 = vld [vmem:[#allocation2 + $0x7a] sm:$0xff]  ;;  %v3793_v0 = vmul.f32 %v8149_v9, %v8205_v46 }
 0x62f   : >> { %3543 = vrot.lane.b32.xlu2 %v3533_v25, %s9273_s23  ;;  %3804 = vrot.lane.b32.xlu1 %v3792_v24, %s9273_s23  ;;  %v3302_v36 = vadd.f32 %v8108_v44, %v3269_v30  ;;  %v3348_v25 = vmul.f32 %v3347_v26, %v7929_v32  ;;  %v8210_v24 = vld [vmem:[#allocation2 + $0xb2] sm:$0xff] }
 0x630   : >> { %3584 = vrot.lane.b32.xlu0 %v3570_v28, %s5520_s17  ;;  %v8212_v28 = vstv %s3873_s25  ;;  %s3959_s25 = sld [smem:[#allocation8 + %s3958_s26]] }
 0x631   : >> { %v8168_v57 = vpop.permute.xlu2 %3371  ;;  %v3287_v15 = vpop.permute.xlu1 %3286 }
 0x632   : >> { %v3242_v39 = vpop.permute.xlu0 %3241 }
 0x633   : >> { %v3252_v14 = vadd.f32 %v3242_v39, %v3219_v58  ;;  %v3618_v58 = vmul.f32 %v8084_v37, %v8203_v40  ;;  %v3515_v39 = vld [vmem:[#allocation2 + $0x81] sm:$0xff] }
 0x635   : >> { %v3272_v22 = vadd.f32 %v3267_v41, %v3252_v14  ;;  %v3352_v14 = vmul.f32 %v3347_v26, %v7965_v56  ;;  %v3651_v56 = vmul.f32 %v8077_v62, %v8203_v40 }
 0x637   : >> { %3576 = vrot.lane.b32.xlu2 %v3566_v31, %s5520_s17  ;;  %3837 = vrot.lane.b32.xlu1 %v3825_v45, %s5520_s17  ;;  %v3305_v41 = vadd.f32 %v8127_v59, %v3272_v22  ;;  %v3534_v59 = vmul.f32 %v8052_v2, %v3515_v39  ;;  %v3433_v2 = vstv %s3426_s15 }
 0x638   : >> { %3720 = vrot.lane.b32.xlu0 %v3707_v33, %s9273_s23 }
 0x639   : >> { %v8185_v49 = vpop.permute.xlu2 %3377  ;;  %v3293_v5 = vpop.permute.xlu1 %3292 }
 0x63a   : >> { %v3291_v4 = vpop.permute.xlu0 %3290  ;;  %v3304_v31 = vadd.f32 %v3293_v5, %v8141_v60  ;;  %v8241_v5 = vstv %s3513_s12  ;;  %s8277_s12 = smul.u32 3, %s3938_s13 }
 0x63b   : >> { %v3303_v42 = vadd.f32 %v3291_v4, %v3270_v13  ;;  %v3351_v4 = vmul.f32 %v3347_v26, %v7945_v63  ;;  %v8246_v26 = vmul.f32 %v8241_v5, %v8145_v61  ;;  %v3826_v61 = vmul.f32 %v8165_v53, %v8205_v46 }
 0x63c   : >> { %s4025_s13 = sadd.s32 1, %s8277_s12 }
 0x63d   : >> { %v3336_v35 = vadd.f32 %v3324_v23, %v3303_v42  ;;  %v3301_v23 = vadd.f32 %v3287_v15, %v8122_v20  ;;  %v3877_v20 = vmul.f32 %v8212_v28, %v8210_v24  ;;  %v8230_v42 = vstv %s3906_s28  ;;  %s3992_s28 = sld [smem:[#allocation8 + %s3991_s18]]  ;;  %s8303_s15 = smul.u32 3, %s4025_s13 }
 0x63e   : >> { %v3910_v60 = vmul.f32 %v8230_v42, %v8210_v24  ;;  %s3598_s13 = sld [smem:[#allocation8 + %s8033_s22]]  ;;  %s4110_s22 = sadd.s32 2, %s8277_s12 }
 0x63f   : >> { %3753 = vrot.lane.b32.xlu1 %v3740_v19, %s5520_s17  ;;  %3669 = vrot.lane.b32.xlu2 %v3655_v50, %s5520_s17  ;;  %v8199_v34 = vadd.f32 %v3350_v51, %v3336_v35  ;;  %s4044_s26 = sadd.s32 1, %s8303_s15  ;;  %s4077_s18 = sadd.s32 2, %s8303_s15 }
 0x640   : >> { %3636 = vrot.lane.b32.xlu0 %v3622_v48, %s9273_s23 }
 0x641   : >> { %v3407_v17 = vpop.permute.xlu2 %3406  ;;  %v3322_v7 = vpop.permute.xlu1 %3321 }
 0x642   : >> { %v3335_v44 = vadd.f32 %v3322_v7, %v3302_v36  ;;  %v3320_v13 = vpop.permute.xlu0 %3319  ;;  %v8253_v36 = vld [vmem:[#allocation2 + $0xc0] sm:$0x3]  ;;  %v3567_v7 = vmul.f32 %v8050_v11, %v3515_v39  ;;  %v8270_v11 = vstv %s3959_s25  ;;  %s4045_s25 = sld [smem:[#allocation8 + %s4044_s26]] }
 0x643   : >> { %v3334_v30 = vadd.f32 %v3320_v13, %v3301_v23  ;;  %s3683_s26 = sld [smem:[#allocation8 + %s8057_s20]] }
 0x644   : >> { %v3354_v32 = vadd.f32 %v3349_v10, %v3335_v44  ;;  %v3708_v44 = vmul.f32 %v8105_v1, %v8253_v36 }
 0x645   : >> { %v3353_v15 = vadd.f32 %v3348_v25, %v3334_v30  ;;  %v3435_v25 = vmul.f32 %v3433_v2, %v7994_v47  ;;  %v8272_v47 = vld [vmem:[#allocation2 + $0xa0] sm:$0xff] }
 0x647   : >> { %3628 = vrot.lane.b32.xlu1 %v3618_v58, %s9273_s23  ;;  %3806 = vrot.lane.b32.xlu2 %v3793_v0, %s9273_s23  ;;  %v3386_v58 = vadd.f32 %v8168_v57, %v3353_v15  ;;  %v8268_v0 = vld [vmem:[#allocation2 + $0xd8] sm:$0xff] }
 0x648   : >> { %3889 = vrot.lane.b32.xlu0 %v3877_v20, %s9273_s23  ;;  %v3963_v15 = vmul.f32 %v8270_v11, %v8268_v0 }
 0x649   : >> { %v3413_v45 = vpop.permute.xlu2 %3412  ;;  %v3328_v33 = vpop.permute.xlu1 %3327 }
 0x64a   : >> { %v3338_v19 = vadd.f32 %v3328_v33, %v3305_v41  ;;  %v3326_v50 = vpop.permute.xlu0 %3325  ;;  %v3704_v33 = vmul.f32 %v8105_v1, %v8272_v47 }
 0x64b   : >> { %v3337_v51 = vadd.f32 %v3326_v50, %v3304_v31  ;;  %v3438_v31 = vmul.f32 %v3433_v2, %v8014_v54 }
 0x64c   : >> { %v3357_v22 = vadd.f32 %v3352_v14, %v3338_v19 }
 0x64d   : >> { %v3356_v63 = vadd.f32 %v3351_v4, %v3337_v51  ;;  %v8285_v4 = vmul.f32 %v8241_v5, %v3515_v39  ;;  %v3437_v39 = vmul.f32 %v3433_v2, %v8020_v29 }
 0x64f   : >> { %3545 = vrot.lane.b32.xlu1 %v3534_v59, %s9273_s23  ;;  %3661 = vrot.lane.b32.xlu2 %v3651_v56, %s5520_s17  ;;  %v3389_v51 = vadd.f32 %v8185_v49, %v3356_v63  ;;  %v8294_v59 = vstv %s3992_s28  ;;  %v8296_v56 = vld [vmem:[#allocation2 + $0x82] sm:$0xff]  ;;  %s4078_s28 = sld [smem:[#allocation8 + %s4077_s18]] }
 0x650   : >> { %3922 = vrot.lane.b32.xlu0 %v3910_v60, %s5520_s17  ;;  %v3996_v63 = vmul.f32 %v8294_v59, %v8268_v0  ;;  %v3619_v29 = vmul.f32 %v8084_v37, %v8296_v56 }
 0x651   : >> { %v8251_v48 = vpop.permute.xlu2 %3461  ;;  %v3376_v35 = vpop.permute.xlu1 %3375 }
 0x652   : >> { %v3374_v10 = vpop.permute.xlu0 %3373  ;;  %v3388_v60 = vadd.f32 %v3376_v35, %v8199_v34 }
 0x653   : >> { %v3387_v23 = vadd.f32 %v3374_v10, %v3354_v32  ;;  %v3436_v10 = vmul.f32 %v3433_v2, %v7992_v52 }
 0x655   : >> { %v3420_v13 = vadd.f32 %v3407_v17, %v3387_v23  ;;  %v3434_v17 = vmul.f32 %v3433_v2, %v8002_v21  ;;  %v3741_v21 = vmul.f32 %v8129_v55, %v8253_v36  ;;  %v8301_v23 = vld [vmem:[#allocation2 + $0xba] sm:$0xff] }
 0x656   : >> { %v3878_v34 = vmul.f32 %v8212_v28, %v8301_v23  ;;  %v8315_v2 = vld [vmem:[#allocation2 + $0xc1] sm:$0x3] }
 0x657   : >> { %3839 = vrot.lane.b32.xlu1 %v3826_v61, %s5520_s17  ;;  %3578 = vrot.lane.b32.xlu2 %v3567_v7, %s5520_s17  ;;  %v8264_v30 = vadd.f32 %v3435_v25, %v3420_v13 }
 0x658   : >> { %3722 = vrot.lane.b32.xlu0 %v3708_v44, %s9273_s23 }
 0x659   : >> { %v3491_v20 = vpop.permute.xlu2 %3490  ;;  %v3405_v32 = vpop.permute.xlu1 %3404 }
 0x65a   : >> { %v3419_v41 = vadd.f32 %v3405_v32, %v3386_v58  ;;  %v3380_v14 = vpop.permute.xlu0 %3379  ;;  %v3794_v58 = vmul.f32 %v8149_v9, %v8315_v2  ;;  %v3737_v32 = vmul.f32 %v8129_v55, %v8272_v47 }
 0x65b   : >> { %v3390_v57 = vadd.f32 %v3380_v14, %v3357_v22 }
 0x65c   : >> { %v3439_v19 = vadd.f32 %v3434_v17, %v3419_v41  ;;  %v3911_v17 = vmul.f32 %v8230_v42, %v8301_v23 }
 0x65d   : >> { %v3423_v50 = vadd.f32 %v3413_v45, %v3390_v57  ;;  %v8334_v57 = vstv %s4045_s25  ;;  %s8388_s25 = smul.u32 3, %s4110_s22 }
 0x65f   : >> { %3975 = vrot.lane.b32.xlu1 %v3963_v15, %s9273_s23  ;;  %3714 = vrot.lane.b32.xlu2 %v3704_v33, %s9273_s23  ;;  %v3443_v54 = vadd.f32 %v3438_v31, %v3423_v50  ;;  %v8332_v31 = vld [vmem:[#allocation2 + $0xd9] sm:$0xff]  ;;  %v3827_v50 = vmul.f32 %v8165_v53, %v8315_v2  ;;  %s4129_s20 = sadd.s32 1, %s8388_s25  ;;  %s4162_s18 = sadd.s32 2, %s8388_s25 }
 0x660   : >> { %3755 = vrot.lane.b32.xlu0 %v3741_v21, %s5520_s17  ;;  %s4130_s12 = sld [smem:[#allocation8 + %s4129_s20]] }
 0x661   : >> { %v3497_v22 = vpop.permute.xlu2 %3496  ;;  %v3411_v45 = vpop.permute.xlu1 %3410 }
 0x662   : >> { %v3422_v61 = vadd.f32 %v3411_v45, %v3389_v51  ;;  %v3409_v7 = vpop.permute.xlu0 %3408  ;;  %v3523_v51 = vmul.f32 %v8241_v5, %v8079_v3  ;;  %v8355_v3 = vstv %s4078_s28  ;;  %s8417_s28 = sld [smem:[#allocation8 + %s8110_s16]] }
 0x663   : >> { %v3421_v49 = vadd.f32 %v3409_v7, %v3388_v60  ;;  %s4163_s16 = sld [smem:[#allocation8 + %s4162_s18]] }
 0x664   : >> { %v3442_v35 = vadd.f32 %v3437_v39, %v3422_v61  ;;  %v3652_v39 = vmul.f32 %v8077_v62, %v8296_v56  ;;  %v3522_v61 = vmul.f32 %v8241_v5, %v8048_v6  ;;  %v4082_v6 = vmul.f32 %v8355_v3, %v8332_v31 }
 0x665   : >> { %v3441_v52 = vadd.f32 %v3436_v10, %v3421_v49  ;;  %v8351_v10 = vld [vmem:[#allocation2 + $0xe0] sm:$0xff] }
 0x666   : >> { %v8360_v49 = vld [vmem:[#allocation2 + $0xa1] sm:$0xff] }
 0x667   : >> { %4008 = vrot.lane.b32.xlu1 %v3996_v63, %s5520_s17  ;;  %3630 = vrot.lane.b32.xlu2 %v3619_v29, %s9273_s23  ;;  %v3474_v45 = vadd.f32 %v8251_v48, %v3441_v52  ;;  %v3964_v48 = vmul.f32 %v8270_v11, %v8351_v10 }
 0x668   : >> { %3891 = vrot.lane.b32.xlu0 %v3878_v34, %s9273_s23 }
 0x669   : >> { %v8317_v25 = vpop.permute.xlu2 %3580  ;;  %v3460_v44 = vpop.permute.xlu1 %3459 }
 0x66a   : >> { %v3458_v37 = vpop.permute.xlu0 %3457  ;;  %v3473_v62 = vadd.f32 %v3460_v44, %v8264_v30  ;;  %v8373_v44 = vstv %s3598_s13  ;;  %s4195_s13 = sadd.s32 6, %s7655_s24 }
 0x66b   : >> { %v3472_v13 = vadd.f32 %v3458_v37, %v3439_v19  ;;  %v8377_v37 = vld [vmem:[#allocation2 + $0xc2] sm:$0x3]  ;;  %s8457_s22 = smul.u32 9, %s4195_s13 }
 0x66d   : >> { %v3505_v41 = vadd.f32 %v3491_v20, %v3472_v13 }
 0x66f   : >> { %3808 = vrot.lane.b32.xlu1 %v3794_v58, %s9273_s23  ;;  %3924 = vrot.lane.b32.xlu2 %v3911_v17, %s5520_s17  ;;  %v8329_v14 = vadd.f32 %v8246_v26, %v3505_v41  ;;  %v4049_v26 = vmul.f32 %v8334_v57, %v8332_v31  ;;  %v8382_v17 = vld [vmem:[#allocation2 + $0xa8] sm:$0xff] }
 0x670   : >> { %3747 = vrot.lane.b32.xlu0 %v3737_v32, %s5520_s17 }
 0x671   : >> { %v8336_v15 = vpop.permute.xlu2 %3665  ;;  %v3466_v33 = vpop.permute.xlu1 %3465 }
 0x672   : >> { %v3476_v20 = vadd.f32 %v3466_v33, %v3443_v54  ;;  %v3464_v21 = vpop.permute.xlu0 %3463  ;;  %v3607_v33 = vmul.f32 %v8373_v44, %v8075_v27 }
 0x673   : >> { %v3475_v19 = vadd.f32 %v3464_v21, %v3442_v35  ;;  %v3790_v35 = vmul.f32 %v8149_v9, %v8360_v49 }
 0x675   : >> { %v3508_v60 = vadd.f32 %v3497_v22, %v3475_v19  ;;  %v3823_v19 = vmul.f32 %v8165_v53, %v8360_v49 }
 0x677   : >> { %3841 = vrot.lane.b32.xlu1 %v3827_v50, %s5520_s17  ;;  %4061 = vrot.lane.b32.xlu2 %v4049_v26, %s9273_s23  ;;  %v3528_v54 = vadd.f32 %v3523_v51, %v3508_v60  ;;  %v3879_v50 = vmul.f32 %v8212_v28, %v8377_v37 }
 0x678   : >> { %3663 = vrot.lane.b32.xlu0 %v3652_v39, %s5520_s17  ;;  %v8401_v39 = vstv %s3683_s26  ;;  %s4215_s26 = sadd.s32 1, %s8457_s22 }
 0x679   : >> { %v8358_v22 = vpop.permute.xlu2 %3634  ;;  %v3495_v7 = vpop.permute.xlu1 %3494  ;;  %s4216_s20 = sld [smem:[#allocation8 + %s4215_s26]] }
 0x67a   : >> { %v3507_v63 = vadd.f32 %v3495_v7, %v3474_v45  ;;  %v3493_v29 = vpop.permute.xlu0 %3492  ;;  %v3997_v7 = vmul.f32 %v8294_v59, %v8351_v10 }
 0x67b   : >> { %v3506_v34 = vadd.f32 %v3493_v29, %v3473_v62  ;;  %v3912_v62 = vmul.f32 %v8230_v42, %v8377_v37 }
 0x67c   : >> { %v3527_v52 = vadd.f32 %v3522_v61, %v3507_v63  ;;  %v3738_v61 = vmul.f32 %v8129_v55, %v8382_v17  ;;  %v3693_v63 = vmul.f32 %v8401_v39, %v8103_v8 }
 0x67d   : >> { %v8369_v30 = vadd.f32 %v8285_v4, %v3506_v34  ;;  %v3524_v4 = vmul.f32 %v8241_v5, %v8125_v16  ;;  %v3705_v16 = vmul.f32 %v8105_v1, %v8382_v17  ;;  %v3605_v34 = vmul.f32 %v8373_v44, %v8203_v40 }
 0x67f   : >> { %3977 = vrot.lane.b32.xlu1 %v3964_v48, %s9273_s23  ;;  %4094 = vrot.lane.b32.xlu2 %v4082_v6, %s5520_s17  ;;  %v3608_v48 = vmul.f32 %v8373_v44, %v8101_v18  ;;  %v8428_v6 = vld [vmem:[#allocation2 + $0xda] sm:$0xff] }
 0x680   : >> { %3800 = vrot.lane.b32.xlu0 %v3790_v35, %s9273_s23  ;;  %v8430_v35 = vstv %s4130_s12  ;;  %s4248_s12 = sadd.s32 2, %s8457_s22 }
 0x681   : >> { %v8380_v13 = vpop.permute.xlu2 %3667  ;;  %v3548_v58 = vpop.permute.xlu1 %3547  ;;  %v4134_v18 = vmul.f32 %v8430_v35, %v8428_v6  ;;  %s4249_s18 = sld [smem:[#allocation8 + %s4248_s12]] }
 0x682   : >> { %v3560_v32 = vadd.f32 %v3548_v58, %v3527_v52  ;;  %v3499_v41 = vpop.permute.xlu0 %3498 }
 0x683   : >> { %v3509_v21 = vadd.f32 %v3499_v41, %v3476_v20 }
 0x684   : >> { %v3593_v26 = vadd.f32 %v8317_v25, %v3560_v32 }
 0x685   : >> { %v3529_v5 = vadd.f32 %v3524_v4, %v3509_v21 }
 0x686   : >> { %v3612_v51 = vadd.f32 %v3607_v33, %v3593_v26 }
 0x687   : >> { %3833 = vrot.lane.b32.xlu1 %v3823_v19, %s5520_s17  ;;  %3893 = vrot.lane.b32.xlu2 %v3879_v50, %s9273_s23  ;;  %v8445_v50 = vld [vmem:[#allocation2 + $0xa9] sm:$0xff] }
 0x688   : >> { %3716 = vrot.lane.b32.xlu0 %v3705_v16, %s9273_s23 }
 0x689   : >> { %v3544_v27 = vpop.permute.xlu2 %3543  ;;  %v3550_v20 = vpop.permute.xlu1 %3549 }
 0x68a   : >> { %v3558_v25 = vadd.f32 %v3544_v27, %v8329_v14  ;;  %v3561_v60 = vadd.f32 %v3550_v20, %v3528_v54  ;;  %v3633_v1 = vpop.permute.xlu0 %3632  ;;  %v8420_v14 = vld [vmem:[#allocation2 + $0xa2] sm:$0xff]  ;;  %v8452_v27 = vstv %s8417_s28  ;;  %s3855_s28 = sld [smem:[#allocation8 + %s8173_s27]] }
 0x68b   : >> { %v3645_v45 = vadd.f32 %v3633_v1, %v3612_v51  ;;  %v8422_v54 = vld [vmem:[#allocation2 + $0xe1] sm:$0xff]  ;;  %v3875_v41 = vmul.f32 %v8212_v28, %v8420_v14  ;;  %v8449_v51 = vstv %s4163_s16  ;;  %v3791_v1 = vmul.f32 %v8149_v9, %v8445_v50  ;;  %s8496_s16 = smul.u32 3, %s4195_s13 }
 0x68c   : >> { %v4050_v40 = vmul.f32 %v8334_v57, %v8422_v54 }
 0x68d   : >> { %v3678_v29 = vadd.f32 %v8336_v15, %v3645_v45  ;;  %v3908_v45 = vmul.f32 %v8230_v42, %v8420_v14  ;;  %s4282_s26 = sadd.s32 1, %s8496_s16 }
 0x68e   : >> { %s8516_s27 = smul.u32 3, %s4282_s26  ;;  %s4367_s26 = sadd.s32 2, %s8496_s16 }
 0x68f   : >> { %3749 = vrot.lane.b32.xlu1 %v3738_v61, %s5520_s17  ;;  %3926 = vrot.lane.b32.xlu2 %v3912_v62, %s5520_s17  ;;  %v3698_v55 = vadd.f32 %v3693_v63, %v3678_v29  ;;  %v4167_v61 = vmul.f32 %v8449_v51, %v8428_v6  ;;  %v3779_v62 = vmul.f32 %v8452_v27, %v8147_v43 }
 0x690   : >> { %4010 = vrot.lane.b32.xlu0 %v3997_v7, %s5520_s17  ;;  %v8471_v7 = vld [vmem:[#allocation2 + $0xe8] sm:$0x3]  ;;  %v3609_v63 = vmul.f32 %v8373_v44, %v8187_v38  ;;  %v8487_v38 = vld [vmem:[#allocation2 + $0x100] sm:$0xff]  ;;  %s4301_s13 = sadd.s32 1, %s8516_s27  ;;  %s4334_s12 = sadd.s32 2, %s8516_s27 }
 0x691   : >> { %v3577_v8 = vpop.permute.xlu2 %3576  ;;  %v3719_v15 = vpop.permute.xlu1 %3718 }
 0x692   : >> { %v3591_v52 = vadd.f32 %v3577_v8, %v3558_v25  ;;  %v3731_v58 = vadd.f32 %v3719_v15, %v3698_v55  ;;  %v3583_v4 = vpop.permute.xlu0 %3582  ;;  %v3824_v8 = vmul.f32 %v8165_v53, %v8445_v50  ;;  %v3965_v15 = vmul.f32 %v8270_v11, %v8471_v7  ;;  %v8491_v53 = vld [vmem:[#allocation2 + $0xc8] sm:$0xff] }
 0x693   : >> { %v3594_v32 = vadd.f32 %v3583_v4, %v3561_v60 }
 0x694   : >> { %v8438_v33 = vadd.f32 %v3605_v34, %v3591_v52  ;;  %v4083_v34 = vmul.f32 %v8355_v3, %v8422_v54 }
 0x695   : >> { %v3613_v21 = vadd.f32 %v3608_v48, %v3594_v32  ;;  %v3694_v48 = vmul.f32 %v8401_v39, %v8171_v12 }
 0x697   : >> { %v3646_v19 = vadd.f32 %v8358_v22, %v3613_v21  ;;  %3885 = vrot.lane.b32.xlu1 %v3875_v41, %s9273_s23  ;;  %4063 = vrot.lane.b32.xlu2 %v4050_v40, %s9273_s23 }
 0x698   : >> { %4146 = vrot.lane.b32.xlu0 %v4134_v18, %s9273_s23 }
 0x699   : >> { %v3552_v26 = vpop.permute.xlu1 %3551  ;;  %v8447_v16 = vpop.permute.xlu2 %3669  ;;  %v3679_v20 = vadd.f32 %v8380_v13, %v3646_v19  ;;  %v3961_v19 = vmul.f32 %v8270_v11, %v8491_v53 }
 0x69a   : >> { %v3562_v22 = vadd.f32 %v3552_v26, %v3529_v5  ;;  %v3752_v25 = vpop.permute.xlu0 %3751  ;;  %v3998_v26 = vmul.f32 %v8294_v59, %v8471_v7 }
 0x69b   : >> { %v3764_v60 = vadd.f32 %v3752_v25, %v3731_v58  ;;  %v8489_v58 = vstv %s4216_s20  ;;  %v3699_v32 = vadd.f32 %v3694_v48, %v3679_v20  ;;  %v3780_v20 = vmul.f32 %v8452_v27, %v8205_v46  ;;  %v8512_v25 = vld [vmem:[#allocation2 + $0xaa] sm:$0xff]  ;;  %s4302_s20 = sld [smem:[#allocation8 + %s4301_s13]]  ;;  %s8596_s13 = smul.u32 3, %s4367_s26 }
 0x69c   : >> { %v4220_v21 = vmul.f32 %v8489_v58, %v8487_v38  ;;  %v3876_v46 = vmul.f32 %v8212_v28, %v8512_v25 }
 0x69d   : >> { %v3784_v13 = vadd.f32 %v3779_v62, %v3764_v60 }
 0x69f   : >> { %3802 = vrot.lane.b32.xlu1 %v3791_v1, %s9273_s23  ;;  %3918 = vrot.lane.b32.xlu2 %v3908_v45, %s5520_s17  ;;  %v8514_v45 = vld [vmem:[#allocation2 + $0xe2] sm:$0xff] }
 0x6a0   : >> { %4179 = vrot.lane.b32.xlu0 %v4167_v61, %s5520_s17 }
 0x6a1   : >> { %v3805_v9 = vpop.permute.xlu1 %3804  ;;  %v3807_v5 = vpop.permute.xlu2 %3806 }
 0x6a2   : >> { %v3817_v29 = vadd.f32 %v3805_v9, %v3784_v13  ;;  %v3585_v55 = vpop.permute.xlu0 %3584  ;;  %v8518_v13 = vstv %s3855_s28  ;;  %s3940_s28 = sld [smem:[#allocation8 + %s8234_s21]] }
 0x6a3   : >> { %v3595_v43 = vadd.f32 %v3585_v55, %v3562_v22  ;;  %v8510_v22 = vstv %s4249_s18  ;;  %v4135_v55 = vmul.f32 %v8430_v35, %v8514_v45  ;;  %s4335_s18 = sld [smem:[#allocation8 + %s4334_s12]] }
 0x6a4   : >> { %s4027_s21 = sld [smem:[#allocation8 + %s8303_s15]]  ;;  %s4386_s15 = sadd.s32 1, %s8596_s13 }
 0x6a5   : >> { %v3614_v52 = vadd.f32 %v3609_v63, %v3595_v43  ;;  %v4253_v63 = vmul.f32 %v8510_v22, %v8487_v38  ;;  %s4387_s16 = sld [smem:[#allocation8 + %s4386_s15]] }
 0x6a7   : >> { %4096 = vrot.lane.b32.xlu1 %v4083_v34, %s5520_s17  ;;  %3835 = vrot.lane.b32.xlu2 %v3824_v8, %s5520_s17  ;;  %v3864_v34 = vmul.f32 %v8518_v13, %v8210_v24  ;;  %v3691_v24 = vmul.f32 %v8401_v39, %v8272_v47  ;;  %v8550_v47 = vld [vmem:[#allocation2 + $0x101] sm:$0xff] }
 0x6a8   : >> { %3979 = vrot.lane.b32.xlu0 %v3965_v15, %s9273_s23  ;;  %v8533_v15 = vld [vmem:[#allocation2 + $0xe9] sm:$0x3] }
 0x6a9   : >> { %v3838_v4 = vpop.permute.xlu1 %3837  ;;  %v3662_v41 = vpop.permute.xlu2 %3661 }
 0x6aa   : >> { %v3850_v12 = vadd.f32 %v3838_v4, %v3817_v29  ;;  %v3721_v40 = vpop.permute.xlu0 %3720 }
 0x6ab   : >> { %v3732_v18 = vadd.f32 %v3721_v40, %v3699_v32  ;;  %v4051_v32 = vmul.f32 %v8334_v57, %v8533_v15  ;;  %v4168_v40 = vmul.f32 %v8449_v51, %v8514_v45 }
 0x6ac   : >> { %v3869_v48 = vadd.f32 %v3864_v34, %v3850_v12 }
 0x6af   : >> { %4232 = vrot.lane.b32.xlu1 %v4220_v21, %s9273_s23  ;;  %3971 = vrot.lane.b32.xlu2 %v3961_v19, %s9273_s23  ;;  %v3994_v21 = vmul.f32 %v8294_v59, %v8491_v53  ;;  %v8552_v19 = vstv %s4302_s20  ;;  %s4419_s20 = sadd.s32 2, %s8596_s13 }
 0x6b0   : >> { %4012 = vrot.lane.b32.xlu0 %v3998_v26, %s5520_s17  ;;  %s4420_s12 = sld [smem:[#allocation8 + %s4419_s20]] }
 0x6b1   : >> { %v3754_v60 = vpop.permute.xlu1 %3753  ;;  %v3579_v1 = vpop.permute.xlu2 %3578  ;;  %s4112_s20 = sld [smem:[#allocation8 + %s8388_s25]] }
 0x6b2   : >> { %v3765_v61 = vadd.f32 %v3754_v60, %v3732_v18  ;;  %v3637_v62 = vpop.permute.xlu0 %3636 }
 0x6b3   : >> { %v3647_v9 = vadd.f32 %v3637_v62, %v3614_v52 }
 0x6b4   : >> { %v3785_v29 = vadd.f32 %v3780_v20, %v3765_v61  ;;  %v3606_v61 = vmul.f32 %v8373_v44, %v8296_v56  ;;  %v8573_v44 = vstv %s4335_s18  ;;  %s4452_s18 = sadd.s32 7, %s7655_s24 }
 0x6b5   : >> { %v3680_v43 = vadd.f32 %v8447_v16, %v3647_v9  ;;  %v4084_v9 = vmul.f32 %v8355_v3, %v8533_v15 }
 0x6b6   : >> { %v3818_v8 = vadd.f32 %v3807_v5, %v3785_v29  ;;  %v3909_v29 = vmul.f32 %v8230_v42, %v8512_v25 }
 0x6b7   : >> { %4265 = vrot.lane.b32.xlu1 %v4253_v63, %s5520_s17  ;;  %3887 = vrot.lane.b32.xlu2 %v3876_v46, %s9273_s23  ;;  %v4306_v63 = vmul.f32 %v8552_v19, %v8550_v47 }
 0x6b8   : >> { %4148 = vrot.lane.b32.xlu0 %v4135_v55, %s9273_s23  ;;  %v3695_v55 = vmul.f32 %v8401_v39, %v8253_v36  ;;  %v8577_v36 = vstv %s3940_s28  ;;  %s8655_s28 = smul.u32 9, %s4452_s18 }
 0x6b9   : >> { %v3629_v28 = vpop.permute.xlu1 %3628  ;;  %v3715_v52 = vpop.permute.xlu2 %3714 }
 0x6ba   : >> { %v3643_v16 = vadd.f32 %v3629_v28, %v8438_v33  ;;  %v3890_v4 = vpop.permute.xlu0 %3889  ;;  %v3700_v42 = vadd.f32 %v3695_v55, %v3680_v43  ;;  %v3950_v43 = vmul.f32 %v8577_v36, %v8268_v0  ;;  %s4505_s15 = sadd.s32 2, %s8655_s28 }
 0x6bb   : >> { %v3902_v5 = vadd.f32 %v3890_v4, %v3869_v48  ;;  %v8575_v48 = vld [vmem:[#allocation2 + $0xc9] sm:$0xff] }
 0x6bc   : >> { %v3676_v18 = vadd.f32 %v3662_v41, %v3643_v16 }
 0x6be   : >> { %v3696_v12 = vadd.f32 %v3691_v24, %v3676_v18 }
 0x6bf   : >> { %4065 = vrot.lane.b32.xlu1 %v4051_v32, %s9273_s23  ;;  %4181 = vrot.lane.b32.xlu2 %v4168_v40, %s5520_s17  ;;  %v4047_v32 = vmul.f32 %v8334_v57, %v8575_v48  ;;  %v8592_v40 = vld [vmem:[#allocation2 + $0xea] sm:$0x3] }
 0x6c0   : >> { %v8547_v33 = vadd.f32 %v3715_v52, %v3696_v12  ;;  %4004 = vrot.lane.b32.xlu0 %v3994_v21, %s5520_s17  ;;  %v8594_v12 = vld [vmem:[#allocation2 + $0xd0] sm:$0xff] }
 0x6c1   : >> { %v3546_v41 = vpop.permute.xlu1 %3545  ;;  %v3631_v26 = vpop.permute.xlu2 %3630 }
 0x6c2   : >> { %v3559_v20 = vadd.f32 %v3546_v41, %v8369_v30  ;;  %v3923_v60 = vpop.permute.xlu0 %3922  ;;  %v8571_v30 = vld [vmem:[#allocation2 + $0x108] sm:$0xff] }
 0x6c3   : >> { %v3935_v62 = vadd.f32 %v3923_v60, %v3902_v5  ;;  %v4221_v24 = vmul.f32 %v8489_v58, %v8571_v30  ;;  %v4339_v5 = vmul.f32 %v8573_v44, %v8550_v47  ;;  %v4136_v60 = vmul.f32 %v8430_v35, %v8592_v40 }
 0x6c4   : >> { %v3592_v46 = vadd.f32 %v3579_v1, %v3559_v20  ;;  %v4080_v20 = vmul.f32 %v8355_v3, %v8575_v48 }
 0x6c6   : >> { %v3611_v34 = vadd.f32 %v3606_v61, %v3592_v46  ;;  %v3962_v61 = vmul.f32 %v8270_v11, %v8594_v12 }
 0x6c7   : >> { %4098 = vrot.lane.b32.xlu1 %v4084_v9, %s5520_s17  ;;  %4318 = vrot.lane.b32.xlu2 %v4306_v63, %s9273_s23  ;;  %v3865_v9 = vmul.f32 %v8518_v13, %v8301_v23  ;;  %v3995_v23 = vmul.f32 %v8294_v59, %v8594_v12 }
 0x6c8   : >> { %v8568_v56 = vadd.f32 %v3631_v26, %v3611_v34  ;;  %3920 = vrot.lane.b32.xlu0 %v3909_v29, %s5520_s17 }
 0x6c9   : >> { %v3840_v1 = vpop.permute.xlu1 %3839  ;;  %v3925_v28 = vpop.permute.xlu2 %3924 }
 0x6ca   : >> { %v3851_v52 = vadd.f32 %v3840_v1, %v3818_v8  ;;  %v3723_v16 = vpop.permute.xlu0 %3722  ;;  %v3955_v8 = vadd.f32 %v3950_v43, %v3935_v62  ;;  %v8604_v62 = vstv %s4027_s21  ;;  %v8630_v43 = vld [vmem:[#allocation2 + $0x109] sm:$0xff]  ;;  %s4472_s21 = sadd.s32 1, %s8655_s28 }
 0x6cb   : >> { %v3733_v4 = vadd.f32 %v3723_v16, %v3700_v42  ;;  %v4036_v63 = vmul.f32 %v8604_v62, %v8332_v31  ;;  %v4169_v42 = vmul.f32 %v8449_v51, %v8592_v40  ;;  %v3781_v31 = vmul.f32 %v8452_v27, %v8315_v2  ;;  %v8632_v2 = vld [vmem:[#allocation2 + $0x102] sm:$0xff]  ;;  %s4473_s26 = sld [smem:[#allocation8 + %s4472_s21]] }
 0x6cc   : >> { %v3870_v29 = vadd.f32 %v3865_v9, %v3851_v52 }
 0x6cf   : >> { %4234 = vrot.lane.b32.xlu1 %v4221_v24, %s9273_s23  ;;  %4351 = vrot.lane.b32.xlu2 %v4339_v5, %s5520_s17 }
 0x6d0   : >> { %4057 = vrot.lane.b32.xlu0 %v4047_v32, %s9273_s23  ;;  %v8628_v32 = vld [vmem:[#allocation2 + $0xca] sm:$0xff] }
 0x6d1   : >> { %v3976_v18 = vpop.permute.xlu1 %3975  ;;  %v4062_v21 = vpop.permute.xlu2 %4061 }
 0x6d2   : >> { %v3988_v41 = vadd.f32 %v3976_v18, %v3955_v8  ;;  %v3756_v26 = vpop.permute.xlu0 %3755 }
 0x6d3   : >> { %v3766_v0 = vadd.f32 %v3756_v26, %v3733_v4  ;;  %v4254_v4 = vmul.f32 %v8510_v22, %v8571_v30 }
 0x6d5   : >> { %v3786_v59 = vadd.f32 %v3781_v31, %v3766_v0  ;;  %v4307_v0 = vmul.f32 %v8552_v19, %v8630_v43 }
 0x6d7   : >> { %4090 = vrot.lane.b32.xlu1 %v4080_v20, %s5520_s17  ;;  %4150 = vrot.lane.b32.xlu2 %v4136_v60, %s9273_s23  ;;  %v4132_v20 = vmul.f32 %v8430_v35, %v8628_v32 }
 0x6d8   : >> { %3973 = vrot.lane.b32.xlu0 %v3962_v61, %s9273_s23  ;;  %v3866_v61 = vmul.f32 %v8518_v13, %v8377_v37  ;;  %v4165_v37 = vmul.f32 %v8449_v51, %v8628_v32 }
 0x6d9   : >> { %v4009_v46 = vpop.permute.xlu1 %4008  ;;  %v4095_v55 = vpop.permute.xlu2 %4094 }
 0x6da   : >> { %v4021_v11 = vadd.f32 %v4009_v46, %v3988_v41  ;;  %v3892_v34 = vpop.permute.xlu0 %3891  ;;  %v8651_v46 = vstv %s4420_s12  ;;  %s8697_s12 = smul.u32 3, %s4452_s18 }
 0x6db   : >> { %v3903_v1 = vadd.f32 %v3892_v34, %v3870_v29 }
 0x6dc   : >> { %v4041_v16 = vadd.f32 %v4036_v63, %v4021_v11  ;;  %s4539_s21 = sadd.s32 1, %s8697_s12 }
 0x6dd   : >> { %v3936_v24 = vadd.f32 %v3925_v28, %v3903_v1  ;;  %v8634_v28 = vstv %s4387_s16  ;;  %s4506_s16 = sld [smem:[#allocation8 + %s4505_s15]]  ;;  %s8717_s24 = smul.u32 3, %s4539_s21 }
 0x6de   : >> { %v4074_v52 = vadd.f32 %v4062_v21, %v4041_v16  ;;  %v4391_v60 = vmul.f32 %v8634_v28, %v8632_v2  ;;  %v3777_v16 = vmul.f32 %v8452_v27, %v8360_v49 }
 0x6df   : >> { %4006 = vrot.lane.b32.xlu1 %v3995_v23, %s5520_s17  ;;  %4183 = vrot.lane.b32.xlu2 %v4169_v42, %s5520_s17  ;;  %v4424_v23 = vmul.f32 %v8651_v46, %v8632_v2  ;;  %v3951_v42 = vmul.f32 %v8577_v36, %v8351_v10  ;;  %v8674_v10 = vld [vmem:[#allocation2 + $0x110] sm:$0x3]  ;;  %s4558_s25 = sadd.s32 1, %s8717_s24 }
 0x6e0   : >> { %v8625_v5 = vadd.f32 %v4095_v55, %v4074_v52  ;;  %4267 = vrot.lane.b32.xlu0 %v4254_v4, %s5520_s17  ;;  %s4559_s18 = sld [smem:[#allocation8 + %s4558_s25]] }
 0x6e1   : >> { %v3809_v8 = vpop.permute.xlu1 %3808  ;;  %v3894_v18 = vpop.permute.xlu2 %3893 }
 0x6e2   : >> { %v3819_v21 = vadd.f32 %v3809_v8, %v3786_v59  ;;  %v3748_v41 = vpop.permute.xlu0 %3747 }
 0x6e3   : >> { %v3762_v26 = vadd.f32 %v3748_v41, %v8547_v33  ;;  %v8649_v33 = vld [vmem:[#allocation2 + $0xd1] sm:$0xff] }
 0x6e4   : >> { %v4048_v34 = vmul.f32 %v8334_v57, %v8649_v33  ;;  %v4081_v41 = vmul.f32 %v8355_v3, %v8649_v33 }
 0x6e5   : >> { %v3782_v52 = vadd.f32 %v3777_v16, %v3762_v26  ;;  %v8688_v26 = vld [vmem:[#allocation2 + $0x128] sm:$0xff] }
 0x6e6   : >> { %v8715_v16 = vld [vmem:[#allocation2 + $0x10a] sm:$0xff] }
 0x6e7   : >> { %4142 = vrot.lane.b32.xlu1 %v4132_v20, %s9273_s23  ;;  %4320 = vrot.lane.b32.xlu2 %v4307_v0, %s9273_s23  ;;  %v4222_v20 = vmul.f32 %v8489_v58, %v8674_v10  ;;  %v8690_v0 = vstv %s4473_s26  ;;  %s4591_s26 = sadd.s32 2, %s8717_s24 }
 0x6e8   : >> { %4403 = vrot.lane.b32.xlu0 %v4391_v60, %s9273_s23  ;;  %v8692_v60 = vld [vmem:[#allocation2 + $0xf0] sm:$0xff]  ;;  %s4592_s15 = sld [smem:[#allocation8 + %s4591_s26]] }
 0x6e9   : >> { %v3842_v9 = vpop.permute.xlu1 %3841  ;;  %v3927_v63 = vpop.permute.xlu2 %3926  ;;  %s4369_s26 = sld [smem:[#allocation8 + %s8596_s13]] }
 0x6ea   : >> { %v3852_v29 = vadd.f32 %v3842_v9, %v3819_v21  ;;  %v3664_v55 = vpop.permute.xlu0 %3663 }
 0x6eb   : >> { %v3677_v11 = vadd.f32 %v3664_v55, %v8568_v56  ;;  %v3956_v56 = vadd.f32 %v3951_v42, %v3936_v24  ;;  %v3692_v24 = vmul.f32 %v8401_v39, %v8382_v17  ;;  %v4218_v55 = vmul.f32 %v8489_v58, %v8692_v60 }
 0x6ec   : >> { %v3871_v1 = vadd.f32 %v3866_v61, %v3852_v29  ;;  %v4477_v29 = vmul.f32 %v8690_v0, %v8688_v26 }
 0x6ed   : >> { %v3697_v61 = vadd.f32 %v3692_v24, %v3677_v11  ;;  %v8709_v11 = vstv %s4506_s16  ;;  %v8735_v24 = vld [vmem:[#allocation2 + $0x111] sm:$0x3]  ;;  %s4197_s16 = sld [smem:[#allocation8 + %s8457_s22]] }
 0x6ee   : >> { %v3904_v4 = vadd.f32 %v3894_v18, %v3871_v1  ;;  %v4340_v18 = vmul.f32 %v8573_v44, %v8630_v43  ;;  %s4284_s22 = sld [smem:[#allocation8 + %s8516_s27]] }
 0x6ef   : >> { %4059 = vrot.lane.b32.xlu1 %v4048_v34, %s9273_s23  ;;  %4175 = vrot.lane.b32.xlu2 %v4165_v37, %s5520_s17  ;;  %v4255_v34 = vmul.f32 %v8510_v22, %v8674_v10  ;;  %v8711_v37 = vld [vmem:[#allocation2 + $0xd2] sm:$0xff] }
 0x6f0   : >> { %v8671_v57 = vadd.f32 %v3927_v63, %v3904_v4  ;;  %4436 = vrot.lane.b32.xlu0 %v4424_v23, %s5520_s17  ;;  %v4037_v23 = vmul.f32 %v8604_v62, %v8422_v54  ;;  %v4392_v54 = vmul.f32 %v8634_v28, %v8715_v16 }
 0x6f1   : >> { %v3978_v31 = vpop.permute.xlu1 %3977  ;;  %v4064_v59 = vpop.permute.xlu2 %4063 }
 0x6f2   : >> { %v3989_v8 = vadd.f32 %v3978_v31, %v3956_v56  ;;  %v3801_v49 = vpop.permute.xlu0 %3800  ;;  %v8719_v31 = vstv %s4112_s20  ;;  %s4624_s20 = sadd.s32 2, %s8697_s12 }
 0x6f3   : >> { %v3815_v21 = vadd.f32 %v3801_v49, %v3782_v52  ;;  %v4510_v49 = vmul.f32 %v8709_v11, %v8688_v26  ;;  %s8800_s21 = smul.u32 3, %s4624_s20 }
 0x6f5   : >> { %s4643_s27 = sadd.s32 1, %s8800_s21  ;;  %s4676_s25 = sadd.s32 2, %s8800_s21 }
 0x6f6   : >> { %s4644_s12 = sld [smem:[#allocation8 + %s4643_s27]] }
 0x6f7   : >> { %4353 = vrot.lane.b32.xlu1 %v4340_v18, %s5520_s17  ;;  %4092 = vrot.lane.b32.xlu2 %v4081_v41, %s5520_s17  ;;  %v3862_v18 = vmul.f32 %v8518_v13, %v8420_v14  ;;  %s4626_s13 = sld [smem:[#allocation8 + %s8800_s21]] }
 0x6f8   : >> { %4236 = vrot.lane.b32.xlu0 %v4222_v20, %s9273_s23  ;;  %v4121_v20 = vmul.f32 %v8719_v31, %v8428_v6  ;;  %v3948_v6 = vmul.f32 %v8577_v36, %v8491_v53 }
 0x6f9   : >> { %v3834_v3 = vpop.permute.xlu1 %3833  ;;  %v3919_v9 = vpop.permute.xlu2 %3918 }
 0x6fa   : >> { %v3848_v63 = vadd.f32 %v3834_v3, %v3815_v21  ;;  %v3717_v17 = vpop.permute.xlu0 %3716  ;;  %v4133_v21 = vmul.f32 %v8430_v35, %v8711_v37  ;;  %v4126_v14 = vadd.f32 %v4121_v20, %v8625_v5  ;;  %v3778_v5 = vmul.f32 %v8452_v27, %v8445_v50 }
 0x6fb   : >> { %v3730_v39 = vadd.f32 %v3717_v17, %v3697_v61  ;;  %v4166_v20 = vmul.f32 %v8449_v51, %v8711_v37 }
 0x6fc   : >> { %v3867_v35 = vadd.f32 %v3862_v18, %v3848_v63  ;;  %v4425_v63 = vmul.f32 %v8651_v46, %v8715_v16  ;;  %v4341_v18 = vmul.f32 %v8573_v44, %v8735_v24 }
 0x6ff   : >> { %4489 = vrot.lane.b32.xlu1 %v4477_v29, %s9273_s23  ;;  %4228 = vrot.lane.b32.xlu2 %v4218_v55, %s9273_s23 }
 0x700   : >> { %4269 = vrot.lane.b32.xlu0 %v4255_v34, %s5520_s17  ;;  %v4251_v34 = vmul.f32 %v8510_v22, %v8692_v60 }
 0x701   : >> { %v3750_v1 = vpop.permute.xlu1 %3749  ;;  %v3836_v42 = vpop.permute.xlu2 %3835 }
 0x702   : >> { %v3763_v4 = vadd.f32 %v3750_v1, %v3730_v39  ;;  %v4011_v56 = vpop.permute.xlu0 %4010 }
 0x703   : >> { %v4022_v52 = vadd.f32 %v4011_v56, %v3989_v8  ;;  %v8754_v56 = vld [vmem:[#allocation2 + $0x129] sm:$0xff] }
 0x705   : >> { %v4042_v41 = vadd.f32 %v4037_v23, %v4022_v52  ;;  %v3783_v23 = vadd.f32 %v3778_v5, %v3763_v4 }
 0x707   : >> { %4522 = vrot.lane.b32.xlu1 %v4510_v49, %s5520_s17  ;;  %4144 = vrot.lane.b32.xlu2 %v4133_v21, %s9273_s23  ;;  %v4075_v8 = vadd.f32 %v4064_v59, %v4042_v41  ;;  %v4308_v59 = vmul.f32 %v8552_v19, %v8735_v24  ;;  %v3863_v21 = vmul.f32 %v8518_v13, %v8512_v25  ;;  %v8774_v13 = vld [vmem:[#allocation2 + $0x130] sm:$0xff] }
 0x708   : >> { %4405 = vrot.lane.b32.xlu0 %v4392_v54, %s9273_s23 }
 0x709   : >> { %v3886_v3 = vpop.permute.xlu1 %3885  ;;  %v3972_v61 = vpop.permute.xlu2 %3971 }
 0x70a   : >> { %v3900_v17 = vadd.f32 %v3886_v3, %v3867_v35  ;;  %v4147_v39 = vpop.permute.xlu0 %4146  ;;  %v3952_v35 = vmul.f32 %v8577_v36, %v8471_v7  ;;  %v8779_v7 = vld [vmem:[#allocation2 + $0xf1] sm:$0xff] }
 0x70b   : >> { %v4159_v29 = vadd.f32 %v4147_v39, %v4126_v14  ;;  %v8776_v14 = vstv %s4592_s15 }
 0x70c   : >> { %v3933_v55 = vadd.f32 %v3919_v9, %v3900_v17  ;;  %v8756_v9 = vstv %s4559_s18  ;;  %v3957_v51 = vadd.f32 %v3952_v35, %v8671_v57  ;;  %v8781_v17 = vstv %s4197_s16  ;;  %s4677_s18 = sld [smem:[#allocation8 + %s4676_s25]] }
 0x70d   : >> { %v4563_v4 = vmul.f32 %v8756_v9, %v8754_v56  ;;  %v4207_v57 = vmul.f32 %v8781_v17, %v8487_v38 }
 0x70e   : >> { %v3953_v1 = vadd.f32 %v3948_v6, %v3933_v55  ;;  %v4304_v55 = vmul.f32 %v8552_v19, %v8779_v7 }
 0x70f   : >> { %4322 = vrot.lane.b32.xlu1 %v4308_v59, %s9273_s23  ;;  %4438 = vrot.lane.b32.xlu2 %v4425_v63, %s5520_s17  ;;  %v4478_v59 = vmul.f32 %v8690_v0, %v8774_v13  ;;  %v4596_v63 = vmul.f32 %v8776_v14, %v8754_v56 }
 0x710   : >> { %v8751_v53 = vadd.f32 %v3972_v61, %v3953_v1  ;;  %4261 = vrot.lane.b32.xlu0 %v4251_v34, %s5520_s17  ;;  %v8796_v34 = vld [vmem:[#allocation2 + $0x112] sm:$0x3] }
 0x711   : >> { %v3803_v52 = vpop.permute.xlu1 %3802  ;;  %v3888_v49 = vpop.permute.xlu2 %3887 }
 0x712   : >> { %v3816_v50 = vadd.f32 %v3803_v52, %v3783_v23  ;;  %v4180_v27 = vpop.permute.xlu0 %4179  ;;  %v8798_v23 = vld [vmem:[#allocation2 + $0xf8] sm:$0xff] }
 0x713   : >> { %v4192_v54 = vadd.f32 %v4180_v27, %v4159_v29  ;;  %v4393_v27 = vmul.f32 %v8634_v28, %v8796_v34 }
 0x714   : >> { %v3849_v41 = vadd.f32 %v3836_v42, %v3816_v50  ;;  %v4337_v50 = vmul.f32 %v8573_v44, %v8779_v7 }
 0x716   : >> { %v3868_v3 = vadd.f32 %v3863_v21, %v3849_v41  ;;  %v4219_v21 = vmul.f32 %v8489_v58, %v8798_v23 }
 0x717   : >> { %4355 = vrot.lane.b32.xlu1 %v4341_v18, %s5520_s17  ;;  %4575 = vrot.lane.b32.xlu2 %v4563_v4, %s9273_s23  ;;  %v4122_v18 = vmul.f32 %v8719_v31, %v8514_v45  ;;  %v4252_v45 = vmul.f32 %v8510_v22, %v8798_v23 }
 0x718   : >> { %v8771_v25 = vadd.f32 %v3888_v49, %v3868_v3  ;;  %4177 = vrot.lane.b32.xlu0 %v4166_v20, %s5520_s17 }
 0x719   : >> { %v4097_v42 = vpop.permute.xlu1 %4096  ;;  %v4182_v61 = vpop.permute.xlu2 %4181 }
 0x71a   : >> { %v4108_v39 = vadd.f32 %v4097_v42, %v4075_v8  ;;  %v3980_v6 = vpop.permute.xlu0 %3979  ;;  %v4212_v8 = vadd.f32 %v4207_v57, %v4192_v54  ;;  %v8808_v54 = vstv %s4284_s22  ;;  %v8834_v57 = vld [vmem:[#allocation2 + $0x131] sm:$0xff] }
 0x71b   : >> { %v3990_v29 = vadd.f32 %v3980_v6, %v3957_v51  ;;  %v4293_v4 = vmul.f32 %v8808_v54, %v8550_v47  ;;  %v4426_v51 = vmul.f32 %v8651_v46, %v8796_v34  ;;  %v4038_v47 = vmul.f32 %v8604_v62, %v8533_v15 }
 0x71c   : >> { %v4127_v20 = vadd.f32 %v4122_v18, %v4108_v39  ;;  %v8838_v15 = vstv %s4644_s12  ;;  %v8852_v18 = vld [vmem:[#allocation2 + $0xf9] sm:$0xff] }
 0x71f   : >> { %4491 = vrot.lane.b32.xlu1 %v4478_v59, %s9273_s23  ;;  %4608 = vrot.lane.b32.xlu2 %v4596_v63, %s5520_s17 }
 0x720   : >> { %4314 = vrot.lane.b32.xlu0 %v4304_v55, %s9273_s23  ;;  %v8832_v55 = vld [vmem:[#allocation2 + $0xf2] sm:$0xff] }
 0x721   : >> { %v4233_v5 = vpop.permute.xlu1 %4232  ;;  %v4319_v1 = vpop.permute.xlu2 %4318 }
 0x722   : >> { %v4245_v52 = vadd.f32 %v4233_v5, %v4212_v8  ;;  %v4013_v49 = vpop.permute.xlu0 %4012 }
 0x723   : >> { %v4023_v38 = vadd.f32 %v4013_v49, %v3990_v29  ;;  %v4511_v29 = vmul.f32 %v8709_v11, %v8774_v13 }
 0x725   : >> { %v4043_v22 = vadd.f32 %v4038_v47, %v4023_v38  ;;  %v4564_v38 = vmul.f32 %v8756_v9, %v8834_v57 }
 0x727   : >> { %4347 = vrot.lane.b32.xlu1 %v4337_v50, %s5520_s17  ;;  %4407 = vrot.lane.b32.xlu2 %v4393_v27, %s9273_s23  ;;  %v4389_v50 = vmul.f32 %v8634_v28, %v8832_v55 }
 0x728   : >> { %4230 = vrot.lane.b32.xlu0 %v4219_v21, %s9273_s23  ;;  %v4123_v21 = vmul.f32 %v8719_v31, %v8592_v40 }
 0x729   : >> { %v4266_v41 = vpop.permute.xlu1 %4265  ;;  %v4352_v35 = vpop.permute.xlu2 %4351 }
 0x72a   : >> { %v4278_v58 = vadd.f32 %v4266_v41, %v4245_v52  ;;  %v4149_v3 = vpop.permute.xlu0 %4148  ;;  %v8836_v52 = vld [vmem:[#allocation2 + $0x12a] sm:$0xff]  ;;  %v8854_v41 = vstv %s4677_s18 }
 0x72b   : >> { %v4160_v42 = vadd.f32 %v4149_v3, %v4127_v20  ;;  %v4648_v27 = vmul.f32 %v8838_v15, %v8836_v52  ;;  %v4305_v3 = vmul.f32 %v8552_v19, %v8852_v18  ;;  %v4681_v40 = vmul.f32 %v8854_v41, %v8836_v52 }
 0x72c   : >> { %v4298_v6 = vadd.f32 %v4293_v4, %v4278_v58 }
 0x72d   : >> { %v4193_v59 = vadd.f32 %v4182_v61, %v4160_v42  ;;  %v4422_v42 = vmul.f32 %v8651_v46, %v8832_v55 }
 0x72e   : >> { %v4331_v39 = vadd.f32 %v4319_v1, %v4298_v6  ;;  %v4034_v6 = vmul.f32 %v8604_v62, %v8575_v48  ;;  %v4597_v48 = vmul.f32 %v8776_v14, %v8834_v57 }
 0x72f   : >> { %4263 = vrot.lane.b32.xlu1 %v4252_v45, %s5520_s17  ;;  %4440 = vrot.lane.b32.xlu2 %v4426_v51, %s5520_s17  ;;  %v4208_v51 = vmul.f32 %v8781_v17, %v8571_v30 }
 0x730   : >> { %v8829_v63 = vadd.f32 %v4352_v35, %v4331_v39  ;;  %4524 = vrot.lane.b32.xlu0 %v4511_v29, %s5520_s17 }
 0x731   : >> { %v4066_v8 = vpop.permute.xlu1 %4065  ;;  %v4151_v5 = vpop.permute.xlu2 %4150  ;;  %v4213_v19 = vadd.f32 %v4208_v51, %v4193_v59  ;;  %v3949_v59 = vmul.f32 %v8577_v36, %v8594_v12 }
 0x732   : >> { %v4076_v61 = vadd.f32 %v4066_v8, %v4043_v22  ;;  %v4005_v1 = vpop.permute.xlu0 %4004  ;;  %v8872_v8 = vld [vmem:[#allocation2 + $0x138] sm:$0x3] }
 0x733   : >> { %v4019_v49 = vadd.f32 %v4005_v1, %v8751_v53 }
 0x735   : >> { %v4039_v39 = vadd.f32 %v4034_v6, %v4019_v49  ;;  %v8885_v49 = vld [vmem:[#allocation2 + $0x118] sm:$0xff] }
 0x736   : >> { %v4475_v36 = vmul.f32 %v8690_v0, %v8885_v49 }
 0x737   : >> { %4399 = vrot.lane.b32.xlu1 %v4389_v50, %s9273_s23  ;;  %4577 = vrot.lane.b32.xlu2 %v4564_v38, %s9273_s23  ;;  %v4479_v50 = vmul.f32 %v8690_v0, %v8872_v8  ;;  %v8887_v38 = vld [vmem:[#allocation2 + $0x132] sm:$0xff] }
 0x738   : >> { %4660 = vrot.lane.b32.xlu0 %v4648_v27, %s9273_s23  ;;  %v4649_v12 = vmul.f32 %v8838_v15, %v8887_v38 }
 0x739   : >> { %v4099_v53 = vpop.permute.xlu1 %4098  ;;  %v4184_v4 = vpop.permute.xlu2 %4183 }
 0x73a   : >> { %v4109_v20 = vadd.f32 %v4099_v53, %v4076_v61  ;;  %v3921_v35 = vpop.permute.xlu0 %3920 }
 0x73b   : >> { %v3934_v58 = vadd.f32 %v3921_v35, %v8771_v25  ;;  %v4512_v35 = vmul.f32 %v8709_v11, %v8872_v8 }
 0x73c   : >> { %v4128_v45 = vadd.f32 %v4123_v21, %v4109_v20 }
 0x73d   : >> { %v3954_v21 = vadd.f32 %v3949_v59, %v3934_v58  ;;  %v8899_v58 = vld [vmem:[#allocation2 + $0x139] sm:$0x3] }
 0x73e   : >> { %v4161_v29 = vadd.f32 %v4151_v5, %v4128_v45  ;;  %v4338_v5 = vmul.f32 %v8573_v44, %v8852_v18 }
 0x73f   : >> { %4316 = vrot.lane.b32.xlu1 %v4305_v3, %s9273_s23  ;;  %4432 = vrot.lane.b32.xlu2 %v4422_v42, %s5520_s17  ;;  %v4294_v42 = vmul.f32 %v8808_v54, %v8630_v43  ;;  %v4119_v43 = vmul.f32 %v8719_v31, %v8628_v32  ;;  %v4205_v32 = vmul.f32 %v8781_v17, %v8692_v60 }
 0x740   : >> { %v8869_v25 = vadd.f32 %v4184_v4, %v4161_v29  ;;  %4693 = vrot.lane.b32.xlu0 %v4681_v40, %s5520_s17  ;;  %v8903_v40 = vld [vmem:[#allocation2 + $0xfa] sm:$0xff]  ;;  %v8905_v29 = vstv %s4369_s26 }
 0x741   : >> { %v4235_v47 = vpop.permute.xlu1 %4234  ;;  %v4321_v22 = vpop.permute.xlu2 %4320 }
 0x742   : >> { %v4246_v61 = vadd.f32 %v4235_v47, %v4213_v19  ;;  %v4058_v30 = vpop.permute.xlu0 %4057  ;;  %v4508_v47 = vmul.f32 %v8709_v11, %v8885_v49 }
 0x743   : >> { %v4072_v1 = vadd.f32 %v4058_v30, %v4039_v39  ;;  %v4565_v39 = vmul.f32 %v8756_v9, %v8899_v58  ;;  %v4390_v30 = vmul.f32 %v8634_v28, %v8903_v40 }
 0x747   : >> { %4610 = vrot.lane.b32.xlu1 %v4597_v48, %s5520_s17  ;;  %4349 = vrot.lane.b32.xlu2 %v4338_v5, %s5520_s17  ;;  %v4378_v48 = vmul.f32 %v8905_v29, %v8632_v2  ;;  %v4423_v2 = vmul.f32 %v8651_v46, %v8903_v40 }
 0x748   : >> { %4493 = vrot.lane.b32.xlu0 %v4479_v50, %s9273_s23 }
 0x749   : >> { %v4091_v27 = vpop.permute.xlu1 %4090  ;;  %v4176_v53 = vpop.permute.xlu2 %4175  ;;  %v4383_v59 = vadd.f32 %v4378_v48, %v8829_v63  ;;  %v4035_v63 = vmul.f32 %v8604_v62, %v8649_v33  ;;  %v4120_v62 = vmul.f32 %v8719_v31, %v8711_v37 }
 0x74a   : >> { %v4105_v44 = vadd.f32 %v4091_v27, %v4072_v1  ;;  %v3974_v4 = vpop.permute.xlu0 %3973 }
 0x74b   : >> { %v3987_v20 = vadd.f32 %v3974_v4, %v3954_v21 }
 0x74c   : >> { %v4124_v5 = vadd.f32 %v4119_v43, %v4105_v44  ;;  %v4682_v44 = vmul.f32 %v8854_v41, %v8887_v38  ;;  %v8958_v43 = vld [vmem:[#allocation2 + $0x13a] sm:$0x3] }
 0x74f   : >> { %4485 = vrot.lane.b32.xlu1 %v4475_v36, %s9273_s23  ;;  %4662 = vrot.lane.b32.xlu2 %v4649_v12, %s9273_s23  ;;  %v8938_v12 = vld [vmem:[#allocation2 + $0x120] sm:$0xff] }
 0x750   : >> { %4526 = vrot.lane.b32.xlu0 %v4512_v35, %s5520_s17 }
 0x751   : >> { %v4007_v3 = vpop.permute.xlu1 %4006  ;;  %v4093_v45 = vpop.permute.xlu2 %4092 }
 0x752   : >> { %v4020_v51 = vadd.f32 %v4007_v3, %v3987_v20  ;;  %v4268_v6 = vpop.permute.xlu0 %4267 }
 0x753   : >> { %v4279_v19 = vadd.f32 %v4268_v6, %v4246_v61  ;;  %v4476_v6 = vmul.f32 %v8690_v0, %v8938_v12 }
 0x754   : >> { %v4040_v46 = vadd.f32 %v4035_v63, %v4020_v51 }
 0x755   : >> { %v4299_v1 = vadd.f32 %v4294_v42, %v4279_v19 }
 0x757   : >> { %4518 = vrot.lane.b32.xlu1 %v4508_v47, %s5520_s17  ;;  %4579 = vrot.lane.b32.xlu2 %v4565_v39, %s9273_s23  ;;  %v4332_v61 = vadd.f32 %v4321_v22, %v4299_v1  ;;  %v4598_v22 = vmul.f32 %v8776_v14, %v8899_v58  ;;  %v4209_v39 = vmul.f32 %v8781_v17, %v8674_v10 }
 0x758   : >> { %4401 = vrot.lane.b32.xlu0 %v4390_v30, %s9273_s23  ;;  %v4683_v10 = vmul.f32 %v8854_v41, %v8958_v43 }
 0x759   : >> { %v4143_v50 = vpop.permute.xlu1 %4142  ;;  %v4229_v27 = vpop.permute.xlu2 %4228  ;;  %v4214_v0 = vadd.f32 %v4209_v39, %v8869_v25  ;;  %v8971_v25 = vld [vmem:[#allocation2 + $0x121] sm:$0xff] }
 0x75a   : >> { %v4157_v28 = vadd.f32 %v4143_v50, %v4124_v5  ;;  %v4404_v21 = vpop.permute.xlu0 %4403  ;;  %v4509_v5 = vmul.f32 %v8709_v11, %v8938_v12 }
 0x75b   : >> { %v8923_v4 = vadd.f32 %v4404_v21, %v4383_v59  ;;  %v4650_v59 = vmul.f32 %v8838_v15, %v8958_v43  ;;  %v4562_v21 = vmul.f32 %v8756_v9, %v8971_v25 }
 0x75c   : >> { %v4190_v20 = vadd.f32 %v4176_v53, %v4157_v28  ;;  %v8940_v53 = vld [vmem:[#allocation2 + $0x119] sm:$0xff] }
 0x75d   : >> { %v4594_v19 = vmul.f32 %v8776_v14, %v8940_v53  ;;  %v4561_v51 = vmul.f32 %v8756_v9, %v8940_v53 }
 0x75e   : >> { %v4210_v36 = vadd.f32 %v4205_v32, %v4190_v20 }
 0x75f   : >> { %4434 = vrot.lane.b32.xlu1 %v4423_v2, %s5520_s17  ;;  %4612 = vrot.lane.b32.xlu2 %v4598_v22, %s5520_s17  ;;  %v4379_v22 = vmul.f32 %v8905_v29, %v8715_v16 }
 0x760   : >> { %v8935_v60 = vadd.f32 %v4229_v27, %v4210_v36  ;;  %4695 = vrot.lane.b32.xlu0 %v4682_v44, %s5520_s17  ;;  %v8973_v27 = vld [vmem:[#allocation2 + $0x11a] sm:$0xff]  ;;  %v8986_v44 = vld [vmem:[#allocation2 + $0x122] sm:$0xff] }
 0x761   : >> { %v4060_v35 = vpop.permute.xlu1 %4059  ;;  %v4145_v33 = vpop.permute.xlu2 %4144  ;;  %v4679_v32 = vmul.f32 %v8854_v41, %v8973_v27  ;;  %v4646_v2 = vmul.f32 %v8838_v15, %v8973_v27  ;;  %v4680_v16 = vmul.f32 %v8854_v41, %v8986_v44 }
 0x762   : >> { %v4073_v3 = vadd.f32 %v4060_v35, %v4040_v46  ;;  %v8942_v42 = vpop.permute.xlu0 %4436  ;;  %v4647_v35 = vmul.f32 %v8838_v15, %v8986_v44 }
 0x764   : >> { %v4106_v47 = vadd.f32 %v4093_v45, %v4073_v3  ;;  %v4595_v3 = vmul.f32 %v8776_v14, %v8971_v25 }
 0x766   : >> { %v4125_v30 = vadd.f32 %v4120_v62, %v4106_v47  ;;  %v4295_v62 = vmul.f32 %v8808_v54, %v8735_v24  ;;  %v9274_v24 = vld [vmem:[#allocation50_spill] sm:$0xff] }
 0x767   : >> { %4487 = vrot.lane.b32.xlu1 %v4476_v6, %s9273_s23  ;;  %4604 = vrot.lane.b32.xlu2 %v4594_v19, %s5520_s17 }
 0x768   : >> { %v4158_v37 = vadd.f32 %v4145_v33, %v4125_v30  ;;  %4571 = vrot.lane.b32.xlu0 %v4561_v51, %s9273_s23  ;;  %5057 = vmatpush.msk.msra.mxu2 %vm4725_vm4, %v9274_v24 }
 0x769   : >> { %v4354_v31 = vpop.permute.xlu1 %4353  ;;  %v8964_v50 = vpop.permute.xlu2 %4438  ;;  %5017 = vmatpush.msk.msra.mxu0 %vm4725_vm4, %v9274_v24 }
 0x76a   : >> { %v4365_v45 = vadd.f32 %v4354_v31, %v4332_v61  ;;  %v4237_v1 = vpop.permute.xlu0 %4236  ;;  %v4291_v31 = vmul.f32 %v8808_v54, %v8779_v7 }
 0x76b   : >> { %v4247_v48 = vadd.f32 %v4237_v1, %v4214_v0  ;;  %v9275_v0 = vld [vmem:[#allocation49_spill] sm:$0xff] }
 0x76c   : >> { %v4384_v9 = vadd.f32 %v4379_v22, %v4365_v45  ;;  %5058 = vmatpush.msra.mxu2 %v9275_v0  ;;  %4741 = vmatpush.msra.mxu0 %v9275_v0 }
 0x76f   : >> { %4520 = vrot.lane.b32.xlu1 %v4509_v5, %s5520_s17  ;;  %4697 = vrot.lane.b32.xlu2 %v4683_v10, %s5520_s17 }
 0x770   : >> { %4664 = vrot.lane.b32.xlu0 %v4650_v59, %s9273_s23  ;;  %v9278_v59 = vld [vmem:[#allocation46_spill] sm:$0xff] }
 0x771   : >> { %v4490_v61 = vpop.permute.xlu1 %4489  ;;  %v4576_v20 = vpop.permute.xlu2 %4575 }
 0x772   : >> { %v4270_v11 = vpop.permute.xlu0 %4269 }
 0x773   : >> { %v4280_v28 = vadd.f32 %v4270_v11, %v4247_v48  ;;  %v9277_v48 = vld [vmem:[#allocation47_spill] sm:$0xff]  ;;  %v4449_v11 = vadd.f32 %v8942_v42, %v8923_v4  ;;  %v9035_v42 = vstv %s4626_s13 }
 0x775   : >> { %v4300_v6 = vadd.f32 %v4295_v62, %v4280_v28 }
 0x777   : >> { %4573 = vrot.lane.b32.xlu1 %v4562_v21, %s9273_s23  ;;  %4689 = vrot.lane.b32.xlu2 %v4679_v32, %s5520_s17 }
 0x778   : >> { %4656 = vrot.lane.b32.xlu0 %v4646_v2, %s9273_s23 }
 0x779   : >> { %v4523_v63 = vpop.permute.xlu1 %4522  ;;  %v4609_v33 = vpop.permute.xlu2 %4608 }
 0x77a   : >> { %v4406_v36 = vpop.permute.xlu0 %4405 }
 0x77b   : >> { %v8988_v46 = vadd.f32 %v4406_v36, %v4384_v9 }
 0x77f   : >> { %4658 = vrot.lane.b32.xlu1 %v4647_v35, %s9273_s23  ;;  %4691 = vrot.lane.b32.xlu2 %v4680_v16, %s5520_s17  ;;  %s4454_s23 = sld [smem:[#allocation8 + %s8655_s28]] }
 0x780   : >> { %4606 = vrot.lane.b32.xlu0 %v4595_v3, %s5520_s17  ;;  %s4541_s17 = sld [smem:[#allocation8 + %s8717_s24]]  ;;  %s4807_s24 = scalar_lea.vmem %s5774_s30, %s7577_s29 }
 0x781   : >> { %v4323_v19 = vpop.permute.xlu1 %4322  ;;  %v9004_v14 = vpop.permute.xlu2 %4407  ;;  %s4802_s28 = sld [smem:[#allocation9 + %s5503_s0]]  ;;  %s2653_s0 = sadd.s32 1, %s5503_s0  }
 0x782   : >> { %v9001_v15 = vadd.f32 %v4323_v19, %v4300_v6  ;;  %v4262_v47 = vpop.permute.xlu0 %4261  ;;  %p2650_p10 = scmp.ge.s32.totalorder %s2653_s0, 16  }
 0x783   : >> { %v4276_v41 = vadd.f32 %v4262_v47, %v8935_v60  ;;  %v9276_v60 = vld [vmem:[#allocation48_spill] sm:$0xff] }
 0x784   : >> { %5059 = vmatpush.msra.mxu2 %v9276_v60  ;;  %4742 = vmatpush.msra.mxu0 %v9276_v60 }
 0x785   : >> { %v4296_v45 = vadd.f32 %v4291_v31, %v4276_v41  ;;  %v9021_v10 = vstv %s4454_s23 }
 0x786   : >> { %5060 = vmatpush.msra.mxu2 %v9277_v48  ;;  %4743 = vmatpush.msra.mxu0 %v9277_v48  ;;  %v4464_v28 = vmul.f32 %v9021_v10, %v8688_v26  ;;  %v9030_v22 = vstv %s4541_s17 }
 0x787   : >> { %v4550_v35 = vmul.f32 %v9030_v22, %v8754_v56 }
 0x788   : >> { %5061 = vmatpush.msra.mxu2 %v9278_v59  ;;  %4744 = vmatpush.msra.mxu0 %v9278_v59  ;;  %v4469_v2 = vadd.f32 %v4464_v28, %v4449_v11  ;;  %v4465_v11 = vmul.f32 %v9021_v10, %v8774_v13 }
 0x789   : >> { %v4356_v51 = vpop.permute.xlu1 %4355  ;;  %v4441_v7 = vpop.permute.xlu2 %4440 }
 0x78a   : >> { %v4178_v39 = vpop.permute.xlu0 %4177  ;;  %v4502_v36 = vadd.f32 %v4490_v61, %v4469_v2 }
 0x78b   : >> { %v9006_v30 = vadd.f32 %v4178_v39, %v4158_v37  ;;  %v4635_v39 = vmul.f32 %v9035_v42, %v8836_v52  ;;  %v4380_v52 = vmul.f32 %v8905_v29, %v8796_v34  ;;  %v4376_v34 = vmul.f32 %v8905_v29, %v8832_v55 }
 0x78c   : >> { %v4535_v16 = vadd.f32 %v4523_v63, %v4502_v36 }
 0x78e   : >> { %v4555_v6 = vadd.f32 %v4550_v35, %v4535_v16  ;;  %v4366_v35 = vadd.f32 %v4356_v51, %v9001_v15  ;;  %v4466_v15 = vmul.f32 %v9021_v10, %v8872_v8  ;;  %v4292_v8 = vmul.f32 %v8808_v54, %v8852_v18 }
 0x790   : >> { %v4588_v4 = vadd.f32 %v4576_v20, %v4555_v6  ;;  %v4450_v20 = vadd.f32 %v8964_v50, %v8988_v46  ;;  %v4551_v6 = vmul.f32 %v9030_v22, %v8834_v57 }
 0x791   : >> { %v4492_v37 = vpop.permute.xlu1 %4491  ;;  %v4578_v9 = vpop.permute.xlu2 %4577 }
 0x792   : >> { %v4315_v1 = vpop.permute.xlu0 %4314  ;;  %v4621_v41 = vadd.f32 %v4609_v33, %v4588_v4  ;;  %v4470_v36 = vadd.f32 %v4465_v11, %v4450_v20 }
 0x793   : >> { %v4329_v5 = vadd.f32 %v4315_v1, %v4296_v45 }
 0x794   : >> { %v4640_v31 = vadd.f32 %v4635_v39, %v4621_v41  ;;  %v4503_v16 = vadd.f32 %v4492_v37, %v4470_v36  ;;  %v4636_v37 = vmul.f32 %v9035_v42, %v8887_v38 }
 0x799   : >> { %v4348_v21 = vpop.permute.xlu1 %4347  ;;  %v4433_v19 = vpop.permute.xlu2 %4432 }
 0x79a   : >> { %v4231_v32 = vpop.permute.xlu0 %4230  ;;  %v4362_v57 = vadd.f32 %v4348_v21, %v4329_v5  ;;  %v4552_v5 = vmul.f32 %v9030_v22, %v8899_v58 }
 0x7a1   : >> { %v4264_v3 = vpop.permute.xlu1 %4263  ;;  %v4350_v61 = vpop.permute.xlu2 %4349 }
 0x7a2   : >> { %v4525_v62 = vpop.permute.xlu0 %4524 }
 0x7a3   : >> { %v4536_v4 = vadd.f32 %v4525_v62, %v4503_v16 }
 0x7a5   : >> { %v4556_v46 = vadd.f32 %v4551_v6, %v4536_v4 }
 0x7a9   : >> { %v4400_v26 = vpop.permute.xlu1 %4399  ;;  %v4663_v33 = vpop.permute.xlu2 %4662 }
 0x7aa   : >> { %v4661_v47 = vpop.permute.xlu0 %4660 }
 0x7ab   : >> { %v4673_v45 = vadd.f32 %v4661_v47, %v4640_v31  ;;  %v4385_v47 = vadd.f32 %v4380_v52, %v4366_v35  ;;  %v4589_v31 = vadd.f32 %v4578_v9, %v4556_v46  ;;  %v4381_v9 = vadd.f32 %v4376_v34, %v4362_v57 }
 0x7ac   : >> { %v4637_v46 = vmul.f32 %v9035_v42, %v8958_v43 }
 0x7ad   : >> { %v4418_v13 = vadd.f32 %v9004_v14, %v4385_v47  ;;  %v4414_v36 = vadd.f32 %v4400_v26, %v4381_v9  ;;  %v4549_v9 = vmul.f32 %v9030_v22, %v8971_v25 }
 0x7af   : >> { %v4451_v51 = vadd.f32 %v4441_v7, %v4418_v13  ;;  %v4447_v35 = vadd.f32 %v4433_v19, %v4414_v36  ;;  %v4377_v19 = vmul.f32 %v8905_v29, %v8903_v40 }
 0x7b1   : >> { %v4317_v1 = vpop.permute.xlu1 %4316  ;;  %v4580_v39 = vpop.permute.xlu2 %4579  ;;  %v4471_v11 = vadd.f32 %v4466_v15, %v4451_v51  ;;  %v4463_v51 = vmul.f32 %v9021_v10, %v8938_v12 }
 0x7b2   : >> { %v4694_v56 = vpop.permute.xlu0 %4693 }
 0x7b3   : >> { %v4706_v63 = vadd.f32 %v4694_v56, %v4673_v45  ;;  %v4206_v45 = vmul.f32 %v8781_v17, %v8798_v23 }
 0x7b5   : >> { %5020 = vmatmul.msk.f32.vlgmr.msra.gmra.mxu2 %vm4709_vm5, %v4706_v63  ;;  %v4211_v14 = vadd.f32 %v4206_v45, %v9006_v30  ;;  %v4462_v30 = vmul.f32 %v9021_v10, %v8885_v49  ;;  %v4548_v49 = vmul.f32 %v9030_v22, %v8940_v53  ;;  %v4633_v53 = vmul.f32 %v9035_v42, %v8973_v27 }
 0x7b6   : >> { %v4634_v27 = vmul.f32 %v9035_v42, %v8986_v44 }
 0x7b7   : >> { %v4244_v23 = vadd.f32 %v4231_v32, %v4211_v14  ;;  %v4467_v54 = vadd.f32 %v4462_v30, %v4447_v35  ;;  %v9281_v35 = vld [vmem:[#allocation45_spill] sm:$0xff] }
 0x7b9   : >> { %v4611_v28 = vpop.permute.xlu1 %4610  ;;  %v4613_v17 = vpop.permute.xlu2 %4612  ;;  %v4277_v7 = vadd.f32 %v4264_v3, %v4244_v23 }
 0x7ba   : >> { %v4494_v2 = vpop.permute.xlu0 %4493  ;;  %v4622_v62 = vadd.f32 %v4611_v28, %v4589_v31 }
 0x7bb   : >> { %v4504_v55 = vadd.f32 %v4494_v2, %v4471_v11  ;;  %v4297_v6 = vadd.f32 %v4292_v8, %v4277_v7 }
 0x7bc   : >> { %v4641_v20 = vadd.f32 %v4636_v37, %v4622_v62 }
 0x7bd   : >> { %v4330_v2 = vadd.f32 %v4317_v1, %v4297_v6  ;;  %v4803_v6 = vstv %s4802_s28 }
 0x7be   : >> { %v4674_v28 = vadd.f32 %v4663_v33, %v4641_v20 }
 0x7bf   : >> { %v4363_v47 = vadd.f32 %v4350_v61, %v4330_v2 }
 0x7c1   : >> { %v4486_v41 = vpop.permute.xlu1 %4485  ;;  %v4605_v26 = vpop.permute.xlu2 %4604  ;;  %v4382_v13 = vadd.f32 %v4377_v19, %v4363_v47 }
 0x7c2   : >> { %v4527_v50 = vpop.permute.xlu0 %4526  ;;  %v4500_v18 = vadd.f32 %v4486_v41, %v4467_v54 }
 0x7c3   : >> { %v4537_v38 = vadd.f32 %v4527_v50, %v4504_v55 }
 0x7c5   : >> { %v4557_v32 = vadd.f32 %v4552_v5, %v4537_v38 }
 0x7c7   : >> { %v4590_v3 = vadd.f32 %v4580_v39, %v4557_v32 }
 0x7c9   : >> { %v4519_v56 = vpop.permute.xlu1 %4518  ;;  %v4623_v33 = vadd.f32 %v4613_v17, %v4590_v3  ;;  %v4698_v1 = vpop.permute.xlu2 %4697 }
 0x7ca   : >> { %v4402_v63 = vpop.permute.xlu0 %4401  ;;  %v4533_v50 = vadd.f32 %v4519_v56, %v4500_v18 }
 0x7cb   : >> { %v4415_v45 = vadd.f32 %v4402_v63, %v4382_v13  ;;  %v4642_v39 = vadd.f32 %v4637_v46, %v4623_v33 }
 0x7cc   : >> { %v4553_v31 = vadd.f32 %v4548_v49, %v4533_v50 }
 0x7d1   : >> { %v4435_v21 = vpop.permute.xlu1 %4434  ;;  %v4690_v63 = vpop.permute.xlu2 %4689 }
 0x7d2   : >> { %v4696_v52 = vpop.permute.xlu0 %4695  ;;  %v4448_v61 = vadd.f32 %v4435_v21, %v4415_v45 }
 0x7d3   : >> { %v4707_v16 = vadd.f32 %v4696_v52, %v4674_v28  ;;  %v9279_v28 = vld [vmem:[#allocation44_spill] sm:$0xff]  ;;  %v9280_v52 = vld [vmem:[#allocation43_spill] sm:$0xff] }
 0x7d4   : >> { %v4468_v37 = vadd.f32 %v4463_v51, %v4448_v61 }
 0x7d5   : >> { %5021 = vmatmul.msk.f32.gmra.mxu2 %vm4709_vm5, %v4707_v16 }
 0x7d9   : >> { %v4488_v4 = vpop.permute.xlu1 %4487  ;;  %v4692_v7 = vpop.permute.xlu2 %4691 }
 0x7da   : >> { %v4572_v58 = vpop.permute.xlu0 %4571  ;;  %v4501_v43 = vadd.f32 %v4488_v4, %v4468_v37 }
 0x7db   : >> { %v4586_v41 = vadd.f32 %v4572_v58, %v4553_v31 }
 0x7dd   : >> { %v4619_v29 = vadd.f32 %v4605_v26, %v4586_v41 }
 0x7df   : >> { %v4638_v62 = vadd.f32 %v4633_v53, %v4619_v29 }
 0x7e1   : >> { %v4521_v34 = vpop.permute.xlu1 %4520 }
 0x7e2   : >> { %v4665_v15 = vpop.permute.xlu0 %4664  ;;  %v4534_v14 = vadd.f32 %v4521_v34, %v4501_v43 }
 0x7e3   : >> { %v4675_v40 = vadd.f32 %v4665_v15, %v4642_v39 }
 0x7e4   : >> { %v4554_v10 = vadd.f32 %v4549_v9, %v4534_v14 }
 0x7e5   : >> { %v4708_v57 = vadd.f32 %v4698_v1, %v4675_v40 }
 0x7e7   : >> { %5022 = vmatmul.msk.f32.gmra.mxu2 %vm4709_vm5, %v4708_v57 }
 0x7e9   : >> { %v4574_v11 = vpop.permute.xlu1 %4573 }
 0x7ea   : >> { %v4657_v56 = vpop.permute.xlu0 %4656  ;;  %v4587_v17 = vadd.f32 %v4574_v11, %v4554_v10 }
 0x7eb   : >> { %v4671_v20 = vadd.f32 %v4657_v56, %v4638_v62 }
 0x7ed   : >> { %v4704_v12 = vadd.f32 %v4690_v63, %v4671_v20 }
 0x7ef   : >> { %5018 = vmatmul.msk.f32.vlgmr.msra.gmra.mxu0 %vm4709_vm5, %v4704_v12 }
 0x7f1   : >> { %v4659_v55 = vpop.permute.xlu1 %4658 }
 0x7f2   : >> { %v4607_v23 = vpop.permute.xlu0 %4606 }
 0x7f3   : >> { %v4620_v36 = vadd.f32 %v4607_v23, %v4587_v17 }
 0x7f5   : >> { %v4639_v8 = vadd.f32 %v4634_v27, %v4620_v36 }
 0x7f7   : >> { %v4672_v5 = vadd.f32 %v4659_v55, %v4639_v8 }
 0x7f9   : >> { %v4705_v38 = vadd.f32 %v4692_v7, %v4672_v5 }
 0x7fb   : >> { %5019 = vmatmul.msk.f32.gmra.mxu0 %vm4709_vm5, %v4705_v38 }
 0x838   : >> { %v4752_v25 = vpop.f32.mrf.mxu2 }
 0x858   : >> { %v4755_v22 = vpop.f32.mrf.mxu2 }
 0x86a   : >> { %v4758_v21 = vpop.f32.mrf.mxu2 }
 0x86b   : >> { %5023 = vmatpush.msk.msra.mxu1 %vm4725_vm4, %v4758_v21  ;;  %5062 = vmatpush.msk.msra.mxu3 %vm4725_vm4, %v4758_v21 }
 0x86c   : >> { %v4746_v44 = vpop.f32.mrf.mxu0 }
 0x86d   : >> { %4785 = vmatpush.msra.mxu1 %v4755_v22  ;;  %5063 = vmatpush.msra.mxu3 %v4755_v22 }
 0x86f   : >> { %4786 = vmatpush.msra.mxu1 %v4752_v25  ;;  %5064 = vmatpush.msra.mxu3 %v4752_v25 }
 0x878   : >> { %v4749_v42 = vpop.f32.mrf.mxu0 }
 0x879   : >> { %4787 = vmatpush.msra.mxu1 %v4749_v42  ;;  %5065 = vmatpush.msra.mxu3 %v4749_v42 }
 0x87b   : >> { %4788 = vmatpush.msra.mxu1 %v4746_v44  ;;  %5066 = vmatpush.msra.mxu3 %v4746_v44 }
 0x87c   : >> { %5025 = vmatmul.msk.f32.vlgmr.msra.gmra.mxu3 %vm4709_vm5, %v9279_v28  ;;  %5024 = vmatmul.msk.f32.vlgmr.msra.gmra.mxu1 %vm4709_vm5, %v9280_v52 }
 0x884   : >> { %5026 = vmatmul.msk.f32.gmra.mxu3 %vm4709_vm5, %v9281_v35 }
 0x8f9   : >> { %v4790_v30 = vpop.f32.mrf.mxu1 }
 0x8fa   : >> { %v4799_v16 = vmul.f32 0.25, %v4790_v30 }
 0x8fc   : >> { %v4804_v32 = vadd.f32 %v4803_v6, %v4799_v16 }
 0x8fe   : >> { %4809 = vst.msk [vmem:[%s4807_s24] sm:$0xff] %vm4808_vm6, %v4804_v32 }
 0x8ff   : >> { %v4793_v26 = vpop.f32.mrf.mxu3 }
 0x900   : >> { %v4800_v2 = vmul.f32 0.25, %v4793_v26 }
 0x902   : >> { %v4805_v54 = vadd.f32 %v4803_v6, %v4800_v2 }
 0x904   : >> { %4810 = vst.msk [vmem:[%s4807_s24 + $0x8] sm:$0xff] %vm4808_vm6, %v4805_v54 }
 0x907   : >> { %v4796_v18 = vpop.f32.mrf.mxu3 }
 0x908   : >> { %v4801_v3 = vmul.f32 0.25, %v4796_v18  ;;  %2652 = sbr.rel (!%p2650_p10) target bundleno = 1275 (0x4fb), region = 163 }
 0x90a   : >> { %v4806_v4 = vadd.f32 %v4803_v6, %v4801_v3 }
 0x90c   : >> { %4812 = vst.msk [vmem:[%s4807_s24 + $0x10] sm:$0x1] %vm4811_vm7, %v4806_v4 }
 0x90d PF: > { %p24_p11 = scmp.ge.s32.totalorder %s5662_s14, 4   ;;  %s9282_s30 = smov %s5487_s10 }
 0x90e   : > { %s9283_s10 = smov %s5491_s11  ;;  %s9284_s11 = smov %s5674_s19 }
 0x90f   : > { %s9285_s12 = smov %s5662_s14  ;;  %26 = sbr.rel (!%p24_p11) target bundleno = 10 (0xa), region = 174 }
 0x914   :  { %4834 = vsyncpa [#allocation4], 1 }
 0x915   :  { %4836 = vsyncpa [#allocation4 + $0x1], 1 }
 0x916   :  { %4837 = vsyncpa [#allocation13], 1 }
 0x917   :  { %4838 = vsyncpa [#allocation16], 1 }
 0x918   :  { %4839 = vsyncpa [#allocation5], 1 }
 0x919   :  { %4841 = vsyncpa [#allocation5 + $0x1], 1 }
 0x91a   :  { %4842 = vsyncpa [#allocation7], 1 }
 0x91b   :  { %4843 = vsyncpa [#allocation10], 1 }

</bundles_post_ra>
